<compile_context>
chip_gen: v7x
topology: tpu7x:2x2x1
jax: 0.10.0
libtpu: 0.0.40
codegen_flags: <defaults>
</compile_context>

<pallas_src>
import numpy as np
import jax
import jax.numpy as jnp
from jax.experimental import pallas as pl
from jax.experimental.pallas import tpu as pltpu

# ----------------------------------------------------------------------------
# Static geometry (Decoder(latent_dim=16, out_dim=1) applied to 8x8 latents).
# ----------------------------------------------------------------------------
H_IN = 8            # input spatial size
C_IN = 16           # latent_dim
C1 = 64             # layer-1 channels
C2 = 32             # layer-2 channels
H1 = 2 * H_IN       # 16
H2 = 2 * H1         # 32  (final spatial size)
K3 = (H2 + 2) * 3 * (4 * C2)   # 34 * 3 * 128 = 13056


# ----------------------------------------------------------------------------
# Fused kernel: one batch element per grid step, everything VMEM-resident.
# ----------------------------------------------------------------------------
def _decoder_kernel(x_ref, w1_ref, b1_ref, w2_ref, b2_ref, w3_ref, b3_ref,
                    o_ref, y1_ref, y2_ref):
    f32 = jnp.float32
    bf16 = jnp.bfloat16

    # Zero scratch: the halo / padding slots must read as zero.
    y1_ref[...] = jnp.zeros(y1_ref.shape, f32)
    y2_ref[...] = jnp.zeros(y2_ref.shape, f32)

    # ---------------- layer 1: ConvTranspose2d(16, 64, 3, s=2, p=1, op=1) + ReLU
    # Phase decomposition: y1[2i+a, 2j+b] = sum_{u,v} x[i+u, j+v] . W1[a+1-2u, b+1-2v]
    xp = x_ref[0]                                           # (9, 9, 16), idx 8 = zero halo
    p1 = jnp.concatenate([
        xp[0:8, 0:8, :].reshape(64, C_IN),                  # shift (0,0)
        xp[0:8, 1:9, :].reshape(64, C_IN),                  # shift (0,1)
        xp[1:9, 0:8, :].reshape(64, C_IN),                  # shift (1,0)
        xp[1:9, 1:9, :].reshape(64, C_IN),                  # shift (1,1)
    ], axis=1).astype(bf16)                                 # (64, 64), rows = (i, j)
    y1 = jnp.dot(p1, w1_ref[...], preferred_element_type=f32)   # (64, 256), cols = (a, b, c)
    y1 = jnp.maximum(y1 + b1_ref[...], 0.0)

    # Scatter the 4 sub-pixel phases into the VMEM-resident spatial layout.
    for pa in range(2):
        for pb in range(2):
            blk = y1[:, (2 * pa + pb) * C1:(2 * pa + pb + 1) * C1].reshape(8, 8, C1)
            y1_ref[pa, 0:8, pb, 0:8, :] = blk               # y1_ref[a, i, b, j, c]

    # ---------------- layer 2: ConvTranspose2d(64, 32, 3, s=2, p=1, op=1) + ReLU
    # Patch rows ordered (a, i, b, j)  <->  y1 position (p, q) = (2i+a, 2j+b).
    z00 = y1_ref[:, 0:8, :, 0:8, :].reshape(256, C1)                         # y1[p,   q  ]
    z01 = jnp.concatenate([y1_ref[:, 0:8, 1:2, 0:8, :],
                           y1_ref[:, 0:8, 0:1, 1:9, :]], axis=2).reshape(256, C1)   # y1[p, q+1]
    z10 = jnp.concatenate([y1_ref[1:2, 0:8, :, 0:8, :],
                           y1_ref[0:1, 1:9, :, 0:8, :]], axis=0).reshape(256, C1)   # y1[p+1, q]
    z11 = jnp.concatenate([
        jnp.concatenate([y1_ref[1:2, 0:8, 1:2, 0:8, :],
                         y1_ref[1:2, 0:8, 0:1, 1:9, :]], axis=2),
        jnp.concatenate([y1_ref[0:1, 1:9, 1:2, 0:8, :],
                         y1_ref[0:1, 1:9, 0:1, 1:9, :]], axis=2),
    ], axis=0).reshape(256, C1)                                              # y1[p+1, q+1]
    p2 = jnp.concatenate([z00, z01, z10, z11], axis=1).astype(bf16)          # (256, 256)
    y2 = jnp.dot(p2, w2_ref[...], preferred_element_type=f32)                # (256, 128) cols=(c,d,ch)
    y2 = jnp.maximum(y2 + b2_ref[...], 0.0)

    # Scatter: y2_ref[c, a, 1+i, 1+j, (2b+d)*32 + ch] = y2_img[4i+2a+c, 4j+2b+d, ch]
    y2r = y2.reshape(2, 8, 2, 8, 4 * C2)                    # [a, i, b, j, (c, d, ch)]
    for pc in range(2):
        for pb in range(2):
            piece = y2r[:, :, pb, :, pc * 64:(pc + 1) * 64]      # (2, 8, 8, 64) = [a, i, j, (d,ch)]
            y2_ref[pc, :, 1:9, 1:9, 64 * pb:64 * pb + 64] = piece

    # ---------------- layer 3: ConvTranspose2d(32, 1, 3, p=1)  == 3x3 conv, pad 1
    # One lane-dense matmul: rows = j (8), cols = (r, t) (128), K over
    # (output row + dy, sub-row shift sigma, packed lane (t_in, ch)).
    pieces = []
    for row in range(H2 + 2):            # row = r + dy, r in 0..31, dy in 0..2
        rr = row - 1                     # y2 image row feeding this K block
        c_idx = rr % 2
        rem = rr // 2
        a_idx = rem % 2
        i_idx = rem // 2 + 1             # rr = -1 -> slot 0 (zero), rr = 32 -> slot 9 (zero)
        for sig in range(3):
            pieces.append(y2_ref[c_idx, a_idx, i_idx, sig:sig + 8, :])   # (8, 128)
    p3 = jnp.concatenate(pieces, axis=1).astype(bf16)        # (8, 13056)
    out = jnp.dot(p3, w3_ref[...], preferred_element_type=f32)           # (8, 128), col = r*4 + t
    o_ref[0] = out + b3_ref[...]


# ----------------------------------------------------------------------------
# Host-side (one-time) weight packing for the phase-decomposed matmuls.
# ----------------------------------------------------------------------------
def pack_params(params):
    w1 = np.asarray(params["w1"], np.float32)   # (Cin, Cout, 3, 3) PyTorch ConvTranspose2d layout
    w2 = np.asarray(params["w2"], np.float32)
    w3 = np.asarray(params["w3"], np.float32)
    b1 = np.asarray(params["b1"], np.float32)
    b2 = np.asarray(params["b2"], np.float32)
    b3 = np.asarray(params["b3"], np.float32)

    def pack_stride2(w):
        # Rows: shift (u, v) blocks of Cin.  Cols: output phase (a, b) blocks of Cout.
        cin, cout = w.shape[0], w.shape[1]
        wp = np.zeros((4, cin, 4, cout), np.float32)
        for u in range(2):
            for v in range(2):
                for a in range(2):
                    for b in range(2):
                        ky = a + 1 - 2 * u
                        kx = b + 1 - 2 * v
                        if 0 <= ky <= 2 and 0 <= kx <= 2:
                            wp[2 * u + v, :, 2 * a + b, :] = w[:, :, ky, kx]
        return wp.reshape(4 * cin, 4 * cout)

    w1p = pack_stride2(w1)                                   # (64, 256)
    w2p = pack_stride2(w2)                                   # (256, 128)

    # Layer 3 (Cout=1): stride-1 convT == correlation with flipped kernel.
    w3f = np.transpose(w3[:, 0, ::-1, ::-1], (1, 2, 0))      # (3, 3, 32) = [dy, dx, ci]
    w3p = np.zeros((H2 + 2, 3, 4, C2, H2, 4), np.float32)    # [ROW, sig, t_in, ch, r, t]
    for row in range(H2 + 2):
        for sig in range(3):
            for t_in in range(4):
                for t in range(4):
                    dx = t_in + 4 * sig - 3 - t
                    if 0 <= dx <= 2:
                        for r in range(H2):
                            dy = row - r
                            if 0 <= dy <= 2:
                                w3p[row, sig, t_in, :, r, t] = w3f[dy, dx, :]
    w3p = w3p.reshape(K3, 4 * H2)                            # (13056, 128)

    return {
        "w1p": jnp.asarray(w1p, jnp.bfloat16),
        "w2p": jnp.asarray(w2p, jnp.bfloat16),
        "w3p": jnp.asarray(w3p, jnp.bfloat16),
        "b1t": jnp.asarray(np.tile(b1, 4).reshape(1, 4 * C1), jnp.float32),
        "b2t": jnp.asarray(np.tile(b2, 4).reshape(1, 4 * C2), jnp.float32),
        "b3t": jnp.asarray(np.full((1, 4 * H2), b3[0]), jnp.float32),
    }


@jax.jit
def decoder_forward(x_nchw, packed):
    B = x_nchw.shape[0]
    x = jnp.transpose(x_nchw, (0, 2, 3, 1))                  # NCHW -> NHWC (B, 8, 8, 16)
    x = jnp.pad(x, ((0, 0), (0, 1), (0, 1), (0, 0)))         # +1 zero halo for the (i+1, j+1) shifts

    grid_spec = pltpu.PrefetchScalarGridSpec(
        num_scalar_prefetch=0,
        grid=(B,),
        in_specs=[
            pl.BlockSpec((1, H_IN + 1, H_IN + 1, C_IN), lambda i: (i, 0, 0, 0)),
            pl.BlockSpec((4 * C_IN, 4 * C1), lambda i: (0, 0)),
            pl.BlockSpec((1, 4 * C1), lambda i: (0, 0)),
            pl.BlockSpec((4 * C1, 4 * C2), lambda i: (0, 0)),
            pl.BlockSpec((1, 4 * C2), lambda i: (0, 0)),
            pl.BlockSpec((K3, 4 * H2), lambda i: (0, 0)),
            pl.BlockSpec((1, 4 * H2), lambda i: (0, 0)),
        ],
        out_specs=pl.BlockSpec((1, 8, 4 * H2), lambda i: (i, 0, 0)),
        scratch_shapes=[
            pltpu.VMEM((2, H_IN + 1, 2, H_IN + 1, C1), jnp.float32),    # layer-1 activation (+halo)
            pltpu.VMEM((2, 2, H_IN + 2, H_IN + 2, 4 * C2), jnp.float32),  # layer-2 activation (+halos)
        ],
    )
    flat = pl.pallas_call(
        _decoder_kernel,
        out_shape=jax.ShapeDtypeStruct((B, 8, 4 * H2), jnp.float32),
        grid_spec=grid_spec,
        compiler_params=pltpu.CompilerParams(
            dimension_semantics=("parallel",),
            vmem_limit_bytes=32 * 1024 * 1024,
        ),
    )(x, packed["w1p"], packed["b1t"], packed["w2p"], packed["b2t"],
      packed["w3p"], packed["b3t"])

    # flat[b, j, r*4 + t] == out_img[b, r, 4j + t]  -> de-interleave to NCHW.
    img = flat.reshape(B, 8, H2, 4).transpose(0, 2, 1, 3).reshape(B, H2, H2)
    return img[:, None, :, :]


# ----------------------------------------------------------------------------
# Pure-JAX reference (XLA conv) for correctness checking.
# ----------------------------------------------------------------------------
def _ref_conv_transpose(x_nhwc, w_t, bias, stride, output_padding):
    k, pad = 3, 1
    w_hwio = jnp.transpose(w_t[:, :, ::-1, ::-1], (2, 3, 0, 1))
    lo = k - 1 - pad
    hi = k - 1 - pad + output_padding
    out = jax.lax.conv_general_dilated(
        x_nhwc, w_hwio, window_strides=(1, 1),
        padding=((lo, hi), (lo, hi)),
        lhs_dilation=(stride, stride),
        dimension_numbers=("NHWC", "HWIO", "NHWC"),
        precision=jax.lax.Precision.HIGHEST)
    return out + bias[None, None, None, :]


def ref_forward(x_nchw, params):
    x = jnp.transpose(x_nchw, (0, 2, 3, 1))
    x = jnp.maximum(_ref_conv_transpose(x, params["w1"], params["b1"], 2, 1), 0.0)
    x = jnp.maximum(_ref_conv_transpose(x, params["w2"], params["b2"], 2, 1), 0.0)
    x = _ref_conv_transpose(x, params["w3"], params["b3"], 1, 0)
    return jnp.transpose(x, (0, 3, 1, 2))


# ----------------------------------------------------------------------------
def init_params(key, latent_dim=16, out_dim=1):
    ks = jax.random.split(key, 6)
    scale = 0.1
    return {
        # PyTorch ConvTranspose2d weight layout: (Cin, Cout, kH, kW)
        "w1": scale * jax.random.normal(ks[0], (latent_dim, 64, 3, 3), jnp.float32),
        "b1": scale * jax.random.normal(ks[1], (64,), jnp.float32),
        "w2": scale * jax.random.normal(ks[2], (64, 32, 3, 3), jnp.float32),
        "b2": scale * jax.random.normal(ks[3], (32,), jnp.float32),
        "w3": scale * jax.random.normal(ks[4], (32, out_dim, 3, 3), jnp.float32),
        "b3": scale * jax.random.normal(ks[5], (out_dim,), jnp.float32),
    }


if __name__ == "__main__":
    key = jax.random.PRNGKey(0)
    k_x, k_p = jax.random.split(key)

    B, latent_dim, H, W = 2, C_IN, H_IN, H_IN
    x = jax.random.normal(k_x, (B, latent_dim, H, W), jnp.float32)   # NCHW
    params = init_params(k_p, latent_dim=latent_dim, out_dim=1)
    packed = pack_params(params)                                     # one-time weight repack

    out = decoder_forward(x, packed)
    out = jax.block_until_ready(out)
    assert out.shape == (B, 1, 4 * H, 4 * W), out.shape

    ref = jax.block_until_ready(ref_forward(x, params))
    # Kernel uses bf16 MXU operands (f32 accumulation); reference runs f32 at
    # HIGHEST precision, so the tolerance is set for bf16 operand rounding.
    np.testing.assert_allclose(np.asarray(out), np.asarray(ref),
                               rtol=8e-2, atol=8e-2)

    print("KERNEL_OK")
</pallas_src>

<mosaic_0001>
module attributes {stable_mosaic.version = 11 : i64} {
  func.func @_decoder_kernel(%arg0: i32, %arg1: memref<1x9x9x16xf32, #tpu.memory_space<vmem>>, %arg2: memref<64x256xbf16, #tpu.memory_space<vmem>>, %arg3: memref<1x256xf32, #tpu.memory_space<vmem>>, %arg4: memref<256x128xbf16, #tpu.memory_space<vmem>>, %arg5: memref<1x128xf32, #tpu.memory_space<vmem>>, %arg6: memref<13056x128xbf16, #tpu.memory_space<vmem>>, %arg7: memref<1x128xf32, #tpu.memory_space<vmem>>, %arg8: memref<1x8x128xf32, #tpu.memory_space<vmem>>, %arg9: memref<2x9x2x9x64xf32, #tpu.memory_space<vmem>>, %arg10: memref<2x2x10x10x128xf32, #tpu.memory_space<vmem>>) attributes {dimension_semantics = [#tpu.dimension_semantics<parallel>], iteration_bounds = array<i64: 2>, scalar_prefetch = 0 : i64, scratch_operands = 2 : i64, tpu.core_type = #tpu.core_type<tc>, window_params = [{transform_indices = @transform_0, window_bounds = array<i64: 1, 9, 9, 16>}, {pipeline_mode = #tpu.pipeline_mode<synchronous>, transform_indices = @transform_1, window_bounds = array<i64: 64, 256>}, {pipeline_mode = #tpu.pipeline_mode<synchronous>, transform_indices = @transform_2, window_bounds = array<i64: 1, 256>}, {pipeline_mode = #tpu.pipeline_mode<synchronous>, transform_indices = @transform_3, window_bounds = array<i64: 256, 128>}, {pipeline_mode = #tpu.pipeline_mode<synchronous>, transform_indices = @transform_4, window_bounds = array<i64: 1, 128>}, {pipeline_mode = #tpu.pipeline_mode<synchronous>, transform_indices = @transform_5, window_bounds = array<i64: 13056, 128>}, {pipeline_mode = #tpu.pipeline_mode<synchronous>, transform_indices = @transform_6, window_bounds = array<i64: 1, 128>}, {transform_indices = @transform_7, window_bounds = array<i64: 1, 8, 128>}]} {
    %cst = arith.constant 0.000000e+00 : f32
    %0 = vector.broadcast %cst : f32 to vector<2x9x2x9x64xf32>
    %c0 = arith.constant 0 : index
    %c0_0 = arith.constant 0 : index
    %c0_1 = arith.constant 0 : index
    %c0_2 = arith.constant 0 : index
    %c0_3 = arith.constant 0 : index
    %1 = vector.load %arg9[%c0, %c0_0, %c0_1, %c0_2, %c0_3] : memref<2x9x2x9x64xf32, #tpu.memory_space<vmem>>, vector<2x9x2x9x64xf32>
    tpu.vector_store %arg9[%c0, %c0_0, %c0_1, %c0_2, %c0_3], %0 {strides = array<i32>} : memref<2x9x2x9x64xf32, #tpu.memory_space<vmem>>, vector<2x9x2x9x64xf32>,
    %cst_4 = arith.constant 0.000000e+00 : f32
    %2 = vector.broadcast %cst_4 : f32 to vector<2x2x10x10x128xf32>
    %c0_5 = arith.constant 0 : index
    %c0_6 = arith.constant 0 : index
    %c0_7 = arith.constant 0 : index
    %c0_8 = arith.constant 0 : index
    %c0_9 = arith.constant 0 : index
    %3 = vector.load %arg10[%c0_5, %c0_6, %c0_7, %c0_8, %c0_9] : memref<2x2x10x10x128xf32, #tpu.memory_space<vmem>>, vector<2x2x10x10x128xf32>
    tpu.vector_store %arg10[%c0_5, %c0_6, %c0_7, %c0_8, %c0_9], %2 {strides = array<i32>} : memref<2x2x10x10x128xf32, #tpu.memory_space<vmem>>, vector<2x2x10x10x128xf32>,
    %c0_10 = arith.constant 0 : index
    %c0_11 = arith.constant 0 : index
    %c0_12 = arith.constant 0 : index
    %c0_13 = arith.constant 0 : index
    %4 = vector.load %arg1[%c0_10, %c0_11, %c0_12, %c0_13] : memref<1x9x9x16xf32, #tpu.memory_space<vmem>>, vector<1x9x9x16xf32>
    %5 = vector.shape_cast %4 : vector<1x9x9x16xf32> to vector<9x9x16xf32>
    %6 = vector.extract_strided_slice %5 {offsets = [0, 0, 0], sizes = [8, 8, 16], strides = [1, 1, 1]} : vector<9x9x16xf32> to vector<8x8x16xf32>
    %7 = vector.shape_cast %6 : vector<8x8x16xf32> to vector<64x16xf32>
    %8 = vector.extract_strided_slice %5 {offsets = [0, 1, 0], sizes = [8, 8, 16], strides = [1, 1, 1]} : vector<9x9x16xf32> to vector<8x8x16xf32>
    %9 = vector.shape_cast %8 : vector<8x8x16xf32> to vector<64x16xf32>
    %10 = vector.extract_strided_slice %5 {offsets = [1, 0, 0], sizes = [8, 8, 16], strides = [1, 1, 1]} : vector<9x9x16xf32> to vector<8x8x16xf32>
    %11 = vector.shape_cast %10 : vector<8x8x16xf32> to vector<64x16xf32>
    %12 = vector.extract_strided_slice %5 {offsets = [1, 1, 0], sizes = [8, 8, 16], strides = [1, 1, 1]} : vector<9x9x16xf32> to vector<8x8x16xf32>
    %13 = vector.shape_cast %12 : vector<8x8x16xf32> to vector<64x16xf32>
    %14 = tpu.concatenate %7, %9, %11, %13 in 1 : vector<64x16xf32>, vector<64x16xf32>, vector<64x16xf32>, vector<64x16xf32> -> vector<64x64xf32>
    %15 = arith.truncf %14 : vector<64x64xf32> to vector<64x64xbf16>
    %c0_14 = arith.constant 0 : index
    %c0_15 = arith.constant 0 : index
    %16 = vector.load %arg2[%c0_14, %c0_15] : memref<64x256xbf16, #tpu.memory_space<vmem>>, vector<64x256xbf16>
    %cst_16 = arith.constant dense<0.000000e+00> : vector<64x256xf32>
    %17 = tpu.matmul %15, %16, %cst_16 {dimension_numbers = #tpu.dot_dimension_numbers<[1], [0], [0], [1], [0, 0, 1, 1], [], []>} : vector<64x64xbf16>, vector<64x256xbf16>, vector<64x256xf32> -> vector<64x256xf32>
    %c0_17 = arith.constant 0 : index
    %c0_18 = arith.constant 0 : index
    %18 = vector.load %arg3[%c0_17, %c0_18] : memref<1x256xf32, #tpu.memory_space<vmem>>, vector<1x256xf32>
    %19 = vector.broadcast %18 : vector<1x256xf32> to vector<64x256xf32>
    %20 = arith.addf %17, %19 : vector<64x256xf32>
    %cst_19 = arith.constant 0.000000e+00 : f32
    %21 = vector.broadcast %cst_19 : f32 to vector<64x256xf32>
    %22 = arith.maximumf %20, %21 : vector<64x256xf32>
    %23 = vector.extract_strided_slice %22 {offsets = [0, 0], sizes = [64, 64], strides = [1, 1]} : vector<64x256xf32> to vector<64x64xf32>
    %24 = vector.shape_cast %23 : vector<64x64xf32> to vector<8x8x64xf32>
    %c0_20 = arith.constant 0 : index
    %c0_21 = arith.constant 0 : index
    %c0_22 = arith.constant 0 : index
    %c0_23 = arith.constant 0 : index
    %c0_24 = arith.constant 0 : index
    %25 = vector.load %arg9[%c0_20, %c0_21, %c0_22, %c0_23, %c0_24] : memref<2x9x2x9x64xf32, #tpu.memory_space<vmem>>, vector<1x8x1x8x64xf32>
    %26 = vector.shape_cast %25 : vector<1x8x1x8x64xf32> to vector<8x8x64xf32>
    %27 = vector.shape_cast %24 : vector<8x8x64xf32> to vector<1x8x1x8x64xf32>
    tpu.vector_store %arg9[%c0_20, %c0_21, %c0_22, %c0_23, %c0_24], %27 {strides = array<i32>} : memref<2x9x2x9x64xf32, #tpu.memory_space<vmem>>, vector<1x8x1x8x64xf32>,
    %28 = vector.extract_strided_slice %22 {offsets = [0, 64], sizes = [64, 64], strides = [1, 1]} : vector<64x256xf32> to vector<64x64xf32>
    %29 = vector.shape_cast %28 : vector<64x64xf32> to vector<8x8x64xf32>
    %c0_25 = arith.constant 0 : index
    %c0_26 = arith.constant 0 : index
    %c1 = arith.constant 1 : index
    %c0_27 = arith.constant 0 : index
    %c0_28 = arith.constant 0 : index
    %30 = vector.load %arg9[%c0_25, %c0_26, %c1, %c0_27, %c0_28] : memref<2x9x2x9x64xf32, #tpu.memory_space<vmem>>, vector<1x8x1x8x64xf32>
    %31 = vector.shape_cast %30 : vector<1x8x1x8x64xf32> to vector<8x8x64xf32>
    %32 = vector.shape_cast %29 : vector<8x8x64xf32> to vector<1x8x1x8x64xf32>
    tpu.vector_store %arg9[%c0_25, %c0_26, %c1, %c0_27, %c0_28], %32 {strides = array<i32>} : memref<2x9x2x9x64xf32, #tpu.memory_space<vmem>>, vector<1x8x1x8x64xf32>,
    %33 = vector.extract_strided_slice %22 {offsets = [0, 128], sizes = [64, 64], strides = [1, 1]} : vector<64x256xf32> to vector<64x64xf32>
    %34 = vector.shape_cast %33 : vector<64x64xf32> to vector<8x8x64xf32>
    %c1_29 = arith.constant 1 : index
    %c0_30 = arith.constant 0 : index
    %c0_31 = arith.constant 0 : index
    %c0_32 = arith.constant 0 : index
    %c0_33 = arith.constant 0 : index
    %35 = vector.load %arg9[%c1_29, %c0_30, %c0_31, %c0_32, %c0_33] : memref<2x9x2x9x64xf32, #tpu.memory_space<vmem>>, vector<1x8x1x8x64xf32>
    %36 = vector.shape_cast %35 : vector<1x8x1x8x64xf32> to vector<8x8x64xf32>
    %37 = vector.shape_cast %34 : vector<8x8x64xf32> to vector<1x8x1x8x64xf32>
    tpu.vector_store %arg9[%c1_29, %c0_30, %c0_31, %c0_32, %c0_33], %37 {strides = array<i32>} : memref<2x9x2x9x64xf32, #tpu.memory_space<vmem>>, vector<1x8x1x8x64xf32>,
    %38 = vector.extract_strided_slice %22 {offsets = [0, 192], sizes = [64, 64], strides = [1, 1]} : vector<64x256xf32> to vector<64x64xf32>
    %39 = vector.shape_cast %38 : vector<64x64xf32> to vector<8x8x64xf32>
    %c1_34 = arith.constant 1 : index
    %c0_35 = arith.constant 0 : index
    %c1_36 = arith.constant 1 : index
    %c0_37 = arith.constant 0 : index
    %c0_38 = arith.constant 0 : index
    %40 = vector.load %arg9[%c1_34, %c0_35, %c1_36, %c0_37, %c0_38] : memref<2x9x2x9x64xf32, #tpu.memory_space<vmem>>, vector<1x8x1x8x64xf32>
    %41 = vector.shape_cast %40 : vector<1x8x1x8x64xf32> to vector<8x8x64xf32>
    %42 = vector.shape_cast %39 : vector<8x8x64xf32> to vector<1x8x1x8x64xf32>
    tpu.vector_store %arg9[%c1_34, %c0_35, %c1_36, %c0_37, %c0_38], %42 {strides = array<i32>} : memref<2x9x2x9x64xf32, #tpu.memory_space<vmem>>, vector<1x8x1x8x64xf32>,
    %c0_39 = arith.constant 0 : index
    %c0_40 = arith.constant 0 : index
    %c0_41 = arith.constant 0 : index
    %c0_42 = arith.constant 0 : index
    %c0_43 = arith.constant 0 : index
    %43 = vector.load %arg9[%c0_39, %c0_40, %c0_41, %c0_42, %c0_43] : memref<2x9x2x9x64xf32, #tpu.memory_space<vmem>>, vector<2x8x2x8x64xf32>
    %44 = vector.shape_cast %43 : vector<2x8x2x8x64xf32> to vector<256x64xf32>
    %c0_44 = arith.constant 0 : index
    %c0_45 = arith.constant 0 : index
    %c1_46 = arith.constant 1 : index
    %c0_47 = arith.constant 0 : index
    %c0_48 = arith.constant 0 : index
    %45 = vector.load %arg9[%c0_44, %c0_45, %c1_46, %c0_47, %c0_48] : memref<2x9x2x9x64xf32, #tpu.memory_space<vmem>>, vector<2x8x1x8x64xf32>
    %c0_49 = arith.constant 0 : index
    %c0_50 = arith.constant 0 : index
    %c0_51 = arith.constant 0 : index
    %c1_52 = arith.constant 1 : index
    %c0_53 = arith.constant 0 : index
    %46 = vector.load %arg9[%c0_49, %c0_50, %c0_51, %c1_52, %c0_53] : memref<2x9x2x9x64xf32, #tpu.memory_space<vmem>>, vector<2x8x1x8x64xf32>
    %47 = tpu.concatenate %45, %46 in 2 : vector<2x8x1x8x64xf32>, vector<2x8x1x8x64xf32> -> vector<2x8x2x8x64xf32>
    %48 = vector.shape_cast %47 : vector<2x8x2x8x64xf32> to vector<256x64xf32>
    %c1_54 = arith.constant 1 : index
    %c0_55 = arith.constant 0 : index
    %c0_56 = arith.constant 0 : index
    %c0_57 = arith.constant 0 : index
    %c0_58 = arith.constant 0 : index
    %49 = vector.load %arg9[%c1_54, %c0_55, %c0_56, %c0_57, %c0_58] : memref<2x9x2x9x64xf32, #tpu.memory_space<vmem>>, vector<1x8x2x8x64xf32>
    %c0_59 = arith.constant 0 : index
    %c1_60 = arith.constant 1 : index
    %c0_61 = arith.constant 0 : index
    %c0_62 = arith.constant 0 : index
    %c0_63 = arith.constant 0 : index
    %50 = vector.load %arg9[%c0_59, %c1_60, %c0_61, %c0_62, %c0_63] : memref<2x9x2x9x64xf32, #tpu.memory_space<vmem>>, vector<1x8x2x8x64xf32>
    %51 = tpu.concatenate %49, %50 in 0 : vector<1x8x2x8x64xf32>, vector<1x8x2x8x64xf32> -> vector<2x8x2x8x64xf32>
    %52 = vector.shape_cast %51 : vector<2x8x2x8x64xf32> to vector<256x64xf32>
    %c1_64 = arith.constant 1 : index
    %c0_65 = arith.constant 0 : index
    %c1_66 = arith.constant 1 : index
    %c0_67 = arith.constant 0 : index
    %c0_68 = arith.constant 0 : index
    %53 = vector.load %arg9[%c1_64, %c0_65, %c1_66, %c0_67, %c0_68] : memref<2x9x2x9x64xf32, #tpu.memory_space<vmem>>, vector<1x8x1x8x64xf32>
    %c1_69 = arith.constant 1 : index
    %c0_70 = arith.constant 0 : index
    %c0_71 = arith.constant 0 : index
    %c1_72 = arith.constant 1 : index
    %c0_73 = arith.constant 0 : index
    %54 = vector.load %arg9[%c1_69, %c0_70, %c0_71, %c1_72, %c0_73] : memref<2x9x2x9x64xf32, #tpu.memory_space<vmem>>, vector<1x8x1x8x64xf32>
    %55 = tpu.concatenate %53, %54 in 2 : vector<1x8x1x8x64xf32>, vector<1x8x1x8x64xf32> -> vector<1x8x2x8x64xf32>
    %c0_74 = arith.constant 0 : index
    %c1_75 = arith.constant 1 : index
    %c1_76 = arith.constant 1 : index
    %c0_77 = arith.constant 0 : index
    %c0_78 = arith.constant 0 : index
    %56 = vector.load %arg9[%c0_74, %c1_75, %c1_76, %c0_77, %c0_78] : memref<2x9x2x9x64xf32, #tpu.memory_space<vmem>>, vector<1x8x1x8x64xf32>
    %c0_79 = arith.constant 0 : index
    %c1_80 = arith.constant 1 : index
    %c0_81 = arith.constant 0 : index
    %c1_82 = arith.constant 1 : index
    %c0_83 = arith.constant 0 : index
    %57 = vector.load %arg9[%c0_79, %c1_80, %c0_81, %c1_82, %c0_83] : memref<2x9x2x9x64xf32, #tpu.memory_space<vmem>>, vector<1x8x1x8x64xf32>
    %58 = tpu.concatenate %56, %57 in 2 : vector<1x8x1x8x64xf32>, vector<1x8x1x8x64xf32> -> vector<1x8x2x8x64xf32>
    %59 = tpu.concatenate %55, %58 in 0 : vector<1x8x2x8x64xf32>, vector<1x8x2x8x64xf32> -> vector<2x8x2x8x64xf32>
    %60 = vector.shape_cast %59 : vector<2x8x2x8x64xf32> to vector<256x64xf32>
    %61 = tpu.concatenate %44, %48, %52, %60 in 1 : vector<256x64xf32>, vector<256x64xf32>, vector<256x64xf32>, vector<256x64xf32> -> vector<256x256xf32>
    %62 = arith.truncf %61 : vector<256x256xf32> to vector<256x256xbf16>
    %c0_84 = arith.constant 0 : index
    %c0_85 = arith.constant 0 : index
    %63 = vector.load %arg4[%c0_84, %c0_85] : memref<256x128xbf16, #tpu.memory_space<vmem>>, vector<256x128xbf16>
    %cst_86 = arith.constant dense<0.000000e+00> : vector<256x128xf32>
    %64 = tpu.matmul %62, %63, %cst_86 {dimension_numbers = #tpu.dot_dimension_numbers<[1], [0], [0], [1], [0, 0, 1, 1], [], []>} : vector<256x256xbf16>, vector<256x128xbf16>, vector<256x128xf32> -> vector<256x128xf32>
    %c0_87 = arith.constant 0 : index
    %c0_88 = arith.constant 0 : index
    %65 = vector.load %arg5[%c0_87, %c0_88] : memref<1x128xf32, #tpu.memory_space<vmem>>, vector<1x128xf32>
    %66 = vector.broadcast %65 : vector<1x128xf32> to vector<256x128xf32>
    %67 = arith.addf %64, %66 : vector<256x128xf32>
    %cst_89 = arith.constant 0.000000e+00 : f32
    %68 = vector.broadcast %cst_89 : f32 to vector<256x128xf32>
    %69 = arith.maximumf %67, %68 : vector<256x128xf32>
    %70 = vector.shape_cast %69 : vector<256x128xf32> to vector<2x8x2x8x128xf32>
    %71 = vector.extract_strided_slice %70 {offsets = [0, 0, 0, 0, 0], sizes = [2, 8, 1, 8, 64], strides = [1, 1, 1, 1, 1]} : vector<2x8x2x8x128xf32> to vector<2x8x1x8x64xf32>
    %72 = vector.shape_cast %71 : vector<2x8x1x8x64xf32> to vector<2x8x8x64xf32>
    %c0_90 = arith.constant 0 : index
    %c0_91 = arith.constant 0 : index
    %c1_92 = arith.constant 1 : index
    %c1_93 = arith.constant 1 : index
    %c0_94 = arith.constant 0 : index
    %73 = vector.load %arg10[%c0_90, %c0_91, %c1_92, %c1_93, %c0_94] : memref<2x2x10x10x128xf32, #tpu.memory_space<vmem>>, vector<1x2x8x8x64xf32>
    %74 = vector.shape_cast %73 : vector<1x2x8x8x64xf32> to vector<2x8x8x64xf32>
    %75 = vector.shape_cast %72 : vector<2x8x8x64xf32> to vector<1x2x8x8x64xf32>
    tpu.vector_store %arg10[%c0_90, %c0_91, %c1_92, %c1_93, %c0_94], %75 {strides = array<i32>} : memref<2x2x10x10x128xf32, #tpu.memory_space<vmem>>, vector<1x2x8x8x64xf32>,
    %76 = vector.extract_strided_slice %70 {offsets = [0, 0, 1, 0, 0], sizes = [2, 8, 1, 8, 64], strides = [1, 1, 1, 1, 1]} : vector<2x8x2x8x128xf32> to vector<2x8x1x8x64xf32>
    %77 = vector.shape_cast %76 : vector<2x8x1x8x64xf32> to vector<2x8x8x64xf32>
    %c0_95 = arith.constant 0 : index
    %c0_96 = arith.constant 0 : index
    %c1_97 = arith.constant 1 : index
    %c1_98 = arith.constant 1 : index
    %c64 = arith.constant 64 : index
    %78 = vector.load %arg10[%c0_95, %c0_96, %c1_97, %c1_98, %c64] : memref<2x2x10x10x128xf32, #tpu.memory_space<vmem>>, vector<1x2x8x8x64xf32>
    %79 = vector.shape_cast %78 : vector<1x2x8x8x64xf32> to vector<2x8x8x64xf32>
    %80 = vector.shape_cast %77 : vector<2x8x8x64xf32> to vector<1x2x8x8x64xf32>
    tpu.vector_store %arg10[%c0_95, %c0_96, %c1_97, %c1_98, %c64], %80 {strides = array<i32>} : memref<2x2x10x10x128xf32, #tpu.memory_space<vmem>>, vector<1x2x8x8x64xf32>,
    %81 = vector.extract_strided_slice %70 {offsets = [0, 0, 0, 0, 64], sizes = [2, 8, 1, 8, 64], strides = [1, 1, 1, 1, 1]} : vector<2x8x2x8x128xf32> to vector<2x8x1x8x64xf32>
    %82 = vector.shape_cast %81 : vector<2x8x1x8x64xf32> to vector<2x8x8x64xf32>
    %c1_99 = arith.constant 1 : index
    %c0_100 = arith.constant 0 : index
    %c1_101 = arith.constant 1 : index
    %c1_102 = arith.constant 1 : index
    %c0_103 = arith.constant 0 : index
    %83 = vector.load %arg10[%c1_99, %c0_100, %c1_101, %c1_102, %c0_103] : memref<2x2x10x10x128xf32, #tpu.memory_space<vmem>>, vector<1x2x8x8x64xf32>
    %84 = vector.shape_cast %83 : vector<1x2x8x8x64xf32> to vector<2x8x8x64xf32>
    %85 = vector.shape_cast %82 : vector<2x8x8x64xf32> to vector<1x2x8x8x64xf32>
    tpu.vector_store %arg10[%c1_99, %c0_100, %c1_101, %c1_102, %c0_103], %85 {strides = array<i32>} : memref<2x2x10x10x128xf32, #tpu.memory_space<vmem>>, vector<1x2x8x8x64xf32>,
    %86 = vector.extract_strided_slice %70 {offsets = [0, 0, 1, 0, 64], sizes = [2, 8, 1, 8, 64], strides = [1, 1, 1, 1, 1]} : vector<2x8x2x8x128xf32> to vector<2x8x1x8x64xf32>
    %87 = vector.shape_cast %86 : vector<2x8x1x8x64xf32> to vector<2x8x8x64xf32>
    %c1_104 = arith.constant 1 : index
    %c0_105 = arith.constant 0 : index
    %c1_106 = arith.constant 1 : index
    %c1_107 = arith.constant 1 : index
    %c64_108 = arith.constant 64 : index
    %88 = vector.load %arg10[%c1_104, %c0_105, %c1_106, %c1_107, %c64_108] : memref<2x2x10x10x128xf32, #tpu.memory_space<vmem>>, vector<1x2x8x8x64xf32>
    %89 = vector.shape_cast %88 : vector<1x2x8x8x64xf32> to vector<2x8x8x64xf32>
    %90 = vector.shape_cast %87 : vector<2x8x8x64xf32> to vector<1x2x8x8x64xf32>
    tpu.vector_store %arg10[%c1_104, %c0_105, %c1_106, %c1_107, %c64_108], %90 {strides = array<i32>} : memref<2x2x10x10x128xf32, #tpu.memory_space<vmem>>, vector<1x2x8x8x64xf32>,
    %c1_109 = arith.constant 1 : index
    %c1_110 = arith.constant 1 : index
    %c0_111 = arith.constant 0 : index
    %c0_112 = arith.constant 0 : index
    %c0_113 = arith.constant 0 : index
    %91 = vector.load %arg10[%c1_109, %c1_110, %c0_111, %c0_112, %c0_113] : memref<2x2x10x10x128xf32, #tpu.memory_space<vmem>>, vector<1x1x1x8x128xf32>
    %92 = vector.shape_cast %91 : vector<1x1x1x8x128xf32> to vector<8x128xf32>
    %c1_114 = arith.constant 1 : index
    %c1_115 = arith.constant 1 : index
    %c0_116 = arith.constant 0 : index
    %c1_117 = arith.constant 1 : index
    %c0_118 = arith.constant 0 : index
    %93 = vector.load %arg10[%c1_114, %c1_115, %c0_116, %c1_117, %c0_118] : memref<2x2x10x10x128xf32, #tpu.memory_space<vmem>>, vector<1x1x1x8x128xf32>
    %94 = vector.shape_cast %93 : vector<1x1x1x8x128xf32> to vector<8x128xf32>
    %c1_119 = arith.constant 1 : index
    %c1_120 = arith.constant 1 : index
    %c0_121 = arith.constant 0 : index
    %c2 = arith.constant 2 : index
    %c0_122 = arith.constant 0 : index
    %95 = vector.load %arg10[%c1_119, %c1_120, %c0_121, %c2, %c0_122] : memref<2x2x10x10x128xf32, #tpu.memory_space<vmem>>, vector<1x1x1x8x128xf32>
    %96 = vector.shape_cast %95 : vector<1x1x1x8x128xf32> to vector<8x128xf32>
    %c0_123 = arith.constant 0 : index
    %c0_124 = arith.constant 0 : index
    %c1_125 = arith.constant 1 : index
    %c0_126 = arith.constant 0 : index
    %c0_127 = arith.constant 0 : index
    %97 = vector.load %arg10[%c0_123, %c0_124, %c1_125, %c0_126, %c0_127] : memref<2x2x10x10x128xf32, #tpu.memory_space<vmem>>, vector<1x1x1x8x128xf32>
    %98 = vector.shape_cast %97 : vector<1x1x1x8x128xf32> to vector<8x128xf32>
    %c0_128 = arith.constant 0 : index
    %c0_129 = arith.constant 0 : index
    %c1_130 = arith.constant 1 : index
    %c1_131 = arith.constant 1 : index
    %c0_132 = arith.constant 0 : index
    %99 = vector.load %arg10[%c0_128, %c0_129, %c1_130, %c1_131, %c0_132] : memref<2x2x10x10x128xf32, #tpu.memory_space<vmem>>, vector<1x1x1x8x128xf32>
    %100 = vector.shape_cast %99 : vector<1x1x1x8x128xf32> to vector<8x128xf32>
    %c0_133 = arith.constant 0 : index
    %c0_134 = arith.constant 0 : index
    %c1_135 = arith.constant 1 : index
    %c2_136 = arith.constant 2 : index
    %c0_137 = arith.constant 0 : index
    %101 = vector.load %arg10[%c0_133, %c0_134, %c1_135, %c2_136, %c0_137] : memref<2x2x10x10x128xf32, #tpu.memory_space<vmem>>, vector<1x1x1x8x128xf32>
    %102 = vector.shape_cast %101 : vector<1x1x1x8x128xf32> to vector<8x128xf32>
    %c1_138 = arith.constant 1 : index
    %c0_139 = arith.constant 0 : index
    %c1_140 = arith.constant 1 : index
    %c0_141 = arith.constant 0 : index
    %c0_142 = arith.constant 0 : index
    %103 = vector.load %arg10[%c1_138, %c0_139, %c1_140, %c0_141, %c0_142] : memref<2x2x10x10x128xf32, #tpu.memory_space<vmem>>, vector<1x1x1x8x128xf32>
    %104 = vector.shape_cast %103 : vector<1x1x1x8x128xf32> to vector<8x128xf32>
    %c1_143 = arith.constant 1 : index
    %c0_144 = arith.constant 0 : index
    %c1_145 = arith.constant 1 : index
    %c1_146 = arith.constant 1 : index
    %c0_147 = arith.constant 0 : index
    %105 = vector.load %arg10[%c1_143, %c0_144, %c1_145, %c1_146, %c0_147] : memref<2x2x10x10x128xf32, #tpu.memory_space<vmem>>, vector<1x1x1x8x128xf32>
    %106 = vector.shape_cast %105 : vector<1x1x1x8x128xf32> to vector<8x128xf32>
    %c1_148 = arith.constant 1 : index
    %c0_149 = arith.constant 0 : index
    %c1_150 = arith.constant 1 : index
    %c2_151 = arith.constant 2 : index
    %c0_152 = arith.constant 0 : index
    %107 = vector.load %arg10[%c1_148, %c0_149, %c1_150, %c2_151, %c0_152] : memref<2x2x10x10x128xf32, #tpu.memory_space<vmem>>, vector<1x1x1x8x128xf32>
    %108 = vector.shape_cast %107 : vector<1x1x1x8x128xf32> to vector<8x128xf32>
    %c0_153 = arith.constant 0 : index
    %c1_154 = arith.constant 1 : index
    %c1_155 = arith.constant 1 : index
    %c0_156 = arith.constant 0 : index
    %c0_157 = arith.constant 0 : index
    %109 = vector.load %arg10[%c0_153, %c1_154, %c1_155, %c0_156, %c0_157] : memref<2x2x10x10x128xf32, #tpu.memory_space<vmem>>, vector<1x1x1x8x128xf32>
    %110 = vector.shape_cast %109 : vector<1x1x1x8x128xf32> to vector<8x128xf32>
    %c0_158 = arith.constant 0 : index
    %c1_159 = arith.constant 1 : index
    %c1_160 = arith.constant 1 : index
    %c1_161 = arith.constant 1 : index
    %c0_162 = arith.constant 0 : index
    %111 = vector.load %arg10[%c0_158, %c1_159, %c1_160, %c1_161, %c0_162] : memref<2x2x10x10x128xf32, #tpu.memory_space<vmem>>, vector<1x1x1x8x128xf32>
    %112 = vector.shape_cast %111 : vector<1x1x1x8x128xf32> to vector<8x128xf32>
    %c0_163 = arith.constant 0 : index
    %c1_164 = arith.constant 1 : index
    %c1_165 = arith.constant 1 : index
    %c2_166 = arith.constant 2 : index
    %c0_167 = arith.constant 0 : index
    %113 = vector.load %arg10[%c0_163, %c1_164, %c1_165, %c2_166, %c0_167] : memref<2x2x10x10x128xf32, #tpu.memory_space<vmem>>, vector<1x1x1x8x128xf32>
    %114 = vector.shape_cast %113 : vector<1x1x1x8x128xf32> to vector<8x128xf32>
    %c1_168 = arith.constant 1 : index
    %c1_169 = arith.constant 1 : index
    %c1_170 = arith.constant 1 : index
    %c0_171 = arith.constant 0 : index
    %c0_172 = arith.constant 0 : index
    %115 = vector.load %arg10[%c1_168, %c1_169, %c1_170, %c0_171, %c0_172] : memref<2x2x10x10x128xf32, #tpu.memory_space<vmem>>, vector<1x1x1x8x128xf32>
    %116 = vector.shape_cast %115 : vector<1x1x1x8x128xf32> to vector<8x128xf32>
    %c1_173 = arith.constant 1 : index
    %c1_174 = arith.constant 1 : index
    %c1_175 = arith.constant 1 : index
    %c1_176 = arith.constant 1 : index
    %c0_177 = arith.constant 0 : index
    %117 = vector.load %arg10[%c1_173, %c1_174, %c1_175, %c1_176, %c0_177] : memref<2x2x10x10x128xf32, #tpu.memory_space<vmem>>, vector<1x1x1x8x128xf32>
    %118 = vector.shape_cast %117 : vector<1x1x1x8x128xf32> to vector<8x128xf32>
    %c1_178 = arith.constant 1 : index
    %c1_179 = arith.constant 1 : index
    %c1_180 = arith.constant 1 : index
    %c2_181 = arith.constant 2 : index
    %c0_182 = arith.constant 0 : index
    %119 = vector.load %arg10[%c1_178, %c1_179, %c1_180, %c2_181, %c0_182] : memref<2x2x10x10x128xf32, #tpu.memory_space<vmem>>, vector<1x1x1x8x128xf32>
    %120 = vector.shape_cast %119 : vector<1x1x1x8x128xf32> to vector<8x128xf32>
    %c0_183 = arith.constant 0 : index
    %c0_184 = arith.constant 0 : index
    %c2_185 = arith.constant 2 : index
    %c0_186 = arith.constant 0 : index
    %c0_187 = arith.constant 0 : index
    %121 = vector.load %arg10[%c0_183, %c0_184, %c2_185, %c0_186, %c0_187] : memref<2x2x10x10x128xf32, #tpu.memory_space<vmem>>, vector<1x1x1x8x128xf32>
    %122 = vector.shape_cast %121 : vector<1x1x1x8x128xf32> to vector<8x128xf32>
    %c0_188 = arith.constant 0 : index
    %c0_189 = arith.constant 0 : index
    %c2_190 = arith.constant 2 : index
    %c1_191 = arith.constant 1 : index
    %c0_192 = arith.constant 0 : index
    %123 = vector.load %arg10[%c0_188, %c0_189, %c2_190, %c1_191, %c0_192] : memref<2x2x10x10x128xf32, #tpu.memory_space<vmem>>, vector<1x1x1x8x128xf32>
    %124 = vector.shape_cast %123 : vector<1x1x1x8x128xf32> to vector<8x128xf32>
    %c0_193 = arith.constant 0 : index
    %c0_194 = arith.constant 0 : index
    %c2_195 = arith.constant 2 : index
    %c2_196 = arith.constant 2 : index
    %c0_197 = arith.constant 0 : index
    %125 = vector.load %arg10[%c0_193, %c0_194, %c2_195, %c2_196, %c0_197] : memref<2x2x10x10x128xf32, #tpu.memory_space<vmem>>, vector<1x1x1x8x128xf32>
    %126 = vector.shape_cast %125 : vector<1x1x1x8x128xf32> to vector<8x128xf32>
    %c1_198 = arith.constant 1 : index
    %c0_199 = arith.constant 0 : index
    %c2_200 = arith.constant 2 : index
    %c0_201 = arith.constant 0 : index
    %c0_202 = arith.constant 0 : index
    %127 = vector.load %arg10[%c1_198, %c0_199, %c2_200, %c0_201, %c0_202] : memref<2x2x10x10x128xf32, #tpu.memory_space<vmem>>, vector<1x1x1x8x128xf32>
    %128 = vector.shape_cast %127 : vector<1x1x1x8x128xf32> to vector<8x128xf32>
    %c1_203 = arith.constant 1 : index
    %c0_204 = arith.constant 0 : index
    %c2_205 = arith.constant 2 : index
    %c1_206 = arith.constant 1 : index
    %c0_207 = arith.constant 0 : index
    %129 = vector.load %arg10[%c1_203, %c0_204, %c2_205, %c1_206, %c0_207] : memref<2x2x10x10x128xf32, #tpu.memory_space<vmem>>, vector<1x1x1x8x128xf32>
    %130 = vector.shape_cast %129 : vector<1x1x1x8x128xf32> to vector<8x128xf32>
    %c1_208 = arith.constant 1 : index
    %c0_209 = arith.constant 0 : index
    %c2_210 = arith.constant 2 : index
    %c2_211 = arith.constant 2 : index
    %c0_212 = arith.constant 0 : index
    %131 = vector.load %arg10[%c1_208, %c0_209, %c2_210, %c2_211, %c0_212] : memref<2x2x10x10x128xf32, #tpu.memory_space<vmem>>, vector<1x1x1x8x128xf32>
    %132 = vector.shape_cast %131 : vector<1x1x1x8x128xf32> to vector<8x128xf32>
    %c0_213 = arith.constant 0 : index
    %c1_214 = arith.constant 1 : index
    %c2_215 = arith.constant 2 : index
    %c0_216 = arith.constant 0 : index
    %c0_217 = arith.constant 0 : index
    %133 = vector.load %arg10[%c0_213, %c1_214, %c2_215, %c0_216, %c0_217] : memref<2x2x10x10x128xf32, #tpu.memory_space<vmem>>, vector<1x1x1x8x128xf32>
    %134 = vector.shape_cast %133 : vector<1x1x1x8x128xf32> to vector<8x128xf32>
    %c0_218 = arith.constant 0 : index
    %c1_219 = arith.constant 1 : index
    %c2_220 = arith.constant 2 : index
    %c1_221 = arith.constant 1 : index
    %c0_222 = arith.constant 0 : index
    %135 = vector.load %arg10[%c0_218, %c1_219, %c2_220, %c1_221, %c0_222] : memref<2x2x10x10x128xf32, #tpu.memory_space<vmem>>, vector<1x1x1x8x128xf32>
    %136 = vector.shape_cast %135 : vector<1x1x1x8x128xf32> to vector<8x128xf32>
    %c0_223 = arith.constant 0 : index
    %c1_224 = arith.constant 1 : index
    %c2_225 = arith.constant 2 : index
    %c2_226 = arith.constant 2 : index
    %c0_227 = arith.constant 0 : index
    %137 = vector.load %arg10[%c0_223, %c1_224, %c2_225, %c2_226, %c0_227] : memref<2x2x10x10x128xf32, #tpu.memory_space<vmem>>, vector<1x1x1x8x128xf32>
    %138 = vector.shape_cast %137 : vector<1x1x1x8x128xf32> to vector<8x128xf32>
    %c1_228 = arith.constant 1 : index
    %c1_229 = arith.constant 1 : index
    %c2_230 = arith.constant 2 : index
    %c0_231 = arith.constant 0 : index
    %c0_232 = arith.constant 0 : index
    %139 = vector.load %arg10[%c1_228, %c1_229, %c2_230, %c0_231, %c0_232] : memref<2x2x10x10x128xf32, #tpu.memory_space<vmem>>, vector<1x1x1x8x128xf32>
    %140 = vector.shape_cast %139 : vector<1x1x1x8x128xf32> to vector<8x128xf32>
    %c1_233 = arith.constant 1 : index
    %c1_234 = arith.constant 1 : index
    %c2_235 = arith.constant 2 : index
    %c1_236 = arith.constant 1 : index
    %c0_237 = arith.constant 0 : index
    %141 = vector.load %arg10[%c1_233, %c1_234, %c2_235, %c1_236, %c0_237] : memref<2x2x10x10x128xf32, #tpu.memory_space<vmem>>, vector<1x1x1x8x128xf32>
    %142 = vector.shape_cast %141 : vector<1x1x1x8x128xf32> to vector<8x128xf32>
    %c1_238 = arith.constant 1 : index
    %c1_239 = arith.constant 1 : index
    %c2_240 = arith.constant 2 : index
    %c2_241 = arith.constant 2 : index
    %c0_242 = arith.constant 0 : index
    %143 = vector.load %arg10[%c1_238, %c1_239, %c2_240, %c2_241, %c0_242] : memref<2x2x10x10x128xf32, #tpu.memory_space<vmem>>, vector<1x1x1x8x128xf32>
    %144 = vector.shape_cast %143 : vector<1x1x1x8x128xf32> to vector<8x128xf32>
    %c0_243 = arith.constant 0 : index
    %c0_244 = arith.constant 0 : index
    %c3 = arith.constant 3 : index
    %c0_245 = arith.constant 0 : index
    %c0_246 = arith.constant 0 : index
    %145 = vector.load %arg10[%c0_243, %c0_244, %c3, %c0_245, %c0_246] : memref<2x2x10x10x128xf32, #tpu.memory_space<vmem>>, vector<1x1x1x8x128xf32>
    %146 = vector.shape_cast %145 : vector<1x1x1x8x128xf32> to vector<8x128xf32>
    %c0_247 = arith.constant 0 : index
    %c0_248 = arith.constant 0 : index
    %c3_249 = arith.constant 3 : index
    %c1_250 = arith.constant 1 : index
    %c0_251 = arith.constant 0 : index
    %147 = vector.load %arg10[%c0_247, %c0_248, %c3_249, %c1_250, %c0_251] : memref<2x2x10x10x128xf32, #tpu.memory_space<vmem>>, vector<1x1x1x8x128xf32>
    %148 = vector.shape_cast %147 : vector<1x1x1x8x128xf32> to vector<8x128xf32>
    %c0_252 = arith.constant 0 : index
    %c0_253 = arith.constant 0 : index
    %c3_254 = arith.constant 3 : index
    %c2_255 = arith.constant 2 : index
    %c0_256 = arith.constant 0 : index
    %149 = vector.load %arg10[%c0_252, %c0_253, %c3_254, %c2_255, %c0_256] : memref<2x2x10x10x128xf32, #tpu.memory_space<vmem>>, vector<1x1x1x8x128xf32>
    %150 = vector.shape_cast %149 : vector<1x1x1x8x128xf32> to vector<8x128xf32>
    %c1_257 = arith.constant 1 : index
    %c0_258 = arith.constant 0 : index
    %c3_259 = arith.constant 3 : index
    %c0_260 = arith.constant 0 : index
    %c0_261 = arith.constant 0 : index
    %151 = vector.load %arg10[%c1_257, %c0_258, %c3_259, %c0_260, %c0_261] : memref<2x2x10x10x128xf32, #tpu.memory_space<vmem>>, vector<1x1x1x8x128xf32>
    %152 = vector.shape_cast %151 : vector<1x1x1x8x128xf32> to vector<8x128xf32>
    %c1_262 = arith.constant 1 : index
    %c0_263 = arith.constant 0 : index
    %c3_264 = arith.constant 3 : index
    %c1_265 = arith.constant 1 : index
    %c0_266 = arith.constant 0 : index
    %153 = vector.load %arg10[%c1_262, %c0_263, %c3_264, %c1_265, %c0_266] : memref<2x2x10x10x128xf32, #tpu.memory_space<vmem>>, vector<1x1x1x8x128xf32>
    %154 = vector.shape_cast %153 : vector<1x1x1x8x128xf32> to vector<8x128xf32>
    %c1_267 = arith.constant 1 : index
    %c0_268 = arith.constant 0 : index
    %c3_269 = arith.constant 3 : index
    %c2_270 = arith.constant 2 : index
    %c0_271 = arith.constant 0 : index
    %155 = vector.load %arg10[%c1_267, %c0_268, %c3_269, %c2_270, %c0_271] : memref<2x2x10x10x128xf32, #tpu.memory_space<vmem>>, vector<1x1x1x8x128xf32>
    %156 = vector.shape_cast %155 : vector<1x1x1x8x128xf32> to vector<8x128xf32>
    %c0_272 = arith.constant 0 : index
    %c1_273 = arith.constant 1 : index
    %c3_274 = arith.constant 3 : index
    %c0_275 = arith.constant 0 : index
    %c0_276 = arith.constant 0 : index
    %157 = vector.load %arg10[%c0_272, %c1_273, %c3_274, %c0_275, %c0_276] : memref<2x2x10x10x128xf32, #tpu.memory_space<vmem>>, vector<1x1x1x8x128xf32>
    %158 = vector.shape_cast %157 : vector<1x1x1x8x128xf32> to vector<8x128xf32>
    %c0_277 = arith.constant 0 : index
    %c1_278 = arith.constant 1 : index
    %c3_279 = arith.constant 3 : index
    %c1_280 = arith.constant 1 : index
    %c0_281 = arith.constant 0 : index
    %159 = vector.load %arg10[%c0_277, %c1_278, %c3_279, %c1_280, %c0_281] : memref<2x2x10x10x128xf32, #tpu.memory_space<vmem>>, vector<1x1x1x8x128xf32>
    %160 = vector.shape_cast %159 : vector<1x1x1x8x128xf32> to vector<8x128xf32>
    %c0_282 = arith.constant 0 : index
    %c1_283 = arith.constant 1 : index
    %c3_284 = arith.constant 3 : index
    %c2_285 = arith.constant 2 : index
    %c0_286 = arith.constant 0 : index
    %161 = vector.load %arg10[%c0_282, %c1_283, %c3_284, %c2_285, %c0_286] : memref<2x2x10x10x128xf32, #tpu.memory_space<vmem>>, vector<1x1x1x8x128xf32>
    %162 = vector.shape_cast %161 : vector<1x1x1x8x128xf32> to vector<8x128xf32>
    %c1_287 = arith.constant 1 : index
    %c1_288 = arith.constant 1 : index
    %c3_289 = arith.constant 3 : index
    %c0_290 = arith.constant 0 : index
    %c0_291 = arith.constant 0 : index
    %163 = vector.load %arg10[%c1_287, %c1_288, %c3_289, %c0_290, %c0_291] : memref<2x2x10x10x128xf32, #tpu.memory_space<vmem>>, vector<1x1x1x8x128xf32>
    %164 = vector.shape_cast %163 : vector<1x1x1x8x128xf32> to vector<8x128xf32>
    %c1_292 = arith.constant 1 : index
    %c1_293 = arith.constant 1 : index
    %c3_294 = arith.constant 3 : index
    %c1_295 = arith.constant 1 : index
    %c0_296 = arith.constant 0 : index
    %165 = vector.load %arg10[%c1_292, %c1_293, %c3_294, %c1_295, %c0_296] : memref<2x2x10x10x128xf32, #tpu.memory_space<vmem>>, vector<1x1x1x8x128xf32>
    %166 = vector.shape_cast %165 : vector<1x1x1x8x128xf32> to vector<8x128xf32>
    %c1_297 = arith.constant 1 : index
    %c1_298 = arith.constant 1 : index
    %c3_299 = arith.constant 3 : index
    %c2_300 = arith.constant 2 : index
    %c0_301 = arith.constant 0 : index
    %167 = vector.load %arg10[%c1_297, %c1_298, %c3_299, %c2_300, %c0_301] : memref<2x2x10x10x128xf32, #tpu.memory_space<vmem>>, vector<1x1x1x8x128xf32>
    %168 = vector.shape_cast %167 : vector<1x1x1x8x128xf32> to vector<8x128xf32>
    %c0_302 = arith.constant 0 : index
    %c0_303 = arith.constant 0 : index
    %c4 = arith.constant 4 : index
    %c0_304 = arith.constant 0 : index
    %c0_305 = arith.constant 0 : index
    %169 = vector.load %arg10[%c0_302, %c0_303, %c4, %c0_304, %c0_305] : memref<2x2x10x10x128xf32, #tpu.memory_space<vmem>>, vector<1x1x1x8x128xf32>
    %170 = vector.shape_cast %169 : vector<1x1x1x8x128xf32> to vector<8x128xf32>
    %c0_306 = arith.constant 0 : index
    %c0_307 = arith.constant 0 : index
    %c4_308 = arith.constant 4 : index
    %c1_309 = arith.constant 1 : index
    %c0_310 = arith.constant 0 : index
    %171 = vector.load %arg10[%c0_306, %c0_307, %c4_308, %c1_309, %c0_310] : memref<2x2x10x10x128xf32, #tpu.memory_space<vmem>>, vector<1x1x1x8x128xf32>
    %172 = vector.shape_cast %171 : vector<1x1x1x8x128xf32> to vector<8x128xf32>
    %c0_311 = arith.constant 0 : index
    %c0_312 = arith.constant 0 : index
    %c4_313 = arith.constant 4 : index
    %c2_314 = arith.constant 2 : index
    %c0_315 = arith.constant 0 : index
    %173 = vector.load %arg10[%c0_311, %c0_312, %c4_313, %c2_314, %c0_315] : memref<2x2x10x10x128xf32, #tpu.memory_space<vmem>>, vector<1x1x1x8x128xf32>
    %174 = vector.shape_cast %173 : vector<1x1x1x8x128xf32> to vector<8x128xf32>
    %c1_316 = arith.constant 1 : index
    %c0_317 = arith.constant 0 : index
    %c4_318 = arith.constant 4 : index
    %c0_319 = arith.constant 0 : index
    %c0_320 = arith.constant 0 : index
    %175 = vector.load %arg10[%c1_316, %c0_317, %c4_318, %c0_319, %c0_320] : memref<2x2x10x10x128xf32, #tpu.memory_space<vmem>>, vector<1x1x1x8x128xf32>
    %176 = vector.shape_cast %175 : vector<1x1x1x8x128xf32> to vector<8x128xf32>
    %c1_321 = arith.constant 1 : index
    %c0_322 = arith.constant 0 : index
    %c4_323 = arith.constant 4 : index
    %c1_324 = arith.constant 1 : index
    %c0_325 = arith.constant 0 : index
    %177 = vector.load %arg10[%c1_321, %c0_322, %c4_323, %c1_324, %c0_325] : memref<2x2x10x10x128xf32, #tpu.memory_space<vmem>>, vector<1x1x1x8x128xf32>
    %178 = vector.shape_cast %177 : vector<1x1x1x8x128xf32> to vector<8x128xf32>
    %c1_326 = arith.constant 1 : index
    %c0_327 = arith.constant 0 : index
    %c4_328 = arith.constant 4 : index
    %c2_329 = arith.constant 2 : index
    %c0_330 = arith.constant 0 : index
    %179 = vector.load %arg10[%c1_326, %c0_327, %c4_328, %c2_329, %c0_330] : memref<2x2x10x10x128xf32, #tpu.memory_space<vmem>>, vector<1x1x1x8x128xf32>
    %180 = vector.shape_cast %179 : vector<1x1x1x8x128xf32> to vector<8x128xf32>
    %c0_331 = arith.constant 0 : index
    %c1_332 = arith.constant 1 : index
    %c4_333 = arith.constant 4 : index
    %c0_334 = arith.constant 0 : index
    %c0_335 = arith.constant 0 : index
    %181 = vector.load %arg10[%c0_331, %c1_332, %c4_333, %c0_334, %c0_335] : memref<2x2x10x10x128xf32, #tpu.memory_space<vmem>>, vector<1x1x1x8x128xf32>
    %182 = vector.shape_cast %181 : vector<1x1x1x8x128xf32> to vector<8x128xf32>
    %c0_336 = arith.constant 0 : index
    %c1_337 = arith.constant 1 : index
    %c4_338 = arith.constant 4 : index
    %c1_339 = arith.constant 1 : index
    %c0_340 = arith.constant 0 : index
    %183 = vector.load %arg10[%c0_336, %c1_337, %c4_338, %c1_339, %c0_340] : memref<2x2x10x10x128xf32, #tpu.memory_space<vmem>>, vector<1x1x1x8x128xf32>
    %184 = vector.shape_cast %183 : vector<1x1x1x8x128xf32> to vector<8x128xf32>
    %c0_341 = arith.constant 0 : index
    %c1_342 = arith.constant 1 : index
    %c4_343 = arith.constant 4 : index
    %c2_344 = arith.constant 2 : index
    %c0_345 = arith.constant 0 : index
    %185 = vector.load %arg10[%c0_341, %c1_342, %c4_343, %c2_344, %c0_345] : memref<2x2x10x10x128xf32, #tpu.memory_space<vmem>>, vector<1x1x1x8x128xf32>
    %186 = vector.shape_cast %185 : vector<1x1x1x8x128xf32> to vector<8x128xf32>
    %c1_346 = arith.constant 1 : index
    %c1_347 = arith.constant 1 : index
    %c4_348 = arith.constant 4 : index
    %c0_349 = arith.constant 0 : index
    %c0_350 = arith.constant 0 : index
    %187 = vector.load %arg10[%c1_346, %c1_347, %c4_348, %c0_349, %c0_350] : memref<2x2x10x10x128xf32, #tpu.memory_space<vmem>>, vector<1x1x1x8x128xf32>
    %188 = vector.shape_cast %187 : vector<1x1x1x8x128xf32> to vector<8x128xf32>
    %c1_351 = arith.constant 1 : index
    %c1_352 = arith.constant 1 : index
    %c4_353 = arith.constant 4 : index
    %c1_354 = arith.constant 1 : index
    %c0_355 = arith.constant 0 : index
    %189 = vector.load %arg10[%c1_351, %c1_352, %c4_353, %c1_354, %c0_355] : memref<2x2x10x10x128xf32, #tpu.memory_space<vmem>>, vector<1x1x1x8x128xf32>
    %190 = vector.shape_cast %189 : vector<1x1x1x8x128xf32> to vector<8x128xf32>
    %c1_356 = arith.constant 1 : index
    %c1_357 = arith.constant 1 : index
    %c4_358 = arith.constant 4 : index
    %c2_359 = arith.constant 2 : index
    %c0_360 = arith.constant 0 : index
    %191 = vector.load %arg10[%c1_356, %c1_357, %c4_358, %c2_359, %c0_360] : memref<2x2x10x10x128xf32, #tpu.memory_space<vmem>>, vector<1x1x1x8x128xf32>
    %192 = vector.shape_cast %191 : vector<1x1x1x8x128xf32> to vector<8x128xf32>
    %c0_361 = arith.constant 0 : index
    %c0_362 = arith.constant 0 : index
    %c5 = arith.constant 5 : index
    %c0_363 = arith.constant 0 : index
    %c0_364 = arith.constant 0 : index
    %193 = vector.load %arg10[%c0_361, %c0_362, %c5, %c0_363, %c0_364] : memref<2x2x10x10x128xf32, #tpu.memory_space<vmem>>, vector<1x1x1x8x128xf32>
    %194 = vector.shape_cast %193 : vector<1x1x1x8x128xf32> to vector<8x128xf32>
    %c0_365 = arith.constant 0 : index
    %c0_366 = arith.constant 0 : index
    %c5_367 = arith.constant 5 : index
    %c1_368 = arith.constant 1 : index
    %c0_369 = arith.constant 0 : index
    %195 = vector.load %arg10[%c0_365, %c0_366, %c5_367, %c1_368, %c0_369] : memref<2x2x10x10x128xf32, #tpu.memory_space<vmem>>, vector<1x1x1x8x128xf32>
    %196 = vector.shape_cast %195 : vector<1x1x1x8x128xf32> to vector<8x128xf32>
    %c0_370 = arith.constant 0 : index
    %c0_371 = arith.constant 0 : index
    %c5_372 = arith.constant 5 : index
    %c2_373 = arith.constant 2 : index
    %c0_374 = arith.constant 0 : index
    %197 = vector.load %arg10[%c0_370, %c0_371, %c5_372, %c2_373, %c0_374] : memref<2x2x10x10x128xf32, #tpu.memory_space<vmem>>, vector<1x1x1x8x128xf32>
    %198 = vector.shape_cast %197 : vector<1x1x1x8x128xf32> to vector<8x128xf32>
    %c1_375 = arith.constant 1 : index
    %c0_376 = arith.constant 0 : index
    %c5_377 = arith.constant 5 : index
    %c0_378 = arith.constant 0 : index
    %c0_379 = arith.constant 0 : index
    %199 = vector.load %arg10[%c1_375, %c0_376, %c5_377, %c0_378, %c0_379] : memref<2x2x10x10x128xf32, #tpu.memory_space<vmem>>, vector<1x1x1x8x128xf32>
    %200 = vector.shape_cast %199 : vector<1x1x1x8x128xf32> to vector<8x128xf32>
    %c1_380 = arith.constant 1 : index
    %c0_381 = arith.constant 0 : index
    %c5_382 = arith.constant 5 : index
    %c1_383 = arith.constant 1 : index
    %c0_384 = arith.constant 0 : index
    %201 = vector.load %arg10[%c1_380, %c0_381, %c5_382, %c1_383, %c0_384] : memref<2x2x10x10x128xf32, #tpu.memory_space<vmem>>, vector<1x1x1x8x128xf32>
    %202 = vector.shape_cast %201 : vector<1x1x1x8x128xf32> to vector<8x128xf32>
    %c1_385 = arith.constant 1 : index
    %c0_386 = arith.constant 0 : index
    %c5_387 = arith.constant 5 : index
    %c2_388 = arith.constant 2 : index
    %c0_389 = arith.constant 0 : index
    %203 = vector.load %arg10[%c1_385, %c0_386, %c5_387, %c2_388, %c0_389] : memref<2x2x10x10x128xf32, #tpu.memory_space<vmem>>, vector<1x1x1x8x128xf32>
    %204 = vector.shape_cast %203 : vector<1x1x1x8x128xf32> to vector<8x128xf32>
    %c0_390 = arith.constant 0 : index
    %c1_391 = arith.constant 1 : index
    %c5_392 = arith.constant 5 : index
    %c0_393 = arith.constant 0 : index
    %c0_394 = arith.constant 0 : index
    %205 = vector.load %arg10[%c0_390, %c1_391, %c5_392, %c0_393, %c0_394] : memref<2x2x10x10x128xf32, #tpu.memory_space<vmem>>, vector<1x1x1x8x128xf32>
    %206 = vector.shape_cast %205 : vector<1x1x1x8x128xf32> to vector<8x128xf32>
    %c0_395 = arith.constant 0 : index
    %c1_396 = arith.constant 1 : index
    %c5_397 = arith.constant 5 : index
    %c1_398 = arith.constant 1 : index
    %c0_399 = arith.constant 0 : index
    %207 = vector.load %arg10[%c0_395, %c1_396, %c5_397, %c1_398, %c0_399] : memref<2x2x10x10x128xf32, #tpu.memory_space<vmem>>, vector<1x1x1x8x128xf32>
    %208 = vector.shape_cast %207 : vector<1x1x1x8x128xf32> to vector<8x128xf32>
    %c0_400 = arith.constant 0 : index
    %c1_401 = arith.constant 1 : index
    %c5_402 = arith.constant 5 : index
    %c2_403 = arith.constant 2 : index
    %c0_404 = arith.constant 0 : index
    %209 = vector.load %arg10[%c0_400, %c1_401, %c5_402, %c2_403, %c0_404] : memref<2x2x10x10x128xf32, #tpu.memory_space<vmem>>, vector<1x1x1x8x128xf32>
    %210 = vector.shape_cast %209 : vector<1x1x1x8x128xf32> to vector<8x128xf32>
    %c1_405 = arith.constant 1 : index
    %c1_406 = arith.constant 1 : index
    %c5_407 = arith.constant 5 : index
    %c0_408 = arith.constant 0 : index
    %c0_409 = arith.constant 0 : index
    %211 = vector.load %arg10[%c1_405, %c1_406, %c5_407, %c0_408, %c0_409] : memref<2x2x10x10x128xf32, #tpu.memory_space<vmem>>, vector<1x1x1x8x128xf32>
    %212 = vector.shape_cast %211 : vector<1x1x1x8x128xf32> to vector<8x128xf32>
    %c1_410 = arith.constant 1 : index
    %c1_411 = arith.constant 1 : index
    %c5_412 = arith.constant 5 : index
    %c1_413 = arith.constant 1 : index
    %c0_414 = arith.constant 0 : index
    %213 = vector.load %arg10[%c1_410, %c1_411, %c5_412, %c1_413, %c0_414] : memref<2x2x10x10x128xf32, #tpu.memory_space<vmem>>, vector<1x1x1x8x128xf32>
    %214 = vector.shape_cast %213 : vector<1x1x1x8x128xf32> to vector<8x128xf32>
    %c1_415 = arith.constant 1 : index
    %c1_416 = arith.constant 1 : index
    %c5_417 = arith.constant 5 : index
    %c2_418 = arith.constant 2 : index
    %c0_419 = arith.constant 0 : index
    %215 = vector.load %arg10[%c1_415, %c1_416, %c5_417, %c2_418, %c0_419] : memref<2x2x10x10x128xf32, #tpu.memory_space<vmem>>, vector<1x1x1x8x128xf32>
    %216 = vector.shape_cast %215 : vector<1x1x1x8x128xf32> to vector<8x128xf32>
    %c0_420 = arith.constant 0 : index
    %c0_421 = arith.constant 0 : index
    %c6 = arith.constant 6 : index
    %c0_422 = arith.constant 0 : index
    %c0_423 = arith.constant 0 : index
    %217 = vector.load %arg10[%c0_420, %c0_421, %c6, %c0_422, %c0_423] : memref<2x2x10x10x128xf32, #tpu.memory_space<vmem>>, vector<1x1x1x8x128xf32>
    %218 = vector.shape_cast %217 : vector<1x1x1x8x128xf32> to vector<8x128xf32>
    %c0_424 = arith.constant 0 : index
    %c0_425 = arith.constant 0 : index
    %c6_426 = arith.constant 6 : index
    %c1_427 = arith.constant 1 : index
    %c0_428 = arith.constant 0 : index
    %219 = vector.load %arg10[%c0_424, %c0_425, %c6_426, %c1_427, %c0_428] : memref<2x2x10x10x128xf32, #tpu.memory_space<vmem>>, vector<1x1x1x8x128xf32>
    %220 = vector.shape_cast %219 : vector<1x1x1x8x128xf32> to vector<8x128xf32>
    %c0_429 = arith.constant 0 : index
    %c0_430 = arith.constant 0 : index
    %c6_431 = arith.constant 6 : index
    %c2_432 = arith.constant 2 : index
    %c0_433 = arith.constant 0 : index
    %221 = vector.load %arg10[%c0_429, %c0_430, %c6_431, %c2_432, %c0_433] : memref<2x2x10x10x128xf32, #tpu.memory_space<vmem>>, vector<1x1x1x8x128xf32>
    %222 = vector.shape_cast %221 : vector<1x1x1x8x128xf32> to vector<8x128xf32>
    %c1_434 = arith.constant 1 : index
    %c0_435 = arith.constant 0 : index
    %c6_436 = arith.constant 6 : index
    %c0_437 = arith.constant 0 : index
    %c0_438 = arith.constant 0 : index
    %223 = vector.load %arg10[%c1_434, %c0_435, %c6_436, %c0_437, %c0_438] : memref<2x2x10x10x128xf32, #tpu.memory_space<vmem>>, vector<1x1x1x8x128xf32>
    %224 = vector.shape_cast %223 : vector<1x1x1x8x128xf32> to vector<8x128xf32>
    %c1_439 = arith.constant 1 : index
    %c0_440 = arith.constant 0 : index
    %c6_441 = arith.constant 6 : index
    %c1_442 = arith.constant 1 : index
    %c0_443 = arith.constant 0 : index
    %225 = vector.load %arg10[%c1_439, %c0_440, %c6_441, %c1_442, %c0_443] : memref<2x2x10x10x128xf32, #tpu.memory_space<vmem>>, vector<1x1x1x8x128xf32>
    %226 = vector.shape_cast %225 : vector<1x1x1x8x128xf32> to vector<8x128xf32>
    %c1_444 = arith.constant 1 : index
    %c0_445 = arith.constant 0 : index
    %c6_446 = arith.constant 6 : index
    %c2_447 = arith.constant 2 : index
    %c0_448 = arith.constant 0 : index
    %227 = vector.load %arg10[%c1_444, %c0_445, %c6_446, %c2_447, %c0_448] : memref<2x2x10x10x128xf32, #tpu.memory_space<vmem>>, vector<1x1x1x8x128xf32>
    %228 = vector.shape_cast %227 : vector<1x1x1x8x128xf32> to vector<8x128xf32>
    %c0_449 = arith.constant 0 : index
    %c1_450 = arith.constant 1 : index
    %c6_451 = arith.constant 6 : index
    %c0_452 = arith.constant 0 : index
    %c0_453 = arith.constant 0 : index
    %229 = vector.load %arg10[%c0_449, %c1_450, %c6_451, %c0_452, %c0_453] : memref<2x2x10x10x128xf32, #tpu.memory_space<vmem>>, vector<1x1x1x8x128xf32>
    %230 = vector.shape_cast %229 : vector<1x1x1x8x128xf32> to vector<8x128xf32>
    %c0_454 = arith.constant 0 : index
    %c1_455 = arith.constant 1 : index
    %c6_456 = arith.constant 6 : index
    %c1_457 = arith.constant 1 : index
    %c0_458 = arith.constant 0 : index
    %231 = vector.load %arg10[%c0_454, %c1_455, %c6_456, %c1_457, %c0_458] : memref<2x2x10x10x128xf32, #tpu.memory_space<vmem>>, vector<1x1x1x8x128xf32>
    %232 = vector.shape_cast %231 : vector<1x1x1x8x128xf32> to vector<8x128xf32>
    %c0_459 = arith.constant 0 : index
    %c1_460 = arith.constant 1 : index
    %c6_461 = arith.constant 6 : index
    %c2_462 = arith.constant 2 : index
    %c0_463 = arith.constant 0 : index
    %233 = vector.load %arg10[%c0_459, %c1_460, %c6_461, %c2_462, %c0_463] : memref<2x2x10x10x128xf32, #tpu.memory_space<vmem>>, vector<1x1x1x8x128xf32>
    %234 = vector.shape_cast %233 : vector<1x1x1x8x128xf32> to vector<8x128xf32>
    %c1_464 = arith.constant 1 : index
    %c1_465 = arith.constant 1 : index
    %c6_466 = arith.constant 6 : index
    %c0_467 = arith.constant 0 : index
    %c0_468 = arith.constant 0 : index
    %235 = vector.load %arg10[%c1_464, %c1_465, %c6_466, %c0_467, %c0_468] : memref<2x2x10x10x128xf32, #tpu.memory_space<vmem>>, vector<1x1x1x8x128xf32>
    %236 = vector.shape_cast %235 : vector<1x1x1x8x128xf32> to vector<8x128xf32>
    %c1_469 = arith.constant 1 : index
    %c1_470 = arith.constant 1 : index
    %c6_471 = arith.constant 6 : index
    %c1_472 = arith.constant 1 : index
    %c0_473 = arith.constant 0 : index
    %237 = vector.load %arg10[%c1_469, %c1_470, %c6_471, %c1_472, %c0_473] : memref<2x2x10x10x128xf32, #tpu.memory_space<vmem>>, vector<1x1x1x8x128xf32>
    %238 = vector.shape_cast %237 : vector<1x1x1x8x128xf32> to vector<8x128xf32>
    %c1_474 = arith.constant 1 : index
    %c1_475 = arith.constant 1 : index
    %c6_476 = arith.constant 6 : index
    %c2_477 = arith.constant 2 : index
    %c0_478 = arith.constant 0 : index
    %239 = vector.load %arg10[%c1_474, %c1_475, %c6_476, %c2_477, %c0_478] : memref<2x2x10x10x128xf32, #tpu.memory_space<vmem>>, vector<1x1x1x8x128xf32>
    %240 = vector.shape_cast %239 : vector<1x1x1x8x128xf32> to vector<8x128xf32>
    %c0_479 = arith.constant 0 : index
    %c0_480 = arith.constant 0 : index
    %c7 = arith.constant 7 : index
    %c0_481 = arith.constant 0 : index
    %c0_482 = arith.constant 0 : index
    %241 = vector.load %arg10[%c0_479, %c0_480, %c7, %c0_481, %c0_482] : memref<2x2x10x10x128xf32, #tpu.memory_space<vmem>>, vector<1x1x1x8x128xf32>
    %242 = vector.shape_cast %241 : vector<1x1x1x8x128xf32> to vector<8x128xf32>
    %c0_483 = arith.constant 0 : index
    %c0_484 = arith.constant 0 : index
    %c7_485 = arith.constant 7 : index
    %c1_486 = arith.constant 1 : index
    %c0_487 = arith.constant 0 : index
    %243 = vector.load %arg10[%c0_483, %c0_484, %c7_485, %c1_486, %c0_487] : memref<2x2x10x10x128xf32, #tpu.memory_space<vmem>>, vector<1x1x1x8x128xf32>
    %244 = vector.shape_cast %243 : vector<1x1x1x8x128xf32> to vector<8x128xf32>
    %c0_488 = arith.constant 0 : index
    %c0_489 = arith.constant 0 : index
    %c7_490 = arith.constant 7 : index
    %c2_491 = arith.constant 2 : index
    %c0_492 = arith.constant 0 : index
    %245 = vector.load %arg10[%c0_488, %c0_489, %c7_490, %c2_491, %c0_492] : memref<2x2x10x10x128xf32, #tpu.memory_space<vmem>>, vector<1x1x1x8x128xf32>
    %246 = vector.shape_cast %245 : vector<1x1x1x8x128xf32> to vector<8x128xf32>
    %c1_493 = arith.constant 1 : index
    %c0_494 = arith.constant 0 : index
    %c7_495 = arith.constant 7 : index
    %c0_496 = arith.constant 0 : index
    %c0_497 = arith.constant 0 : index
    %247 = vector.load %arg10[%c1_493, %c0_494, %c7_495, %c0_496, %c0_497] : memref<2x2x10x10x128xf32, #tpu.memory_space<vmem>>, vector<1x1x1x8x128xf32>
    %248 = vector.shape_cast %247 : vector<1x1x1x8x128xf32> to vector<8x128xf32>
    %c1_498 = arith.constant 1 : index
    %c0_499 = arith.constant 0 : index
    %c7_500 = arith.constant 7 : index
    %c1_501 = arith.constant 1 : index
    %c0_502 = arith.constant 0 : index
    %249 = vector.load %arg10[%c1_498, %c0_499, %c7_500, %c1_501, %c0_502] : memref<2x2x10x10x128xf32, #tpu.memory_space<vmem>>, vector<1x1x1x8x128xf32>
    %250 = vector.shape_cast %249 : vector<1x1x1x8x128xf32> to vector<8x128xf32>
    %c1_503 = arith.constant 1 : index
    %c0_504 = arith.constant 0 : index
    %c7_505 = arith.constant 7 : index
    %c2_506 = arith.constant 2 : index
    %c0_507 = arith.constant 0 : index
    %251 = vector.load %arg10[%c1_503, %c0_504, %c7_505, %c2_506, %c0_507] : memref<2x2x10x10x128xf32, #tpu.memory_space<vmem>>, vector<1x1x1x8x128xf32>
    %252 = vector.shape_cast %251 : vector<1x1x1x8x128xf32> to vector<8x128xf32>
    %c0_508 = arith.constant 0 : index
    %c1_509 = arith.constant 1 : index
    %c7_510 = arith.constant 7 : index
    %c0_511 = arith.constant 0 : index
    %c0_512 = arith.constant 0 : index
    %253 = vector.load %arg10[%c0_508, %c1_509, %c7_510, %c0_511, %c0_512] : memref<2x2x10x10x128xf32, #tpu.memory_space<vmem>>, vector<1x1x1x8x128xf32>
    %254 = vector.shape_cast %253 : vector<1x1x1x8x128xf32> to vector<8x128xf32>
    %c0_513 = arith.constant 0 : index
    %c1_514 = arith.constant 1 : index
    %c7_515 = arith.constant 7 : index
    %c1_516 = arith.constant 1 : index
    %c0_517 = arith.constant 0 : index
    %255 = vector.load %arg10[%c0_513, %c1_514, %c7_515, %c1_516, %c0_517] : memref<2x2x10x10x128xf32, #tpu.memory_space<vmem>>, vector<1x1x1x8x128xf32>
    %256 = vector.shape_cast %255 : vector<1x1x1x8x128xf32> to vector<8x128xf32>
    %c0_518 = arith.constant 0 : index
    %c1_519 = arith.constant 1 : index
    %c7_520 = arith.constant 7 : index
    %c2_521 = arith.constant 2 : index
    %c0_522 = arith.constant 0 : index
    %257 = vector.load %arg10[%c0_518, %c1_519, %c7_520, %c2_521, %c0_522] : memref<2x2x10x10x128xf32, #tpu.memory_space<vmem>>, vector<1x1x1x8x128xf32>
    %258 = vector.shape_cast %257 : vector<1x1x1x8x128xf32> to vector<8x128xf32>
    %c1_523 = arith.constant 1 : index
    %c1_524 = arith.constant 1 : index
    %c7_525 = arith.constant 7 : index
    %c0_526 = arith.constant 0 : index
    %c0_527 = arith.constant 0 : index
    %259 = vector.load %arg10[%c1_523, %c1_524, %c7_525, %c0_526, %c0_527] : memref<2x2x10x10x128xf32, #tpu.memory_space<vmem>>, vector<1x1x1x8x128xf32>
    %260 = vector.shape_cast %259 : vector<1x1x1x8x128xf32> to vector<8x128xf32>
    %c1_528 = arith.constant 1 : index
    %c1_529 = arith.constant 1 : index
    %c7_530 = arith.constant 7 : index
    %c1_531 = arith.constant 1 : index
    %c0_532 = arith.constant 0 : index
    %261 = vector.load %arg10[%c1_528, %c1_529, %c7_530, %c1_531, %c0_532] : memref<2x2x10x10x128xf32, #tpu.memory_space<vmem>>, vector<1x1x1x8x128xf32>
    %262 = vector.shape_cast %261 : vector<1x1x1x8x128xf32> to vector<8x128xf32>
    %c1_533 = arith.constant 1 : index
    %c1_534 = arith.constant 1 : index
    %c7_535 = arith.constant 7 : index
    %c2_536 = arith.constant 2 : index
    %c0_537 = arith.constant 0 : index
    %263 = vector.load %arg10[%c1_533, %c1_534, %c7_535, %c2_536, %c0_537] : memref<2x2x10x10x128xf32, #tpu.memory_space<vmem>>, vector<1x1x1x8x128xf32>
    %264 = vector.shape_cast %263 : vector<1x1x1x8x128xf32> to vector<8x128xf32>
    %c0_538 = arith.constant 0 : index
    %c0_539 = arith.constant 0 : index
    %c8 = arith.constant 8 : index
    %c0_540 = arith.constant 0 : index
    %c0_541 = arith.constant 0 : index
    %265 = vector.load %arg10[%c0_538, %c0_539, %c8, %c0_540, %c0_541] : memref<2x2x10x10x128xf32, #tpu.memory_space<vmem>>, vector<1x1x1x8x128xf32>
    %266 = vector.shape_cast %265 : vector<1x1x1x8x128xf32> to vector<8x128xf32>
    %c0_542 = arith.constant 0 : index
    %c0_543 = arith.constant 0 : index
    %c8_544 = arith.constant 8 : index
    %c1_545 = arith.constant 1 : index
    %c0_546 = arith.constant 0 : index
    %267 = vector.load %arg10[%c0_542, %c0_543, %c8_544, %c1_545, %c0_546] : memref<2x2x10x10x128xf32, #tpu.memory_space<vmem>>, vector<1x1x1x8x128xf32>
    %268 = vector.shape_cast %267 : vector<1x1x1x8x128xf32> to vector<8x128xf32>
    %c0_547 = arith.constant 0 : index
    %c0_548 = arith.constant 0 : index
    %c8_549 = arith.constant 8 : index
    %c2_550 = arith.constant 2 : index
    %c0_551 = arith.constant 0 : index
    %269 = vector.load %arg10[%c0_547, %c0_548, %c8_549, %c2_550, %c0_551] : memref<2x2x10x10x128xf32, #tpu.memory_space<vmem>>, vector<1x1x1x8x128xf32>
    %270 = vector.shape_cast %269 : vector<1x1x1x8x128xf32> to vector<8x128xf32>
    %c1_552 = arith.constant 1 : index
    %c0_553 = arith.constant 0 : index
    %c8_554 = arith.constant 8 : index
    %c0_555 = arith.constant 0 : index
    %c0_556 = arith.constant 0 : index
    %271 = vector.load %arg10[%c1_552, %c0_553, %c8_554, %c0_555, %c0_556] : memref<2x2x10x10x128xf32, #tpu.memory_space<vmem>>, vector<1x1x1x8x128xf32>
    %272 = vector.shape_cast %271 : vector<1x1x1x8x128xf32> to vector<8x128xf32>
    %c1_557 = arith.constant 1 : index
    %c0_558 = arith.constant 0 : index
    %c8_559 = arith.constant 8 : index
    %c1_560 = arith.constant 1 : index
    %c0_561 = arith.constant 0 : index
    %273 = vector.load %arg10[%c1_557, %c0_558, %c8_559, %c1_560, %c0_561] : memref<2x2x10x10x128xf32, #tpu.memory_space<vmem>>, vector<1x1x1x8x128xf32>
    %274 = vector.shape_cast %273 : vector<1x1x1x8x128xf32> to vector<8x128xf32>
    %c1_562 = arith.constant 1 : index
    %c0_563 = arith.constant 0 : index
    %c8_564 = arith.constant 8 : index
    %c2_565 = arith.constant 2 : index
    %c0_566 = arith.constant 0 : index
    %275 = vector.load %arg10[%c1_562, %c0_563, %c8_564, %c2_565, %c0_566] : memref<2x2x10x10x128xf32, #tpu.memory_space<vmem>>, vector<1x1x1x8x128xf32>
    %276 = vector.shape_cast %275 : vector<1x1x1x8x128xf32> to vector<8x128xf32>
    %c0_567 = arith.constant 0 : index
    %c1_568 = arith.constant 1 : index
    %c8_569 = arith.constant 8 : index
    %c0_570 = arith.constant 0 : index
    %c0_571 = arith.constant 0 : index
    %277 = vector.load %arg10[%c0_567, %c1_568, %c8_569, %c0_570, %c0_571] : memref<2x2x10x10x128xf32, #tpu.memory_space<vmem>>, vector<1x1x1x8x128xf32>
    %278 = vector.shape_cast %277 : vector<1x1x1x8x128xf32> to vector<8x128xf32>
    %c0_572 = arith.constant 0 : index
    %c1_573 = arith.constant 1 : index
    %c8_574 = arith.constant 8 : index
    %c1_575 = arith.constant 1 : index
    %c0_576 = arith.constant 0 : index
    %279 = vector.load %arg10[%c0_572, %c1_573, %c8_574, %c1_575, %c0_576] : memref<2x2x10x10x128xf32, #tpu.memory_space<vmem>>, vector<1x1x1x8x128xf32>
    %280 = vector.shape_cast %279 : vector<1x1x1x8x128xf32> to vector<8x128xf32>
    %c0_577 = arith.constant 0 : index
    %c1_578 = arith.constant 1 : index
    %c8_579 = arith.constant 8 : index
    %c2_580 = arith.constant 2 : index
    %c0_581 = arith.constant 0 : index
    %281 = vector.load %arg10[%c0_577, %c1_578, %c8_579, %c2_580, %c0_581] : memref<2x2x10x10x128xf32, #tpu.memory_space<vmem>>, vector<1x1x1x8x128xf32>
    %282 = vector.shape_cast %281 : vector<1x1x1x8x128xf32> to vector<8x128xf32>
    %c1_582 = arith.constant 1 : index
    %c1_583 = arith.constant 1 : index
    %c8_584 = arith.constant 8 : index
    %c0_585 = arith.constant 0 : index
    %c0_586 = arith.constant 0 : index
    %283 = vector.load %arg10[%c1_582, %c1_583, %c8_584, %c0_585, %c0_586] : memref<2x2x10x10x128xf32, #tpu.memory_space<vmem>>, vector<1x1x1x8x128xf32>
    %284 = vector.shape_cast %283 : vector<1x1x1x8x128xf32> to vector<8x128xf32>
    %c1_587 = arith.constant 1 : index
    %c1_588 = arith.constant 1 : index
    %c8_589 = arith.constant 8 : index
    %c1_590 = arith.constant 1 : index
    %c0_591 = arith.constant 0 : index
    %285 = vector.load %arg10[%c1_587, %c1_588, %c8_589, %c1_590, %c0_591] : memref<2x2x10x10x128xf32, #tpu.memory_space<vmem>>, vector<1x1x1x8x128xf32>
    %286 = vector.shape_cast %285 : vector<1x1x1x8x128xf32> to vector<8x128xf32>
    %c1_592 = arith.constant 1 : index
    %c1_593 = arith.constant 1 : index
    %c8_594 = arith.constant 8 : index
    %c2_595 = arith.constant 2 : index
    %c0_596 = arith.constant 0 : index
    %287 = vector.load %arg10[%c1_592, %c1_593, %c8_594, %c2_595, %c0_596] : memref<2x2x10x10x128xf32, #tpu.memory_space<vmem>>, vector<1x1x1x8x128xf32>
    %288 = vector.shape_cast %287 : vector<1x1x1x8x128xf32> to vector<8x128xf32>
    %c0_597 = arith.constant 0 : index
    %c0_598 = arith.constant 0 : index
    %c9 = arith.constant 9 : index
    %c0_599 = arith.constant 0 : index
    %c0_600 = arith.constant 0 : index
    %289 = vector.load %arg10[%c0_597, %c0_598, %c9, %c0_599, %c0_600] : memref<2x2x10x10x128xf32, #tpu.memory_space<vmem>>, vector<1x1x1x8x128xf32>
    %290 = vector.shape_cast %289 : vector<1x1x1x8x128xf32> to vector<8x128xf32>
    %c0_601 = arith.constant 0 : index
    %c0_602 = arith.constant 0 : index
    %c9_603 = arith.constant 9 : index
    %c1_604 = arith.constant 1 : index
    %c0_605 = arith.constant 0 : index
    %291 = vector.load %arg10[%c0_601, %c0_602, %c9_603, %c1_604, %c0_605] : memref<2x2x10x10x128xf32, #tpu.memory_space<vmem>>, vector<1x1x1x8x128xf32>
    %292 = vector.shape_cast %291 : vector<1x1x1x8x128xf32> to vector<8x128xf32>
    %c0_606 = arith.constant 0 : index
    %c0_607 = arith.constant 0 : index
    %c9_608 = arith.constant 9 : index
    %c2_609 = arith.constant 2 : index
    %c0_610 = arith.constant 0 : index
    %293 = vector.load %arg10[%c0_606, %c0_607, %c9_608, %c2_609, %c0_610] : memref<2x2x10x10x128xf32, #tpu.memory_space<vmem>>, vector<1x1x1x8x128xf32>
    %294 = vector.shape_cast %293 : vector<1x1x1x8x128xf32> to vector<8x128xf32>
    %295 = tpu.concatenate %92, %94, %96, %98, %100, %102, %104, %106, %108, %110, %112, %114, %116, %118, %120, %122 in 1 : vector<8x128xf32>, vector<8x128xf32>, vector<8x128xf32>, vector<8x128xf32>, vector<8x128xf32>, vector<8x128xf32>, vector<8x128xf32>, vector<8x128xf32>, vector<8x128xf32>, vector<8x128xf32>, vector<8x128xf32>, vector<8x128xf32>, vector<8x128xf32>, vector<8x128xf32>, vector<8x128xf32>, vector<8x128xf32> -> vector<8x2048xf32>
    %296 = tpu.concatenate %124, %126, %128, %130, %132, %134, %136, %138, %140, %142, %144, %146, %148, %150, %152, %154 in 1 : vector<8x128xf32>, vector<8x128xf32>, vector<8x128xf32>, vector<8x128xf32>, vector<8x128xf32>, vector<8x128xf32>, vector<8x128xf32>, vector<8x128xf32>, vector<8x128xf32>, vector<8x128xf32>, vector<8x128xf32>, vector<8x128xf32>, vector<8x128xf32>, vector<8x128xf32>, vector<8x128xf32>, vector<8x128xf32> -> vector<8x2048xf32>
    %297 = tpu.concatenate %156, %158, %160, %162, %164, %166, %168, %170, %172, %174, %176, %178, %180, %182, %184, %186 in 1 : vector<8x128xf32>, vector<8x128xf32>, vector<8x128xf32>, vector<8x128xf32>, vector<8x128xf32>, vector<8x128xf32>, vector<8x128xf32>, vector<8x128xf32>, vector<8x128xf32>, vector<8x128xf32>, vector<8x128xf32>, vector<8x128xf32>, vector<8x128xf32>, vector<8x128xf32>, vector<8x128xf32>, vector<8x128xf32> -> vector<8x2048xf32>
    %298 = tpu.concatenate %188, %190, %192, %194, %196, %198, %200, %202, %204, %206, %208, %210, %212, %214, %216, %218 in 1 : vector<8x128xf32>, vector<8x128xf32>, vector<8x128xf32>, vector<8x128xf32>, vector<8x128xf32>, vector<8x128xf32>, vector<8x128xf32>, vector<8x128xf32>, vector<8x128xf32>, vector<8x128xf32>, vector<8x128xf32>, vector<8x128xf32>, vector<8x128xf32>, vector<8x128xf32>, vector<8x128xf32>, vector<8x128xf32> -> vector<8x2048xf32>
    %299 = tpu.concatenate %220, %222, %224, %226, %228, %230, %232, %234, %236, %238, %240, %242, %244, %246, %248, %250 in 1 : vector<8x128xf32>, vector<8x128xf32>, vector<8x128xf32>, vector<8x128xf32>, vector<8x128xf32>, vector<8x128xf32>, vector<8x128xf32>, vector<8x128xf32>, vector<8x128xf32>, vector<8x128xf32>, vector<8x128xf32>, vector<8x128xf32>, vector<8x128xf32>, vector<8x128xf32>, vector<8x128xf32>, vector<8x128xf32> -> vector<8x2048xf32>
    %300 = tpu.concatenate %252, %254, %256, %258, %260, %262, %264, %266, %268, %270, %272, %274, %276, %278, %280, %282 in 1 : vector<8x128xf32>, vector<8x128xf32>, vector<8x128xf32>, vector<8x128xf32>, vector<8x128xf32>, vector<8x128xf32>, vector<8x128xf32>, vector<8x128xf32>, vector<8x128xf32>, vector<8x128xf32>, vector<8x128xf32>, vector<8x128xf32>, vector<8x128xf32>, vector<8x128xf32>, vector<8x128xf32>, vector<8x128xf32> -> vector<8x2048xf32>
    %301 = tpu.concatenate %284, %286, %288, %290, %292, %294 in 1 : vector<8x128xf32>, vector<8x128xf32>, vector<8x128xf32>, vector<8x128xf32>, vector<8x128xf32>, vector<8x128xf32> -> vector<8x768xf32>
    %302 = tpu.concatenate %295, %296, %297, %298, %299, %300, %301 in 1 : vector<8x2048xf32>, vector<8x2048xf32>, vector<8x2048xf32>, vector<8x2048xf32>, vector<8x2048xf32>, vector<8x2048xf32>, vector<8x768xf32> -> vector<8x13056xf32>
    %303 = arith.truncf %302 : vector<8x13056xf32> to vector<8x13056xbf16>
    %c0_611 = arith.constant 0 : index
    %c0_612 = arith.constant 0 : index
    %304 = vector.load %arg6[%c0_611, %c0_612] : memref<13056x128xbf16, #tpu.memory_space<vmem>>, vector<13056x128xbf16>
    %cst_613 = arith.constant dense<0.000000e+00> : vector<8x128xf32>
    %305 = tpu.matmul %303, %304, %cst_613 {dimension_numbers = #tpu.dot_dimension_numbers<[1], [0], [0], [1], [0, 0, 1, 1], [], []>} : vector<8x13056xbf16>, vector<13056x128xbf16>, vector<8x128xf32> -> vector<8x128xf32>
    %c0_614 = arith.constant 0 : index
    %c0_615 = arith.constant 0 : index
    %306 = vector.load %arg7[%c0_614, %c0_615] : memref<1x128xf32, #tpu.memory_space<vmem>>, vector<1x128xf32>
    %307 = vector.broadcast %306 : vector<1x128xf32> to vector<8x128xf32>
    %308 = arith.addf %305, %307 : vector<8x128xf32>
    %c0_616 = arith.constant 0 : index
    %c0_617 = arith.constant 0 : index
    %c0_618 = arith.constant 0 : index
    %309 = vector.load %arg8[%c0_616, %c0_617, %c0_618] : memref<1x8x128xf32, #tpu.memory_space<vmem>>, vector<1x8x128xf32>
    %310 = vector.shape_cast %309 : vector<1x8x128xf32> to vector<8x128xf32>
    %311 = vector.shape_cast %308 : vector<8x128xf32> to vector<1x8x128xf32>
    tpu.vector_store %arg8[%c0_616, %c0_617, %c0_618], %311 {strides = array<i32>} : memref<1x8x128xf32, #tpu.memory_space<vmem>>, vector<1x8x128xf32>,
    return
  }
  func.func @transform_0(%arg0: i32) -> (i32, i32, i32, i32) {
    %c0_i32 = arith.constant 0 : i32
    %c0_i32_0 = arith.constant 0 : i32
    %c0_i32_1 = arith.constant 0 : i32
    %c0_i32_2 = arith.constant 0 : i32
    return %arg0, %c0_i32, %c0_i32_0, %c0_i32_1 : i32, i32, i32, i32
  }
  func.func @transform_1(%arg0: i32) -> (i32, i32) {
    %c0_i32 = arith.constant 0 : i32
    %c0_i32_0 = arith.constant 0 : i32
    %c0_i32_1 = arith.constant 0 : i32
    return %c0_i32, %c0_i32_0 : i32, i32
  }
  func.func @transform_2(%arg0: i32) -> (i32, i32) {
    %c0_i32 = arith.constant 0 : i32
    %c0_i32_0 = arith.constant 0 : i32
    %c0_i32_1 = arith.constant 0 : i32
    return %c0_i32, %c0_i32_0 : i32, i32
  }
  func.func @transform_3(%arg0: i32) -> (i32, i32) {
    %c0_i32 = arith.constant 0 : i32
    %c0_i32_0 = arith.constant 0 : i32
    %c0_i32_1 = arith.constant 0 : i32
    return %c0_i32, %c0_i32_0 : i32, i32
  }
  func.func @transform_4(%arg0: i32) -> (i32, i32) {
    %c0_i32 = arith.constant 0 : i32
    %c0_i32_0 = arith.constant 0 : i32
    %c0_i32_1 = arith.constant 0 : i32
    return %c0_i32, %c0_i32_0 : i32, i32
  }
  func.func @transform_5(%arg0: i32) -> (i32, i32) {
    %c0_i32 = arith.constant 0 : i32
    %c0_i32_0 = arith.constant 0 : i32
    %c0_i32_1 = arith.constant 0 : i32
    return %c0_i32, %c0_i32_0 : i32, i32
  }
  func.func @transform_6(%arg0: i32) -> (i32, i32) {
    %c0_i32 = arith.constant 0 : i32
    %c0_i32_0 = arith.constant 0 : i32
    %c0_i32_1 = arith.constant 0 : i32
    return %c0_i32, %c0_i32_0 : i32, i32
  }
  func.func @transform_7(%arg0: i32) -> (i32, i32, i32) {
    %c0_i32 = arith.constant 0 : i32
    %c0_i32_0 = arith.constant 0 : i32
    %c0_i32_1 = arith.constant 0 : i32
    return %arg0, %c0_i32, %c0_i32_0 : i32, i32, i32
  }
}

</mosaic_0001>

<bundles_post_ra>
// kernel: decoder_forward.1
= control target key start
LH: loop header
LB: loop body
LE: loop exit
PB: predicated region body
PF: predicated region fallthrough
CT: control target
= control target key end

     0   :  { %12 = vsyncpa [#allocation5], 0  ;;  %s15527_s0 = inlined_call_operand.vmem [shape: f32[2,9,9,16], index: 0, kind: input, shape index: {}]   ;;  %s15528_s1 = inlined_call_operand.hbm [shape: bf16[64,256], index: 1, kind: input, shape index: {}]   ;;  %s15529_s2 = inlined_call_operand.hbm [shape: f32[1,256], index: 2, kind: input, shape index: {}]   ;;  %s15530_s3 = inlined_call_operand.hbm [shape: bf16[256,128], index: 3, kind: input, shape index: {}]   ;;  %s15531_s4 = inlined_call_operand.hbm [shape: f32[1,128], index: 4, kind: input, shape index: {}]   ;;  %s15532_s5 = inlined_call_operand.hbm [shape: bf16[13056,128], index: 5, kind: input, shape index: {}]   ;;  %s15533_s6 = inlined_call_operand.hbm [shape: f32[1,128], index: 6, kind: input, shape index: {}]   ;;  %s15534_s7 = inlined_call_operand.vmem [shape: f32[2,8,128], index: 7, kind: output, shape index: {}]  }
   0x1   :  { %13 = vsyncpa [#allocation7], 0 }
   0x2   :  { %14 = vsyncpa [#allocation10], 0 }
   0x3   :  { %15 = vsyncpa [#allocation13], 0  ;;  %s14377_s24 = smov 0  }
   0x4 LB: > { %s14321_s25 = smov [#allocation6]   ;;  %s14383_s27 = sadd.s32 4294967295, %s14319_s24   ;;  %s14319_s24 = sphi %s14377_s24, %s21_s24  }
   0x5   : > { %s230_s26 = sshll.u32 %s14321_s25, 4  ;;  %p10873_p0 = scmp.ge.s32.totalorder %s14319_s24, 1  ;;  %s14388_s26 = int_to_ptr.vmem [resolvable:$true] %s230_s26 }
   0x6   : > { %p204_p1 = scmp.lt.s32.totalorder %s14319_s24, 3  ;;  %p15535_p2 = scmp.eq.s32.totalorder %s14383_s27, 0 }
   0x7   : > { %s14322_s29 = smov [#allocation9]   ;;  %s14323_s8 = smov [#allocation4]  }
   0x8   : > { %p14390_p3 = pnand %p10873_p0, %p204_p1  ;;  %s254_s30 = sshll.u32 %s14322_s29, 4  ;;  %s14396_s30 = int_to_ptr.vmem [resolvable:$true] %s254_s30 }
   0x9   : > { %s216_s9 = sshll.u32 %s14323_s8, 4  ;;  %s14324_s11 = smov [#allocation8]   ;;  %s14404_s9 = int_to_ptr.vmem [resolvable:$true] %s216_s9 }
   0xa   : > { %s15537_s28 = scalar_select %p14390_p3, 1, 0 }
   0xb   : > { %p12997_p4 = pneg %p14390_p3  ;;  %s14406_s12 = sshll.u32 %s14324_s11, 4  ;;  %s241_s12 = int_to_ptr.vmem [resolvable:$true] %s14406_s12 }
   0xc   : > { %s14129_s15 = scalar_lea.hbm %s15529_s2, 32 }
   0xd   : > { %p14400_p5 = pnand %p15535_p2, %p12997_p4  ;;  %p14130_p6 = scmp.ne.s32.totalorder %s15529_s2, %s14129_s15 }
   0xe   : > { %p14136_p10 = scmp.lt.u32.totalorder %s14129_s15, %s15529_s2 }
   0xf   : > { %p14416_p7 = pneg %p14400_p5 }
  0x11   : > { %p14132_p8 = pnand %p14416_p7, %p14130_p6 }
  0x13   : > { %p14133_p9 = pneg %p14132_p8 }
  0x15   : > { %p14138_p11 = pnand %p14136_p10, %p14133_p9 }
  0x17   : > { %14141 = shalt.err (!%p14138_p11)
}
  0x18   : > { %s14142_s21 = scalar_lea.vmem %s14388_s26, 32  ;;  %p14150_p1 = scmp.lt.s32.totalorder %s14388_s26, %s14388_s26 }
  0x19   : > { %p14143_p12 = scmp.ne.s32.totalorder %s14388_s26, %s14142_s21  ;;  %p14151_p4 = scmp.lt.s32.totalorder %s14142_s21, %s14142_s21 }
  0x1b   : > { %p14145_p13 = pnand %p14143_p12, %p14416_p7  ;;  %p14152_p6 = por %p14151_p4, %p14150_p1 }
  0x1d   : > { %p14146_p0 = pneg %p14145_p13 }
  0x1f   : > { %p14153_p8 = pnand %p14152_p6, %p14146_p0 }
  0x21   : > { %14156 = shalt.err (!%p14153_p8)
}
  0x22   : > { %13003 = dma.hbm_to_vmem [thread:$0]  (!%p14400_p5), %s15529_s2, 32, %s14388_s26, [#allocation7]  }
  0x23   : > { %s14157_s8 = scalar_lea.hbm %s15531_s4, 16 }
  0x24   : > { %p14158_p9 = scmp.ne.s32.totalorder %s15531_s4, %s14157_s8  ;;  %p14164_p12 = scmp.lt.u32.totalorder %s14157_s8, %s15531_s4 }
  0x26   : > { %p14160_p10 = pnand %p14158_p9, %p14416_p7 }
  0x28   : > { %p14161_p11 = pneg %p14160_p10 }
  0x2a   : > { %p14166_p13 = pnand %p14164_p12, %p14161_p11 }
  0x2c   : > { %14169 = shalt.err (!%p14166_p13)
}
  0x2d   : > { %s14170_s26 = scalar_lea.vmem %s14396_s30, 16  ;;  %s14177_s16 = scalar_lea.vmem %s14396_s30, 32 }
  0x2e   : > { %p14171_p0 = scmp.ne.s32.totalorder %s14396_s30, %s14170_s26  ;;  %p14178_p6 = scmp.lt.s32.totalorder %s14396_s30, %s14396_s30 }
  0x2f   : > { %p14179_p8 = scmp.lt.s32.totalorder %s14177_s16, %s14170_s26 }
  0x30   : > { %p14173_p1 = pnand %p14171_p0, %p14416_p7 }
  0x31   : > { %p14180_p9 = por %p14179_p8, %p14178_p6 }
  0x32   : > { %p14174_p4 = pneg %p14173_p1 }
  0x34   : > { %p14181_p10 = pnand %p14180_p9, %p14174_p4 }
  0x36   : > { %14184 = shalt.err (!%p14181_p10)
}
  0x37   : > { %13009 = dma.hbm_to_vmem [thread:$0]  (!%p14400_p5), %s15531_s4, 16, %s14396_s30, [#allocation10]  }
  0x38   : > { %s14185_s22 = scalar_lea.hbm %s15528_s1, 1024 }
  0x39   : > { %p14186_p11 = scmp.ne.s32.totalorder %s15528_s1, %s14185_s22  ;;  %p14192_p0 = scmp.lt.u32.totalorder %s14185_s22, %s15528_s1 }
  0x3b   : > { %p14188_p12 = pnand %p14186_p11, %p14416_p7 }
  0x3d   : > { %p14189_p13 = pneg %p14188_p12 }
  0x3f   : > { %p14194_p1 = pnand %p14192_p0, %p14189_p13 }
  0x41   : > { %14197 = shalt.err (!%p14194_p1)
}
  0x42   : > { %s14198_s30 = scalar_lea.vmem %s14404_s9, 1024  ;;  %p14206_p9 = scmp.lt.s32.totalorder %s14404_s9, %s14404_s9 }
  0x43   : > { %p14199_p4 = scmp.ne.s32.totalorder %s14404_s9, %s14198_s30  ;;  %p14207_p10 = scmp.lt.s32.totalorder %s14198_s30, %s14198_s30 }
  0x45   : > { %p14201_p6 = pnand %p14199_p4, %p14416_p7  ;;  %p14208_p11 = por %p14207_p10, %p14206_p9 }
  0x47   : > { %p14202_p8 = pneg %p14201_p6 }
  0x49   : > { %p14209_p12 = pnand %p14208_p11, %p14202_p8 }
  0x4b   : > { %14212 = shalt.err (!%p14209_p12)
}
  0x4c   : > { %s14325_s11 = smov 128   ;;  %s14326_s13 = smov 8  }
  0x4d   : > { %13000 = dma.hbm_to_vmem [thread:$0]  (!%p14400_p5), %s15528_s1, 1024, %s14404_s9, [#allocation5], %s14325_s11, %s14325_s11, %s14326_s13  }
  0x4e   : > { %s14213_s17 = scalar_lea.hbm %s15530_s3, 2048 }
  0x4f   : > { %p14214_p13 = scmp.ne.s32.totalorder %s15530_s3, %s14213_s17  ;;  %p14220_p4 = scmp.lt.u32.totalorder %s14213_s17, %s15530_s3 }
  0x51   : > { %p14216_p0 = pnand %p14214_p13, %p14416_p7 }
  0x53   : > { %p14217_p1 = pneg %p14216_p0 }
  0x55   : > { %p14222_p6 = pnand %p14220_p4, %p14217_p1 }
  0x57   : > { %14225 = shalt.err (!%p14222_p6)
}
  0x58   : > { %s14226_s23 = scalar_lea.vmem %s241_s12, 2048  ;;  %p14234_p11 = scmp.lt.s32.totalorder %s241_s12, %s241_s12 }
  0x59   : > { %p14227_p8 = scmp.ne.s32.totalorder %s241_s12, %s14226_s23  ;;  %p14235_p12 = scmp.lt.s32.totalorder %s14226_s23, %s14226_s23 }
  0x5b   : > { %p14229_p9 = pnand %p14227_p8, %p14416_p7  ;;  %p14236_p2 = por %p14235_p12, %p14234_p11 }
  0x5d   : > { %p14230_p10 = pneg %p14229_p9 }
  0x5f   : > { %p14237_p3 = pnand %p14236_p2, %p14230_p10 }
  0x61   : > { %14240 = shalt.err (!%p14237_p3)
}
  0x62   : > { %s14327_s9 = smov 64   ;;  %s14328_s25 = smov 4  }
  0x63   : > { %13006 = dma.hbm_to_vmem [thread:$0]  (!%p14400_p5), %s15530_s3, 2048, %s241_s12, [#allocation7], %s14327_s9, %s14327_s9, %s14328_s25  }
  0x64   : > { %s14329_s30 = smov [#allocation11]   ;;  %s14330_s13 = smov [#allocation12]  }
  0x65   : > { %s264_s11 = sshll.u32 %s14329_s30, 4  ;;  %s278_s14 = sshll.u32 %s14330_s13, 4  ;;  %s265_s11 = int_to_ptr.vmem [resolvable:$true] %s264_s11  ;;  %s279_s14 = int_to_ptr.vmem [resolvable:$true] %s278_s14 }
  0x66   : > { %s14241_s16 = scalar_lea.hbm %s15532_s5, 104448 }
  0x67   : > { %p14242_p2 = scmp.ne.s32.totalorder %s15532_s5, %s14241_s16  ;;  %p14248_p0 = scmp.lt.u32.totalorder %s14241_s16, %s15532_s5 }
  0x69   : > { %p14244_p3 = pnand %p14242_p2, %p14416_p7 }
  0x6b   : > { %p14245_p13 = pneg %p14244_p3 }
  0x6d   : > { %p14250_p1 = pnand %p14248_p0, %p14245_p13 }
  0x6f   : > { %14253 = shalt.err (!%p14250_p1)
}
  0x70   : > { %s14254_s12 = scalar_lea.vmem %s265_s11, 104448  ;;  %p14262_p9 = scmp.lt.s32.totalorder %s265_s11, %s265_s11 }
  0x71   : > { %p14255_p4 = scmp.ne.s32.totalorder %s265_s11, %s14254_s12  ;;  %p14263_p10 = scmp.lt.s32.totalorder %s14254_s12, %s14254_s12 }
  0x73   : > { %p14257_p6 = pnand %p14255_p4, %p14416_p7  ;;  %p14264_p11 = por %p14263_p10, %p14262_p9 }
  0x75   : > { %p14258_p8 = pneg %p14257_p6 }
  0x77   : > { %p14265_p12 = pnand %p14264_p11, %p14258_p8 }
  0x79   : > { %14268 = shalt.err (!%p14265_p12)
}
  0x7a   : > { %13012 = dma.hbm_to_vmem [thread:$0]  (!%p14400_p5), %s15532_s5, 104448, %s265_s11, [#allocation10], %s14327_s9, %s14327_s9, %s14328_s25  }
  0x7b   : > { %s14269_s30 = scalar_lea.hbm %s15533_s6, 16 }
  0x7c   : > { %p14270_p2 = scmp.ne.s32.totalorder %s15533_s6, %s14269_s30  ;;  %p14276_p0 = scmp.lt.u32.totalorder %s14269_s30, %s15533_s6 }
  0x7e   : > { %p14272_p3 = pnand %p14270_p2, %p14416_p7 }
  0x80   : > { %p14273_p13 = pneg %p14272_p3 }
  0x82   : > { %p14278_p1 = pnand %p14276_p0, %p14273_p13 }
  0x84   : > { %14281 = shalt.err (!%p14278_p1)
}
  0x85   : > { %s14282_s17 = scalar_lea.vmem %s279_s14, 16  ;;  %s14289_s9 = scalar_lea.vmem %s279_s14, 32 }
  0x86   : > { %p14283_p4 = scmp.ne.s32.totalorder %s279_s14, %s14282_s17  ;;  %p14290_p9 = scmp.lt.s32.totalorder %s279_s14, %s279_s14 }
  0x87   : > { %p14291_p10 = scmp.lt.s32.totalorder %s14289_s9, %s14282_s17 }
  0x88   : > { %p14285_p6 = pnand %p14283_p4, %p14416_p7 }
  0x89   : > { %p14292_p11 = por %p14291_p10, %p14290_p9 }
  0x8a   : > { %p14286_p8 = pneg %p14285_p6 }
  0x8c   : > { %p14293_p12 = pnand %p14292_p11, %p14286_p8 }
  0x8e   : > { %14296 = shalt.err (!%p14293_p12)
}
  0x8f   : > { %13015 = dma.hbm_to_vmem [thread:$0]  (!%p14400_p5), %s15533_s6, 16, %s279_s14, [#allocation13]  }
  0x90   : > { %p15540_p2 = scmp.ne.s32.totalorder %s15537_s28, 0 }
  0x91   : > { %p15541_p3 = scmp.eq.s32.totalorder (!%p15540_p2), %s14383_s27, 0 }
  0x92   : > { %299 = sbr.rel (%p15540_p2) target bundleno = 2132 (0x854), region = 48 }
  0x99   : > { %14302 = dma.done.wait (%p15541_p3), [#allocation5], 1024   ;;  %p15542_p7 = pmov %p15541_p3 }
  0x9a   : > { %p15543_p13 = pmov %p15541_p3 }
  0x9b   : > { %14304 = vsyncadd (%p15542_p7), [#allocation5], 4294966272 }
  0x9c   : > { %14306 = dma.done.wait (%p15543_p13), [#allocation7], 2080   ;;  %p15544_p0 = pmov %p15541_p3 }
  0x9e   : > { %14308 = vsyncadd (%p15544_p0), [#allocation7], 4294965216  ;;  %p15545_p1 = pmov %p15544_p0 }
  0x9f   : > { %p15546_p5 = pmov %p15544_p0 }
  0xa0   : > { %14310 = dma.done.wait (%p15545_p1), [#allocation10], 104464  }
  0xa1   : > { %14312 = vsyncadd (%p15546_p5), [#allocation10], 4294862832  ;;  %p15547_p4 = pmov %p15544_p0 }
  0xa2   : > { %p15548_p6 = pmov %p15544_p0 }
  0xa3   : > { %14314 = dma.done.wait (%p15547_p4), [#allocation13], 16  }
  0xa4   : > { %14316 = vsyncadd (%p15548_p6), [#allocation13], 4294967280  ;;  %vm360_vm0 = vcmask 523264   ;;  %p350_p8 = scmp.lt.s32.totalorder %s14383_s27, 1  ;;  %v14331_v0 = vmov 0.0   ;;  %vm548_vm1 = vcmask 1046528  }
  0xa5   : > { %434 = vst [vmem:[#allocation3] sm:$0xff] %v14331_v0  ;;  %361 = vst.msk [vmem:[#allocation2] sm:$0xff] %vm360_vm0, %v14331_v0  ;;  %s14332_s19 = smov 16   ;;  %v13272_v36 = vld [vmem:[#allocation4 + $0x4] ss:$8 sps:$4 sm:$0xff]   ;;  %s14333_s20 = smov 48  }
  0xa6   : > { %364 = vst.msk [vmem:[#allocation2 + $0x10] sm:$0xff] %vm360_vm0, %v14331_v0  ;;  %366 = vst.msk [vmem:[#allocation2 + $0x20] sm:$0xff] %vm360_vm0, %v14331_v0  ;;  %s15550_s27 = smov (!%p350_p8, %s14383_s27), 1  ;;  %v13274_v40 = vld [vmem:[#allocation4] ss:$8 sps:$4 sm:$0xff]   ;;  %753 = vmatprep.subr.bf16.mxu0 %v13272_v36  ;;  %s14334_s21 = smov 32  }
  0xa7   : > { %368 = vst.msk [vmem:[#allocation2 + $0x30] sm:$0xff] %vm360_vm0, %v14331_v0  ;;  %370 = vst.msk [vmem:[#allocation2 + $0x40] sm:$0xff] %vm360_vm0, %v14331_v0  ;;  %s12972_s28 = smul.u32 144, %s15550_s27  ;;  %v13275_v44 = vld [vmem:[#allocation4 + $0x14] ss:$8 sps:$4 sm:$0xff]   ;;  %754 = vmatpush1.bf16.msra.mxu0 %v13274_v40  ;;  %v14335_v55 = vmov 0  }
  0xa8   : > { %372 = vst.msk [vmem:[#allocation2 + $0x50] sm:$0xff] %vm360_vm0, %v14331_v0  ;;  %374 = vst.msk [vmem:[#allocation2 + $0x60] sm:$0xff] %vm360_vm0, %v14331_v0  ;;  %v13277_v48 = vld [vmem:[#allocation4 + $0x10] ss:$8 sps:$4 sm:$0xff]   ;;  %755 = vmatprep.subr.bf16.mxu0 %v13275_v44  ;;  %v13278_v51 = vld [vmem:[#allocation4 + $0x24] ss:$8 sps:$4 sm:$0xff]   ;;  %785 = vmatprep.mubr.bf16.mxu0 %v14335_v55 }
  0xa9   : > { %376 = vst.msk [vmem:[#allocation2 + $0x70] sm:$0xff] %vm360_vm0, %v14331_v0  ;;  %378 = vst.msk [vmem:[#allocation2 + $0x80] sm:$0xff] %vm360_vm0, %v14331_v0  ;;  %s14704_s14 = scalar_lea.vmem %s15527_s0, %s12972_s28  ;;  %v13280_v54 = vld [vmem:[#allocation4 + $0x20] ss:$8 sps:$4 sm:$0xff]   ;;  %v13281_v56 = vld [vmem:[#allocation4 + $0x34] ss:$8 sps:$4 sm:$0xff]  }
  0xaa   : > { %380 = vst.msk [vmem:[#allocation2 + $0x90] sm:$0xff] %vm360_vm0, %v14331_v0  ;;  %382 = vst.msk [vmem:[#allocation2 + $0xa0] sm:$0xff] %vm360_vm0, %v14331_v0  ;;  %v14707_v1 = vld [vmem:[%s14704_s14] sm:$0xff]  ;;  %v515_v2 = vld [vmem:[%s14704_s14 + $0x8] sm:$0x1]  ;;  %vm650_vm2 = vcmask 130048  }
  0xab   : > { %384 = vst.msk [vmem:[#allocation2 + $0xb0] sm:$0xff] %vm360_vm0, %v14331_v0  ;;  %386 = vst.msk [vmem:[#allocation2 + $0xc0] sm:$0xff] %vm360_vm0, %v14331_v0  ;;  %v14711_v3 = vld [vmem:[%s14704_s14 + $0x10] sm:$0xff]  ;;  %v517_v4 = vld [vmem:[%s14704_s14 + $0x18] sm:$0x1]  ;;  %v549_v5 = vrot.slane %v14707_v1, 1  ;;  %756 = vmatpush1.bf16.msra.mxu0 %v13277_v48 }
  0xac   : > { %388 = vst.msk [vmem:[#allocation2 + $0xd0] sm:$0xff] %vm360_vm0, %v14331_v0  ;;  %390 = vst.msk [vmem:[#allocation2 + $0xe0] sm:$0xff] %vm360_vm0, %v14331_v0  ;;  %v550_v6 = vrot.slane %v515_v2, 1  ;;  %v552_v7 = vrot.slane %v14711_v3, 1  ;;  %v14717_v8 = vld [vmem:[%s14704_s14 + $0x20] sm:$0xff]  ;;  %v553_v9 = vrot.slane %v517_v4, 1  ;;  %757 = vmatprep.subr.bf16.mxu0 %v13278_v51 }
  0xad   : > { %392 = vst.msk [vmem:[#allocation2 + $0xf0] sm:$0xff] %vm360_vm0, %v14331_v0  ;;  %394 = vst.msk [vmem:[#allocation2 + $0x100] sm:$0xff] %vm360_vm0, %v14331_v0  ;;  %v519_v10 = vld [vmem:[%s14704_s14 + $0x28] sm:$0x1]  ;;  %v14721_v11 = vld [vmem:[%s14704_s14 + $0x30] sm:$0xff]  ;;  %v555_v14 = vrot.slane %v14717_v8, 1  ;;  %v13057_v35 = vpack.i.bf16 %v14717_v8, %v14711_v3 }
  0xae   : > { %396 = vst.msk [vmem:[#allocation2 + $0x110] sm:$0xff] %vm360_vm0, %v14331_v0  ;;  %398 = vst.msk [vmem:[#allocation2 + $0x120] sm:$0xff] %vm360_vm0, %v14331_v0  ;;  %v521_v12 = vld [vmem:[%s14704_s14 + $0x38] sm:$0x1]  ;;  %v551_v13 = vsel %vm548_vm1, %v549_v5, %v550_v6  ;;  %v556_v15 = vrot.slane %v519_v10, 1  ;;  %v558_v16 = vrot.slane %v14721_v11, 1  ;;  %v554_v19 = vsel %vm548_vm1, %v552_v7, %v553_v9 }
  0xaf   : > { %400 = vst.msk [vmem:[#allocation2 + $0x130] sm:$0xff] %vm360_vm0, %v14331_v0  ;;  %402 = vst.msk [vmem:[#allocation2 + $0x140] sm:$0xff] %vm360_vm0, %v14331_v0  ;;  %v14728_v17 = vld [vmem:[%s14704_s14 + $0x40] sm:$0xff]  ;;  %v523_v18 = vld [vmem:[%s14704_s14 + $0x48] sm:$0x1]  ;;  %v559_v20 = vrot.slane %v521_v12, 1  ;;  %v13052_v23 = vpack.i.bf16 %v554_v19, %v551_v13  ;;  %758 = vmatpush1.bf16.msra.mxu0 %v13280_v54  ;;  %v691_v5 = vlaneseq }
  0xb0   : > { %404 = vst.msk [vmem:[#allocation2 + $0x150] sm:$0xff] %vm360_vm0, %v14331_v0  ;;  %406 = vst.msk [vmem:[#allocation2 + $0x160] sm:$0xff] %vm360_vm0, %v14331_v0  ;;  %v14733_v21 = vld [vmem:[%s14704_s14 + $0x50] sm:$0xff]  ;;  %v525_v22 = vld [vmem:[%s14704_s14 + $0x58] sm:$0x1]  ;;  %v557_v24 = vsel %vm548_vm1, %v555_v14, %v556_v15  ;;  %v561_v25 = vrot.slane %v14728_v17, 1  ;;  %v13067_v49 = vpack.i.bf16 %v14728_v17, %v14721_v11  ;;  %759 = vmatprep.subr.bf16.mxu0 %v13281_v56 }
  0xb1   : > { %408 = vst.msk [vmem:[#allocation2 + $0x170] sm:$0xff] %vm360_vm0, %v14331_v0  ;;  %410 = vst.msk [vmem:[#allocation2 + $0x180] sm:$0xff] %vm360_vm0, %v14331_v0  ;;  %v562_v26 = vrot.slane %v523_v18, 1  ;;  %v526_v27 = vld [vmem:[%s14704_s14 + $0x60] sm:$0xff]  ;;  %v527_v28 = vld [vmem:[%s14704_s14 + $0x68] sm:$0x1]  ;;  %v560_v30 = vsel %vm548_vm1, %v558_v16, %v559_v20  ;;  %v13062_v31 = vpack.i.bf16 %v557_v24, %v554_v19  ;;  %13053 = vrot.lane.b32.xlu0 %v13052_v23, %s14332_s19 }
  0xb2   : > { %412 = vst.msk [vmem:[#allocation2 + $0x190] sm:$0xff] %vm360_vm0, %v14331_v0  ;;  %414 = vst.msk [vmem:[#allocation2 + $0x1a0] sm:$0xff] %vm360_vm0, %v14331_v0  ;;  %v528_v29 = vld [vmem:[%s14704_s14 + $0x70] sm:$0xff]  ;;  %v529_v32 = vld [vmem:[%s14704_s14 + $0x78] sm:$0x1]  ;;  %v13072_v37 = vpack.i.bf16 %v560_v30, %v557_v24  ;;  %v564_v38 = vrot.slane %v14733_v21, 1  ;;  %v13087_v58 = vpack.i.bf16 %v526_v27, %v14733_v21 }
  0xb3   : > { %416 = vst.msk [vmem:[#allocation2 + $0x1b0] sm:$0xff] %vm360_vm0, %v14331_v0  ;;  %418 = vst.msk [vmem:[#allocation2 + $0x1c0] sm:$0xff] %vm360_vm0, %v14331_v0  ;;  %v530_v33 = vld [vmem:[%s14704_s14 + $0x80] sm:$0xff]  ;;  %v531_v34 = vld [vmem:[%s14704_s14 + $0x88] sm:$0x1]  ;;  %13063 = vrot.lane.b32.xlu1 %v13062_v31, %s14333_s20  ;;  %v565_v39 = vrot.slane %v525_v22, 1  ;;  %v563_v41 = vsel %vm548_vm1, %v561_v25, %v562_v26 }
  0xb4   : > { %420 = vst.msk [vmem:[#allocation2 + $0x1d0] sm:$0xff] %vm360_vm0, %v14331_v0  ;;  %422 = vst.msk [vmem:[#allocation2 + $0x1e0] sm:$0xff] %vm360_vm0, %v14331_v0  ;;  %v567_v42 = vrot.slane %v526_v27, 1  ;;  %v568_v43 = vrot.slane %v527_v28, 1  ;;  %v570_v45 = vrot.slane %v528_v29, 1  ;;  %v571_v46 = vrot.slane %v529_v32, 1 }
  0xb5   : > { %424 = vst.msk [vmem:[#allocation2 + $0x1f0] sm:$0xff] %vm360_vm0, %v14331_v0  ;;  %426 = vst.msk [vmem:[#allocation2 + $0x200] sm:$0xff] %vm360_vm0, %v14331_v0  ;;  %v575_v47 = vrot.slane %v530_v33, 1  ;;  %13058 = vrot.lane.b32.xlu0 %v13057_v35, %s14334_s21  ;;  %v576_v50 = vrot.slane %v531_v34, 1  ;;  %v13077_v52 = vpack.i.bf16 %v563_v41, %v560_v30  ;;  %v566_v53 = vsel %vm548_vm1, %v564_v38, %v565_v39  ;;  %v13283_v60 = vld [vmem:[#allocation4 + $0x30] ss:$8 sps:$4 sm:$0xff]  }
  0xb6   : > { %428 = vst.msk [vmem:[#allocation2 + $0x210] sm:$0xff] %vm360_vm0, %v14331_v0  ;;  %436 = vst [vmem:[#allocation3 + $0x10] sm:$0xff] %v14331_v0  ;;  %v13082_v57 = vpack.i.bf16 %v566_v53, %v563_v41  ;;  %v569_v59 = vsel %vm548_vm1, %v567_v42, %v568_v43  ;;  %v572_v61 = vsel %vm548_vm1, %v570_v45, %v571_v46  ;;  %760 = vmatpush1.bf16.msra.mxu0 %v13283_v60  ;;  %vm659_vm3 = vcmask 261120   ;;  %v14116_v60 = vld [vmem:[%s14704_s14 + $0x70] sm:$0xff]  ;;  %s14336_s12 = smov 64   ;;  %s10889_s22 = sshll.u32 %s15550_s27, 3 }
  0xb7   : > { %437 = vst [vmem:[#allocation3 + $0x18] sm:$0x3] %v14331_v0  ;;  %438 = vst [vmem:[#allocation3 + $0x20] sm:$0xff] %v14331_v0  ;;  %13073 = vrot.lane.b32.xlu1 %v13072_v37, %s14332_s19  ;;  %v13092_v62 = vpack.i.bf16 %v569_v59, %v566_v53  ;;  %v13097_v63 = vpack.i.bf16 %v572_v61, %v569_v59  ;;  %v13102_v2 = vpack.i.bf16 %v530_v33, %v528_v29  ;;  %vm668_vm4 = vcmask 392192   ;;  %s358_s8 = scalar_lea.vmem %s15534_s7, %s10889_s22 }
  0xb8   : > { %439 = vst [vmem:[#allocation3 + $0x28] sm:$0x3] %v14331_v0  ;;  %440 = vst [vmem:[#allocation3 + $0x30] sm:$0xff] %v14331_v0  ;;  %v14769_v6 = vshrl.u32 %v691_v5, 7  ;;  %vm362_vm5 = vcmask 516096   ;;  %vm1832_vm6 = vcmask 1048064  }
  0xb9   : > { %441 = vst [vmem:[#allocation3 + $0x38] sm:$0x3] %v14331_v0  ;;  %442 = vst [vmem:[#allocation3 + $0x40] sm:$0xff] %v14331_v0  ;;  %13068 = vrot.lane.b32.xlu0 %v13067_v49, %s14334_s21 }
  0xba   : > { %443 = vst [vmem:[#allocation3 + $0x48] sm:$0x3] %v14331_v0  ;;  %444 = vst [vmem:[#allocation3 + $0x50] sm:$0xff] %v14331_v0 }
  0xbb   : > { %445 = vst [vmem:[#allocation3 + $0x58] sm:$0x3] %v14331_v0  ;;  %446 = vst [vmem:[#allocation3 + $0x60] sm:$0xff] %v14331_v0  ;;  %13078 = vrot.lane.b32.xlu1 %v13077_v52, %s14333_s20 }
  0xbc   : > { %447 = vst [vmem:[#allocation3 + $0x68] sm:$0x3] %v14331_v0  ;;  %448 = vst [vmem:[#allocation3 + $0x70] sm:$0xff] %v14331_v0 }
  0xbd   : > { %449 = vst [vmem:[#allocation3 + $0x78] sm:$0x3] %v14331_v0  ;;  %450 = vst [vmem:[#allocation3 + $0x80] sm:$0xff] %v14331_v0  ;;  %13083 = vrot.lane.b32.xlu0 %v13082_v57, %s14332_s19 }
  0xbe   : > { %451 = vst [vmem:[#allocation3 + $0x88] sm:$0x3] %v14331_v0  ;;  %452 = vst [vmem:[#allocation3 + $0x90] sm:$0xff] %v14331_v0 }
  0xbf   : > { %453 = vst [vmem:[#allocation3 + $0x98] sm:$0x3] %v14331_v0  ;;  %456 = vst [vmem:[#allocation3 + $0xb0] sm:$0xff] %v14331_v0  ;;  %13088 = vrot.lane.b32.xlu1 %v13087_v58, %s14334_s21 }
  0xc0   : > { %457 = vst [vmem:[#allocation3 + $0xb8] sm:$0x3] %v14331_v0  ;;  %458 = vst [vmem:[#allocation3 + $0xc0] sm:$0xff] %v14331_v0 }
  0xc1   : > { %459 = vst [vmem:[#allocation3 + $0xc8] sm:$0x3] %v14331_v0  ;;  %460 = vst [vmem:[#allocation3 + $0xd0] sm:$0xff] %v14331_v0  ;;  %13093 = vrot.lane.b32.xlu0 %v13092_v62, %s14333_s20  ;;  %v14117_v62 = vld [vmem:[%s14704_s14 + $0x60] sm:$0xff] }
  0xc2   : > { %461 = vst [vmem:[#allocation3 + $0xd8] sm:$0x3] %v14331_v0  ;;  %462 = vst [vmem:[#allocation3 + $0xe0] sm:$0xff] %v14331_v0 }
  0xc3   : > { %463 = vst [vmem:[#allocation3 + $0xe8] sm:$0x3] %v14331_v0  ;;  %464 = vst [vmem:[#allocation3 + $0xf0] sm:$0xff] %v14331_v0  ;;  %13098 = vrot.lane.b32.xlu1 %v13097_v63, %s14332_s19 }
  0xc4   : > { %465 = vst [vmem:[#allocation3 + $0xf8] sm:$0x3] %v14331_v0  ;;  %466 = vst [vmem:[#allocation3 + $0x100] sm:$0xff] %v14331_v0 }
  0xc5   : > { %467 = vst [vmem:[#allocation3 + $0x108] sm:$0x3] %v14331_v0  ;;  %468 = vst [vmem:[#allocation3 + $0x110] sm:$0xff] %v14331_v0  ;;  %13103 = vrot.lane.b32.xlu0 %v13102_v2, %s14334_s21 }
  0xc6   : > { %469 = vst [vmem:[#allocation3 + $0x118] sm:$0x3] %v14331_v0  ;;  %470 = vst [vmem:[#allocation3 + $0x120] sm:$0xff] %v14331_v0 }
  0xc7   : > { %471 = vst [vmem:[#allocation3 + $0x128] sm:$0x3] %v14331_v0  ;;  %476 = vst [vmem:[#allocation3 + $0x150] sm:$0xff] %v14331_v0 }
  0xc8   : > { %477 = vst [vmem:[#allocation3 + $0x158] sm:$0x3] %v14331_v0  ;;  %478 = vst [vmem:[#allocation3 + $0x160] sm:$0xff] %v14331_v0 }
  0xc9   : > { %479 = vst [vmem:[#allocation3 + $0x168] sm:$0x3] %v14331_v0  ;;  %480 = vst [vmem:[#allocation3 + $0x170] sm:$0xff] %v14331_v0 }
  0xca   : > { %481 = vst [vmem:[#allocation3 + $0x178] sm:$0x3] %v14331_v0  ;;  %482 = vst [vmem:[#allocation3 + $0x180] sm:$0xff] %v14331_v0 }
  0xcb   : > { %483 = vst [vmem:[#allocation3 + $0x188] sm:$0x3] %v14331_v0  ;;  %484 = vst [vmem:[#allocation3 + $0x190] sm:$0xff] %v14331_v0 }
  0xcc   : > { %485 = vst [vmem:[#allocation3 + $0x198] sm:$0x3] %v14331_v0  ;;  %486 = vst [vmem:[#allocation3 + $0x1a0] sm:$0xff] %v14331_v0 }
  0xcd   : > { %487 = vst [vmem:[#allocation3 + $0x1a8] sm:$0x3] %v14331_v0  ;;  %488 = vst [vmem:[#allocation3 + $0x1b0] sm:$0xff] %v14331_v0 }
  0xce   : > { %489 = vst [vmem:[#allocation3 + $0x1b8] sm:$0x3] %v14331_v0  ;;  %490 = vst [vmem:[#allocation3 + $0x1c0] sm:$0xff] %v14331_v0 }
  0xcf   : > { %491 = vst [vmem:[#allocation3 + $0x1c8] sm:$0x3] %v14331_v0  ;;  %494 = vst [vmem:[#allocation3 + $0x1e0] sm:$0xff] %v14331_v0 }
  0xd0   : > { %495 = vst [vmem:[#allocation3 + $0x1e8] sm:$0x3] %v14331_v0  ;;  %496 = vst [vmem:[#allocation3 + $0x1f0] sm:$0xff] %v14331_v0 }
  0xd1   : > { %497 = vst [vmem:[#allocation3 + $0x1f8] sm:$0x3] %v14331_v0  ;;  %498 = vst [vmem:[#allocation3 + $0x200] sm:$0xff] %v14331_v0 }
  0xd2   : > { %499 = vst [vmem:[#allocation3 + $0x208] sm:$0x3] %v14331_v0  ;;  %500 = vst [vmem:[#allocation3 + $0x210] sm:$0xff] %v14331_v0 }
  0xd3   : > { %501 = vst [vmem:[#allocation3 + $0x218] sm:$0x3] %v14331_v0  ;;  %502 = vst [vmem:[#allocation3 + $0x220] sm:$0xff] %v14331_v0 }
  0xd4   : > { %503 = vst [vmem:[#allocation3 + $0x228] sm:$0x3] %v14331_v0  ;;  %504 = vst [vmem:[#allocation3 + $0x230] sm:$0xff] %v14331_v0 }
  0xd5   : > { %505 = vst [vmem:[#allocation3 + $0x238] sm:$0x3] %v14331_v0  ;;  %506 = vst [vmem:[#allocation3 + $0x240] sm:$0xff] %v14331_v0 }
  0xd6   : > { %507 = vst [vmem:[#allocation3 + $0x248] sm:$0x3] %v14331_v0  ;;  %508 = vst [vmem:[#allocation3 + $0x250] sm:$0xff] %v14331_v0 }
  0xd7   : > { %509 = vst [vmem:[#allocation3 + $0x258] sm:$0x3] %v14331_v0  ;;  %510 = vst [vmem:[#allocation3 + $0x260] sm:$0xff] %v14331_v0 }
  0xd8   : > { %511 = vst [vmem:[#allocation3 + $0x268] sm:$0x3] %v14331_v0  ;;  %v577_v0 = vsel %vm548_vm1, %v575_v47, %v576_v50 }
  0xd9   : > { %v13107_v4 = vpack.i.bf16 %v577_v0, %v572_v61 }
  0xdb   : > { %13108 = vrot.lane.b32.xlu1 %v13107_v4, %s14333_s20 }
 0x123   : > { %v13054_v7 = vpop.permute.xlu0 %13053 }
 0x124   : > { %v13056_v10 = vunpack.i.h.bf16 %v13054_v7  ;;  %v13055_v12 = vunpack.i.l.bf16 %v13054_v7 }
 0x125   : > { %v13064_v9 = vpop.permute.xlu1 %13063 }
 0x126   : > { %v13066_v14 = vunpack.i.h.bf16 %v13064_v9  ;;  %v13065_v15 = vunpack.i.l.bf16 %v13064_v9  ;;  %v652_v20 = vsel %vm650_vm2, %v14711_v3, %v13056_v10  ;;  %v651_v22 = vsel %vm650_vm2, %v14707_v1, %v13055_v12 }
 0x127   : > { %v13059_v13 = vpop.permute.xlu0 %13058 }
 0x128   : > { %v13061_v16 = vunpack.i.h.bf16 %v13059_v13  ;;  %v13060_v18 = vunpack.i.l.bf16 %v13059_v13  ;;  %v693_v13 = vsub.s32 0, %v14769_v6 }
 0x129   : > { %v13074_v19 = vpop.permute.xlu1 %13073 }
 0x12a   : > { %v13076_v23 = vunpack.i.h.bf16 %v13074_v19  ;;  %v13075_v24 = vunpack.i.l.bf16 %v13074_v19  ;;  %v660_v25 = vsel %vm659_vm3, %v651_v22, %v13060_v18  ;;  %v661_v26 = vsel %vm659_vm3, %v652_v20, %v13061_v16 }
 0x12b   : > { %v669_v27 = vsel %vm668_vm4, %v660_v25, %v13065_v15  ;;  %v670_v28 = vsel %vm668_vm4, %v661_v26, %v13066_v14  ;;  %v13069_v3 = vpop.permute.xlu0 %13068  ;;  %v697_v14 = vsub.s32 1, %v14769_v6  ;;  %v14118_v15 = vld [vmem:[#allocation3] sm:$0xff] }
 0x12c   : > { %v654_v29 = vsel %vm650_vm2, %v14721_v11, %v13076_v23  ;;  %v653_v30 = vsel %vm650_vm2, %v14717_v8, %v13075_v24  ;;  %v677_v31 = vpack.c.bf16 %v670_v28, %v669_v27  ;;  %v13071_v32 = vunpack.i.h.bf16 %v13069_v3  ;;  %363 = vst.msk [vmem:[#allocation2 + $0x8] sm:$0x1] %vm362_vm5, %v14118_v15  ;;  %367 = vst.msk [vmem:[#allocation2 + $0x28] sm:$0x1] %vm362_vm5, %v14118_v15 }
 0x12d   : > { %v13070_v1 = vunpack.i.l.bf16 %v13069_v3  ;;  %v13079_v33 = vpop.permute.xlu1 %13078  ;;  %371 = vst.msk [vmem:[#allocation2 + $0x48] sm:$0x1] %vm362_vm5, %v14118_v15  ;;  %375 = vst.msk [vmem:[#allocation2 + $0x68] sm:$0x1] %vm362_vm5, %v14118_v15 }
 0x12e   : > { %v13081_v34 = vunpack.i.h.bf16 %v13079_v33  ;;  %v13080_v35 = vunpack.i.l.bf16 %v13079_v33  ;;  %10898 = vmatmul.mubr.msk.bf16.vlgmr.msra.gmra.mrb[0].mxu0 %vm360_vm0, %v677_v31  ;;  %v663_v36 = vsel %vm659_vm3, %v654_v29, %v13071_v32  ;;  %379 = vst.msk [vmem:[#allocation2 + $0x88] sm:$0x1] %vm362_vm5, %v14118_v15  ;;  %383 = vst.msk [vmem:[#allocation2 + $0xa8] sm:$0x1] %vm362_vm5, %v14118_v15 }
 0x12f   : > { %v662_v37 = vsel %vm659_vm3, %v653_v30, %v13070_v1  ;;  %v13084_v39 = vpop.permute.xlu0 %13083  ;;  %795 = vmatprep.mubr.bf16.mxu0 %v14335_v55  ;;  %387 = vst.msk [vmem:[#allocation2 + $0xc8] sm:$0x1] %vm362_vm5, %v14118_v15  ;;  %391 = vst.msk [vmem:[#allocation2 + $0xe8] sm:$0x1] %vm362_vm5, %v14118_v15 }
 0x130   : > { %v671_v38 = vsel %vm668_vm4, %v662_v37, %v13080_v35  ;;  %v672_v11 = vsel %vm668_vm4, %v663_v36, %v13081_v34  ;;  %v13086_v8 = vunpack.i.h.bf16 %v13084_v39  ;;  %v13085_v40 = vunpack.i.l.bf16 %v13084_v39  ;;  %395 = vst.msk [vmem:[#allocation2 + $0x108] sm:$0x1] %vm362_vm5, %v14118_v15  ;;  %399 = vst.msk [vmem:[#allocation2 + $0x128] sm:$0x1] %vm362_vm5, %v14118_v15 }
 0x131   : > { %v13089_v41 = vpop.permute.xlu1 %13088  ;;  %v678_v44 = vpack.c.bf16 %v672_v11, %v671_v38  ;;  %403 = vst.msk [vmem:[#allocation2 + $0x148] sm:$0x1] %vm362_vm5, %v14118_v15  ;;  %407 = vst.msk [vmem:[#allocation2 + $0x168] sm:$0x1] %vm362_vm5, %v14118_v15 }
 0x132   : > { %v13091_v42 = vunpack.i.h.bf16 %v13089_v41  ;;  %v13090_v43 = vunpack.i.l.bf16 %v13089_v41  ;;  %v656_v45 = vsel %vm650_vm2, %v14733_v21, %v13086_v8  ;;  %v655_v46 = vsel %vm650_vm2, %v14728_v17, %v13085_v40  ;;  %411 = vst.msk [vmem:[#allocation2 + $0x188] sm:$0x1] %vm362_vm5, %v14118_v15  ;;  %415 = vst.msk [vmem:[#allocation2 + $0x1a8] sm:$0x1] %vm362_vm5, %v14118_v15 }
 0x133   : > { %v13094_v47 = vpop.permute.xlu0 %13093  ;;  %419 = vst.msk [vmem:[#allocation2 + $0x1c8] sm:$0x1] %vm362_vm5, %v14118_v15  ;;  %423 = vst.msk [vmem:[#allocation2 + $0x1e8] sm:$0x1] %vm362_vm5, %v14118_v15 }
 0x134   : > { %v664_v48 = vsel %vm659_vm3, %v655_v46, %v13090_v43  ;;  %v665_v49 = vsel %vm659_vm3, %v656_v45, %v13091_v42  ;;  %v13096_v50 = vunpack.i.h.bf16 %v13094_v47  ;;  %v13095_v51 = vunpack.i.l.bf16 %v13094_v47  ;;  %427 = vst.msk [vmem:[#allocation2 + $0x208] sm:$0x1] %vm362_vm5, %v14118_v15  ;;  %v13296_v15 = vld [vmem:[#allocation8 + $0x70] sm:$0xff]  }
 0x135   : > { %v13099_v52 = vpop.permute.xlu1 %13098 }
 0x136   : > { %v13101_v53 = vunpack.i.h.bf16 %v13099_v52  ;;  %v13100_v54 = vunpack.i.l.bf16 %v13099_v52  ;;  %10899 = vmatmul.mubr.msk.bf16.gmra.mrb[4].mxu0 %vm360_vm0, %v678_v44  ;;  %v673_v56 = vsel %vm668_vm4, %v664_v48, %v13095_v51  ;;  %v674_v21 = vsel %vm668_vm4, %v665_v49, %v13096_v50 }
 0x137   : > { %805 = vmatprep.mubr.bf16.mxu0 %v14335_v55  ;;  %v13104_v17 = vpop.permute.xlu0 %13103  ;;  %v679_v0 = vpack.c.bf16 %v674_v21, %v673_v56 }
 0x138   : > { %v13106_v57 = vunpack.i.h.bf16 %v13104_v17  ;;  %v13105_v58 = vunpack.i.l.bf16 %v13104_v17  ;;  %v658_v61 = vsel %vm650_vm2, %v14116_v60, %v13101_v53  ;;  %v657_v63 = vsel %vm650_vm2, %v14117_v62, %v13100_v54  ;;  %v13284_v62 = vld [vmem:[#allocation8 + $0x40] sm:$0xff]  }
 0x139   : > { %11738 = vmatprep.subr.bf16.mxu1 %v13284_v62 }
 0x13a   : > { %v667_v5 = vsel %vm659_vm3, %v658_v61, %v13106_v57  ;;  %v666_v7 = vsel %vm659_vm3, %v657_v63, %v13105_v58  ;;  %v13285_v63 = vld [vmem:[#allocation8] sm:$0xff]  }
 0x13b   : > { %11739 = vmatpush3.bf16.msra.mxu1 %v13285_v63 }
 0x13e   : > { %10900 = vmatmul.mubr.msk.bf16.gmra.mrb[8].mxu0 %vm360_vm0, %v679_v0  ;;  %v13286_v0 = vld [vmem:[#allocation8 + $0x48] sm:$0xff]  }
 0x13f   : > { %815 = vmatprep.mubr.bf16.mxu0 %v14335_v55  ;;  %v689_v55 = vld [vmem:[#allocation6] sm:$0x3]  ;;  %11740 = vmatprep.subr.bf16.mxu1 %v13286_v0 }
 0x140   : > { %v14829_v6 = vrot.slane %v689_v55, %v693_v13  ;;  %v14831_v16 = vrot.slane %v689_v55, %v697_v14  ;;  %v13294_v13 = vld [vmem:[#allocation8 + $0x68] sm:$0xff]   ;;  %v13297_v55 = vld [vmem:[#allocation8 + $0x30] sm:$0xff]  }
 0x141   : > { %v13295_v14 = vld [vmem:[#allocation8 + $0x28] sm:$0xff]  }
 0x14d   : > { %v13109_v59 = vpop.permute.xlu1 %13108 }
 0x14e   : > { %v13111_v2 = vunpack.i.h.bf16 %v13109_v59  ;;  %v13110_v4 = vunpack.i.l.bf16 %v13109_v59 }
 0x150   : > { %v675_v9 = vsel %vm668_vm4, %v666_v7, %v13110_v4  ;;  %v676_v10 = vsel %vm668_vm4, %v667_v5, %v13111_v2  ;;  %v13287_v2 = vld [vmem:[#allocation8 + $0x8] sm:$0xff]   ;;  %v13288_v4 = vld [vmem:[#allocation8 + $0x50] sm:$0xff]   ;;  %v13290_v7 = vld [vmem:[#allocation8 + $0x58] sm:$0xff]  }
 0x151   : > { %v680_v12 = vpack.c.bf16 %v676_v10, %v675_v9  ;;  %v13289_v5 = vld [vmem:[#allocation8 + $0x10] sm:$0xff]   ;;  %11741 = vmatpush3.bf16.msra.mxu1 %v13287_v2  ;;  %v13291_v9 = vld [vmem:[#allocation8 + $0x18] sm:$0xff]   ;;  %v13292_v10 = vld [vmem:[#allocation8 + $0x60] sm:$0xff]  }
 0x152   : > { %11742 = vmatprep.subr.bf16.mxu1 %v13288_v4 }
 0x153   : > { %10901 = vmatmul.mubr.msk.bf16.gmra.mrb[12].mxu0 %vm360_vm0, %v680_v12  ;;  %v13293_v12 = vld [vmem:[#allocation8 + $0x20] sm:$0xff]  }
 0x155   : > { %11743 = vmatpush3.bf16.msra.mxu1 %v13289_v5 }
 0x156   : > { %11744 = vmatprep.subr.bf16.mxu1 %v13290_v7 }
 0x159   : > { %11745 = vmatpush3.bf16.msra.mxu1 %v13291_v9 }
 0x15a   : > { %11746 = vmatprep.subr.bf16.mxu1 %v13292_v10 }
 0x15d   : > { %11747 = vmatpush3.bf16.msra.mxu1 %v13293_v12 }
 0x15e   : > { %11748 = vmatprep.subr.bf16.mxu1 %v13294_v13 }
 0x161   : > { %11749 = vmatpush3.bf16.msra.mxu1 %v13295_v14 }
 0x162   : > { %11750 = vmatprep.subr.bf16.mxu1 %v13296_v15 }
 0x165   : > { %11751 = vmatpush3.bf16.msra.mxu1 %v13297_v55 }
 0x201   : > { %v787_v18 = vpop.f32.mrb[0].mxu0 }
 0x202   : > { %v788_v19 = vadd.f32 %v787_v18, %v14829_v6  ;;  %v789_v20 = vpop.f32.mrb[1].mxu0  ;;  %v13299_v18 = vld [vmem:[#allocation8 + $0x38] sm:$0xff]  }
 0x203   : > { %v790_v22 = vadd.f32 %v789_v20, %v14831_v16  ;;  %v791_v23 = vpop.f32.mrb[2].mxu0 }
 0x204   : > { %v826_v24 = vmax.f32 %v788_v19, 0.0  ;;  %v792_v25 = vadd.f32 %v791_v23, %v14829_v6  ;;  %v793_v26 = vpop.f32.mrb[3].mxu0 }
 0x205   : > { %v827_v27 = vmax.f32 %v790_v22, 0.0  ;;  %v794_v28 = vadd.f32 %v793_v26, %v14831_v16 }
 0x206   : > { %842 = vst.msk [vmem:[#allocation2] sm:$0xff] %vm360_vm0, %v826_v24  ;;  %v828_v29 = vmax.f32 %v792_v25, 0.0  ;;  %858 = vrot.lane.b32.xlu1 %v826_v24, %s14336_s12 }
 0x207   : > { %892 = vst.msk [vmem:[#allocation2 + $0x120] sm:$0xff] %vm360_vm0, %v827_v27  ;;  %v829_v30 = vmax.f32 %v794_v28, 0.0  ;;  %908 = vrot.lane.b32.xlu0 %v827_v27, %s14336_s12 }
 0x208   : > { %843 = vst.msk [vmem:[#allocation2 + $0x20] sm:$0xff] %vm360_vm0, %v828_v29 }
 0x209   : > { %893 = vst.msk [vmem:[#allocation2 + $0x140] sm:$0xff] %vm360_vm0, %v829_v30  ;;  %v797_v3 = vpop.f32.mrb[4].mxu0 }
 0x20a   : > { %v798_v31 = vadd.f32 %v797_v3, %v14829_v6  ;;  %v799_v32 = vpop.f32.mrb[5].mxu0  ;;  %860 = vrot.lane.b32.xlu1 %v828_v29, %s14336_s12 }
 0x20b   : > { %v800_v1 = vadd.f32 %v799_v32, %v14831_v16  ;;  %910 = vrot.lane.b32.xlu0 %v829_v30, %s14336_s12  ;;  %v801_v33 = vpop.f32.mrb[6].mxu0 }
 0x20c   : > { %v830_v34 = vmax.f32 %v798_v31, 0.0  ;;  %v802_v35 = vadd.f32 %v801_v33, %v14829_v6  ;;  %v803_v36 = vpop.f32.mrb[7].mxu0 }
 0x20d   : > { %v831_v37 = vmax.f32 %v800_v1, 0.0  ;;  %v804_v38 = vadd.f32 %v803_v36, %v14831_v16  ;;  %v989_v23 = vld [vmem:[#allocation2 + $0x1] sm:$0xff] }
 0x20e   : > { %844 = vst.msk [vmem:[#allocation2 + $0x40] sm:$0xff] %vm360_vm0, %v830_v34  ;;  %v832_v11 = vmax.f32 %v802_v35, 0.0  ;;  %862 = vrot.lane.b32.xlu1 %v830_v34, %s14336_s12  ;;  %v1046_v24 = vld [vmem:[#allocation2 + $0x121] sm:$0xff] }
 0x20f   : > { %894 = vst.msk [vmem:[#allocation2 + $0x160] sm:$0xff] %vm360_vm0, %v831_v37  ;;  %v833_v39 = vmax.f32 %v804_v38, 0.0  ;;  %912 = vrot.lane.b32.xlu0 %v831_v37, %s14336_s12  ;;  %v990_v3 = vld [vmem:[#allocation2 + $0x21] sm:$0xff] }
 0x210   : > { %845 = vst.msk [vmem:[#allocation2 + $0x60] sm:$0xff] %vm360_vm0, %v832_v11  ;;  %v1047_v31 = vld [vmem:[#allocation2 + $0x141] sm:$0xff] }
 0x211   : > { %895 = vst.msk [vmem:[#allocation2 + $0x180] sm:$0xff] %vm360_vm0, %v833_v39  ;;  %v807_v8 = vpop.f32.mrb[8].mxu0 }
 0x212   : > { %v808_v40 = vadd.f32 %v807_v8, %v14829_v6  ;;  %v809_v41 = vpop.f32.mrb[9].mxu0  ;;  %864 = vrot.lane.b32.xlu1 %v832_v11, %s14336_s12 }
 0x213   : > { %v810_v42 = vadd.f32 %v809_v41, %v14831_v16  ;;  %914 = vrot.lane.b32.xlu0 %v833_v39, %s14336_s12  ;;  %v811_v43 = vpop.f32.mrb[10].mxu0 }
 0x214   : > { %v834_v44 = vmax.f32 %v808_v40, 0.0  ;;  %v812_v45 = vadd.f32 %v811_v43, %v14829_v6  ;;  %v813_v46 = vpop.f32.mrb[11].mxu0 }
 0x215   : > { %v835_v47 = vmax.f32 %v810_v42, 0.0  ;;  %v814_v48 = vadd.f32 %v813_v46, %v14831_v16  ;;  %v991_v37 = vld [vmem:[#allocation2 + $0x41] sm:$0xff] }
 0x216   : > { %846 = vst.msk [vmem:[#allocation2 + $0x80] sm:$0xff] %vm360_vm0, %v834_v44  ;;  %v836_v49 = vmax.f32 %v812_v45, 0.0  ;;  %866 = vrot.lane.b32.xlu1 %v834_v44, %s14336_s12  ;;  %v1048_v38 = vld [vmem:[#allocation2 + $0x161] sm:$0xff] }
 0x217   : > { %896 = vst.msk [vmem:[#allocation2 + $0x1a0] sm:$0xff] %vm360_vm0, %v835_v47  ;;  %v837_v50 = vmax.f32 %v814_v48, 0.0  ;;  %916 = vrot.lane.b32.xlu0 %v835_v47, %s14336_s12  ;;  %v992_v43 = vld [vmem:[#allocation2 + $0x61] sm:$0xff] }
 0x218   : > { %847 = vst.msk [vmem:[#allocation2 + $0xa0] sm:$0xff] %vm360_vm0, %v836_v49 }
 0x219   : > { %897 = vst.msk [vmem:[#allocation2 + $0x1c0] sm:$0xff] %vm360_vm0, %v837_v50 }
 0x21a   : > { %868 = vrot.lane.b32.xlu1 %v836_v49, %s14336_s12  ;;  %v1049_v49 = vld [vmem:[#allocation2 + $0x181] sm:$0xff] }
 0x21b   : > { %918 = vrot.lane.b32.xlu0 %v837_v50, %s14336_s12 }
 0x220   : > { %v1051_v0 = vld [vmem:[#allocation2 + $0x1c1] sm:$0xff] }
 0x226   : > { %v817_v51 = vpop.f32.mrb[12].mxu0 }
 0x227   : > { %v818_v52 = vadd.f32 %v817_v51, %v14829_v6  ;;  %v819_v53 = vpop.f32.mrb[13].mxu0  ;;  %v993_v51 = vld [vmem:[#allocation2 + $0x81] sm:$0xff] }
 0x228   : > { %v820_v54 = vadd.f32 %v819_v53, %v14831_v16  ;;  %v821_v56 = vpop.f32.mrb[14].mxu0 }
 0x229   : > { %v838_v21 = vmax.f32 %v818_v52, 0.0  ;;  %v822_v17 = vadd.f32 %v821_v56, %v14829_v6  ;;  %v823_v57 = vpop.f32.mrb[15].mxu0  ;;  %v13298_v6 = vld [vmem:[#allocation8 + $0x78] sm:$0xff]  }
 0x22a   : > { %v839_v58 = vmax.f32 %v820_v54, 0.0  ;;  %v824_v59 = vadd.f32 %v823_v57, %v14831_v16  ;;  %11752 = vmatprep.subr.bf16.mxu1 %v13298_v6 }
 0x22b   : > { %848 = vst.msk [vmem:[#allocation2 + $0xc0] sm:$0xff] %vm360_vm0, %v838_v21  ;;  %v840_v60 = vmax.f32 %v822_v17, 0.0  ;;  %870 = vrot.lane.b32.xlu1 %v838_v21, %s14336_s12  ;;  %11753 = vmatpush3.bf16.msra.mxu1 %v13299_v18  ;;  %v1050_v17 = vld [vmem:[#allocation2 + $0x1a1] sm:$0xff] }
 0x22c   : > { %898 = vst.msk [vmem:[#allocation2 + $0x1e0] sm:$0xff] %vm360_vm0, %v839_v58  ;;  %v841_v61 = vmax.f32 %v824_v59, 0.0  ;;  %920 = vrot.lane.b32.xlu0 %v839_v58, %s14336_s12 }
 0x22d   : > { %849 = vst.msk [vmem:[#allocation2 + $0xe0] sm:$0xff] %vm360_vm0, %v840_v60 }
 0x22e   : > { %899 = vst.msk [vmem:[#allocation2 + $0x200] sm:$0xff] %vm360_vm0, %v841_v61 }
 0x22f   : > { %872 = vrot.lane.b32.xlu1 %v840_v60, %s14336_s12  ;;  %v994_v60 = vld [vmem:[#allocation2 + $0xa1] sm:$0xff] }
 0x230   : > { %922 = vrot.lane.b32.xlu0 %v841_v61, %s14336_s12 }
 0x232   : > { %v995_v5 = vld [vmem:[#allocation2 + $0xc1] sm:$0xff] }
 0x233   : > { %v1052_v10 = vld [vmem:[#allocation2 + $0x1e1] sm:$0xff] }
 0x234   : > { %v996_v14 = vld [vmem:[#allocation2 + $0xe1] sm:$0xff] }
 0x235   : > { %v1053_v6 = vld [vmem:[#allocation2 + $0x201] sm:$0xff] }
 0x278   : > { %v859_v16 = vpop.permute.xlu1 %858 }
 0x279   : > { %883 = vst.msk [vmem:[#allocation2 + $0x10] sm:$0xff] %vm360_vm0, %v859_v16  ;;  %v909_v19 = vpop.permute.xlu0 %908 }
 0x27a   : > { %933 = vst.msk [vmem:[#allocation2 + $0x130] sm:$0xff] %vm360_vm0, %v909_v19  ;;  %v941_v19 = vld [vmem:[#allocation2] sm:$0xff] }
 0x27c   : > { %v861_v20 = vpop.permute.xlu1 %860 }
 0x27d   : > { %884 = vst.msk [vmem:[#allocation2 + $0x30] sm:$0xff] %vm360_vm0, %v861_v20  ;;  %v911_v22 = vpop.permute.xlu0 %910 }
 0x27e   : > { %934 = vst.msk [vmem:[#allocation2 + $0x150] sm:$0xff] %vm360_vm0, %v911_v22 }
 0x280   : > { %v863_v25 = vpop.permute.xlu1 %862  ;;  %v14885_v26 = vld [vmem:[#allocation2 + $0x10] sm:$0xff] }
 0x281   : > { %885 = vst.msk [vmem:[#allocation2 + $0x50] sm:$0xff] %vm360_vm0, %v863_v25  ;;  %v913_v27 = vpop.permute.xlu0 %912  ;;  %v13117_v28 = vpack.i.bf16 %v989_v23, %v14885_v26  ;;  %v14889_v29 = vld [vmem:[#allocation2 + $0x130] sm:$0xff] }
 0x282   : > { %935 = vst.msk [vmem:[#allocation2 + $0x170] sm:$0xff] %vm360_vm0, %v913_v27  ;;  %v14893_v30 = vpack.i.bf16 %v1046_v24, %v14889_v29  ;;  %v14998_v24 = vld [vmem:[#allocation2 + $0x120] sm:$0xff] }
 0x283   : > { %13118 = vrot.lane.b32.xlu1 %v13117_v28, %s14336_s12 }
 0x284   : > { %v865_v32 = vpop.permute.xlu1 %864  ;;  %13113 = vrot.lane.b32.xlu0 %v14893_v30, %s14336_s12  ;;  %v14898_v1 = vld [vmem:[#allocation2 + $0x30] sm:$0xff] }
 0x285   : > { %886 = vst.msk [vmem:[#allocation2 + $0x70] sm:$0xff] %vm360_vm0, %v865_v32  ;;  %v915_v33 = vpop.permute.xlu0 %914  ;;  %v14902_v34 = vpack.i.bf16 %v990_v3, %v14898_v1  ;;  %v14904_v35 = vld [vmem:[#allocation2 + $0x150] sm:$0xff] }
 0x286   : > { %936 = vst.msk [vmem:[#allocation2 + $0x190] sm:$0xff] %vm360_vm0, %v915_v33  ;;  %v14908_v36 = vpack.i.bf16 %v1047_v31, %v14904_v35 }
 0x287   : > { %13128 = vrot.lane.b32.xlu1 %v14902_v34, %s14336_s12 }
 0x288   : > { %v867_v11 = vpop.permute.xlu1 %866  ;;  %13123 = vrot.lane.b32.xlu0 %v14908_v36, %s14336_s12  ;;  %v14914_v39 = vld [vmem:[#allocation2 + $0x50] sm:$0xff] }
 0x289   : > { %887 = vst.msk [vmem:[#allocation2 + $0x90] sm:$0xff] %vm360_vm0, %v867_v11  ;;  %v917_v8 = vpop.permute.xlu0 %916  ;;  %v13137_v40 = vpack.i.bf16 %v991_v37, %v14914_v39  ;;  %v14918_v41 = vld [vmem:[#allocation2 + $0x170] sm:$0xff] }
 0x28a   : > { %937 = vst.msk [vmem:[#allocation2 + $0x1b0] sm:$0xff] %vm360_vm0, %v917_v8  ;;  %v13132_v42 = vpack.i.bf16 %v1048_v38, %v14918_v41 }
 0x28b   : > { %13138 = vrot.lane.b32.xlu1 %v13137_v40, %s14336_s12 }
 0x28c   : > { %v869_v44 = vpop.permute.xlu1 %868  ;;  %13133 = vrot.lane.b32.xlu0 %v13132_v42, %s14336_s12  ;;  %v14924_v45 = vld [vmem:[#allocation2 + $0x70] sm:$0xff] }
 0x28d   : > { %888 = vst.msk [vmem:[#allocation2 + $0xb0] sm:$0xff] %vm360_vm0, %v869_v44  ;;  %v919_v46 = vpop.permute.xlu0 %918  ;;  %v13147_v47 = vpack.i.bf16 %v992_v43, %v14924_v45  ;;  %v14928_v48 = vld [vmem:[#allocation2 + $0x190] sm:$0xff]  ;;  %v15013_v43 = vld [vmem:[#allocation2 + $0x20] sm:$0xff] }
 0x28e   : > { %938 = vst.msk [vmem:[#allocation2 + $0x1d0] sm:$0xff] %vm360_vm0, %v919_v46  ;;  %v14932_v50 = vpack.i.bf16 %v1049_v49, %v14928_v48  ;;  %v15015_v46 = vld [vmem:[#allocation2 + $0x160] sm:$0xff] }
 0x28f   : > { %13148 = vrot.lane.b32.xlu1 %v13147_v47, %s14336_s12 }
 0x290   : > { %13143 = vrot.lane.b32.xlu0 %v14932_v50, %s14336_s12  ;;  %v14937_v53 = vld [vmem:[#allocation2 + $0x90] sm:$0xff] }
 0x291   : > { %v13157_v56 = vpack.i.bf16 %v993_v51, %v14937_v53  ;;  %v14941_v21 = vld [vmem:[#allocation2 + $0x1b0] sm:$0xff] }
 0x292   : > { %v14945_v57 = vpack.i.bf16 %v1050_v17, %v14941_v21 }
 0x293   : > { %13158 = vrot.lane.b32.xlu1 %v13157_v56, %s14336_s12 }
 0x294   : > { %13153 = vrot.lane.b32.xlu0 %v14945_v57, %s14336_s12  ;;  %v14950_v59 = vld [vmem:[#allocation2 + $0xb0] sm:$0xff] }
 0x295   : > { %v13167_v62 = vpack.i.bf16 %v994_v60, %v14950_v59  ;;  %v14954_v63 = vld [vmem:[#allocation2 + $0x1d0] sm:$0xff] }
 0x296   : > { %v14958_v2 = vpack.i.bf16 %v1051_v0, %v14954_v63 }
 0x297   : > { %13168 = vrot.lane.b32.xlu1 %v13167_v62, %s14336_s12 }
 0x298   : > { %13163 = vrot.lane.b32.xlu0 %v14958_v2, %s14336_s12 }
 0x29d   : > { %v871_v52 = vpop.permute.xlu1 %870 }
 0x29e   : > { %889 = vst.msk [vmem:[#allocation2 + $0xd0] sm:$0xff] %vm360_vm0, %v871_v52  ;;  %v921_v54 = vpop.permute.xlu0 %920 }
 0x29f   : > { %939 = vst.msk [vmem:[#allocation2 + $0x1f0] sm:$0xff] %vm360_vm0, %v921_v54 }
 0x2a1   : > { %v873_v58 = vpop.permute.xlu1 %872 }
 0x2a2   : > { %890 = vst.msk [vmem:[#allocation2 + $0xf0] sm:$0xff] %vm360_vm0, %v873_v58  ;;  %v923_v61 = vpop.permute.xlu0 %922 }
 0x2a3   : > { %940 = vst.msk [vmem:[#allocation2 + $0x210] sm:$0xff] %vm360_vm0, %v923_v61 }
 0x2a5   : > { %v14963_v4 = vld [vmem:[#allocation2 + $0xd0] sm:$0xff] }
 0x2a6   : > { %v13177_v7 = vpack.i.bf16 %v995_v5, %v14963_v4  ;;  %v14966_v9 = vld [vmem:[#allocation2 + $0x1f0] sm:$0xff] }
 0x2a7   : > { %v14969_v12 = vpack.i.bf16 %v1052_v10, %v14966_v9 }
 0x2a8   : > { %13178 = vrot.lane.b32.xlu1 %v13177_v7, %s14336_s12 }
 0x2a9   : > { %13173 = vrot.lane.b32.xlu0 %v14969_v12, %s14336_s12  ;;  %v14974_v13 = vld [vmem:[#allocation2 + $0xf0] sm:$0xff] }
 0x2aa   : > { %v13187_v15 = vpack.i.bf16 %v996_v14, %v14974_v13  ;;  %v14977_v55 = vld [vmem:[#allocation2 + $0x210] sm:$0xff]  ;;  %v15031_v14 = vld [vmem:[#allocation2 + $0x180] sm:$0xff] }
 0x2ab   : > { %v14980_v16 = vpack.i.bf16 %v1053_v6, %v14977_v55 }
 0x2ac   : > { %13188 = vrot.lane.b32.xlu1 %v13187_v15, %s14336_s12 }
 0x2ad   : > { %13183 = vrot.lane.b32.xlu0 %v14980_v16, %s14336_s12 }
 0x2b0   : > { %13198 = vrot.lane.b32.xlu1 %v14893_v30, %s14336_s12 }
 0x2b1   : > { %13193 = vrot.lane.b32.xlu0 %v14902_v34, %s14336_s12 }
 0x2b4   : > { %13208 = vrot.lane.b32.xlu1 %v14908_v36, %s14336_s12  ;;  %v15007_v36 = vld [vmem:[#allocation2 + $0x140] sm:$0xff] }
 0x2b5   : > { %13203 = vrot.lane.b32.xlu0 %v13137_v40, %s14336_s12 }
 0x2b8   : > { %13218 = vrot.lane.b32.xlu1 %v13132_v42, %s14336_s12 }
 0x2b9   : > { %13213 = vrot.lane.b32.xlu0 %v13147_v47, %s14336_s12 }
 0x2bc   : > { %13223 = vrot.lane.b32.xlu1 %v13157_v56, %s14336_s12 }
 0x2c0   : > { %13233 = vrot.lane.b32.xlu1 %v13167_v62, %s14336_s12 }
 0x2c4   : > { %13243 = vrot.lane.b32.xlu1 %v13177_v7, %s14336_s12  ;;  %v15025_v7 = vld [vmem:[#allocation2 + $0x40] sm:$0xff] }
 0x2c8   : > { %13253 = vrot.lane.b32.xlu1 %v13187_v15, %s14336_s12 }
 0x2f5   : > { %v13119_v18 = vpop.permute.xlu1 %13118 }
 0x2f6   : > { %v13121_v20 = vunpack.i.h.bf16 %v13119_v18  ;;  %v13120_v22 = vunpack.i.l.bf16 %v13119_v18  ;;  %v13114_v23 = vpop.permute.xlu0 %13113 }
 0x2f7   : > { %v13116_v25 = vunpack.i.h.bf16 %v13114_v23  ;;  %v13115_v27 = vunpack.i.l.bf16 %v13114_v23 }
 0x2f8   : > { %v1327_v28 = vsel %vm360_vm0, %v941_v19, %v13120_v22  ;;  %v1328_v30 = vsel %vm360_vm0, %v14885_v26, %v13121_v20 }
 0x2f9   : > { %v13129_v3 = vpop.permute.xlu1 %13128  ;;  %v1359_v31 = vsel %vm360_vm0, %v14998_v24, %v13115_v27  ;;  %v1360_v32 = vsel %vm360_vm0, %v14889_v29, %v13116_v25  ;;  %v1391_v11 = vpack.c.bf16 %v1328_v30, %v1327_v28  ;;  %v15037_v28 = vld [vmem:[#allocation2 + $0x60] sm:$0xff] }
 0x2fa   : > { %v13124_v33 = vpop.permute.xlu0 %13123  ;;  %v1392_v34 = vpack.c.bf16 %v1360_v32, %v1359_v31  ;;  %v13131_v8 = vunpack.i.h.bf16 %v13129_v3  ;;  %v13130_v40 = vunpack.i.l.bf16 %v13129_v3  ;;  %v15043_v3 = vld [vmem:[#allocation2 + $0x1a0] sm:$0xff] }
 0x2fb   : > { %v13126_v37 = vunpack.i.h.bf16 %v13124_v33  ;;  %v13125_v38 = vunpack.i.l.bf16 %v13124_v33 }
 0x2fc   : > { %1590 = vmatprep.mubr.bf16.mxu1 %v1392_v34  ;;  %v1329_v51 = vsel %vm360_vm0, %v15013_v43, %v13130_v40  ;;  %v1330_v52 = vsel %vm360_vm0, %v14898_v1, %v13131_v8 }
 0x2fd   : > { %1591 = vmatmul.mubr.bf16.vlgmr.msra.gmra.mrb[0].mxu1 %v1391_v11  ;;  %v1361_v26 = vsel %vm360_vm0, %v15007_v36, %v13125_v38  ;;  %v1362_v42 = vsel %vm360_vm0, %v14904_v35, %v13126_v37  ;;  %v13139_v54 = vpop.permute.xlu1 %13138  ;;  %v1393_v58 = vpack.c.bf16 %v1330_v52, %v1329_v51 }
 0x2fe   : > { %v13134_v29 = vpop.permute.xlu0 %13133  ;;  %v1394_v44 = vpack.c.bf16 %v1362_v42, %v1361_v26  ;;  %v13141_v60 = vunpack.i.h.bf16 %v13139_v54  ;;  %v13140_v61 = vunpack.i.l.bf16 %v13139_v54  ;;  %v15049_v26 = vld [vmem:[#allocation2 + $0x80] sm:$0xff] }
 0x2ff   : > { %v13136_v47 = vunpack.i.h.bf16 %v13134_v29  ;;  %v13135_v49 = vunpack.i.l.bf16 %v13134_v29  ;;  %v15055_v29 = vld [vmem:[#allocation2 + $0x1c0] sm:$0xff] }
 0x300   : > { %1598 = vmatprep.mubr.bf16.mxu1 %v1394_v44  ;;  %v1331_v1 = vsel %vm360_vm0, %v15025_v7, %v13140_v61  ;;  %v1332_v10 = vsel %vm360_vm0, %v14914_v39, %v13141_v60  ;;  %v1017_v61 = vld [vmem:[#allocation2 + $0x1e0] sm:$0xff] }
 0x301   : > { %v1363_v56 = vsel %vm360_vm0, %v15015_v46, %v13135_v49  ;;  %v1364_v35 = vsel %vm360_vm0, %v14918_v41, %v13136_v47  ;;  %v13149_v41 = vpop.permute.xlu1 %13148  ;;  %v1395_v19 = vpack.c.bf16 %v1332_v10, %v1331_v1 }
 0x302   : > { %v13144_v17 = vpop.permute.xlu0 %13143  ;;  %v1396_v62 = vpack.c.bf16 %v1364_v35, %v1363_v56  ;;  %v13151_v20 = vunpack.i.h.bf16 %v13149_v41  ;;  %v13150_v22 = vunpack.i.l.bf16 %v13149_v41 }
 0x303   : > { %v13146_v0 = vunpack.i.h.bf16 %v13144_v17  ;;  %v13145_v5 = vunpack.i.l.bf16 %v13144_v17 }
 0x304   : > { %v1333_v39 = vsel %vm360_vm0, %v15037_v28, %v13150_v22  ;;  %v1334_v30 = vsel %vm360_vm0, %v14924_v45, %v13151_v20  ;;  %v1019_v22 = vld [vmem:[#allocation2 + $0x200] sm:$0xff] }
 0x305   : > { %1599 = vmatmul.mubr.bf16.gmra.mrb[4].mxu1 %v1393_v58  ;;  %v1365_v15 = vsel %vm360_vm0, %v15031_v14, %v13145_v5  ;;  %v1366_v6 = vsel %vm360_vm0, %v14928_v48, %v13146_v0  ;;  %v13159_v48 = vpop.permute.xlu1 %13158  ;;  %v1397_v34 = vpack.c.bf16 %v1334_v30, %v1333_v39  ;;  %v15061_v58 = vld [vmem:[#allocation2 + $0xa0] sm:$0xff] }
 0x306   : > { %1606 = vmatprep.mubr.bf16.mxu1 %v1396_v62  ;;  %v13154_v18 = vpop.permute.xlu0 %13153  ;;  %v1398_v23 = vpack.c.bf16 %v1366_v6, %v1365_v15  ;;  %v13161_v37 = vunpack.i.h.bf16 %v13159_v48  ;;  %v13160_v38 = vunpack.i.l.bf16 %v13159_v48 }
 0x307   : > { %v13156_v25 = vunpack.i.h.bf16 %v13154_v18  ;;  %v13155_v27 = vunpack.i.l.bf16 %v13154_v18 }
 0x308   : > { %v1335_v45 = vsel %vm360_vm0, %v15049_v26, %v13160_v38  ;;  %v1336_v42 = vsel %vm360_vm0, %v14937_v53, %v13161_v37 }
 0x309   : > { %v1367_v31 = vsel %vm360_vm0, %v15043_v3, %v13155_v27  ;;  %v1368_v32 = vsel %vm360_vm0, %v14941_v21, %v13156_v25  ;;  %v13169_v21 = vpop.permute.xlu1 %13168  ;;  %v1399_v51 = vpack.c.bf16 %v1336_v42, %v1335_v45 }
 0x30a   : > { %v13164_v33 = vpop.permute.xlu0 %13163  ;;  %v1400_v11 = vpack.c.bf16 %v1368_v32, %v1367_v31  ;;  %v13171_v52 = vunpack.i.h.bf16 %v13169_v21  ;;  %v13170_v54 = vunpack.i.l.bf16 %v13169_v21 }
 0x30b   : > { %v13166_v8 = vunpack.i.h.bf16 %v13164_v33  ;;  %v13165_v40 = vunpack.i.l.bf16 %v13164_v33 }
 0x30c   : > { %v1337_v53 = vsel %vm360_vm0, %v15061_v58, %v13170_v54  ;;  %v1338_v60 = vsel %vm360_vm0, %v14950_v59, %v13171_v52 }
 0x30d   : > { %1607 = vmatmul.mubr.bf16.gmra.mrb[8].mxu1 %v1395_v19  ;;  %v1369_v44 = vsel %vm360_vm0, %v15055_v29, %v13165_v40  ;;  %v1370_v47 = vsel %vm360_vm0, %v14954_v63, %v13166_v8  ;;  %v1401_v1 = vpack.c.bf16 %v1338_v60, %v1337_v53  ;;  %v15070_v19 = vld [vmem:[#allocation2 + $0xc0] sm:$0xff] }
 0x30e   : > { %1614 = vmatprep.mubr.bf16.mxu1 %v1398_v23  ;;  %v1402_v56 = vpack.c.bf16 %v1370_v47, %v1369_v44 }
 0x315   : > { %1615 = vmatmul.mubr.bf16.gmra.mrb[12].mxu1 %v1397_v34  ;;  %v15079_v34 = vld [vmem:[#allocation2 + $0xe0] sm:$0xff] }
 0x316   : > { %1622 = vmatprep.mubr.bf16.mxu1 %v1400_v11  ;;  %v14119_v11 = vld [vmem:[#allocation2 + $0x30] sm:$0xff] }
 0x31a   : > { %v13179_v62 = vpop.permute.xlu1 %13178 }
 0x31b   : > { %v13174_v49 = vpop.permute.xlu0 %13173  ;;  %v13181_v10 = vunpack.i.h.bf16 %v13179_v62  ;;  %v13180_v41 = vunpack.i.l.bf16 %v13179_v62 }
 0x31c   : > { %v13176_v35 = vunpack.i.h.bf16 %v13174_v49  ;;  %v13175_v17 = vunpack.i.l.bf16 %v13174_v49 }
 0x31d   : > { %1623 = vmatmul.mubr.bf16.gmra.mrb[16].mxu1 %v1399_v51  ;;  %v1339_v59 = vsel %vm360_vm0, %v15070_v19, %v13180_v41  ;;  %v1340_v20 = vsel %vm360_vm0, %v14963_v4, %v13181_v10  ;;  %v14123_v41 = vld [vmem:[#allocation2 + $0x70] sm:$0xff] }
 0x31e   : > { %1630 = vmatprep.mubr.bf16.mxu1 %v1402_v56  ;;  %v1371_v63 = vsel %vm360_vm0, %v1017_v61, %v13175_v17  ;;  %v1372_v0 = vsel %vm360_vm0, %v14966_v9, %v13176_v35  ;;  %v13189_v23 = vpop.permute.xlu1 %13188  ;;  %v1403_v39 = vpack.c.bf16 %v1340_v20, %v1339_v59  ;;  %v14121_v56 = vld [vmem:[#allocation2 + $0x50] sm:$0xff] }
 0x31f   : > { %v13184_v5 = vpop.permute.xlu0 %13183  ;;  %v1404_v15 = vpack.c.bf16 %v1372_v0, %v1371_v63  ;;  %v13191_v30 = vunpack.i.h.bf16 %v13189_v23  ;;  %v13190_v48 = vunpack.i.l.bf16 %v13189_v23 }
 0x320   : > { %v13186_v6 = vunpack.i.h.bf16 %v13184_v5  ;;  %v13185_v18 = vunpack.i.l.bf16 %v13184_v5 }
 0x321   : > { %v1341_v4 = vsel %vm360_vm0, %v15079_v34, %v13190_v48  ;;  %v1342_v38 = vsel %vm360_vm0, %v14974_v13, %v13191_v30  ;;  %v14120_v13 = vld [vmem:[#allocation2 + $0x130] sm:$0xff] }
 0x322   : > { %v1373_v9 = vsel %vm360_vm0, %v1019_v22, %v13185_v18  ;;  %v1374_v25 = vsel %vm360_vm0, %v14977_v55, %v13186_v6  ;;  %v13199_v37 = vpop.permute.xlu1 %13198  ;;  %v1405_v45 = vpack.c.bf16 %v1342_v38, %v1341_v4  ;;  %v13304_v4 = vld [vmem:[#allocation11 + $0x8] sm:$0xff]   ;;  %v13307_v38 = vld [vmem:[#allocation11 + $0x10] sm:$0xff]  }
 0x323   : > { %v13194_v27 = vpop.permute.xlu0 %13193  ;;  %v1406_v31 = vpack.c.bf16 %v1374_v25, %v1373_v9  ;;  %v13201_v42 = vunpack.i.h.bf16 %v13199_v37  ;;  %v13200_v21 = vunpack.i.l.bf16 %v13199_v37  ;;  %v14124_v25 = vld [vmem:[#allocation2 + $0x170] sm:$0xff] }
 0x324   : > { %v13196_v32 = vunpack.i.h.bf16 %v13194_v27  ;;  %v13195_v33 = vunpack.i.l.bf16 %v13194_v27  ;;  %v13302_v37 = vld [vmem:[#allocation11 + $0x48] sm:$0xff]  }
 0x325   : > { %1631 = vmatmul.mubr.bf16.gmra.mrb[20].mxu1 %v1401_v1  ;;  %v1343_v52 = vsel %vm360_vm0, %v14998_v24, %v13200_v21  ;;  %v1344_v54 = vsel %vm360_vm0, %v14120_v13, %v13201_v42  ;;  %v14122_v1 = vld [vmem:[#allocation2 + $0x150] sm:$0xff]  ;;  %v13319_v13 = vld [vmem:[#allocation11 + $0x38] sm:$0xff]  }
 0x326   : > { %1638 = vmatprep.mubr.bf16.mxu1 %v1404_v15  ;;  %v1375_v55 = vsel %vm360_vm0, %v15013_v43, %v13195_v33  ;;  %v1376_v8 = vsel %vm360_vm0, %v14119_v11, %v13196_v32  ;;  %v13209_v51 = vpop.permute.xlu1 %13208  ;;  %v1407_v53 = vpack.c.bf16 %v1344_v54, %v1343_v52  ;;  %v13300_v32 = vld [vmem:[#allocation11 + $0x40] sm:$0xff]   ;;  %v13312_v42 = vld [vmem:[#allocation11 + $0x68] sm:$0xff]   ;;  %v13318_v52 = vld [vmem:[#allocation11 + $0x78] sm:$0xff]  }
 0x327   : > { %v13204_v40 = vpop.permute.xlu0 %13203  ;;  %v1408_v44 = vpack.c.bf16 %v1376_v8, %v1375_v55  ;;  %v13211_v60 = vunpack.i.h.bf16 %v13209_v51  ;;  %v13210_v61 = vunpack.i.l.bf16 %v13209_v51  ;;  %v13301_v33 = vld [vmem:[#allocation11] sm:$0xff]   ;;  %11850 = vmatprep.subr.bf16.mxu0 %v13300_v32  ;;  %v13309_v8 = vld [vmem:[#allocation11 + $0x18] sm:$0xff]   ;;  %v13313_v21 = vld [vmem:[#allocation11 + $0x248] sm:$0xff]  }
 0x328   : > { %v13206_v47 = vunpack.i.h.bf16 %v13204_v40  ;;  %v13205_v49 = vunpack.i.l.bf16 %v13204_v40  ;;  %11851 = vmatpush3.bf16.msra.mxu0 %v13301_v33  ;;  %v13303_v55 = vld [vmem:[#allocation11 + $0x240] sm:$0xff]   ;;  %v13317_v51 = vld [vmem:[#allocation11 + $0x30] sm:$0xff]  }
 0x329   : > { %v1345_v24 = vsel %vm360_vm0, %v15007_v36, %v13210_v61  ;;  %v1346_v10 = vsel %vm360_vm0, %v14122_v1, %v13211_v60  ;;  %11852 = vmatprep.subr.bf16.mxu0 %v13302_v37  ;;  %v13305_v11 = vld [vmem:[#allocation11 + $0x200] sm:$0xff]   ;;  %11938 = vmatprep.subr.bf16.mxu1 %v13303_v55  ;;  %v13327_v1 = vld [vmem:[#allocation11 + $0x90] sm:$0xff]  }
 0x32a   : > { %v1377_v43 = vsel %vm360_vm0, %v15025_v7, %v13205_v49  ;;  %v1378_v35 = vsel %vm360_vm0, %v14121_v56, %v13206_v47  ;;  %v13219_v62 = vpop.permute.xlu1 %13218  ;;  %v1409_v18 = vpack.c.bf16 %v1346_v10, %v1345_v24  ;;  %11939 = vmatpush3.bf16.msra.mxu1 %v13305_v11  ;;  %v13310_v40 = vld [vmem:[#allocation11 + $0x60] sm:$0xff]   ;;  %v13315_v47 = vld [vmem:[#allocation11 + $0x208] sm:$0xff]   ;;  %v13316_v49 = vld [vmem:[#allocation11 + $0x70] sm:$0xff]  }
 0x32b   : > { %v13214_v17 = vpop.permute.xlu0 %13213  ;;  %v1410_v63 = vpack.c.bf16 %v1378_v35, %v1377_v43  ;;  %v13221_v59 = vunpack.i.h.bf16 %v13219_v62  ;;  %v13220_v20 = vunpack.i.l.bf16 %v13219_v62  ;;  %11940 = vmatprep.subr.bf16.mxu1 %v13313_v21  ;;  %v1948_v54 = vld [vmem:[#allocation3 + $0x1e1] sm:$0xff]  ;;  %v13322_v35 = vld [vmem:[#allocation11 + $0x250] sm:$0xff]   ;;  %v13324_v62 = vld [vmem:[#allocation11 + $0xc8] sm:$0xff]  }
 0x32c   : > { %v13216_v0 = vunpack.i.h.bf16 %v13214_v17  ;;  %v13215_v5 = vunpack.i.l.bf16 %v13214_v17  ;;  %11853 = vmatpush3.bf16.msra.mxu0 %v13304_v4  ;;  %v2081_v43 = vpack.c.bf16 %v1948_v54, %v1948_v54  ;;  %v13320_v56 = vld [vmem:[#allocation11 + $0xc0] sm:$0xff]   ;;  %v13323_v17 = vld [vmem:[#allocation11 + $0x210] sm:$0xff]   ;;  %v13328_v10 = vld [vmem:[#allocation11 + $0xd8] sm:$0xff]  }
 0x32d   : > { %1639 = vmatmul.mubr.bf16.gmra.mrb[24].mxu1 %v1403_v39  ;;  %v1347_v36 = vsel %vm360_vm0, %v15015_v46, %v13220_v20  ;;  %v1348_v27 = vsel %vm360_vm0, %v14124_v25, %v13221_v59  ;;  %v14125_v39 = vld [vmem:[#allocation2 + $0x90] sm:$0xff]  ;;  %v13321_v61 = vld [vmem:[#allocation11 + $0x80] sm:$0xff]   ;;  %v13339_v25 = vld [vmem:[#allocation11 + $0xb8] sm:$0xff]  }
 0x32e   : > { %1646 = vmatprep.mubr.bf16.mxu1 %v1406_v31  ;;  %v1379_v7 = vsel %vm360_vm0, %v15037_v28, %v13215_v5  ;;  %v1380_v15 = vsel %vm360_vm0, %v14123_v41, %v13216_v0  ;;  %v13224_v6 = vpop.permute.xlu1 %13223  ;;  %v1411_v48 = vpack.c.bf16 %v1348_v27, %v1347_v36  ;;  %v13306_v46 = vld [vmem:[#allocation11 + $0x50] sm:$0xff]   ;;  %11941 = vmatpush3.bf16.msra.mxu1 %v13315_v47  ;;  %v13333_v0 = vld [vmem:[#allocation11 + $0x218] sm:$0xff]   ;;  %v13325_v5 = vld [vmem:[#allocation11 + $0x88] sm:$0xff]  }
 0x32f   : > { %v1412_v22 = vpack.c.bf16 %v1380_v15, %v1379_v7  ;;  %v13226_v23 = vunpack.i.h.bf16 %v13224_v6  ;;  %v13225_v9 = vunpack.i.l.bf16 %v13224_v6  ;;  %11854 = vmatprep.subr.bf16.mxu0 %v13306_v46  ;;  %8749 = vmatprep.mubr.bf16.mxu0 %v2081_v43  ;;  %v13326_v24 = vld [vmem:[#allocation11 + $0xd0] sm:$0xff]   ;;  %v13329_v7 = vld [vmem:[#allocation11 + $0x98] sm:$0xff]   ;;  %v13330_v41 = vld [vmem:[#allocation11 + $0xe0] sm:$0xff]  }
 0x330   : > { %11855 = vmatpush3.bf16.msra.mxu0 %v13307_v38  ;;  %11942 = vmatprep.subr.bf16.mxu1 %v13322_v35  ;;  %v13331_v15 = vld [vmem:[#allocation11 + $0xa0] sm:$0xff]   ;;  %v13334_v6 = vld [vmem:[#allocation11 + $0xe8] sm:$0xff]   ;;  %v13336_v59 = vld [vmem:[#allocation11 + $0xf0] sm:$0xff]  }
 0x331   : > { %v1381_v28 = vsel %vm360_vm0, %v15049_v26, %v13225_v9  ;;  %v1382_v30 = vsel %vm360_vm0, %v14125_v39, %v13226_v23  ;;  %v13308_v26 = vld [vmem:[#allocation11 + $0x58] sm:$0xff]   ;;  %v13337_v20 = vld [vmem:[#allocation11 + $0xb0] sm:$0xff]   ;;  %v13342_v38 = vld [vmem:[#allocation11 + $0x260] sm:$0xff]  }
 0x332   : > { %v1414_v31 = vpack.c.bf16 %v1382_v30, %v1381_v28  ;;  %11856 = vmatprep.subr.bf16.mxu0 %v13308_v26  ;;  %11943 = vmatpush3.bf16.msra.mxu1 %v13323_v17  ;;  %v15106_v23 = vld [vmem:[#allocation9] ss:$0 sm:$0xff]  ;;  %v13343_v26 = vld [vmem:[#allocation11 + $0x220] sm:$0xff]   ;;  %v13353_v35 = vld [vmem:[#allocation11 + $0x228] sm:$0xff]  }
 0x333   : > { %v13338_v36 = vld [vmem:[#allocation11 + $0xf8] sm:$0xff]  }
 0x334   : > { %11857 = vmatpush3.bf16.msra.mxu0 %v13309_v8  ;;  %v1070_v54 = vld [vmem:[#allocation2 + $0x101] sm:$0xff] }
 0x335   : > { %1647 = vmatmul.mubr.bf16.gmra.mrb[28].mxu1 %v1405_v45  ;;  %v13311_v45 = vld [vmem:[#allocation11 + $0x20] sm:$0xff]   ;;  %11858 = vmatprep.subr.bf16.mxu0 %v13310_v40 }
 0x336   : > { %1654 = vmatprep.mubr.bf16.mxu1 %v1408_v44  ;;  %v13314_v44 = vld [vmem:[#allocation11 + $0x28] sm:$0xff]  }
 0x338   : > { %11859 = vmatpush3.bf16.msra.mxu0 %v13311_v45 }
 0x339   : > { %11860 = vmatprep.subr.bf16.mxu0 %v13312_v42 }
 0x33c   : > { %11861 = vmatpush3.bf16.msra.mxu0 %v13314_v44 }
 0x33d   : > { %1655 = vmatmul.mubr.bf16.gmra.mrb[32].mxu1 %v1407_v53  ;;  %11862 = vmatprep.subr.bf16.mxu0 %v13316_v49  ;;  %v14126_v53 = vld [vmem:[#allocation3] sm:$0xff] }
 0x33e   : > { %1662 = vmatprep.mubr.bf16.mxu1 %v1410_v63  ;;  %v2080_v60 = vpack.c.bf16 %v14126_v53, %v14126_v53  ;;  %v13332_v63 = vld [vmem:[#allocation11 + $0x258] sm:$0xff]  }
 0x33f   : > { %11944 = vmatprep.subr.bf16.mxu1 %v13332_v63 }
 0x340   : > { %11863 = vmatpush3.bf16.msra.mxu0 %v13317_v51  ;;  %11945 = vmatpush3.bf16.msra.mxu1 %v13333_v0 }
 0x341   : > { %11864 = vmatprep.subr.bf16.mxu0 %v13318_v52  ;;  %11946 = vmatprep.subr.bf16.mxu1 %v13342_v38 }
 0x344   : > { %11865 = vmatpush3.bf16.msra.mxu0 %v13319_v13  ;;  %11947 = vmatpush3.bf16.msra.mxu1 %v13343_v26 }
 0x345   : > { %1663 = vmatmul.mubr.bf16.gmra.mrb[36].mxu1 %v1409_v18  ;;  %11872 = vmatprep.subr.bf16.mxu0 %v13320_v56  ;;  %v13335_v18 = vld [vmem:[#allocation11 + $0xa8] sm:$0xff]  }
 0x346   : > { %1670 = vmatprep.mubr.bf16.mxu1 %v1412_v22  ;;  %v13352_v56 = vld [vmem:[#allocation11 + $0x268] sm:$0xff]  }
 0x347   : > { %8750 = vmatmul.mubr.bf16.vlgmr.msra.gmra.mrb[16].mxu0 %v2080_v60  ;;  %11948 = vmatprep.subr.bf16.mxu1 %v13352_v56 }
 0x348   : > { %11873 = vmatpush3.bf16.msra.mxu0 %v13321_v61  ;;  %11949 = vmatpush3.bf16.msra.mxu1 %v13353_v35 }
 0x349   : > { %11874 = vmatprep.subr.bf16.mxu0 %v13324_v62 }
 0x34c   : > { %11875 = vmatpush3.bf16.msra.mxu0 %v13325_v5 }
 0x34d   : > { %1671 = vmatmul.mubr.bf16.gmra.mrb[40].mxu1 %v1411_v48  ;;  %11876 = vmatprep.subr.bf16.mxu0 %v13326_v24 }
 0x34e   : > { %1678 = vmatprep.mubr.bf16.mxu1 %v1414_v31  ;;  %v13340_v31 = vld [vmem:[#allocation11 + $0x140] sm:$0xff]  }
 0x350   : > { %11877 = vmatpush3.bf16.msra.mxu0 %v13327_v1 }
 0x351   : > { %11878 = vmatprep.subr.bf16.mxu0 %v13328_v10 }
 0x354   : > { %11879 = vmatpush3.bf16.msra.mxu0 %v13329_v7 }
 0x355   : > { %11880 = vmatprep.subr.bf16.mxu0 %v13330_v41 }
 0x358   : > { %11881 = vmatpush3.bf16.msra.mxu0 %v13331_v15 }
 0x359   : > { %11882 = vmatprep.subr.bf16.mxu0 %v13334_v6 }
 0x35c   : > { %11883 = vmatpush3.bf16.msra.mxu0 %v13335_v18  ;;  %v13362_v18 = vld [vmem:[#allocation11 + $0x270] sm:$0xff]  }
 0x35d   : > { %11884 = vmatprep.subr.bf16.mxu0 %v13336_v59  ;;  %v13363_v59 = vld [vmem:[#allocation11 + $0x230] sm:$0xff]   ;;  %11950 = vmatprep.subr.bf16.mxu1 %v13362_v18 }
 0x35e   : > { %11951 = vmatpush3.bf16.msra.mxu1 %v13363_v59 }
 0x360   : > { %11885 = vmatpush3.bf16.msra.mxu0 %v13337_v20 }
 0x361   : > { %11886 = vmatprep.subr.bf16.mxu0 %v13338_v36 }
 0x364   : > { %11887 = vmatpush3.bf16.msra.mxu0 %v13339_v25 }
 0x365   : > { %11894 = vmatprep.subr.bf16.mxu0 %v13340_v31 }
 0x3d0   : > { %v11754_v22 = vpop.f32.mrb[0].mxu1 }
 0x3d1   : > { %v11755_v9 = vpop.f32.mrb[1].mxu1 }
 0x3d2   : > { %v11756_v27 = vadd.f32 %v11755_v9, %v11754_v22  ;;  %v11757_v28 = vpop.f32.mrb[2].mxu1 }
 0x3d3   : > { %v11758_v39 = vpop.f32.mrb[3].mxu1 }
 0x3d4   : > { %v1593_v30 = vadd.f32 %v11756_v27, %v15106_v23  ;;  %v11759_v48 = vadd.f32 %v11758_v39, %v11757_v28 }
 0x3d6   : > { %v1719_v32 = vmax.f32 %v1593_v30, 0.0  ;;  %v15110_v33 = vadd.f32 %v11759_v48, %v15106_v23 }
 0x3d8   : > { %1752 = vst.msk [vmem:[#allocation3 + $0x11] sm:$0xff] %vm360_vm0, %v1719_v32  ;;  %v1720_v37 = vmax.f32 %v15110_v33, 0.0  ;;  %v11760_v4 = vpop.f32.mrb[4].mxu1  ;;  %1865 = vrot.lane.b32.xlu1 %v1719_v32, %s14336_s12 }
 0x3d9   : > { %v11761_v46 = vpop.f32.mrb[5].mxu1 }
 0x3da   : > { %v11762_v55 = vadd.f32 %v11761_v46, %v11760_v4  ;;  %v11763_v11 = vpop.f32.mrb[6].mxu1  ;;  %1784 = vrot.lane.b32.xlu0 %v1720_v37, %s14336_s12 }
 0x3db   : > { %v11764_v8 = vpop.f32.mrb[7].mxu1 }
 0x3dc   : > { %v15119_v40 = vadd.f32 %v11762_v55, %v15106_v23  ;;  %v15121_v45 = vadd.f32 %v11764_v8, %v11763_v11  ;;  %13268 = vrot.lane.b32.xlu1 %v14980_v16, %s14336_s12  ;;  %v13372_v55 = vld [vmem:[#allocation11 + $0x278] sm:$0xff]  }
 0x3dd   : > { %v13373_v11 = vld [vmem:[#allocation11 + $0x238] sm:$0xff]   ;;  %11952 = vmatprep.subr.bf16.mxu1 %v13372_v55 }
 0x3de   : > { %v1721_v42 = vmax.f32 %v15119_v40, 0.0  ;;  %13228 = vrot.lane.b32.xlu0 %v14932_v50, %s14336_s12  ;;  %v15141_v50 = vld [vmem:[#allocation2 + $0x110] sm:$0xff]  ;;  %11953 = vmatpush3.bf16.msra.mxu1 %v13373_v11 }
 0x3df   : > { %v13262_v60 = vpack.i.bf16 %v1070_v54, %v15141_v50 }
 0x3e0   : > { %1753 = vst.msk [vmem:[#allocation3 + $0x21] sm:$0xff] %vm360_vm0, %v1721_v42  ;;  %v11766_v21 = vpop.f32.mrb[8].mxu1 }
 0x3e1   : > { %v11767_v44 = vpop.f32.mrb[9].mxu1 }
 0x3e2   : > { %v11768_v47 = vadd.f32 %v11767_v44, %v11766_v21  ;;  %v11769_v49 = vpop.f32.mrb[10].mxu1  ;;  %13238 = vrot.lane.b32.xlu0 %v14945_v57, %s14336_s12 }
 0x3e3   : > { %v11770_v51 = vpop.f32.mrb[11].mxu1 }
 0x3e4   : > { %v15134_v16 = vadd.f32 %v11768_v47, %v15106_v23  ;;  %v15136_v52 = vadd.f32 %v11770_v51, %v11769_v49 }
 0x3e6   : > { %v1723_v13 = vmax.f32 %v15134_v16, 0.0  ;;  %13248 = vrot.lane.b32.xlu0 %v14958_v2, %s14336_s12 }
 0x3e8   : > { %1754 = vst.msk [vmem:[#allocation3 + $0x31] sm:$0xff] %vm360_vm0, %v1723_v13  ;;  %v11772_v43 = vpop.f32.mrb[12].mxu1 }
 0x3e9   : > { %v11773_v57 = vpop.f32.mrb[13].mxu1 }
 0x3ea   : > { %v11774_v17 = vadd.f32 %v11773_v57, %v11772_v43  ;;  %v11775_v53 = vpop.f32.mrb[14].mxu1  ;;  %13258 = vrot.lane.b32.xlu0 %v14969_v12, %s14336_s12 }
 0x3eb   : > { %v11776_v61 = vpop.f32.mrb[15].mxu1 }
 0x3ec   : > { %v15150_v2 = vadd.f32 %v11774_v17, %v15106_v23  ;;  %v15152_v62 = vadd.f32 %v11776_v61, %v11775_v53 }
 0x3ee   : > { %v1725_v63 = vmax.f32 %v15150_v2, 0.0  ;;  %13263 = vrot.lane.b32.xlu0 %v13262_v60, %s14336_s12 }
 0x3f0   : > { %1755 = vst.msk [vmem:[#allocation3 + $0x41] sm:$0xff] %vm360_vm0, %v1725_v63  ;;  %v11778_v0 = vpop.f32.mrb[16].mxu1 }
 0x3f1   : > { %v11779_v12 = vpop.f32.mrb[17].mxu1 }
 0x3f2   : > { %v11780_v5 = vadd.f32 %v11779_v12, %v11778_v0  ;;  %v11781_v24 = vpop.f32.mrb[18].mxu1  ;;  %v13381_v0 = vld [vmem:[#allocation11 + $0x340] sm:$0xff]   ;;  %v15201_v12 = vadd.f32 %v15121_v45, %v15106_v23 }
 0x3f3   : > { %v11782_v1 = vpop.f32.mrb[19].mxu1  ;;  %11982 = vmatprep.subr.bf16.mxu1 %v13381_v0 }
 0x3f4   : > { %v15160_v10 = vadd.f32 %v11780_v5, %v15106_v23  ;;  %v15162_v7 = vadd.f32 %v11782_v1, %v11781_v24  ;;  %v1722_v59 = vmax.f32 %v15201_v12, 0.0 }
 0x3f6   : > { %v1727_v41 = vmax.f32 %v15160_v10, 0.0 }
 0x3f8   : > { %1756 = vst.msk [vmem:[#allocation3 + $0x51] sm:$0xff] %vm360_vm0, %v1727_v41  ;;  %v11784_v15 = vpop.f32.mrb[20].mxu1 }
 0x3f9   : > { %v11785_v6 = vpop.f32.mrb[21].mxu1 }
 0x3fa   : > { %v11786_v20 = vadd.f32 %v11785_v6, %v11784_v15  ;;  %v11787_v22 = vpop.f32.mrb[22].mxu1 }
 0x3fb   : > { %v11788_v9 = vpop.f32.mrb[23].mxu1 }
 0x3fc   : > { %v15169_v36 = vadd.f32 %v11786_v20, %v15106_v23  ;;  %v15171_v25 = vadd.f32 %v11788_v9, %v11787_v22 }
 0x3fe   : > { %v1729_v27 = vmax.f32 %v15169_v36, 0.0 }
 0x400   : > { %1757 = vst.msk [vmem:[#allocation3 + $0x61] sm:$0xff] %vm360_vm0, %v1729_v27  ;;  %v11790_v28 = vpop.f32.mrb[24].mxu1 }
 0x401   : > { %v11791_v39 = vpop.f32.mrb[25].mxu1 }
 0x402   : > { %v11792_v30 = vadd.f32 %v11791_v39, %v11790_v28  ;;  %v11793_v48 = vpop.f32.mrb[26].mxu1  ;;  %v15222_v28 = vadd.f32 %v15136_v52, %v15106_v23 }
 0x403   : > { %v11794_v31 = vpop.f32.mrb[27].mxu1 }
 0x404   : > { %v15178_v32 = vadd.f32 %v11792_v30, %v15106_v23  ;;  %v15180_v4 = vadd.f32 %v11794_v31, %v11793_v48 }
 0x406   : > { %v1731_v46 = vmax.f32 %v15178_v32, 0.0 }
 0x408   : > { %1758 = vst.msk [vmem:[#allocation3 + $0x71] sm:$0xff] %vm360_vm0, %v1731_v46  ;;  %v11796_v38 = vpop.f32.mrb[28].mxu1 }
 0x409   : > { %v11797_v26 = vpop.f32.mrb[29].mxu1 }
 0x40a   : > { %v11798_v8 = vadd.f32 %v11797_v26, %v11796_v38  ;;  %v11799_v21 = vpop.f32.mrb[30].mxu1  ;;  %v1724_v38 = vmax.f32 %v15222_v28, 0.0  ;;  %v13389_v28 = vld [vmem:[#allocation11 + $0x350] sm:$0xff]  }
 0x40b   : > { %v11800_v44 = vpop.f32.mrb[31].mxu1 }
 0x40c   : > { %v15187_v47 = vadd.f32 %v11798_v8, %v15106_v23  ;;  %v15189_v49 = vadd.f32 %v11800_v44, %v11799_v21  ;;  %v15243_v8 = vadd.f32 %v15152_v62, %v15106_v23 }
 0x40e   : > { %v1733_v51 = vmax.f32 %v15187_v47, 0.0  ;;  %v1726_v16 = vmax.f32 %v15243_v8, 0.0  ;;  %v13401_v8 = vld [vmem:[#allocation11 + $0x368] sm:$0xff]  }
 0x410   : > { %1759 = vst.msk [vmem:[#allocation3 + $0x81] sm:$0xff] %vm360_vm0, %v1733_v51  ;;  %v11802_v54 = vpop.f32.mrb[32].mxu1 }
 0x411   : > { %v11803_v43 = vpop.f32.mrb[33].mxu1 }
 0x412   : > { %v11804_v57 = vadd.f32 %v11803_v43, %v11802_v54  ;;  %v11805_v56 = vpop.f32.mrb[34].mxu1 }
 0x413   : > { %v11806_v35 = vpop.f32.mrb[35].mxu1 }
 0x414   : > { %v1657_v17 = vadd.f32 %v11804_v57, %v15106_v23  ;;  %v11807_v53 = vadd.f32 %v11806_v35, %v11805_v56  ;;  %v1031_v35 = vld [vmem:[#allocation2 + $0xb0] sm:$0xff] }
 0x416   : > { %v1735_v60 = vmax.f32 %v1657_v17, 0.0  ;;  %v15197_v61 = vadd.f32 %v11807_v53, %v15106_v23  ;;  %v1949_v17 = vld [vmem:[#allocation3 + $0x1e2] sm:$0xff]  ;;  %v964_v53 = vld [vmem:[#allocation2 + $0x190] sm:$0xff] }
 0x418   : > { %1760 = vst.msk [vmem:[#allocation3 + $0xb1] sm:$0xff] %vm360_vm0, %v1735_v60  ;;  %v1736_v5 = vmax.f32 %v15197_v61, 0.0  ;;  %v11808_v24 = vpop.f32.mrb[36].mxu1  ;;  %1881 = vrot.lane.b32.xlu1 %v1735_v60, %s14336_s12  ;;  %v13379_v61 = vld [vmem:[#allocation11 + $0x1b8] sm:$0xff]  }
 0x419   : > { %v11809_v1 = vpop.f32.mrb[37].mxu1 }
 0x41a   : > { %v11810_v15 = vadd.f32 %v11809_v1, %v11808_v24  ;;  %v11811_v6 = vpop.f32.mrb[38].mxu1  ;;  %1800 = vrot.lane.b32.xlu0 %v1736_v5, %s14336_s12 }
 0x41b   : > { %v11812_v18 = vpop.f32.mrb[39].mxu1 }
 0x41c   : > { %v1665_v45 = vadd.f32 %v11810_v15, %v15106_v23  ;;  %v11813_v20 = vadd.f32 %v11812_v18, %v11811_v6  ;;  %1867 = vrot.lane.b32.xlu1 %v1721_v42, %s14336_s12  ;;  %v2082_v6 = vpack.c.bf16 %v1949_v17, %v1949_v17  ;;  %v13347_v17 = vld [vmem:[#allocation11 + $0x110] sm:$0xff]  }
 0x41e   : > { %v1737_v22 = vmax.f32 %v1665_v45, 0.0  ;;  %v15215_v9 = vadd.f32 %v11813_v20, %v15106_v23  ;;  %1786 = vrot.lane.b32.xlu0 %v1722_v59, %s14336_s12 }
 0x420   : > { %1761 = vst.msk [vmem:[#allocation3 + $0xc1] sm:$0xff] %vm360_vm0, %v1737_v22  ;;  %v1738_v39 = vmax.f32 %v15215_v9, 0.0  ;;  %v11814_v30 = vpop.f32.mrb[40].mxu1  ;;  %1883 = vrot.lane.b32.xlu1 %v1737_v22, %s14336_s12  ;;  %v13384_v9 = vld [vmem:[#allocation11 + $0x2c8] sm:$0xff]  }
 0x421   : > { %v11815_v40 = vpop.f32.mrb[41].mxu1 }
 0x422   : > { %v11816_v42 = vadd.f32 %v11815_v40, %v11814_v30  ;;  %v11817_v48 = vpop.f32.mrb[42].mxu1  ;;  %1802 = vrot.lane.b32.xlu0 %v1738_v39, %s14336_s12  ;;  %v13341_v40 = vld [vmem:[#allocation11 + $0x100] sm:$0xff]  }
 0x423   : > { %v11818_v31 = vpop.f32.mrb[43].mxu1 }
 0x424   : > { %v1673_v52 = vadd.f32 %v11816_v42, %v15106_v23  ;;  %v11819_v26 = vadd.f32 %v11818_v31, %v11817_v48  ;;  %1869 = vrot.lane.b32.xlu1 %v1723_v13, %s14336_s12 }
 0x426   : > { %v1739_v55 = vmax.f32 %v1673_v52, 0.0  ;;  %v15236_v11 = vadd.f32 %v11819_v26, %v15106_v23  ;;  %1788 = vrot.lane.b32.xlu0 %v1724_v38, %s14336_s12  ;;  %v13234_v23 = vpop.permute.xlu1 %13233  ;;  %v966_v52 = vld [vmem:[#allocation2 + $0x1b0] sm:$0xff] }
 0x427   : > { %v13236_v2 = vunpack.i.h.bf16 %v13234_v23  ;;  %v13345_v26 = vld [vmem:[#allocation11 + $0x108] sm:$0xff]  }
 0x428   : > { %1762 = vst.msk [vmem:[#allocation3 + $0xd1] sm:$0xff] %vm360_vm0, %v1739_v55  ;;  %v1740_v21 = vmax.f32 %v15236_v11, 0.0  ;;  %1885 = vrot.lane.b32.xlu1 %v1739_v55, %s14336_s12 }
 0x429   : > { %v1384_v0 = vsel %vm360_vm0, %v1031_v35, %v13236_v2  ;;  %v13346_v2 = vld [vmem:[#allocation11 + $0x150] sm:$0xff]  }
 0x42a   : > { %1804 = vrot.lane.b32.xlu0 %v1740_v21, %s14336_s12  ;;  %v13244_v13 = vpop.permute.xlu1 %13243 }
 0x42b   : > { %v13246_v42 = vunpack.i.h.bf16 %v13244_v13  ;;  %v13245_v48 = vunpack.i.l.bf16 %v13244_v13 }
 0x42c   : > { %1871 = vrot.lane.b32.xlu1 %v1725_v63, %s14336_s12  ;;  %v13235_v63 = vunpack.i.l.bf16 %v13234_v23 }
 0x42d   : > { %v1385_v13 = vsel %vm360_vm0, %v15070_v19, %v13245_v48  ;;  %v13349_v19 = vld [vmem:[#allocation11 + $0x118] sm:$0xff]   ;;  %v13354_v48 = vld [vmem:[#allocation11 + $0x168] sm:$0xff]  }
 0x42e   : > { %1790 = vrot.lane.b32.xlu0 %v1726_v16, %s14336_s12  ;;  %v15258_v62 = vpop.permute.xlu1 %13253  ;;  %v1383_v60 = vsel %vm360_vm0, %v15061_v58, %v13235_v63  ;;  %v13344_v58 = vld [vmem:[#allocation11 + $0x148] sm:$0xff]  }
 0x42f   : > { %v1416_v22 = vpack.c.bf16 %v1384_v0, %v1383_v60  ;;  %v13348_v60 = vld [vmem:[#allocation11 + $0x158] sm:$0xff]   ;;  %v968_v0 = vld [vmem:[#allocation2 + $0x1d0] sm:$0xff] }
 0x44a   : > { %v1866_v44 = vpop.permute.xlu1 %1865 }
 0x44b   : > { %1914 = vst.msk [vmem:[#allocation3 + $0x151] sm:$0xff] %vm360_vm0, %v1866_v44  ;;  %v1033_v44 = vld [vmem:[#allocation2 + $0xd0] sm:$0xff] }
 0x44c   : > { %1930 = vst.msk [vmem:[#allocation3 + $0x151] sm:$0xff] %vm1832_vm6, %v1720_v37  ;;  %v1785_v54 = vpop.permute.xlu0 %1784 }
 0x44d   : > { %1833 = vst.msk [vmem:[#allocation3 + $0x11] sm:$0xff] %vm1832_vm6, %v1785_v54  ;;  %v1386_v54 = vsel %vm360_vm0, %v1033_v44, %v13246_v42  ;;  %v13351_v42 = vld [vmem:[#allocation11 + $0x120] sm:$0xff]   ;;  %v13356_v44 = vld [vmem:[#allocation11 + $0x170] sm:$0xff]  }
 0x44e   : > { %v1418_v35 = vpack.c.bf16 %v1386_v54, %v1385_v13 }
 0x450   : > { %v13229_v43 = vpop.permute.xlu0 %13228 }
 0x451   : > { %v13231_v57 = vunpack.i.h.bf16 %v13229_v43  ;;  %v13230_v56 = vunpack.i.l.bf16 %v13229_v43 }
 0x453   : > { %v1349_v33 = vsel %vm360_vm0, %v15031_v14, %v13230_v56  ;;  %v1350_v37 = vsel %vm360_vm0, %v964_v53, %v13231_v57  ;;  %v13256_v53 = vunpack.i.h.bf16 %v15258_v62 }
 0x454   : > { %v13239_v24 = vpop.permute.xlu0 %13238  ;;  %v1413_v1 = vpack.c.bf16 %v1350_v37, %v1349_v33  ;;  %v1950_v15 = vld [vmem:[#allocation3 + $0x10] sm:$0xff] }
 0x455   : > { %v1952_v18 = vld [vmem:[#allocation3 + $0x12] sm:$0xff]  ;;  %v13241_v45 = vunpack.i.h.bf16 %v13239_v24  ;;  %v13240_v20 = vunpack.i.l.bf16 %v13239_v24  ;;  %v2083_v30 = vpack.c.bf16 %v1950_v15, %v1950_v15 }
 0x456   : > { %1679 = vmatmul.mubr.bf16.gmra.mrb[44].mxu1 %v1413_v1  ;;  %v2085_v31 = vpack.c.bf16 %v1952_v18, %v1952_v18  ;;  %v1035_v24 = vld [vmem:[#allocation2 + $0xf0] sm:$0xff] }
 0x457   : > { %1686 = vmatprep.mubr.bf16.mxu1 %v1416_v22  ;;  %8789 = vmatprep.mubr.bf16.mxu0 %v2083_v30  ;;  %v1351_v55 = vsel %vm360_vm0, %v15043_v3, %v13240_v20  ;;  %v1352_v23 = vsel %vm360_vm0, %v966_v52, %v13241_v45  ;;  %v13255_v3 = vunpack.i.l.bf16 %v15258_v62  ;;  %v1388_v62 = vsel %vm360_vm0, %v1035_v24, %v13256_v53  ;;  %v13355_v52 = vld [vmem:[#allocation11 + $0x128] sm:$0xff]  }
 0x458   : > { %v13249_v14 = vpop.permute.xlu0 %13248  ;;  %8790 = vmatmul.mubr.bf16.vlgmr.msra.gmra.mrb[20].mxu0 %v2082_v6  ;;  %v1415_v63 = vpack.c.bf16 %v1352_v23, %v1351_v55  ;;  %v13350_v6 = vld [vmem:[#allocation11 + $0x160] sm:$0xff]   ;;  %v13269_v23 = vpop.permute.xlu1 %13268  ;;  %v13364_v24 = vld [vmem:[#allocation11 + $0x1c8] sm:$0xff]  }
 0x459   : > { %11895 = vmatpush3.bf16.msra.mxu0 %v13341_v40  ;;  %8829 = vmatprep.mubr.bf16.mxu0 %v2085_v31  ;;  %v13251_v43 = vunpack.i.h.bf16 %v13249_v14  ;;  %v13250_v57 = vunpack.i.l.bf16 %v13249_v14  ;;  %v1387_v15 = vsel %vm360_vm0, %v15079_v34, %v13255_v3  ;;  %v970_v31 = vld [vmem:[#allocation2 + $0x1f0] sm:$0xff]  ;;  %v13360_v3 = vld [vmem:[#allocation11 + $0x1c0] sm:$0xff]  }
 0x45a   : > { %11896 = vmatprep.subr.bf16.mxu0 %v13344_v58  ;;  %v1420_v40 = vpack.c.bf16 %v1388_v62, %v1387_v15  ;;  %v969_v58 = vld [vmem:[#allocation2 + $0x1e0] sm:$0xff]  ;;  %v13365_v15 = vld [vmem:[#allocation11 + $0x188] sm:$0xff]   ;;  %v13366_v62 = vld [vmem:[#allocation11 + $0x1d0] sm:$0xff]  }
 0x45b   : > { %v1353_v33 = vsel %vm360_vm0, %v15055_v29, %v13250_v57  ;;  %v1354_v37 = vsel %vm360_vm0, %v968_v0, %v13251_v43  ;;  %v1036_v29 = vld [vmem:[#allocation2 + $0x100] sm:$0xff]  ;;  %v13357_v43 = vld [vmem:[#allocation11 + $0x130] sm:$0xff]  }
 0x45c   : > { %v13259_v56 = vpop.permute.xlu0 %13258  ;;  %v1417_v18 = vpack.c.bf16 %v1354_v37, %v1353_v33  ;;  %v13358_v57 = vld [vmem:[#allocation11 + $0x178] sm:$0xff]   ;;  %v13361_v33 = vld [vmem:[#allocation11 + $0x180] sm:$0xff]  }
 0x45d   : > { %11897 = vmatpush3.bf16.msra.mxu0 %v13345_v26  ;;  %v13261_v22 = vunpack.i.h.bf16 %v13259_v56  ;;  %v13260_v30 = vunpack.i.l.bf16 %v13259_v56  ;;  %v972_v56 = vld [vmem:[#allocation2 + $0x210] sm:$0xff] }
 0x45e   : > { %1687 = vmatmul.mubr.bf16.gmra.mrb[48].mxu1 %v1415_v63  ;;  %11898 = vmatprep.subr.bf16.mxu0 %v13346_v2  ;;  %v13271_v2 = vunpack.i.h.bf16 %v13269_v23  ;;  %v13270_v63 = vunpack.i.l.bf16 %v13269_v23  ;;  %v13378_v23 = vld [vmem:[#allocation11 + $0x1f8] sm:$0xff]  }
 0x45f   : > { %1694 = vmatprep.mubr.bf16.mxu1 %v1418_v35  ;;  %v1355_v26 = vsel %vm360_vm0, %v969_v58, %v13260_v30  ;;  %v1356_v55 = vsel %vm360_vm0, %v970_v31, %v13261_v22  ;;  %v13359_v35 = vld [vmem:[#allocation11 + $0x138] sm:$0xff]   ;;  %v13371_v22 = vld [vmem:[#allocation11 + $0x1a0] sm:$0xff]   ;;  %v13374_v30 = vld [vmem:[#allocation11 + $0x1e8] sm:$0xff]  }
 0x460   : > { %v13264_v1 = vpop.permute.xlu0 %13263  ;;  %v1419_v54 = vpack.c.bf16 %v1356_v55, %v1355_v26  ;;  %v1358_v53 = vsel %vm360_vm0, %v972_v56, %v13271_v2  ;;  %v13377_v26 = vld [vmem:[#allocation11 + $0x1b0] sm:$0xff]  }
 0x461   : > { %11899 = vmatpush3.bf16.msra.mxu0 %v13347_v17  ;;  %v13266_v45 = vunpack.i.h.bf16 %v13264_v1  ;;  %v13265_v20 = vunpack.i.l.bf16 %v13264_v1  ;;  %v1955_v2 = vld [vmem:[#allocation3 + $0x152] sm:$0xff] }
 0x462   : > { %11900 = vmatprep.subr.bf16.mxu0 %v13348_v60  ;;  %v1951_v60 = vld [vmem:[#allocation3 + $0x11] sm:$0xff] }
 0x463   : > { %v1389_v34 = vsel %vm360_vm0, %v1036_v29, %v13265_v20  ;;  %v1390_v14 = vsel %vm360_vm0, %v15141_v50, %v13266_v45  ;;  %v971_v50 = vld [vmem:[#allocation2 + $0x200] sm:$0xff]  ;;  %v2084_v37 = vpack.c.bf16 %v1951_v60, %v1951_v60 }
 0x464   : > { %v1422_v13 = vpack.c.bf16 %v1390_v14, %v1389_v34  ;;  %v1357_v17 = vsel %vm360_vm0, %v971_v50, %v13270_v63  ;;  %v13369_v45 = vld [vmem:[#allocation11 + $0x198] sm:$0xff]   ;;  %v13370_v20 = vld [vmem:[#allocation11 + $0x1e0] sm:$0xff]  }
 0x465   : > { %11901 = vmatpush3.bf16.msra.mxu0 %v13349_v19  ;;  %v1421_v0 = vpack.c.bf16 %v1358_v53, %v1357_v17  ;;  %v1954_v19 = vld [vmem:[#allocation3 + $0x151] sm:$0xff]  ;;  %v2088_v53 = vpack.c.bf16 %v1955_v2, %v1955_v2 }
 0x466   : > { %1695 = vmatmul.mubr.bf16.gmra.mrb[52].mxu1 %v1417_v18  ;;  %11902 = vmatprep.subr.bf16.mxu0 %v13350_v6  ;;  %v2087_v1 = vpack.c.bf16 %v1954_v19, %v1954_v19  ;;  %v13367_v6 = vld [vmem:[#allocation11 + $0x190] sm:$0xff]   ;;  %v13368_v18 = vld [vmem:[#allocation11 + $0x1d8] sm:$0xff]   ;;  %v13386_v19 = vld [vmem:[#allocation11 + $0x288] sm:$0xff]  }
 0x467   : > { %1702 = vmatprep.mubr.bf16.mxu1 %v1420_v40  ;;  %v11866_v40 = vpop.f32.mrb[16].mxu0 }
 0x468   : > { %v11867_v58 = vpop.f32.mrb[17].mxu0 }
 0x469   : > { %11903 = vmatpush3.bf16.msra.mxu0 %v13351_v42  ;;  %v13375_v42 = vld [vmem:[#allocation11 + $0x1a8] sm:$0xff]   ;;  %v15293_v31 = vadd.f32 %v11867_v58, %v11866_v40  ;;  %v11869_v34 = vpop.f32.mrb[18].mxu0  ;;  %v13399_v40 = vld [vmem:[#allocation11 + $0x320] sm:$0xff]   ;;  %v13405_v58 = vld [vmem:[#allocation11 + $0x370] sm:$0xff]  }
 0x46a   : > { %11904 = vmatprep.subr.bf16.mxu0 %v13354_v48  ;;  %v13376_v48 = vld [vmem:[#allocation11 + $0x1f0] sm:$0xff]  }
 0x46b   : > { %v13406_v34 = vld [vmem:[#allocation11 + $0x2b0] sm:$0xff]  }
 0x46d   : > { %11905 = vmatpush3.bf16.msra.mxu0 %v13355_v52  ;;  %v11870_v52 = vpop.f32.mrb[19].mxu0 }
 0x46e   : > { %1703 = vmatmul.mubr.bf16.gmra.mrb[56].mxu1 %v1419_v54  ;;  %11906 = vmatprep.subr.bf16.mxu0 %v13356_v44  ;;  %v1953_v54 = vld [vmem:[#allocation3 + $0x150] sm:$0xff]  ;;  %v13408_v52 = vld [vmem:[#allocation11 + $0x2f8] sm:$0xff]  }
 0x46f   : > { %1710 = vmatprep.mubr.bf16.mxu1 %v1422_v13  ;;  %v13380_v13 = vld [vmem:[#allocation11 + $0x2c0] sm:$0xff]   ;;  %v2086_v17 = vpack.c.bf16 %v1953_v54, %v1953_v54 }
 0x470   : > { %v13414_v54 = vld [vmem:[#allocation11 + $0x380] sm:$0xff]  }
 0x471   : > { %11907 = vmatpush3.bf16.msra.mxu0 %v13357_v43 }
 0x472   : > { %11908 = vmatprep.subr.bf16.mxu0 %v13358_v57  ;;  %v13382_v57 = vld [vmem:[#allocation11 + $0x280] sm:$0xff]  }
 0x475   : > { %11909 = vmatpush3.bf16.msra.mxu0 %v13359_v35 }
 0x476   : > { %1711 = vmatmul.mubr.bf16.gmra.mrb[60].mxu1 %v1421_v0  ;;  %11916 = vmatprep.subr.bf16.mxu0 %v13360_v3  ;;  %v13383_v3 = vld [vmem:[#allocation11 + $0x300] sm:$0xff]  }
 0x478   : > { %8830 = vmatmul.mubr.bf16.vlgmr.msra.gmra.mrb[24].mxu0 %v2084_v37  ;;  %v13387_v37 = vld [vmem:[#allocation11 + $0x308] sm:$0xff]  }
 0x479   : > { %11917 = vmatpush3.bf16.msra.mxu0 %v13361_v33  ;;  %8869 = vmatprep.mubr.bf16.mxu0 %v2087_v1  ;;  %v13390_v1 = vld [vmem:[#allocation11 + $0x290] sm:$0xff]  }
 0x47a   : > { %11918 = vmatprep.subr.bf16.mxu0 %v13364_v24  ;;  %v13388_v24 = vld [vmem:[#allocation11 + $0x2d0] sm:$0xff]  }
 0x47d   : > { %11919 = vmatpush3.bf16.msra.mxu0 %v13365_v15 }
 0x47e   : > { %11920 = vmatprep.subr.bf16.mxu0 %v13366_v62  ;;  %v13391_v62 = vld [vmem:[#allocation11 + $0x310] sm:$0xff]  }
 0x481   : > { %11921 = vmatpush3.bf16.msra.mxu0 %v13367_v6  ;;  %v13392_v6 = vld [vmem:[#allocation11 + $0x2d8] sm:$0xff]  }
 0x482   : > { %11922 = vmatprep.subr.bf16.mxu0 %v13368_v18  ;;  %v13393_v18 = vld [vmem:[#allocation11 + $0x358] sm:$0xff]  }
 0x485   : > { %11923 = vmatpush3.bf16.msra.mxu0 %v13369_v45  ;;  %v13395_v45 = vld [vmem:[#allocation11 + $0x318] sm:$0xff]  }
 0x486   : > { %11924 = vmatprep.subr.bf16.mxu0 %v13370_v20  ;;  %v13396_v20 = vld [vmem:[#allocation11 + $0x2e0] sm:$0xff]  }
 0x489   : > { %11925 = vmatpush3.bf16.msra.mxu0 %v13371_v22  ;;  %v13397_v22 = vld [vmem:[#allocation11 + $0x360] sm:$0xff]  }
 0x48a   : > { %v1882_v29 = vpop.permute.xlu1 %1881  ;;  %11926 = vmatprep.subr.bf16.mxu0 %v13374_v30  ;;  %v13398_v30 = vld [vmem:[#allocation11 + $0x2a0] sm:$0xff]  }
 0x48b   : > { %1922 = vst.msk [vmem:[#allocation3 + $0x1f1] sm:$0xff] %vm360_vm0, %v1882_v29  ;;  %v13403_v29 = vld [vmem:[#allocation11 + $0x328] sm:$0xff]  }
 0x48c   : > { %1938 = vst.msk [vmem:[#allocation3 + $0x1f1] sm:$0xff] %vm1832_vm6, %v1736_v5  ;;  %v1801_v14 = vpop.permute.xlu0 %1800 }
 0x48d   : > { %1841 = vst.msk [vmem:[#allocation3 + $0xb1] sm:$0xff] %vm1832_vm6, %v1801_v14  ;;  %11927 = vmatpush3.bf16.msra.mxu0 %v13375_v42  ;;  %v13400_v42 = vld [vmem:[#allocation11 + $0x2e8] sm:$0xff]   ;;  %v13407_v14 = vld [vmem:[#allocation11 + $0x330] sm:$0xff]  }
 0x48e   : > { %v1868_v55 = vpop.permute.xlu1 %1867  ;;  %11928 = vmatprep.subr.bf16.mxu0 %v13376_v48  ;;  %v13404_v48 = vld [vmem:[#allocation11 + $0x2f0] sm:$0xff]  }
 0x48f   : > { %1915 = vst.msk [vmem:[#allocation3 + $0x161] sm:$0xff] %vm360_vm0, %v1868_v55  ;;  %v13410_v55 = vld [vmem:[#allocation11 + $0x2b8] sm:$0xff]  }
 0x490   : > { %1931 = vst.msk [vmem:[#allocation3 + $0x161] sm:$0xff] %vm1832_vm6, %v1722_v59  ;;  %v1787_v44 = vpop.permute.xlu0 %1786 }
 0x491   : > { %1834 = vst.msk [vmem:[#allocation3 + $0x21] sm:$0xff] %vm1832_vm6, %v1787_v44  ;;  %11929 = vmatpush3.bf16.msra.mxu0 %v13377_v26  ;;  %v13409_v26 = vld [vmem:[#allocation11 + $0x378] sm:$0xff]   ;;  %v13412_v44 = vld [vmem:[#allocation11 + $0x3c0] sm:$0xff]  }
 0x492   : > { %v1884_v5 = vpop.permute.xlu1 %1883  ;;  %11930 = vmatprep.subr.bf16.mxu0 %v13378_v23  ;;  %v13411_v23 = vld [vmem:[#allocation11 + $0x338] sm:$0xff]  }
 0x493   : > { %1923 = vst.msk [vmem:[#allocation3 + $0x201] sm:$0xff] %vm360_vm0, %v1884_v5  ;;  %v1962_v56 = vld [vmem:[#allocation3 + $0x1f1] sm:$0xff]  ;;  %v13413_v5 = vld [vmem:[#allocation11 + $0x440] sm:$0xff]  }
 0x494   : > { %1939 = vst.msk [vmem:[#allocation3 + $0x201] sm:$0xff] %vm1832_vm6, %v1738_v39  ;;  %v1803_v63 = vpop.permute.xlu0 %1802  ;;  %v1957_v12 = vld [vmem:[#allocation3 + $0xb0] sm:$0xff]  ;;  %v2093_v0 = vpack.c.bf16 %v1962_v56, %v1962_v56 }
 0x495   : > { %v1959_v43 = vld [vmem:[#allocation3 + $0xb2] sm:$0xff]  ;;  %1842 = vst.msk [vmem:[#allocation3 + $0xc1] sm:$0xff] %vm1832_vm6, %v1803_v63  ;;  %11931 = vmatpush3.bf16.msra.mxu0 %v13379_v61  ;;  %v2089_v59 = vpack.c.bf16 %v1957_v12, %v1957_v12  ;;  %v13415_v12 = vld [vmem:[#allocation11 + $0x400] sm:$0xff]  }
 0x496   : > { %v2091_v50 = vpack.c.bf16 %v1959_v43, %v1959_v43  ;;  %v1870_v35 = vpop.permute.xlu1 %1869  ;;  %11960 = vmatprep.subr.bf16.mxu0 %v13380_v13  ;;  %v13385_v39 = vld [vmem:[#allocation11 + $0x348] sm:$0xff]  }
 0x497   : > { %1916 = vst.msk [vmem:[#allocation3 + $0x171] sm:$0xff] %vm360_vm0, %v1870_v35  ;;  %8909 = vmatprep.mubr.bf16.mxu1 %v2089_v59  ;;  %v1958_v61 = vld [vmem:[#allocation3 + $0xb1] sm:$0xff] }
 0x498   : > { %1932 = vst.msk [vmem:[#allocation3 + $0x171] sm:$0xff] %vm1832_vm6, %v1724_v38  ;;  %8870 = vmatmul.mubr.bf16.vlgmr.msra.gmra.mrb[28].mxu0 %v2086_v17  ;;  %v1789_v60 = vpop.permute.xlu0 %1788  ;;  %8910 = vmatmul.mubr.bf16.vlgmr.msra.gmra.mrb[64].mxu1 %v2088_v53  ;;  %v1961_v13 = vld [vmem:[#allocation3 + $0x1f0] sm:$0xff]  ;;  %v1965_v2 = vld [vmem:[#allocation3 + $0x20] sm:$0xff]  ;;  %v2090_v63 = vpack.c.bf16 %v1958_v61, %v1958_v61 }
 0x499   : > { %1835 = vst.msk [vmem:[#allocation3 + $0x31] sm:$0xff] %vm1832_vm6, %v1789_v60  ;;  %11961 = vmatpush3.bf16.msra.mxu0 %v13382_v57  ;;  %8949 = vmatprep.mubr.bf16.mxu0 %v2091_v50  ;;  %v1967_v43 = vld [vmem:[#allocation3 + $0x22] sm:$0xff]  ;;  %v2092_v59 = vpack.c.bf16 %v1961_v13, %v1961_v13  ;;  %v13416_v57 = vld [vmem:[#allocation11 + $0x3c8] sm:$0xff]   ;;  %v2095_v50 = vpack.c.bf16 %v1965_v2, %v1965_v2  ;;  %v13423_v60 = vld [vmem:[#allocation11 + $0x410] sm:$0xff]  }
 0x49a   : > { %11983 = vmatpush3.bf16.msra.mxu1 %v13383_v3  ;;  %8989 = vmatprep.mubr.bf16.mxu1 %v2093_v0  ;;  %v1886_v33 = vpop.permute.xlu1 %1885  ;;  %v13417_v56 = vld [vmem:[#allocation11 + $0x448] sm:$0xff]   ;;  %v2097_v35 = vpack.c.bf16 %v1967_v43, %v1967_v43  ;;  %v13420_v3 = vld [vmem:[#allocation11 + $0x3d0] sm:$0xff]   ;;  %v13424_v0 = vld [vmem:[#allocation11 + $0x3d8] sm:$0xff]  }
 0x49b   : > { %1924 = vst.msk [vmem:[#allocation3 + $0x211] sm:$0xff] %vm360_vm0, %v1886_v33  ;;  %11962 = vmatprep.subr.bf16.mxu0 %v13384_v9  ;;  %11984 = vmatprep.subr.bf16.mxu1 %v13385_v39  ;;  %v13418_v17 = vld [vmem:[#allocation11 + $0x388] sm:$0xff]   ;;  %v13421_v9 = vld [vmem:[#allocation11 + $0x450] sm:$0xff]   ;;  %v13426_v33 = vld [vmem:[#allocation11 + $0x398] sm:$0xff]  }
 0x49c   : > { %1940 = vst.msk [vmem:[#allocation3 + $0x211] sm:$0xff] %vm1832_vm6, %v1740_v21  ;;  %v1805_v38 = vpop.permute.xlu0 %1804  ;;  %v13394_v21 = vld [vmem:[#allocation11 + $0x298] sm:$0xff]   ;;  %v13419_v53 = vld [vmem:[#allocation11 + $0x408] sm:$0xff]   ;;  %v13422_v39 = vld [vmem:[#allocation11 + $0x390] sm:$0xff]  }
 0x49d   : > { %1843 = vst.msk [vmem:[#allocation3 + $0xd1] sm:$0xff] %vm1832_vm6, %v1805_v38  ;;  %11963 = vmatpush3.bf16.msra.mxu0 %v13386_v19  ;;  %v13425_v19 = vld [vmem:[#allocation11 + $0x458] sm:$0xff]   ;;  %v13430_v38 = vld [vmem:[#allocation11 + $0x3a0] sm:$0xff]   ;;  %v13449_v61 = vld [vmem:[#allocation11 + $0x548] sm:$0xff]  }
 0x49e   : > { %11985 = vmatpush3.bf16.msra.mxu1 %v13387_v37  ;;  %v1872_v15 = vpop.permute.xlu1 %1871  ;;  %11964 = vmatprep.subr.bf16.mxu0 %v13388_v24  ;;  %v13427_v37 = vld [vmem:[#allocation11 + $0x418] sm:$0xff]   ;;  %v13428_v24 = vld [vmem:[#allocation11 + $0x3e0] sm:$0xff]   ;;  %v13450_v13 = vld [vmem:[#allocation11 + $0x488] sm:$0xff]  }
 0x49f   : > { %1917 = vst.msk [vmem:[#allocation3 + $0x181] sm:$0xff] %vm360_vm0, %v1872_v15  ;;  %11986 = vmatprep.subr.bf16.mxu1 %v13389_v28  ;;  %v13429_v28 = vld [vmem:[#allocation11 + $0x460] sm:$0xff]   ;;  %v13432_v15 = vld [vmem:[#allocation11 + $0x3e8] sm:$0xff]   ;;  %v13452_v2 = vld [vmem:[#allocation11 + $0x4d0] sm:$0xff]  }
 0x4a0   : > { %1933 = vst.msk [vmem:[#allocation3 + $0x181] sm:$0xff] %vm1832_vm6, %v1726_v16  ;;  %v1791_v11 = vpop.permute.xlu0 %1790  ;;  %v13402_v16 = vld [vmem:[#allocation11 + $0x2a8] sm:$0xff]   ;;  %v13455_v43 = vld [vmem:[#allocation11 + $0x510] sm:$0xff]  }
 0x4a1   : > { %1836 = vst.msk [vmem:[#allocation3 + $0x41] sm:$0xff] %vm1832_vm6, %v1791_v11  ;;  %11965 = vmatpush3.bf16.msra.mxu0 %v13390_v1  ;;  %v13431_v1 = vld [vmem:[#allocation11 + $0x420] sm:$0xff]   ;;  %v13436_v11 = vld [vmem:[#allocation11 + $0x3f0] sm:$0xff]  }
 0x4a2   : > { %11987 = vmatpush3.bf16.msra.mxu1 %v13391_v62  ;;  %11966 = vmatprep.subr.bf16.mxu0 %v13392_v6  ;;  %v13433_v62 = vld [vmem:[#allocation11 + $0x468] sm:$0xff]  }
 0x4a3   : > { %11988 = vmatprep.subr.bf16.mxu1 %v13393_v18  ;;  %v13434_v6 = vld [vmem:[#allocation11 + $0x3a8] sm:$0xff]  }
 0x4a4   : > { %v13435_v18 = vld [vmem:[#allocation11 + $0x428] sm:$0xff]  }
 0x4a5   : > { %11967 = vmatpush3.bf16.msra.mxu0 %v13394_v21  ;;  %v13437_v21 = vld [vmem:[#allocation11 + $0x470] sm:$0xff]  }
 0x4a6   : > { %11989 = vmatpush3.bf16.msra.mxu1 %v13395_v45  ;;  %11968 = vmatprep.subr.bf16.mxu0 %v13396_v20  ;;  %v13438_v45 = vld [vmem:[#allocation11 + $0x3b0] sm:$0xff]  }
 0x4a7   : > { %11990 = vmatprep.subr.bf16.mxu1 %v13397_v22  ;;  %v13439_v20 = vld [vmem:[#allocation11 + $0x430] sm:$0xff]   ;;  %v13440_v22 = vld [vmem:[#allocation11 + $0x3f8] sm:$0xff]  }
 0x4a8   : > { %v1985_v47 = vld [vmem:[#allocation3 + $0x170] sm:$0xff] }
 0x4a9   : > { %11969 = vmatpush3.bf16.msra.mxu0 %v13398_v30  ;;  %v13441_v30 = vld [vmem:[#allocation11 + $0x478] sm:$0xff]  }
 0x4aa   : > { %11991 = vmatpush3.bf16.msra.mxu1 %v13399_v40  ;;  %11970 = vmatprep.subr.bf16.mxu0 %v13400_v42  ;;  %v13442_v40 = vld [vmem:[#allocation11 + $0x3b8] sm:$0xff]  }
 0x4ab   : > { %11992 = vmatprep.subr.bf16.mxu1 %v13401_v8  ;;  %v13443_v42 = vld [vmem:[#allocation11 + $0x438] sm:$0xff]   ;;  %v13444_v8 = vld [vmem:[#allocation11 + $0x4c0] sm:$0xff]  }
 0x4ad   : > { %11971 = vmatpush3.bf16.msra.mxu0 %v13402_v16  ;;  %v1963_v16 = vld [vmem:[#allocation3 + $0x1f2] sm:$0xff] }
 0x4ae   : > { %11993 = vmatpush3.bf16.msra.mxu1 %v13403_v29  ;;  %11972 = vmatprep.subr.bf16.mxu0 %v13404_v48  ;;  %v13445_v29 = vld [vmem:[#allocation11 + $0x540] sm:$0xff]  }
 0x4af   : > { %11994 = vmatprep.subr.bf16.mxu1 %v13405_v58  ;;  %v1966_v48 = vld [vmem:[#allocation3 + $0x21] sm:$0xff] }
 0x4b0   : > { %v13446_v58 = vld [vmem:[#allocation11 + $0x480] sm:$0xff]  }
 0x4b1   : > { %11973 = vmatpush3.bf16.msra.mxu0 %v13406_v34  ;;  %v1970_v34 = vld [vmem:[#allocation3 + $0x161] sm:$0xff] }
 0x4b2   : > { %11995 = vmatpush3.bf16.msra.mxu1 %v13407_v14  ;;  %11974 = vmatprep.subr.bf16.mxu0 %v13408_v52  ;;  %v2094_v14 = vpack.c.bf16 %v1963_v16, %v1963_v16  ;;  %v13447_v52 = vld [vmem:[#allocation11 + $0x500] sm:$0xff]   ;;  %v13481_v16 = vld [vmem:[#allocation11 + $0x648] sm:$0xff]  }
 0x4b3   : > { %11996 = vmatprep.subr.bf16.mxu1 %v13409_v26  ;;  %v1973_v26 = vld [vmem:[#allocation3 + $0xc0] sm:$0xff] }
 0x4b5   : > { %11975 = vmatpush3.bf16.msra.mxu0 %v13410_v55  ;;  %v2096_v55 = vpack.c.bf16 %v1966_v48, %v1966_v48  ;;  %v13482_v48 = vld [vmem:[#allocation11 + $0x588] sm:$0xff]  }
 0x4b6   : > { %11997 = vmatpush3.bf16.msra.mxu1 %v13411_v23  ;;  %12004 = vmatprep.subr.bf16.mxu0 %v13412_v44  ;;  %v13448_v23 = vld [vmem:[#allocation11 + $0x4c8] sm:$0xff]   ;;  %v2099_v44 = vpack.c.bf16 %v1970_v34, %v1970_v34  ;;  %v13484_v34 = vld [vmem:[#allocation11 + $0x5d0] sm:$0xff]  }
 0x4b7   : > { %12026 = vmatprep.subr.bf16.mxu1 %v13413_v5  ;;  %v2101_v5 = vpack.c.bf16 %v1973_v26, %v1973_v26  ;;  %v13487_v26 = vld [vmem:[#allocation11 + $0x610] sm:$0xff]  }
 0x4b8   : > { %8950 = vmatmul.mubr.bf16.vlgmr.msra.gmra.mrb[32].mxu0 %v2090_v63  ;;  %v13453_v63 = vld [vmem:[#allocation11 + $0x550] sm:$0xff]  }
 0x4b9   : > { %8990 = vmatmul.mubr.bf16.vlgmr.msra.gmra.mrb[68].mxu1 %v2092_v59  ;;  %12005 = vmatpush3.bf16.msra.mxu0 %v13414_v54  ;;  %v13451_v54 = vld [vmem:[#allocation11 + $0x508] sm:$0xff]   ;;  %v13456_v59 = vld [vmem:[#allocation11 + $0x4d8] sm:$0xff]  }
 0x4ba   : > { %9029 = vmatprep.mubr.bf16.mxu0 %v2095_v50  ;;  %12027 = vmatpush3.bf16.msra.mxu1 %v13415_v12  ;;  %v13454_v12 = vld [vmem:[#allocation11 + $0x490] sm:$0xff]   ;;  %v13458_v50 = vld [vmem:[#allocation11 + $0x498] sm:$0xff]  }
 0x4bb   : > { %9069 = vmatprep.mubr.bf16.mxu1 %v2097_v35  ;;  %12006 = vmatprep.subr.bf16.mxu0 %v13416_v57  ;;  %v13457_v57 = vld [vmem:[#allocation11 + $0x558] sm:$0xff]   ;;  %v13460_v35 = vld [vmem:[#allocation11 + $0x4e0] sm:$0xff]  }
 0x4bc   : > { %12028 = vmatprep.subr.bf16.mxu1 %v13417_v56  ;;  %v13459_v56 = vld [vmem:[#allocation11 + $0x518] sm:$0xff]  }
 0x4bd   : > { %12007 = vmatpush3.bf16.msra.mxu0 %v13418_v17  ;;  %v13461_v17 = vld [vmem:[#allocation11 + $0x560] sm:$0xff]  }
 0x4be   : > { %12029 = vmatpush3.bf16.msra.mxu1 %v13419_v53  ;;  %12008 = vmatprep.subr.bf16.mxu0 %v13420_v3  ;;  %v13462_v53 = vld [vmem:[#allocation11 + $0x4a0] sm:$0xff]  }
 0x4bf   : > { %12030 = vmatprep.subr.bf16.mxu1 %v13421_v9  ;;  %v13463_v3 = vld [vmem:[#allocation11 + $0x520] sm:$0xff]   ;;  %v13464_v9 = vld [vmem:[#allocation11 + $0x4e8] sm:$0xff]  }
 0x4c1   : > { %12009 = vmatpush3.bf16.msra.mxu0 %v13422_v39  ;;  %v13465_v39 = vld [vmem:[#allocation11 + $0x568] sm:$0xff]  }
 0x4c2   : > { %12031 = vmatpush3.bf16.msra.mxu1 %v13423_v60  ;;  %12010 = vmatprep.subr.bf16.mxu0 %v13424_v0  ;;  %v13466_v60 = vld [vmem:[#allocation11 + $0x4a8] sm:$0xff]  }
 0x4c3   : > { %12032 = vmatprep.subr.bf16.mxu1 %v13425_v19  ;;  %v13467_v0 = vld [vmem:[#allocation11 + $0x528] sm:$0xff]   ;;  %v13468_v19 = vld [vmem:[#allocation11 + $0x4f0] sm:$0xff]  }
 0x4c5   : > { %12011 = vmatpush3.bf16.msra.mxu0 %v13426_v33  ;;  %v13469_v33 = vld [vmem:[#allocation11 + $0x570] sm:$0xff]  }
 0x4c6   : > { %12033 = vmatpush3.bf16.msra.mxu1 %v13427_v37  ;;  %12012 = vmatprep.subr.bf16.mxu0 %v13428_v24  ;;  %v13470_v37 = vld [vmem:[#allocation11 + $0x4b0] sm:$0xff]  }
 0x4c7   : > { %12034 = vmatprep.subr.bf16.mxu1 %v13429_v28  ;;  %v13471_v24 = vld [vmem:[#allocation11 + $0x530] sm:$0xff]   ;;  %v13472_v28 = vld [vmem:[#allocation11 + $0x4f8] sm:$0xff]  }
 0x4c9   : > { %12013 = vmatpush3.bf16.msra.mxu0 %v13430_v38  ;;  %v13473_v38 = vld [vmem:[#allocation11 + $0x578] sm:$0xff]  }
 0x4ca   : > { %12035 = vmatpush3.bf16.msra.mxu1 %v13431_v1  ;;  %12014 = vmatprep.subr.bf16.mxu0 %v13432_v15  ;;  %v13474_v1 = vld [vmem:[#allocation11 + $0x4b8] sm:$0xff]  }
 0x4cb   : > { %12036 = vmatprep.subr.bf16.mxu1 %v13433_v62  ;;  %v13475_v15 = vld [vmem:[#allocation11 + $0x538] sm:$0xff]   ;;  %v13476_v62 = vld [vmem:[#allocation11 + $0x5c0] sm:$0xff]  }
 0x4cd   : > { %12015 = vmatpush3.bf16.msra.mxu0 %v13434_v6  ;;  %v1969_v6 = vld [vmem:[#allocation3 + $0x160] sm:$0xff] }
 0x4ce   : > { %12037 = vmatpush3.bf16.msra.mxu1 %v13435_v18  ;;  %12016 = vmatprep.subr.bf16.mxu0 %v13436_v11  ;;  %v13477_v18 = vld [vmem:[#allocation11 + $0x640] sm:$0xff]  }
 0x4cf   : > { %12038 = vmatprep.subr.bf16.mxu1 %v13437_v21  ;;  %v1971_v11 = vld [vmem:[#allocation3 + $0x162] sm:$0xff] }
 0x4d0   : > { %v13478_v21 = vld [vmem:[#allocation11 + $0x580] sm:$0xff]  }
 0x4d1   : > { %12017 = vmatpush3.bf16.msra.mxu0 %v13438_v45  ;;  %v1975_v45 = vld [vmem:[#allocation3 + $0xc2] sm:$0xff] }
 0x4d2   : > { %12039 = vmatpush3.bf16.msra.mxu1 %v13439_v20  ;;  %12018 = vmatprep.subr.bf16.mxu0 %v13440_v22  ;;  %v2098_v20 = vpack.c.bf16 %v1969_v6, %v1969_v6  ;;  %v13479_v22 = vld [vmem:[#allocation11 + $0x600] sm:$0xff]   ;;  %v13513_v6 = vld [vmem:[#allocation11 + $0x748] sm:$0xff]  }
 0x4d3   : > { %12040 = vmatprep.subr.bf16.mxu1 %v13441_v30  ;;  %v1978_v30 = vld [vmem:[#allocation3 + $0x201] sm:$0xff] }
 0x4d5   : > { %12019 = vmatpush3.bf16.msra.mxu0 %v13442_v40  ;;  %v2100_v40 = vpack.c.bf16 %v1971_v11, %v1971_v11  ;;  %v13514_v11 = vld [vmem:[#allocation11 + $0x688] sm:$0xff]  }
 0x4d6   : > { %12041 = vmatpush3.bf16.msra.mxu1 %v13443_v42  ;;  %12048 = vmatprep.subr.bf16.mxu0 %v13444_v8  ;;  %v13480_v42 = vld [vmem:[#allocation11 + $0x5c8] sm:$0xff]   ;;  %v2103_v8 = vpack.c.bf16 %v1975_v45, %v1975_v45  ;;  %v13516_v45 = vld [vmem:[#allocation11 + $0x6d0] sm:$0xff]  }
 0x4d7   : > { %12070 = vmatprep.subr.bf16.mxu1 %v13445_v29  ;;  %v2105_v29 = vpack.c.bf16 %v1978_v30, %v1978_v30  ;;  %v13519_v30 = vld [vmem:[#allocation11 + $0x710] sm:$0xff]  }
 0x4d8   : > { %9030 = vmatmul.mubr.bf16.vlgmr.msra.gmra.mrb[36].mxu0 %v2094_v14  ;;  %v13485_v14 = vld [vmem:[#allocation11 + $0x650] sm:$0xff]  }
 0x4d9   : > { %9070 = vmatmul.mubr.bf16.vlgmr.msra.gmra.mrb[72].mxu1 %v2096_v55  ;;  %12049 = vmatpush3.bf16.msra.mxu0 %v13446_v58  ;;  %v13483_v58 = vld [vmem:[#allocation11 + $0x608] sm:$0xff]   ;;  %v13488_v55 = vld [vmem:[#allocation11 + $0x5d8] sm:$0xff]  }
 0x4da   : > { %9109 = vmatprep.mubr.bf16.mxu0 %v2099_v44  ;;  %12071 = vmatpush3.bf16.msra.mxu1 %v13447_v52  ;;  %v13486_v52 = vld [vmem:[#allocation11 + $0x590] sm:$0xff]   ;;  %v13490_v44 = vld [vmem:[#allocation11 + $0x598] sm:$0xff]  }
 0x4db   : > { %9149 = vmatprep.mubr.bf16.mxu1 %v2101_v5  ;;  %12050 = vmatprep.subr.bf16.mxu0 %v13448_v23  ;;  %v13489_v23 = vld [vmem:[#allocation11 + $0x658] sm:$0xff]   ;;  %v13492_v5 = vld [vmem:[#allocation11 + $0x5e0] sm:$0xff]  }
 0x4dc   : > { %12072 = vmatprep.subr.bf16.mxu1 %v13449_v61  ;;  %v13491_v61 = vld [vmem:[#allocation11 + $0x618] sm:$0xff]  }
 0x4dd   : > { %12051 = vmatpush3.bf16.msra.mxu0 %v13450_v13  ;;  %v13493_v13 = vld [vmem:[#allocation11 + $0x660] sm:$0xff]  }
 0x4de   : > { %12073 = vmatpush3.bf16.msra.mxu1 %v13451_v54  ;;  %12052 = vmatprep.subr.bf16.mxu0 %v13452_v2  ;;  %v13494_v54 = vld [vmem:[#allocation11 + $0x5a0] sm:$0xff]  }
 0x4df   : > { %12074 = vmatprep.subr.bf16.mxu1 %v13453_v63  ;;  %v13495_v2 = vld [vmem:[#allocation11 + $0x620] sm:$0xff]   ;;  %v13496_v63 = vld [vmem:[#allocation11 + $0x5e8] sm:$0xff]  }
 0x4e1   : > { %12053 = vmatpush3.bf16.msra.mxu0 %v13454_v12  ;;  %v13497_v12 = vld [vmem:[#allocation11 + $0x668] sm:$0xff]  }
 0x4e2   : > { %12075 = vmatpush3.bf16.msra.mxu1 %v13455_v43  ;;  %12054 = vmatprep.subr.bf16.mxu0 %v13456_v59  ;;  %v13498_v43 = vld [vmem:[#allocation11 + $0x5a8] sm:$0xff]  }
 0x4e3   : > { %12076 = vmatprep.subr.bf16.mxu1 %v13457_v57  ;;  %v13499_v59 = vld [vmem:[#allocation11 + $0x628] sm:$0xff]   ;;  %v13500_v57 = vld [vmem:[#allocation11 + $0x5f0] sm:$0xff]  }
 0x4e5   : > { %12055 = vmatpush3.bf16.msra.mxu0 %v13458_v50  ;;  %v13501_v50 = vld [vmem:[#allocation11 + $0x670] sm:$0xff]  }
 0x4e6   : > { %12077 = vmatpush3.bf16.msra.mxu1 %v13459_v56  ;;  %12056 = vmatprep.subr.bf16.mxu0 %v13460_v35  ;;  %v13502_v56 = vld [vmem:[#allocation11 + $0x5b0] sm:$0xff]  }
 0x4e7   : > { %12078 = vmatprep.subr.bf16.mxu1 %v13461_v17  ;;  %v13503_v35 = vld [vmem:[#allocation11 + $0x630] sm:$0xff]   ;;  %v13504_v17 = vld [vmem:[#allocation11 + $0x5f8] sm:$0xff]  }
 0x4e9   : > { %12057 = vmatpush3.bf16.msra.mxu0 %v13462_v53  ;;  %v13505_v53 = vld [vmem:[#allocation11 + $0x678] sm:$0xff]  }
 0x4ea   : > { %12079 = vmatpush3.bf16.msra.mxu1 %v13463_v3  ;;  %12058 = vmatprep.subr.bf16.mxu0 %v13464_v9  ;;  %v13506_v3 = vld [vmem:[#allocation11 + $0x5b8] sm:$0xff]  }
 0x4eb   : > { %12080 = vmatprep.subr.bf16.mxu1 %v13465_v39  ;;  %v13507_v9 = vld [vmem:[#allocation11 + $0x638] sm:$0xff]   ;;  %v13508_v39 = vld [vmem:[#allocation11 + $0x6c0] sm:$0xff]  }
 0x4ed   : > { %12059 = vmatpush3.bf16.msra.mxu0 %v13466_v60  ;;  %v1974_v60 = vld [vmem:[#allocation3 + $0xc1] sm:$0xff] }
 0x4ee   : > { %12081 = vmatpush3.bf16.msra.mxu1 %v13467_v0  ;;  %12060 = vmatprep.subr.bf16.mxu0 %v13468_v19  ;;  %v13509_v0 = vld [vmem:[#allocation11 + $0x740] sm:$0xff]  }
 0x4ef   : > { %12082 = vmatprep.subr.bf16.mxu1 %v13469_v33  ;;  %v1977_v19 = vld [vmem:[#allocation3 + $0x200] sm:$0xff] }
 0x4f0   : > { %v13510_v33 = vld [vmem:[#allocation11 + $0x680] sm:$0xff]  }
 0x4f1   : > { %12061 = vmatpush3.bf16.msra.mxu0 %v13470_v37  ;;  %v1981_v37 = vld [vmem:[#allocation3 + $0x30] sm:$0xff] }
 0x4f2   : > { %12083 = vmatpush3.bf16.msra.mxu1 %v13471_v24  ;;  %12062 = vmatprep.subr.bf16.mxu0 %v13472_v28  ;;  %v2102_v24 = vpack.c.bf16 %v1974_v60, %v1974_v60  ;;  %v13511_v28 = vld [vmem:[#allocation11 + $0x700] sm:$0xff]  }
 0x4f3   : > { %12084 = vmatprep.subr.bf16.mxu1 %v13473_v38  ;;  %v1983_v38 = vld [vmem:[#allocation3 + $0x32] sm:$0xff] }
 0x4f5   : > { %12063 = vmatpush3.bf16.msra.mxu0 %v13474_v1  ;;  %v2104_v1 = vpack.c.bf16 %v1977_v19, %v1977_v19 }
 0x4f6   : > { %12085 = vmatpush3.bf16.msra.mxu1 %v13475_v15  ;;  %12092 = vmatprep.subr.bf16.mxu0 %v13476_v62  ;;  %v13512_v15 = vld [vmem:[#allocation11 + $0x6c8] sm:$0xff]   ;;  %v2107_v62 = vpack.c.bf16 %v1981_v37, %v1981_v37 }
 0x4f7   : > { %12114 = vmatprep.subr.bf16.mxu1 %v13477_v18  ;;  %v2109_v18 = vpack.c.bf16 %v1983_v38, %v1983_v38 }
 0x4f8   : > { %9110 = vmatmul.mubr.bf16.vlgmr.msra.gmra.mrb[40].mxu0 %v2098_v20  ;;  %v13517_v20 = vld [vmem:[#allocation11 + $0x750] sm:$0xff]  }
 0x4f9   : > { %9150 = vmatmul.mubr.bf16.vlgmr.msra.gmra.mrb[76].mxu1 %v2100_v40  ;;  %12093 = vmatpush3.bf16.msra.mxu0 %v13478_v21  ;;  %v13515_v21 = vld [vmem:[#allocation11 + $0x708] sm:$0xff]   ;;  %v13520_v40 = vld [vmem:[#allocation11 + $0x6d8] sm:$0xff]  }
 0x4fa   : > { %9189 = vmatprep.mubr.bf16.mxu0 %v2103_v8  ;;  %12115 = vmatpush3.bf16.msra.mxu1 %v13479_v22  ;;  %v13518_v22 = vld [vmem:[#allocation11 + $0x690] sm:$0xff]   ;;  %v13522_v8 = vld [vmem:[#allocation11 + $0x698] sm:$0xff]  }
 0x4fb   : > { %9229 = vmatprep.mubr.bf16.mxu1 %v2105_v29  ;;  %12094 = vmatprep.subr.bf16.mxu0 %v13480_v42  ;;  %v13521_v42 = vld [vmem:[#allocation11 + $0x758] sm:$0xff]   ;;  %v13524_v29 = vld [vmem:[#allocation11 + $0x6e0] sm:$0xff]  }
 0x4fc   : > { %12116 = vmatprep.subr.bf16.mxu1 %v13481_v16  ;;  %v13523_v16 = vld [vmem:[#allocation11 + $0x718] sm:$0xff]  }
 0x4fd   : > { %12095 = vmatpush3.bf16.msra.mxu0 %v13482_v48  ;;  %v13525_v48 = vld [vmem:[#allocation11 + $0x760] sm:$0xff]  }
 0x4fe   : > { %12117 = vmatpush3.bf16.msra.mxu1 %v13483_v58  ;;  %12096 = vmatprep.subr.bf16.mxu0 %v13484_v34  ;;  %v13526_v58 = vld [vmem:[#allocation11 + $0x6a0] sm:$0xff]  }
 0x4ff   : > { %12118 = vmatprep.subr.bf16.mxu1 %v13485_v14  ;;  %v13527_v34 = vld [vmem:[#allocation11 + $0x720] sm:$0xff]   ;;  %v13528_v14 = vld [vmem:[#allocation11 + $0x6e8] sm:$0xff]  }
 0x501   : > { %12097 = vmatpush3.bf16.msra.mxu0 %v13486_v52  ;;  %v13529_v52 = vld [vmem:[#allocation11 + $0x768] sm:$0xff]  }
 0x502   : > { %12119 = vmatpush3.bf16.msra.mxu1 %v13487_v26  ;;  %12098 = vmatprep.subr.bf16.mxu0 %v13488_v55  ;;  %v13530_v55 = vld [vmem:[#allocation11 + $0x6a8] sm:$0xff]  }
 0x503   : > { %12120 = vmatprep.subr.bf16.mxu1 %v13489_v23  ;;  %v10919_v23 = vld [vmem:[#allocation12] ss:$0 sm:$0xff] }
 0x505   : > { %12099 = vmatpush3.bf16.msra.mxu0 %v13490_v44 }
 0x506   : > { %12121 = vmatpush3.bf16.msra.mxu1 %v13491_v61  ;;  %12100 = vmatprep.subr.bf16.mxu0 %v13492_v5  ;;  %v13531_v61 = vld [vmem:[#allocation11 + $0x728] sm:$0xff]   ;;  %v13532_v5 = vld [vmem:[#allocation11 + $0x6f0] sm:$0xff]  }
 0x507   : > { %12122 = vmatprep.subr.bf16.mxu1 %v13493_v13 }
 0x509   : > { %12101 = vmatpush3.bf16.msra.mxu0 %v13494_v54 }
 0x50a   : > { %12123 = vmatpush3.bf16.msra.mxu1 %v13495_v2  ;;  %12102 = vmatprep.subr.bf16.mxu0 %v13496_v63  ;;  %v13533_v63 = vld [vmem:[#allocation11 + $0x770] sm:$0xff]  }
 0x50b   : > { %12124 = vmatprep.subr.bf16.mxu1 %v13497_v12 }
 0x50d   : > { %12103 = vmatpush3.bf16.msra.mxu0 %v13498_v43 }
 0x50e   : > { %12125 = vmatpush3.bf16.msra.mxu1 %v13499_v59  ;;  %12104 = vmatprep.subr.bf16.mxu0 %v13500_v57  ;;  %v8752_v59 = vadd.f32 %v15293_v31, %v10919_v23  ;;  %v15325_v57 = vld [vmem:[#allocation9] ss:$0 sm:$0xff] }
 0x50f   : > { %12126 = vmatprep.subr.bf16.mxu1 %v13501_v50  ;;  %v13537_v31 = vld [vmem:[#allocation11 + $0x778] sm:$0xff]   ;;  %v15358_v23 = vadd.f32 %v15325_v57, %v15171_v25 }
 0x511   : > { %12105 = vmatpush3.bf16.msra.mxu0 %v13502_v56 }
 0x512   : > { %12127 = vmatpush3.bf16.msra.mxu1 %v13503_v35  ;;  %12106 = vmatprep.subr.bf16.mxu0 %v13504_v17 }
 0x513   : > { %12128 = vmatprep.subr.bf16.mxu1 %v13505_v53  ;;  %v13534_v53 = vld [vmem:[#allocation11 + $0x6b0] sm:$0xff]  }
 0x515   : > { %12107 = vmatpush3.bf16.msra.mxu0 %v13506_v3 }
 0x516   : > { %12129 = vmatpush3.bf16.msra.mxu1 %v13507_v9  ;;  %12136 = vmatprep.subr.bf16.mxu0 %v13508_v39  ;;  %v13535_v9 = vld [vmem:[#allocation11 + $0x730] sm:$0xff]   ;;  %v13536_v39 = vld [vmem:[#allocation11 + $0x6f8] sm:$0xff]  }
 0x517   : > { %12158 = vmatprep.subr.bf16.mxu1 %v13509_v0 }
 0x518   : > { %9190 = vmatmul.mubr.bf16.vlgmr.msra.gmra.mrb[44].mxu0 %v2102_v24 }
 0x519   : > { %9230 = vmatmul.mubr.bf16.vlgmr.msra.gmra.mrb[80].mxu1 %v2104_v1  ;;  %12137 = vmatpush3.bf16.msra.mxu0 %v13510_v33  ;;  %v15335_v33 = vadd.f32 %v15325_v57, %v15162_v7  ;;  %v13539_v1 = vld [vmem:[#allocation11 + $0x738] sm:$0xff]  }
 0x51a   : > { %9269 = vmatprep.mubr.bf16.mxu0 %v2107_v62  ;;  %12159 = vmatpush3.bf16.msra.mxu1 %v13511_v28  ;;  %v13538_v28 = vld [vmem:[#allocation11 + $0x6b8] sm:$0xff]  }
 0x51b   : > { %9309 = vmatprep.mubr.bf16.mxu1 %v2109_v18  ;;  %12138 = vmatprep.subr.bf16.mxu0 %v13512_v15  ;;  %v13540_v15 = vld [vmem:[#allocation11 + $0x7c0] sm:$0xff]  }
 0x51c   : > { %12160 = vmatprep.subr.bf16.mxu1 %v13513_v6  ;;  %v1979_v7 = vld [vmem:[#allocation3 + $0x202] sm:$0xff] }
 0x51d   : > { %12139 = vmatpush3.bf16.msra.mxu0 %v13514_v11  ;;  %v13541_v18 = vld [vmem:[#allocation11 + $0x840] sm:$0xff]  }
 0x51e   : > { %12161 = vmatpush3.bf16.msra.mxu1 %v13515_v21  ;;  %12140 = vmatprep.subr.bf16.mxu0 %v13516_v45  ;;  %v1982_v21 = vld [vmem:[#allocation3 + $0x31] sm:$0xff]  ;;  %v1728_v45 = vmax.f32 %v15335_v33, 0.0 }
 0x51f   : > { %12162 = vmatprep.subr.bf16.mxu1 %v13517_v20  ;;  %v13662_v33 = vld [vmem:[#allocation11 + $0xab0] sm:$0xff]  }
 0x521   : > { %12141 = vmatpush3.bf16.msra.mxu0 %v13518_v22 }
 0x522   : > { %12163 = vmatpush3.bf16.msra.mxu1 %v13519_v30  ;;  %12142 = vmatprep.subr.bf16.mxu0 %v13520_v40  ;;  %v13542_v30 = vld [vmem:[#allocation11 + $0x780] sm:$0xff]   ;;  %v1986_v40 = vld [vmem:[#allocation3 + $0x171] sm:$0xff] }
 0x523   : > { %12164 = vmatprep.subr.bf16.mxu1 %v13521_v42  ;;  %v2106_v42 = vpack.c.bf16 %v1979_v7, %v1979_v7  ;;  %v2111_v10 = vpack.c.bf16 %v1986_v40, %v1986_v40  ;;  %v13559_v7 = vld [vmem:[#allocation11 + $0x820] sm:$0xff]   ;;  %v13562_v40 = vld [vmem:[#allocation11 + $0x7a8] sm:$0xff]  }
 0x525   : > { %12143 = vmatpush3.bf16.msra.mxu0 %v13522_v8  ;;  %v13543_v8 = vld [vmem:[#allocation11 + $0x800] sm:$0xff]  }
 0x526   : > { %12165 = vmatpush3.bf16.msra.mxu1 %v13523_v16  ;;  %12144 = vmatprep.subr.bf16.mxu0 %v13524_v29  ;;  %v1989_v16 = vld [vmem:[#allocation3 + $0xd0] sm:$0xff] }
 0x527   : > { %12166 = vmatprep.subr.bf16.mxu1 %v13525_v48 }
 0x529   : > { %12145 = vmatpush3.bf16.msra.mxu0 %v13526_v58  ;;  %v11820_v26 = vpop.f32.mrb[44].mxu1  ;;  %v2108_v58 = vpack.c.bf16 %v1982_v21, %v1982_v21 }
 0x52a   : > { %12167 = vmatpush3.bf16.msra.mxu1 %v13527_v34  ;;  %v11821_v44 = vpop.f32.mrb[45].mxu1  ;;  %12146 = vmatprep.subr.bf16.mxu0 %v13528_v14  ;;  %v2113_v14 = vpack.c.bf16 %v1989_v16, %v1989_v16 }
 0x52b   : > { %v11822_v13 = vadd.f32 %v11821_v44, %v11820_v26  ;;  %v11823_v54 = vpop.f32.mrb[46].mxu1  ;;  %v11888_v2 = vpop.f32.mrb[20].mxu0  ;;  %12168 = vmatprep.subr.bf16.mxu1 %v13529_v52  ;;  %v13545_v26 = vld [vmem:[#allocation11 + $0x848] sm:$0xff]  }
 0x52c   : > { %v11824_v12 = vpop.f32.mrb[47].mxu1  ;;  %v11889_v43 = vpop.f32.mrb[21].mxu0 }
 0x52d   : > { %v1681_v50 = vadd.f32 %v15325_v57, %v11822_v13  ;;  %v11825_v56 = vadd.f32 %v11824_v12, %v11823_v54  ;;  %v11890_v35 = vadd.f32 %v11889_v43, %v11888_v2  ;;  %12147 = vmatpush3.bf16.msra.mxu0 %v13530_v55  ;;  %v11891_v17 = vpop.f32.mrb[22].mxu0  ;;  %v13546_v55 = vld [vmem:[#allocation11 + $0x788] sm:$0xff]   ;;  %v13549_v2 = vld [vmem:[#allocation11 + $0x850] sm:$0xff]  }
 0x52e   : > { %12169 = vmatpush3.bf16.msra.mxu1 %v13531_v61  ;;  %v11892_v3 = vpop.f32.mrb[23].mxu0  ;;  %12148 = vmatprep.subr.bf16.mxu0 %v13532_v5  ;;  %v13547_v61 = vld [vmem:[#allocation11 + $0x808] sm:$0xff]   ;;  %v13548_v5 = vld [vmem:[#allocation11 + $0x7d0] sm:$0xff]  }
 0x52f   : > { %v1741_v60 = vmax.f32 %v1681_v50, 0.0  ;;  %v15329_v0 = vadd.f32 %v15325_v57, %v11825_v56  ;;  %v15331_v19 = vadd.f32 %v11890_v35, %v8752_v59  ;;  %12170 = vmatprep.subr.bf16.mxu1 %v13533_v63  ;;  %v13550_v43 = vld [vmem:[#allocation11 + $0x790] sm:$0xff]   ;;  %v1730_v59 = vmax.f32 %v15358_v23, 0.0  ;;  %v13552_v56 = vld [vmem:[#allocation11 + $0x7d8] sm:$0xff]  }
 0x530   : > { %v13551_v50 = vld [vmem:[#allocation11 + $0x810] sm:$0xff]  }
 0x531   : > { %1763 = vst.msk [vmem:[#allocation3 + $0xe1] sm:$0xff] %vm360_vm0, %v1741_v60  ;;  %v1742_v37 = vmax.f32 %v15329_v0, 0.0  ;;  %12149 = vmatpush3.bf16.msra.mxu0 %v13534_v53  ;;  %v11826_v24 = vpop.f32.mrb[48].mxu1  ;;  %1887 = vrot.lane.b32.xlu1 %v1741_v60, %s14336_s12  ;;  %v13553_v53 = vld [vmem:[#allocation11 + $0x858] sm:$0xff]   ;;  %v15379_v60 = vadd.f32 %v15325_v57, %v15180_v4 }
 0x532   : > { %12171 = vmatpush3.bf16.msra.mxu1 %v13535_v9  ;;  %v11827_v38 = vpop.f32.mrb[49].mxu1  ;;  %12150 = vmatprep.subr.bf16.mxu0 %v13536_v39  ;;  %v13554_v39 = vld [vmem:[#allocation11 + $0x798] sm:$0xff]  }
 0x533   : > { %v11828_v62 = vadd.f32 %v11827_v38, %v11826_v24  ;;  %v11829_v6 = vpop.f32.mrb[50].mxu1  ;;  %1806 = vrot.lane.b32.xlu0 %v1742_v37, %s14336_s12  ;;  %12172 = vmatprep.subr.bf16.mxu1 %v13537_v31  ;;  %v13556_v31 = vld [vmem:[#allocation11 + $0x7e0] sm:$0xff]  }
 0x534   : > { %v11830_v11 = vpop.f32.mrb[51].mxu1  ;;  %v13557_v38 = vld [vmem:[#allocation11 + $0x860] sm:$0xff]  }
 0x535   : > { %v1689_v20 = vadd.f32 %v15325_v57, %v11828_v62  ;;  %v11831_v22 = vadd.f32 %v11830_v11, %v11829_v6  ;;  %12151 = vmatpush3.bf16.msra.mxu0 %v13538_v28  ;;  %1873 = vrot.lane.b32.xlu1 %v1727_v41, %s14336_s12  ;;  %v13544_v41 = vld [vmem:[#allocation11 + $0x7c8] sm:$0xff]   ;;  %v13558_v62 = vld [vmem:[#allocation11 + $0x7a0] sm:$0xff]   ;;  %v1732_v6 = vmax.f32 %v15379_v60, 0.0 }
 0x536   : > { %12173 = vmatpush3.bf16.msra.mxu1 %v13539_v1  ;;  %12180 = vmatprep.subr.bf16.mxu0 %v13540_v15 }
 0x537   : > { %v1743_v29 = vmax.f32 %v1689_v20, 0.0  ;;  %v15349_v48 = vadd.f32 %v15325_v57, %v11831_v22  ;;  %1792 = vrot.lane.b32.xlu0 %v1728_v45, %s14336_s12  ;;  %12202 = vmatprep.subr.bf16.mxu1 %v13541_v18  ;;  %v13560_v18 = vld [vmem:[#allocation11 + $0x7e8] sm:$0xff]  }
 0x538   : > { %9270 = vmatmul.mubr.bf16.vlgmr.msra.gmra.mrb[48].mxu0 %v2106_v42  ;;  %v13561_v20 = vld [vmem:[#allocation11 + $0x868] sm:$0xff]   ;;  %v15400_v42 = vadd.f32 %v15325_v57, %v15189_v49 }
 0x539   : > { %1764 = vst.msk [vmem:[#allocation3 + $0xf1] sm:$0xff] %vm360_vm0, %v1743_v29  ;;  %v1744_v34 = vmax.f32 %v15349_v48, 0.0  ;;  %9310 = vmatmul.mubr.bf16.vlgmr.msra.gmra.mrb[84].mxu1 %v2108_v58  ;;  %12181 = vmatpush3.bf16.msra.mxu0 %v13542_v30  ;;  %v11832_v52 = vpop.f32.mrb[52].mxu1  ;;  %v13667_v48 = vld [vmem:[#allocation11 + $0xb38] sm:$0xff]  }
 0x53a   : > { %9349 = vmatprep.mubr.bf16.mxu0 %v2111_v10  ;;  %12203 = vmatpush3.bf16.msra.mxu1 %v13543_v8  ;;  %v11833_v44 = vpop.f32.mrb[53].mxu1  ;;  %v13564_v8 = vld [vmem:[#allocation11 + $0x7f0] sm:$0xff]  }
 0x53b   : > { %9389 = vmatprep.mubr.bf16.mxu1 %v2113_v14  ;;  %1889 = vrot.lane.b32.xlu1 %v1743_v29, %s14336_s12  ;;  %v11834_v13 = vadd.f32 %v11833_v44, %v11832_v52  ;;  %v11835_v54 = vpop.f32.mrb[54].mxu1  ;;  %v13565_v10 = vld [vmem:[#allocation11 + $0x870] sm:$0xff]  }
 0x53c   : > { %1808 = vrot.lane.b32.xlu0 %v1744_v34, %s14336_s12  ;;  %12182 = vmatprep.subr.bf16.mxu0 %v13544_v41  ;;  %v11836_v63 = vpop.f32.mrb[55].mxu1  ;;  %v13566_v44 = vld [vmem:[#allocation11 + $0x7b0] sm:$0xff]  }
 0x53d   : > { %v1697_v25 = vadd.f32 %v15325_v57, %v11834_v13  ;;  %12204 = vmatprep.subr.bf16.mxu1 %v13545_v26  ;;  %v11837_v12 = vadd.f32 %v11836_v63, %v11835_v54  ;;  %12183 = vmatpush3.bf16.msra.mxu0 %v13546_v55  ;;  %v13567_v13 = vld [vmem:[#allocation11 + $0x830] sm:$0xff]   ;;  %v13569_v54 = vld [vmem:[#allocation11 + $0x7f8] sm:$0xff]  }
 0x53e   : > { %12205 = vmatpush3.bf16.msra.mxu1 %v13547_v61  ;;  %12184 = vmatprep.subr.bf16.mxu0 %v13548_v5  ;;  %v1734_v61 = vmax.f32 %v15400_v42, 0.0 }
 0x53f   : > { %v1745_v35 = vmax.f32 %v1697_v25, 0.0  ;;  %v15367_v17 = vadd.f32 %v15325_v57, %v11837_v12  ;;  %1875 = vrot.lane.b32.xlu1 %v1729_v27, %s14336_s12  ;;  %12206 = vmatprep.subr.bf16.mxu1 %v13549_v2  ;;  %v13555_v27 = vld [vmem:[#allocation11 + $0x818] sm:$0xff]  }
 0x540   : > { %1794 = vrot.lane.b32.xlu0 %v1730_v59, %s14336_s12  ;;  %v13568_v12 = vld [vmem:[#allocation11 + $0x878] sm:$0xff]  }
 0x541   : > { %1765 = vst.msk [vmem:[#allocation3 + $0x101] sm:$0xff] %vm360_vm0, %v1745_v35  ;;  %v1746_v3 = vmax.f32 %v15367_v17, 0.0  ;;  %12185 = vmatpush3.bf16.msra.mxu0 %v13550_v43  ;;  %v11838_v9 = vpop.f32.mrb[56].mxu1  ;;  %v13675_v17 = vld [vmem:[#allocation11 + $0xc08] sm:$0xff]  }
 0x542   : > { %12207 = vmatpush3.bf16.msra.mxu1 %v13551_v50  ;;  %v11839_v36 = vpop.f32.mrb[57].mxu1  ;;  %12186 = vmatprep.subr.bf16.mxu0 %v13552_v56  ;;  %v13572_v50 = vld [vmem:[#allocation11 + $0x8c0] sm:$0xff]   ;;  %v1987_v56 = vld [vmem:[#allocation3 + $0x172] sm:$0xff] }
 0x543   : > { %1891 = vrot.lane.b32.xlu1 %v1745_v35, %s14336_s12  ;;  %v11840_v24 = vadd.f32 %v11839_v36, %v11838_v9  ;;  %v11841_v28 = vpop.f32.mrb[58].mxu1  ;;  %12208 = vmatprep.subr.bf16.mxu1 %v13553_v53  ;;  %v13574_v35 = vld [vmem:[#allocation11 + $0x880] sm:$0xff]   ;;  %v1991_v53 = vld [vmem:[#allocation3 + $0xd2] sm:$0xff]  ;;  %v2110_v9 = vpack.c.bf16 %v1985_v47, %v1985_v47  ;;  %v13600_v47 = vld [vmem:[#allocation11 + $0x8f8] sm:$0xff]  }
 0x544   : > { %1810 = vrot.lane.b32.xlu0 %v1746_v3, %s14336_s12  ;;  %v11842_v1 = vpop.f32.mrb[59].mxu1  ;;  %v1994_v36 = vld [vmem:[#allocation3 + $0x211] sm:$0xff] }
 0x545   : > { %v1705_v15 = vadd.f32 %v15325_v57, %v11840_v24  ;;  %v11843_v4 = vadd.f32 %v11842_v1, %v11841_v28  ;;  %12187 = vmatpush3.bf16.msra.mxu0 %v13554_v39  ;;  %v13575_v39 = vld [vmem:[#allocation11 + $0x900] sm:$0xff]   ;;  %v2115_v24 = vpack.c.bf16 %v1991_v53, %v1991_v53  ;;  %v13577_v28 = vld [vmem:[#allocation11 + $0x948] sm:$0xff]   ;;  %v13602_v53 = vld [vmem:[#allocation11 + $0x8b8] sm:$0xff]  }
 0x546   : > { %12209 = vmatpush3.bf16.msra.mxu1 %v13555_v27  ;;  %12188 = vmatprep.subr.bf16.mxu0 %v13556_v31  ;;  %v2112_v27 = vpack.c.bf16 %v1987_v56, %v1987_v56  ;;  %v13576_v31 = vld [vmem:[#allocation11 + $0x8c8] sm:$0xff]   ;;  %v13601_v56 = vld [vmem:[#allocation11 + $0x978] sm:$0xff]  }
 0x547   : > { %v1747_v11 = vmax.f32 %v1705_v15, 0.0  ;;  %v15388_v21 = vadd.f32 %v15325_v57, %v11843_v4  ;;  %1877 = vrot.lane.b32.xlu1 %v1731_v46, %s14336_s12  ;;  %12210 = vmatprep.subr.bf16.mxu1 %v13557_v38  ;;  %v13563_v46 = vld [vmem:[#allocation11 + $0x828] sm:$0xff]   ;;  %v2117_v38 = vpack.c.bf16 %v1994_v36, %v1994_v36  ;;  %v13580_v4 = vld [vmem:[#allocation11 + $0x8d0] sm:$0xff]  }
 0x548   : > { %1796 = vrot.lane.b32.xlu0 %v1732_v6, %s14336_s12  ;;  %v13578_v1 = vld [vmem:[#allocation11 + $0x888] sm:$0xff]  }
 0x549   : > { %1766 = vst.msk [vmem:[#allocation3 + $0x111] sm:$0xff] %vm360_vm0, %v1747_v11  ;;  %v1748_v22 = vmax.f32 %v15388_v21, 0.0  ;;  %12189 = vmatpush3.bf16.msra.mxu0 %v13558_v62  ;;  %v11844_v30 = vpop.f32.mrb[60].mxu1  ;;  %v13579_v15 = vld [vmem:[#allocation11 + $0x908] sm:$0xff]   ;;  %v13581_v62 = vld [vmem:[#allocation11 + $0x950] sm:$0xff]  }
 0x54a   : > { %12211 = vmatpush3.bf16.msra.mxu1 %v13559_v7  ;;  %v11845_v32 = vpop.f32.mrb[61].mxu1  ;;  %12190 = vmatprep.subr.bf16.mxu0 %v13560_v18  ;;  %v13582_v7 = vld [vmem:[#allocation11 + $0x890] sm:$0xff]  }
 0x54b   : > { %1893 = vrot.lane.b32.xlu1 %v1747_v11, %s14336_s12  ;;  %v11846_v16 = vadd.f32 %v11845_v32, %v11844_v30  ;;  %v11910_v29 = vpop.f32.mrb[24].mxu0  ;;  %v11847_v58 = vpop.f32.mrb[62].mxu1  ;;  %12212 = vmatprep.subr.bf16.mxu1 %v13561_v20  ;;  %v13583_v18 = vld [vmem:[#allocation11 + $0x910] sm:$0xff]   ;;  %v13584_v11 = vld [vmem:[#allocation11 + $0x8d8] sm:$0xff]   ;;  %v13588_v32 = vld [vmem:[#allocation11 + $0x8e0] sm:$0xff]  }
 0x54c   : > { %1812 = vrot.lane.b32.xlu0 %v1748_v22, %s14336_s12  ;;  %v11911_v41 = vpop.f32.mrb[25].mxu0  ;;  %v11848_v14 = vpop.f32.mrb[63].mxu1  ;;  %v13585_v20 = vld [vmem:[#allocation11 + $0x958] sm:$0xff]   ;;  %v1990_v36 = vld [vmem:[#allocation3 + $0xd1] sm:$0xff] }
 0x54d   : > { %v1713_v49 = vadd.f32 %v15325_v57, %v11846_v16  ;;  %v11912_v52 = vadd.f32 %v11911_v41, %v11910_v29  ;;  %v11849_v26 = vadd.f32 %v11848_v14, %v11847_v58  ;;  %v11913_v55 = vpop.f32.mrb[26].mxu0  ;;  %12191 = vmatpush3.bf16.msra.mxu0 %v13562_v40  ;;  %v13586_v30 = vld [vmem:[#allocation11 + $0x898] sm:$0xff]   ;;  %v13591_v16 = vld [vmem:[#allocation11 + $0x920] sm:$0xff]   ;;  %v13592_v29 = vld [vmem:[#allocation11 + $0x8e8] sm:$0xff]  }
 0x54e   : > { %12213 = vmatpush3.bf16.msra.mxu1 %v13563_v46  ;;  %v11914_v5 = vpop.f32.mrb[27].mxu0  ;;  %12192 = vmatprep.subr.bf16.mxu0 %v13564_v8  ;;  %v13587_v40 = vld [vmem:[#allocation11 + $0x918] sm:$0xff]   ;;  %v13589_v46 = vld [vmem:[#allocation11 + $0x960] sm:$0xff]   ;;  %v13593_v58 = vld [vmem:[#allocation11 + $0x968] sm:$0xff]  }
 0x54f   : > { %v1749_v2 = vmax.f32 %v1713_v49, 0.0  ;;  %v15409_v63 = vadd.f32 %v11912_v52, %v15331_v19  ;;  %v15412_v25 = vadd.f32 %v15325_v57, %v11849_v26  ;;  %1879 = vrot.lane.b32.xlu1 %v1733_v51, %s14336_s12  ;;  %12214 = vmatprep.subr.bf16.mxu1 %v13565_v10  ;;  %v13570_v19 = vld [vmem:[#allocation11 + $0x7b8] sm:$0xff]   ;;  %v13573_v51 = vld [vmem:[#allocation11 + $0x940] sm:$0xff]   ;;  %v13594_v10 = vld [vmem:[#allocation11 + $0x8a8] sm:$0xff]  }
 0x550   : > { %1798 = vrot.lane.b32.xlu0 %v1734_v61, %s14336_s12  ;;  %v13571_v57 = vld [vmem:[#allocation11 + $0x838] sm:$0xff]   ;;  %v13590_v8 = vld [vmem:[#allocation11 + $0x8a0] sm:$0xff]   ;;  %v13595_v41 = vld [vmem:[#allocation11 + $0x928] sm:$0xff]  }
 0x551   : > { %1767 = vst.msk [vmem:[#allocation3 + $0x121] sm:$0xff] %vm360_vm0, %v1749_v2  ;;  %v1750_v43 = vmax.f32 %v15412_v25, 0.0  ;;  %12193 = vmatpush3.bf16.msra.mxu0 %v13566_v44  ;;  %v13596_v14 = vld [vmem:[#allocation11 + $0x8f0] sm:$0xff]  }
 0x552   : > { %12215 = vmatpush3.bf16.msra.mxu1 %v13567_v13  ;;  %12194 = vmatprep.subr.bf16.mxu0 %v13569_v54  ;;  %v13597_v26 = vld [vmem:[#allocation11 + $0x970] sm:$0xff]  }
 0x553   : > { %1895 = vrot.lane.b32.xlu1 %v1749_v2, %s14336_s12  ;;  %12216 = vmatprep.subr.bf16.mxu1 %v13568_v12  ;;  %v13598_v12 = vld [vmem:[#allocation11 + $0x8b0] sm:$0xff]  }
 0x554   : > { %1814 = vrot.lane.b32.xlu0 %v1750_v43, %s14336_s12 }
 0x555   : > { %12195 = vmatpush3.bf16.msra.mxu0 %v13570_v19 }
 0x556   : > { %12217 = vmatpush3.bf16.msra.mxu1 %v13571_v57  ;;  %12224 = vmatprep.subr.bf16.mxu0 %v13572_v50  ;;  %v13599_v50 = vld [vmem:[#allocation11 + $0x930] sm:$0xff]  }
 0x557   : > { %12246 = vmatprep.subr.bf16.mxu1 %v13573_v51 }
 0x558   : > { %9350 = vmatmul.mubr.bf16.vlgmr.msra.gmra.mrb[52].mxu0 %v2110_v9  ;;  %v13603_v9 = vld [vmem:[#allocation11 + $0x938] sm:$0xff]  }
 0x559   : > { %9390 = vmatmul.mubr.bf16.vlgmr.msra.gmra.mrb[88].mxu1 %v2112_v27  ;;  %12225 = vmatpush3.bf16.msra.mxu0 %v13574_v35  ;;  %v13605_v27 = vld [vmem:[#allocation11 + $0xa40] sm:$0xff]  }
 0x55a   : > { %9429 = vmatprep.mubr.bf16.mxu0 %v2115_v24  ;;  %12247 = vmatpush3.bf16.msra.mxu1 %v13575_v39  ;;  %v13604_v39 = vld [vmem:[#allocation11 + $0x9c0] sm:$0xff]  }
 0x55b   : > { %9469 = vmatprep.mubr.bf16.mxu1 %v2117_v38  ;;  %12226 = vmatprep.subr.bf16.mxu0 %v13576_v31  ;;  %v1993_v31 = vld [vmem:[#allocation3 + $0x210] sm:$0xff]  ;;  %v13606_v24 = vld [vmem:[#allocation11 + $0x980] sm:$0xff]   ;;  %v2114_v38 = vpack.c.bf16 %v1990_v36, %v1990_v36 }
 0x55c   : > { %12248 = vmatprep.subr.bf16.mxu1 %v13577_v28  ;;  %v1997_v28 = vld [vmem:[#allocation3 + $0x40] sm:$0xff] }
 0x55d   : > { %12227 = vmatpush3.bf16.msra.mxu0 %v13578_v1  ;;  %v1999_v1 = vld [vmem:[#allocation3 + $0x42] sm:$0xff] }
 0x55e   : > { %12249 = vmatpush3.bf16.msra.mxu1 %v13579_v15  ;;  %12228 = vmatprep.subr.bf16.mxu0 %v13580_v4  ;;  %v2116_v15 = vpack.c.bf16 %v1993_v31, %v1993_v31  ;;  %v13608_v4 = vld [vmem:[#allocation11 + $0x9c8] sm:$0xff]   ;;  %v13633_v31 = vld [vmem:[#allocation11 + $0xa78] sm:$0xff]  }
 0x55f   : > { %12250 = vmatprep.subr.bf16.mxu1 %v13581_v62  ;;  %v2119_v62 = vpack.c.bf16 %v1997_v28, %v1997_v28  ;;  %v13634_v28 = vld [vmem:[#allocation11 + $0x9b8] sm:$0xff]  }
 0x561   : > { %12229 = vmatpush3.bf16.msra.mxu0 %v13582_v7  ;;  %v13609_v7 = vld [vmem:[#allocation11 + $0xa48] sm:$0xff]  }
 0x562   : > { %12251 = vmatpush3.bf16.msra.mxu1 %v13583_v18  ;;  %12230 = vmatprep.subr.bf16.mxu0 %v13584_v11  ;;  %v2121_v18 = vpack.c.bf16 %v1999_v1, %v1999_v1  ;;  %v13610_v11 = vld [vmem:[#allocation11 + $0x988] sm:$0xff]  }
 0x563   : > { %12252 = vmatprep.subr.bf16.mxu1 %v13585_v20  ;;  %v13611_v20 = vld [vmem:[#allocation11 + $0xa08] sm:$0xff]  }
 0x564   : > { %v1995_v1 = vld [vmem:[#allocation3 + $0x212] sm:$0xff] }
 0x565   : > { %12231 = vmatpush3.bf16.msra.mxu0 %v13586_v30  ;;  %v13612_v30 = vld [vmem:[#allocation11 + $0x9d0] sm:$0xff]  }
 0x566   : > { %12253 = vmatpush3.bf16.msra.mxu1 %v13587_v40  ;;  %12232 = vmatprep.subr.bf16.mxu0 %v13588_v32  ;;  %v13613_v40 = vld [vmem:[#allocation11 + $0xa50] sm:$0xff]  }
 0x567   : > { %12254 = vmatprep.subr.bf16.mxu1 %v13589_v46  ;;  %v13614_v32 = vld [vmem:[#allocation11 + $0x990] sm:$0xff]  }
 0x568   : > { %v13615_v46 = vld [vmem:[#allocation11 + $0xa10] sm:$0xff]  }
 0x569   : > { %12233 = vmatpush3.bf16.msra.mxu0 %v13590_v8  ;;  %v13616_v8 = vld [vmem:[#allocation11 + $0x9d8] sm:$0xff]  }
 0x56a   : > { %12255 = vmatpush3.bf16.msra.mxu1 %v13591_v16  ;;  %12234 = vmatprep.subr.bf16.mxu0 %v13592_v29  ;;  %v13617_v16 = vld [vmem:[#allocation11 + $0xa58] sm:$0xff]  }
 0x56b   : > { %v11932_v49 = vpop.f32.mrb[28].mxu0  ;;  %v11954_v52 = vpop.f32.mrb[64].mxu1  ;;  %12256 = vmatprep.subr.bf16.mxu1 %v13593_v58  ;;  %v13618_v29 = vld [vmem:[#allocation11 + $0x998] sm:$0xff]  }
 0x56c   : > { %v11933_v55 = vpop.f32.mrb[29].mxu0  ;;  %v11955_v44 = vpop.f32.mrb[65].mxu1  ;;  %v13619_v58 = vld [vmem:[#allocation11 + $0xa18] sm:$0xff]  }
 0x56d   : > { %v11934_v5 = vadd.f32 %v11933_v55, %v11932_v49  ;;  %v11935_v13 = vpop.f32.mrb[30].mxu0  ;;  %v11956_v54 = vadd.f32 %v11955_v44, %v11954_v52  ;;  %12235 = vmatpush3.bf16.msra.mxu0 %v13594_v10  ;;  %v11957_v2 = vpop.f32.mrb[66].mxu1  ;;  %v13620_v10 = vld [vmem:[#allocation11 + $0x9e0] sm:$0xff]   ;;  %v13624_v52 = vld [vmem:[#allocation11 + $0x9e8] sm:$0xff]  }
 0x56e   : > { %12257 = vmatpush3.bf16.msra.mxu1 %v13595_v41  ;;  %v11936_v19 = vpop.f32.mrb[31].mxu0  ;;  %v11958_v57 = vpop.f32.mrb[67].mxu1  ;;  %12236 = vmatprep.subr.bf16.mxu0 %v13596_v14  ;;  %v13621_v41 = vld [vmem:[#allocation11 + $0xa60] sm:$0xff]   ;;  %v13626_v55 = vld [vmem:[#allocation11 + $0x9a8] sm:$0xff]  }
 0x56f   : > { %v8872_v51 = vadd.f32 %v11934_v5, %v15409_v63  ;;  %12258 = vmatprep.subr.bf16.mxu1 %v13597_v26  ;;  %v13607_v63 = vld [vmem:[#allocation11 + $0xa00] sm:$0xff]   ;;  %v13625_v26 = vld [vmem:[#allocation11 + $0xa68] sm:$0xff]   ;;  %v13628_v5 = vld [vmem:[#allocation11 + $0x9f0] sm:$0xff]  }
 0x570   : > { %v13622_v14 = vld [vmem:[#allocation11 + $0x9a0] sm:$0xff]   ;;  %v13627_v44 = vld [vmem:[#allocation11 + $0xa28] sm:$0xff]  }
 0x571   : > { %v15427_v35 = vadd.f32 %v11956_v54, %v8872_v51  ;;  %12237 = vmatpush3.bf16.msra.mxu0 %v13598_v12  ;;  %v13623_v49 = vld [vmem:[#allocation11 + $0xa20] sm:$0xff]   ;;  %v13629_v54 = vld [vmem:[#allocation11 + $0xa70] sm:$0xff]  }
 0x572   : > { %12259 = vmatpush3.bf16.msra.mxu1 %v13599_v50  ;;  %12238 = vmatprep.subr.bf16.mxu0 %v13600_v47  ;;  %v13630_v47 = vld [vmem:[#allocation11 + $0x9b0] sm:$0xff]  }
 0x573   : > { %12260 = vmatprep.subr.bf16.mxu1 %v13601_v56 }
 0x575   : > { %12239 = vmatpush3.bf16.msra.mxu0 %v13602_v53 }
 0x576   : > { %12261 = vmatpush3.bf16.msra.mxu1 %v13603_v9  ;;  %12268 = vmatprep.subr.bf16.mxu0 %v13604_v39  ;;  %v13631_v9 = vld [vmem:[#allocation11 + $0xa30] sm:$0xff]   ;;  %v13632_v39 = vld [vmem:[#allocation11 + $0x9f8] sm:$0xff]  }
 0x577   : > { %12290 = vmatprep.subr.bf16.mxu1 %v13605_v27 }
 0x578   : > { %9430 = vmatmul.mubr.bf16.vlgmr.msra.gmra.mrb[56].mxu0 %v2114_v38  ;;  %v13635_v38 = vld [vmem:[#allocation11 + $0xa38] sm:$0xff]  }
 0x579   : > { %9470 = vmatmul.mubr.bf16.vlgmr.msra.gmra.mrb[92].mxu1 %v2116_v15  ;;  %12269 = vmatpush3.bf16.msra.mxu0 %v13606_v24  ;;  %v13637_v15 = vld [vmem:[#allocation11 + $0xb40] sm:$0xff]  }
 0x57a   : > { %9509 = vmatprep.mubr.bf16.mxu0 %v2119_v62  ;;  %12291 = vmatpush3.bf16.msra.mxu1 %v13607_v63  ;;  %v13636_v63 = vld [vmem:[#allocation11 + $0xac0] sm:$0xff]  }
 0x57b   : > { %9549 = vmatprep.mubr.bf16.mxu1 %v2121_v18  ;;  %12270 = vmatprep.subr.bf16.mxu0 %v13608_v4  ;;  %v1998_v4 = vld [vmem:[#allocation3 + $0x41] sm:$0xff] }
 0x57c   : > { %12292 = vmatprep.subr.bf16.mxu1 %v13609_v7  ;;  %v13638_v62 = vld [vmem:[#allocation11 + $0xa80] sm:$0xff]  }
 0x57d   : > { %12271 = vmatpush3.bf16.msra.mxu0 %v13610_v11  ;;  %v2002_v7 = vld [vmem:[#allocation3 + $0x181] sm:$0xff]  ;;  %v2120_v11 = vpack.c.bf16 %v1998_v4, %v1998_v4 }
 0x57e   : > { %12293 = vmatpush3.bf16.msra.mxu1 %v13611_v20  ;;  %12272 = vmatprep.subr.bf16.mxu0 %v13612_v30  ;;  %v13639_v18 = vld [vmem:[#allocation11 + $0xb00] sm:$0xff]   ;;  %v13640_v20 = vld [vmem:[#allocation11 + $0xac8] sm:$0xff]  }
 0x57f   : > { %12294 = vmatprep.subr.bf16.mxu1 %v13613_v40  ;;  %v13641_v30 = vld [vmem:[#allocation11 + $0xb48] sm:$0xff]   ;;  %v2123_v40 = vpack.c.bf16 %v2002_v7, %v2002_v7 }
 0x581   : > { %12273 = vmatpush3.bf16.msra.mxu0 %v13614_v32  ;;  %v13642_v32 = vld [vmem:[#allocation11 + $0xa88] sm:$0xff]  }
 0x582   : > { %12295 = vmatpush3.bf16.msra.mxu1 %v13615_v46  ;;  %12274 = vmatprep.subr.bf16.mxu0 %v13616_v8  ;;  %v13643_v46 = vld [vmem:[#allocation11 + $0xb08] sm:$0xff]   ;;  %v13644_v8 = vld [vmem:[#allocation11 + $0xad0] sm:$0xff]  }
 0x583   : > { %12296 = vmatprep.subr.bf16.mxu1 %v13617_v16  ;;  %v13645_v16 = vld [vmem:[#allocation11 + $0xb50] sm:$0xff]  }
 0x585   : > { %12275 = vmatpush3.bf16.msra.mxu0 %v13618_v29  ;;  %v13646_v29 = vld [vmem:[#allocation11 + $0xa90] sm:$0xff]  }
 0x586   : > { %12297 = vmatpush3.bf16.msra.mxu1 %v13619_v58  ;;  %12276 = vmatprep.subr.bf16.mxu0 %v13620_v10  ;;  %v13647_v58 = vld [vmem:[#allocation11 + $0xb10] sm:$0xff]   ;;  %v13648_v10 = vld [vmem:[#allocation11 + $0xad8] sm:$0xff]  }
 0x587   : > { %12298 = vmatprep.subr.bf16.mxu1 %v13621_v41  ;;  %v13649_v41 = vld [vmem:[#allocation11 + $0xb58] sm:$0xff]  }
 0x589   : > { %12277 = vmatpush3.bf16.msra.mxu0 %v13622_v14  ;;  %v13650_v14 = vld [vmem:[#allocation11 + $0xa98] sm:$0xff]  }
 0x58a   : > { %12299 = vmatpush3.bf16.msra.mxu1 %v13623_v49  ;;  %12278 = vmatprep.subr.bf16.mxu0 %v13624_v52  ;;  %v13651_v49 = vld [vmem:[#allocation11 + $0xb18] sm:$0xff]   ;;  %v13652_v52 = vld [vmem:[#allocation11 + $0xae0] sm:$0xff]  }
 0x58b   : > { %v11976_v13 = vpop.f32.mrb[32].mxu0  ;;  %12300 = vmatprep.subr.bf16.mxu1 %v13625_v26 }
 0x58c   : > { %v11998_v2 = vpop.f32.mrb[68].mxu1  ;;  %v11977_v12 = vpop.f32.mrb[33].mxu0 }
 0x58d   : > { %v11978_v19 = vadd.f32 %v11977_v12, %v11976_v13  ;;  %v11999_v57 = vpop.f32.mrb[69].mxu1  ;;  %v11979_v50 = vpop.f32.mrb[34].mxu0  ;;  %12279 = vmatpush3.bf16.msra.mxu0 %v13626_v55  ;;  %v13653_v55 = vld [vmem:[#allocation11 + $0xb60] sm:$0xff]   ;;  %v13657_v12 = vld [vmem:[#allocation11 + $0xb68] sm:$0xff]  }
 0x58e   : > { %v12000_v51 = vadd.f32 %v11999_v57, %v11998_v2  ;;  %v12001_v56 = vpop.f32.mrb[70].mxu1  ;;  %12301 = vmatpush3.bf16.msra.mxu1 %v13627_v44  ;;  %v11980_v53 = vpop.f32.mrb[35].mxu0  ;;  %12280 = vmatprep.subr.bf16.mxu0 %v13628_v5  ;;  %v13654_v5 = vld [vmem:[#allocation11 + $0xaa0] sm:$0xff]   ;;  %v13660_v57 = vld [vmem:[#allocation11 + $0xaf0] sm:$0xff]  }
 0x58f   : > { %v8952_v36 = vadd.f32 %v11978_v19, %v15427_v35  ;;  %v12002_v27 = vpop.f32.mrb[71].mxu1  ;;  %12302 = vmatprep.subr.bf16.mxu1 %v13629_v54  ;;  %v2118_v35 = vpack.c.bf16 %v1995_v1, %v1995_v1  ;;  %v13655_v13 = vld [vmem:[#allocation11 + $0xb20] sm:$0xff]   ;;  %v13656_v54 = vld [vmem:[#allocation11 + $0xae8] sm:$0xff]  }
 0x590   : > { %v13659_v19 = vld [vmem:[#allocation11 + $0xb28] sm:$0xff]  }
 0x591   : > { %v15430_v24 = vadd.f32 %v12000_v51, %v8952_v36  ;;  %12281 = vmatpush3.bf16.msra.mxu0 %v13630_v47  ;;  %v13661_v47 = vld [vmem:[#allocation11 + $0xb70] sm:$0xff]  }
 0x592   : > { %12303 = vmatpush3.bf16.msra.mxu1 %v13631_v9  ;;  %12282 = vmatprep.subr.bf16.mxu0 %v13632_v39 }
 0x593   : > { %12304 = vmatprep.subr.bf16.mxu1 %v13633_v31 }
 0x595   : > { %12283 = vmatpush3.bf16.msra.mxu0 %v13634_v28  ;;  %v13663_v28 = vld [vmem:[#allocation11 + $0xb30] sm:$0xff]  }
 0x596   : > { %12305 = vmatpush3.bf16.msra.mxu1 %v13635_v38  ;;  %12312 = vmatprep.subr.bf16.mxu0 %v13636_v63  ;;  %v13664_v63 = vld [vmem:[#allocation11 + $0xaf8] sm:$0xff]  }
 0x597   : > { %12334 = vmatprep.subr.bf16.mxu1 %v13637_v15 }
 0x598   : > { %9510 = vmatmul.mubr.bf16.vlgmr.msra.gmra.mrb[60].mxu0 %v2118_v35 }
 0x599   : > { %9550 = vmatmul.mubr.bf16.vlgmr.msra.gmra.mrb[96].mxu1 %v2120_v11  ;;  %12313 = vmatpush3.bf16.msra.mxu0 %v13638_v62  ;;  %v13665_v62 = vld [vmem:[#allocation11 + $0xb78] sm:$0xff]  }
 0x59a   : > { %9589 = vmatprep.mubr.bf16.mxu0 %v2123_v40  ;;  %12335 = vmatpush3.bf16.msra.mxu1 %v13639_v18  ;;  %v13666_v11 = vld [vmem:[#allocation11 + $0xab8] sm:$0xff]  }
 0x59b   : > { %12314 = vmatprep.subr.bf16.mxu0 %v13640_v20  ;;  %12336 = vmatprep.subr.bf16.mxu1 %v13641_v30  ;;  %v2001_v20 = vld [vmem:[#allocation3 + $0x180] sm:$0xff] }
 0x59c   : > { %v13669_v30 = vld [vmem:[#allocation11 + $0xc40] sm:$0xff]  }
 0x59d   : > { %12315 = vmatpush3.bf16.msra.mxu0 %v13642_v32  ;;  %v2003_v40 = vld [vmem:[#allocation3 + $0x182] sm:$0xff] }
 0x59e   : > { %12337 = vmatpush3.bf16.msra.mxu1 %v13643_v46  ;;  %12316 = vmatprep.subr.bf16.mxu0 %v13644_v8  ;;  %v13670_v46 = vld [vmem:[#allocation11 + $0xb80] sm:$0xff]  }
 0x59f   : > { %12338 = vmatprep.subr.bf16.mxu1 %v13645_v16  ;;  %v2122_v16 = vpack.c.bf16 %v2001_v20, %v2001_v20  ;;  %v13701_v20 = vld [vmem:[#allocation11 + $0xd40] sm:$0xff]  }
 0x5a1   : > { %12317 = vmatpush3.bf16.msra.mxu0 %v13646_v29  ;;  %v13671_v29 = vld [vmem:[#allocation11 + $0xc00] sm:$0xff]  }
 0x5a2   : > { %12339 = vmatpush3.bf16.msra.mxu1 %v13647_v58  ;;  %12318 = vmatprep.subr.bf16.mxu0 %v13648_v10  ;;  %v2124_v58 = vpack.c.bf16 %v2003_v40, %v2003_v40  ;;  %v13672_v10 = vld [vmem:[#allocation11 + $0xbc8] sm:$0xff]   ;;  %v13702_v40 = vld [vmem:[#allocation11 + $0xc80] sm:$0xff]  }
 0x5a3   : > { %v1888_v26 = vpop.permute.xlu1 %1887  ;;  %12340 = vmatprep.subr.bf16.mxu1 %v13649_v41 }
 0x5a4   : > { %1925 = vst.msk [vmem:[#allocation3 + $0x221] sm:$0xff] %vm360_vm0, %v1888_v26  ;;  %v13674_v26 = vld [vmem:[#allocation11 + $0xb88] sm:$0xff]  }
 0x5a5   : > { %1941 = vst.msk [vmem:[#allocation3 + $0x221] sm:$0xff] %vm1832_vm6, %v1742_v37  ;;  %12319 = vmatpush3.bf16.msra.mxu0 %v13650_v14  ;;  %v1807_v44 = vpop.permute.xlu0 %1806  ;;  %v13658_v37 = vld [vmem:[#allocation11 + $0xaa8] sm:$0xff]  }
 0x5a6   : > { %12341 = vmatpush3.bf16.msra.mxu1 %v13651_v49  ;;  %1844 = vst.msk [vmem:[#allocation3 + $0xe1] sm:$0xff] %vm1832_vm6, %v1807_v44  ;;  %12320 = vmatprep.subr.bf16.mxu0 %v13652_v52  ;;  %v13673_v14 = vld [vmem:[#allocation11 + $0xc48] sm:$0xff]   ;;  %v13677_v44 = vld [vmem:[#allocation11 + $0xc50] sm:$0xff]  }
 0x5a7   : > { %v1874_v2 = vpop.permute.xlu1 %1873  ;;  %12342 = vmatprep.subr.bf16.mxu1 %v13653_v55 }
 0x5a8   : > { %1918 = vst.msk [vmem:[#allocation3 + $0x191] sm:$0xff] %vm360_vm0, %v1874_v2  ;;  %v13681_v2 = vld [vmem:[#allocation11 + $0xbd8] sm:$0xff]  }
 0x5a9   : > { %1934 = vst.msk [vmem:[#allocation3 + $0x191] sm:$0xff] %vm1832_vm6, %v1728_v45  ;;  %12321 = vmatpush3.bf16.msra.mxu0 %v13654_v5  ;;  %v1793_v0 = vpop.permute.xlu0 %1792 }
 0x5aa   : > { %12343 = vmatpush3.bf16.msra.mxu1 %v13655_v13  ;;  %1837 = vst.msk [vmem:[#allocation3 + $0x51] sm:$0xff] %vm1832_vm6, %v1793_v0  ;;  %12322 = vmatprep.subr.bf16.mxu0 %v13656_v54  ;;  %v13678_v13 = vld [vmem:[#allocation11 + $0xb90] sm:$0xff]   ;;  %v13682_v0 = vld [vmem:[#allocation11 + $0xb98] sm:$0xff]  }
 0x5ab   : > { %v12020_v50 = vpop.f32.mrb[36].mxu0  ;;  %12344 = vmatprep.subr.bf16.mxu1 %v13657_v12  ;;  %v13679_v54 = vld [vmem:[#allocation11 + $0xc10] sm:$0xff]  }
 0x5ac   : > { %v12042_v51 = vpop.f32.mrb[72].mxu1  ;;  %v12021_v56 = vpop.f32.mrb[37].mxu0  ;;  %v2010_v23 = vld [vmem:[#allocation3 + $0x221] sm:$0xff] }
 0x5ad   : > { %v1890_v53 = vpop.permute.xlu1 %1889  ;;  %v12022_v9 = vadd.f32 %v12021_v56, %v12020_v50  ;;  %v12043_v39 = vpop.f32.mrb[73].mxu1  ;;  %12323 = vmatpush3.bf16.msra.mxu0 %v13658_v37  ;;  %v2005_v45 = vld [vmem:[#allocation3 + $0xe0] sm:$0xff]  ;;  %v2129_v52 = vpack.c.bf16 %v2010_v23, %v2010_v23  ;;  %v13690_v56 = vld [vmem:[#allocation11 + $0xba8] sm:$0xff]  }
 0x5ae   : > { %1926 = vst.msk [vmem:[#allocation3 + $0x231] sm:$0xff] %vm360_vm0, %v1890_v53  ;;  %v12044_v36 = vadd.f32 %v12043_v39, %v12042_v51  ;;  %v12023_v27 = vpop.f32.mrb[38].mxu0  ;;  %v12045_v31 = vpop.f32.mrb[74].mxu1  ;;  %12345 = vmatpush3.bf16.msra.mxu1 %v13659_v19  ;;  %12324 = vmatprep.subr.bf16.mxu0 %v13660_v57  ;;  %v2125_v38 = vpack.c.bf16 %v2005_v45, %v2005_v45  ;;  %v2007_v8 = vld [vmem:[#allocation3 + $0xe2] sm:$0xff]  ;;  %v13688_v51 = vld [vmem:[#allocation11 + $0xbe8] sm:$0xff]  }
 0x5af   : > { %1942 = vst.msk [vmem:[#allocation3 + $0x231] sm:$0xff] %vm1832_vm6, %v1744_v34  ;;  %v9032_v1 = vadd.f32 %v12022_v9, %v15430_v24  ;;  %v1809_v15 = vpop.permute.xlu0 %1808  ;;  %v12024_v4 = vpop.f32.mrb[39].mxu0  ;;  %12346 = vmatprep.subr.bf16.mxu1 %v13661_v47  ;;  %v13668_v34 = vld [vmem:[#allocation11 + $0xbc0] sm:$0xff]   ;;  %v2127_v41 = vpack.c.bf16 %v2007_v8, %v2007_v8  ;;  %v13683_v37 = vld [vmem:[#allocation11 + $0xc18] sm:$0xff]   ;;  %v13691_v53 = vld [vmem:[#allocation11 + $0xc28] sm:$0xff]  }
 0x5b0   : > { %1845 = vst.msk [vmem:[#allocation3 + $0xf1] sm:$0xff] %vm1832_vm6, %v1809_v15  ;;  %v12046_v7 = vpop.f32.mrb[75].mxu1  ;;  %9629 = vmatprep.mubr.bf16.mxu1 %v2125_v38  ;;  %v13684_v19 = vld [vmem:[#allocation11 + $0xbe0] sm:$0xff]   ;;  %v13692_v9 = vld [vmem:[#allocation11 + $0xbf0] sm:$0xff]   ;;  %v13696_v15 = vld [vmem:[#allocation11 + $0xbf8] sm:$0xff]  }
 0x5b1   : > { %v15448_v35 = vadd.f32 %v12044_v36, %v9032_v1  ;;  %v1876_v18 = vpop.permute.xlu1 %1875  ;;  %12325 = vmatpush3.bf16.msra.mxu0 %v13662_v33  ;;  %v13686_v50 = vld [vmem:[#allocation11 + $0xba0] sm:$0xff]   ;;  %v13693_v33 = vld [vmem:[#allocation11 + $0xc70] sm:$0xff]   ;;  %v13697_v7 = vld [vmem:[#allocation11 + $0xc78] sm:$0xff]  }
 0x5b2   : > { %1919 = vst.msk [vmem:[#allocation3 + $0x1a1] sm:$0xff] %vm360_vm0, %v1876_v18  ;;  %12347 = vmatpush3.bf16.msra.mxu1 %v13663_v28  ;;  %12326 = vmatprep.subr.bf16.mxu0 %v13664_v63  ;;  %v13687_v47 = vld [vmem:[#allocation11 + $0xc20] sm:$0xff]   ;;  %v13695_v1 = vld [vmem:[#allocation11 + $0xc30] sm:$0xff]  }
 0x5b3   : > { %1935 = vst.msk [vmem:[#allocation3 + $0x1a1] sm:$0xff] %vm1832_vm6, %v1730_v59  ;;  %v1795_v24 = vpop.permute.xlu0 %1794  ;;  %12348 = vmatprep.subr.bf16.mxu1 %v13665_v62  ;;  %v2015_v8 = vld [vmem:[#allocation3 + $0x52] sm:$0xff] }
 0x5b4   : > { %1838 = vst.msk [vmem:[#allocation3 + $0x61] sm:$0xff] %vm1832_vm6, %v1795_v24  ;;  %v2006_v24 = vld [vmem:[#allocation3 + $0xe1] sm:$0xff] }
 0x5b5   : > { %v1892_v32 = vpop.permute.xlu1 %1891  ;;  %12327 = vmatpush3.bf16.msra.mxu0 %v13666_v11  ;;  %v13698_v11 = vld [vmem:[#allocation11 + $0xbb8] sm:$0xff]  }
 0x5b6   : > { %1927 = vst.msk [vmem:[#allocation3 + $0x241] sm:$0xff] %vm360_vm0, %v1892_v32  ;;  %12349 = vmatpush3.bf16.msra.mxu1 %v13667_v48  ;;  %12356 = vmatprep.subr.bf16.mxu0 %v13668_v34  ;;  %v13699_v48 = vld [vmem:[#allocation11 + $0xc38] sm:$0xff]   ;;  %v13700_v34 = vld [vmem:[#allocation11 + $0xcc0] sm:$0xff]   ;;  %v2013_v32 = vld [vmem:[#allocation3 + $0x50] sm:$0xff] }
 0x5b7   : > { %1943 = vst.msk [vmem:[#allocation3 + $0x241] sm:$0xff] %vm1832_vm6, %v1746_v3  ;;  %v1811_v59 = vpop.permute.xlu0 %1810  ;;  %12378 = vmatprep.subr.bf16.mxu1 %v13669_v30  ;;  %v13676_v3 = vld [vmem:[#allocation11 + $0xbd0] sm:$0xff]   ;;  %v2009_v30 = vld [vmem:[#allocation3 + $0x220] sm:$0xff]  ;;  %v2131_v23 = vpack.c.bf16 %v2013_v32, %v2013_v32 }
 0x5b8   : > { %1846 = vst.msk [vmem:[#allocation3 + $0x101] sm:$0xff] %vm1832_vm6, %v1811_v59  ;;  %9590 = vmatmul.mubr.bf16.vlgmr.msra.gmra.mrb[64].mxu0 %v2122_v16  ;;  %v2128_v16 = vpack.c.bf16 %v2009_v30, %v2009_v30  ;;  %v13705_v59 = vld [vmem:[#allocation11 + $0xd48] sm:$0xff]   ;;  %v13741_v32 = vld [vmem:[#allocation11 + $0xe50] sm:$0xff]  }
 0x5b9   : > { %v1878_v49 = vpop.permute.xlu1 %1877  ;;  %9630 = vmatmul.mubr.bf16.vlgmr.msra.gmra.mrb[100].mxu1 %v2124_v58  ;;  %12357 = vmatpush3.bf16.msra.mxu0 %v13670_v46  ;;  %v13703_v46 = vld [vmem:[#allocation11 + $0xd00] sm:$0xff]   ;;  %v2133_v58 = vpack.c.bf16 %v2015_v8, %v2015_v8  ;;  %v13739_v30 = vld [vmem:[#allocation11 + $0xe08] sm:$0xff]   ;;  %v13744_v8 = vld [vmem:[#allocation11 + $0xdd8] sm:$0xff]  }
 0x5ba   : > { %1920 = vst.msk [vmem:[#allocation3 + $0x1b1] sm:$0xff] %vm360_vm0, %v1878_v49  ;;  %9669 = vmatprep.mubr.bf16.mxu0 %v2127_v41  ;;  %12379 = vmatpush3.bf16.msra.mxu1 %v13671_v29  ;;  %v13704_v29 = vld [vmem:[#allocation11 + $0xcc8] sm:$0xff]   ;;  %v13709_v49 = vld [vmem:[#allocation11 + $0xd50] sm:$0xff]  }
 0x5bb   : > { %1936 = vst.msk [vmem:[#allocation3 + $0x1b1] sm:$0xff] %vm1832_vm6, %v1732_v6  ;;  %9709 = vmatprep.mubr.bf16.mxu1 %v2129_v52  ;;  %v1797_v55 = vpop.permute.xlu0 %1796  ;;  %12358 = vmatprep.subr.bf16.mxu0 %v13672_v10  ;;  %v13680_v6 = vld [vmem:[#allocation11 + $0xc58] sm:$0xff]   ;;  %v13706_v10 = vld [vmem:[#allocation11 + $0xc88] sm:$0xff]   ;;  %v13710_v52 = vld [vmem:[#allocation11 + $0xc90] sm:$0xff]  }
 0x5bc   : > { %1839 = vst.msk [vmem:[#allocation3 + $0x71] sm:$0xff] %vm1832_vm6, %v1797_v55  ;;  %12380 = vmatprep.subr.bf16.mxu1 %v13673_v14  ;;  %v13707_v41 = vld [vmem:[#allocation11 + $0xd08] sm:$0xff]   ;;  %v13708_v14 = vld [vmem:[#allocation11 + $0xcd0] sm:$0xff]   ;;  %v13714_v55 = vld [vmem:[#allocation11 + $0xc98] sm:$0xff]  }
 0x5bd   : > { %v1894_v5 = vpop.permute.xlu1 %1893  ;;  %12359 = vmatpush3.bf16.msra.mxu0 %v13674_v26  ;;  %v13711_v26 = vld [vmem:[#allocation11 + $0xd10] sm:$0xff]  }
 0x5be   : > { %1928 = vst.msk [vmem:[#allocation3 + $0x251] sm:$0xff] %vm360_vm0, %v1894_v5  ;;  %12381 = vmatpush3.bf16.msra.mxu1 %v13675_v17  ;;  %12360 = vmatprep.subr.bf16.mxu0 %v13676_v3  ;;  %v13712_v17 = vld [vmem:[#allocation11 + $0xcd8] sm:$0xff]   ;;  %v13716_v5 = vld [vmem:[#allocation11 + $0xce0] sm:$0xff]  }
 0x5bf   : > { %1944 = vst.msk [vmem:[#allocation3 + $0x251] sm:$0xff] %vm1832_vm6, %v1748_v22  ;;  %v1813_v60 = vpop.permute.xlu0 %1812  ;;  %12382 = vmatprep.subr.bf16.mxu1 %v13677_v44  ;;  %v13685_v22 = vld [vmem:[#allocation11 + $0xc60] sm:$0xff]   ;;  %v13713_v3 = vld [vmem:[#allocation11 + $0xd58] sm:$0xff]  }
 0x5c0   : > { %1847 = vst.msk [vmem:[#allocation3 + $0x111] sm:$0xff] %vm1832_vm6, %v1813_v60  ;;  %v13715_v44 = vld [vmem:[#allocation11 + $0xd18] sm:$0xff]   ;;  %v13720_v60 = vld [vmem:[#allocation11 + $0xce8] sm:$0xff]  }
 0x5c1   : > { %v1880_v12 = vpop.permute.xlu1 %1879  ;;  %12361 = vmatpush3.bf16.msra.mxu0 %v13678_v13  ;;  %v13717_v13 = vld [vmem:[#allocation11 + $0xd60] sm:$0xff]  }
 0x5c2   : > { %1921 = vst.msk [vmem:[#allocation3 + $0x1c1] sm:$0xff] %vm360_vm0, %v1880_v12  ;;  %12383 = vmatpush3.bf16.msra.mxu1 %v13679_v54  ;;  %12362 = vmatprep.subr.bf16.mxu0 %v13681_v2  ;;  %v13718_v54 = vld [vmem:[#allocation11 + $0xca0] sm:$0xff]   ;;  %v13722_v12 = vld [vmem:[#allocation11 + $0xca8] sm:$0xff]  }
 0x5c3   : > { %1937 = vst.msk [vmem:[#allocation3 + $0x1c1] sm:$0xff] %vm1832_vm6, %v1734_v61  ;;  %v1799_v21 = vpop.permute.xlu0 %1798  ;;  %12384 = vmatprep.subr.bf16.mxu1 %v13680_v6  ;;  %v13689_v61 = vld [vmem:[#allocation11 + $0xc68] sm:$0xff]   ;;  %v13719_v2 = vld [vmem:[#allocation11 + $0xd20] sm:$0xff]  }
 0x5c4   : > { %1840 = vst.msk [vmem:[#allocation3 + $0x81] sm:$0xff] %vm1832_vm6, %v1799_v21  ;;  %v13721_v6 = vld [vmem:[#allocation11 + $0xd68] sm:$0xff]   ;;  %v13725_v21 = vld [vmem:[#allocation11 + $0xd70] sm:$0xff]  }
 0x5c5   : > { %v1896_v57 = vpop.permute.xlu1 %1895  ;;  %12363 = vmatpush3.bf16.msra.mxu0 %v13682_v0  ;;  %v13723_v0 = vld [vmem:[#allocation11 + $0xd28] sm:$0xff]  }
 0x5c6   : > { %1929 = vst.msk [vmem:[#allocation3 + $0x261] sm:$0xff] %vm360_vm0, %v1896_v57  ;;  %12385 = vmatpush3.bf16.msra.mxu1 %v13683_v37  ;;  %12364 = vmatprep.subr.bf16.mxu0 %v13684_v19  ;;  %v13724_v37 = vld [vmem:[#allocation11 + $0xcf0] sm:$0xff]  }
 0x5c7   : > { %1945 = vst.msk [vmem:[#allocation3 + $0x261] sm:$0xff] %vm1832_vm6, %v1750_v43  ;;  %v1815_v42 = vpop.permute.xlu0 %1814  ;;  %12386 = vmatprep.subr.bf16.mxu1 %v13685_v22  ;;  %v13694_v43 = vld [vmem:[#allocation11 + $0xbb0] sm:$0xff]  }
 0x5c8   : > { %1848 = vst.msk [vmem:[#allocation3 + $0x121] sm:$0xff] %vm1832_vm6, %v1815_v42  ;;  %v13726_v42 = vld [vmem:[#allocation11 + $0xcb0] sm:$0xff]  }
 0x5c9   : > { %12365 = vmatpush3.bf16.msra.mxu0 %v13686_v50 }
 0x5ca   : > { %12387 = vmatpush3.bf16.msra.mxu1 %v13687_v47  ;;  %12366 = vmatprep.subr.bf16.mxu0 %v13688_v51 }
 0x5cb   : > { %v12064_v39 = vpop.f32.mrb[40].mxu0  ;;  %12388 = vmatprep.subr.bf16.mxu1 %v13689_v61 }
 0x5cc   : > { %v12086_v45 = vpop.f32.mrb[76].mxu1  ;;  %v12065_v36 = vpop.f32.mrb[41].mxu0 }
 0x5cd   : > { %v12066_v27 = vadd.f32 %v12065_v36, %v12064_v39  ;;  %v12087_v25 = vpop.f32.mrb[77].mxu1  ;;  %v12067_v31 = vpop.f32.mrb[42].mxu0  ;;  %12367 = vmatpush3.bf16.msra.mxu0 %v13690_v56  ;;  %v13728_v39 = vld [vmem:[#allocation11 + $0xcf8] sm:$0xff]  }
 0x5ce   : > { %v12088_v28 = vadd.f32 %v12087_v25, %v12086_v45  ;;  %v12089_v38 = vpop.f32.mrb[78].mxu1  ;;  %12389 = vmatpush3.bf16.msra.mxu1 %v13691_v53  ;;  %v12068_v63 = vpop.f32.mrb[43].mxu0  ;;  %12368 = vmatprep.subr.bf16.mxu0 %v13692_v9  ;;  %v13727_v9 = vld [vmem:[#allocation11 + $0xd30] sm:$0xff]   ;;  %v13729_v36 = vld [vmem:[#allocation11 + $0xd78] sm:$0xff]  }
 0x5cf   : > { %v9112_v4 = vadd.f32 %v12066_v27, %v15448_v35  ;;  %v12090_v62 = vpop.f32.mrb[79].mxu1  ;;  %12390 = vmatprep.subr.bf16.mxu1 %v13693_v33  ;;  %v2126_v35 = vpack.c.bf16 %v2006_v24, %v2006_v24  ;;  %v13730_v25 = vld [vmem:[#allocation11 + $0xcb8] sm:$0xff]   ;;  %v13733_v38 = vld [vmem:[#allocation11 + $0xe40] sm:$0xff]   ;;  %v2014_v63 = vld [vmem:[#allocation3 + $0x51] sm:$0xff] }
 0x5d0   : > { %v13731_v31 = vld [vmem:[#allocation11 + $0xd38] sm:$0xff]   ;;  %v13735_v62 = vld [vmem:[#allocation11 + $0xe00] sm:$0xff]  }
 0x5d1   : > { %v15481_v18 = vadd.f32 %v12088_v28, %v9112_v4  ;;  %12369 = vmatpush3.bf16.msra.mxu0 %v13694_v43  ;;  %v13732_v43 = vld [vmem:[#allocation11 + $0xdc0] sm:$0xff]  }
 0x5d2   : > { %12391 = vmatpush3.bf16.msra.mxu1 %v13695_v1  ;;  %12370 = vmatprep.subr.bf16.mxu0 %v13696_v15  ;;  %v2011_v28 = vld [vmem:[#allocation3 + $0x222] sm:$0xff]  ;;  %v2018_v15 = vld [vmem:[#allocation3 + $0x191] sm:$0xff] }
 0x5d3   : > { %12392 = vmatprep.subr.bf16.mxu1 %v13697_v7  ;;  %v13734_v1 = vld [vmem:[#allocation11 + $0xd80] sm:$0xff]   ;;  %v2130_v4 = vpack.c.bf16 %v2011_v28, %v2011_v28  ;;  %v2021_v7 = vld [vmem:[#allocation3 + $0xf0] sm:$0xff] }
 0x5d4   : > { %v2137_v24 = vpack.c.bf16 %v2021_v7, %v2021_v7  ;;  %v13776_v7 = vld [vmem:[#allocation11 + $0xed8] sm:$0xff]  }
 0x5d5   : > { %12371 = vmatpush3.bf16.msra.mxu0 %v13698_v11  ;;  %v13736_v11 = vld [vmem:[#allocation11 + $0xdc8] sm:$0xff]  }
 0x5d6   : > { %12393 = vmatpush3.bf16.msra.mxu1 %v13699_v48  ;;  %12400 = vmatprep.subr.bf16.mxu0 %v13700_v34  ;;  %v2135_v48 = vpack.c.bf16 %v2018_v15, %v2018_v15  ;;  %v13737_v34 = vld [vmem:[#allocation11 + $0xe48] sm:$0xff]   ;;  %v13773_v15 = vld [vmem:[#allocation11 + $0xf50] sm:$0xff]  }
 0x5d7   : > { %12422 = vmatprep.subr.bf16.mxu1 %v13701_v20  ;;  %v13738_v20 = vld [vmem:[#allocation11 + $0xd88] sm:$0xff]  }
 0x5d8   : > { %9670 = vmatmul.mubr.bf16.vlgmr.msra.gmra.mrb[68].mxu0 %v2126_v35  ;;  %v13742_v35 = vld [vmem:[#allocation11 + $0xd90] sm:$0xff]  }
 0x5d9   : > { %9710 = vmatmul.mubr.bf16.vlgmr.msra.gmra.mrb[104].mxu1 %v2128_v16  ;;  %12401 = vmatpush3.bf16.msra.mxu0 %v13702_v40  ;;  %v13740_v40 = vld [vmem:[#allocation11 + $0xdd0] sm:$0xff]   ;;  %v13745_v16 = vld [vmem:[#allocation11 + $0xe58] sm:$0xff]  }
 0x5da   : > { %9749 = vmatprep.mubr.bf16.mxu0 %v2131_v23  ;;  %12423 = vmatpush3.bf16.msra.mxu1 %v13703_v46  ;;  %v13743_v46 = vld [vmem:[#allocation11 + $0xe10] sm:$0xff]   ;;  %v13747_v23 = vld [vmem:[#allocation11 + $0xe18] sm:$0xff]  }
 0x5db   : > { %9789 = vmatprep.mubr.bf16.mxu1 %v2133_v58  ;;  %12402 = vmatprep.subr.bf16.mxu0 %v13704_v29  ;;  %v13746_v29 = vld [vmem:[#allocation11 + $0xd98] sm:$0xff]   ;;  %v13749_v58 = vld [vmem:[#allocation11 + $0xe60] sm:$0xff]  }
 0x5dc   : > { %12424 = vmatprep.subr.bf16.mxu1 %v13705_v59  ;;  %v13748_v59 = vld [vmem:[#allocation11 + $0xde0] sm:$0xff]  }
 0x5dd   : > { %12403 = vmatpush3.bf16.msra.mxu0 %v13706_v10  ;;  %v13750_v10 = vld [vmem:[#allocation11 + $0xda0] sm:$0xff]  }
 0x5de   : > { %12425 = vmatpush3.bf16.msra.mxu1 %v13707_v41  ;;  %12404 = vmatprep.subr.bf16.mxu0 %v13708_v14  ;;  %v13751_v41 = vld [vmem:[#allocation11 + $0xe20] sm:$0xff]   ;;  %v13752_v14 = vld [vmem:[#allocation11 + $0xde8] sm:$0xff]  }
 0x5df   : > { %12426 = vmatprep.subr.bf16.mxu1 %v13709_v49  ;;  %v13753_v49 = vld [vmem:[#allocation11 + $0xe68] sm:$0xff]  }
 0x5e1   : > { %12405 = vmatpush3.bf16.msra.mxu0 %v13710_v52  ;;  %v13754_v52 = vld [vmem:[#allocation11 + $0xda8] sm:$0xff]  }
 0x5e2   : > { %12427 = vmatpush3.bf16.msra.mxu1 %v13711_v26  ;;  %12406 = vmatprep.subr.bf16.mxu0 %v13712_v17  ;;  %v13755_v26 = vld [vmem:[#allocation11 + $0xe28] sm:$0xff]   ;;  %v13756_v17 = vld [vmem:[#allocation11 + $0xdf0] sm:$0xff]  }
 0x5e3   : > { %12428 = vmatprep.subr.bf16.mxu1 %v13713_v3 }
 0x5e5   : > { %12407 = vmatpush3.bf16.msra.mxu0 %v13714_v55  ;;  %v13757_v55 = vld [vmem:[#allocation11 + $0xe70] sm:$0xff]  }
 0x5e6   : > { %12429 = vmatpush3.bf16.msra.mxu1 %v13715_v44  ;;  %12408 = vmatprep.subr.bf16.mxu0 %v13716_v5 }
 0x5e7   : > { %12430 = vmatprep.subr.bf16.mxu1 %v13717_v13 }
 0x5e9   : > { %12409 = vmatpush3.bf16.msra.mxu0 %v13718_v54 }
 0x5ea   : > { %12431 = vmatpush3.bf16.msra.mxu1 %v13719_v2  ;;  %12410 = vmatprep.subr.bf16.mxu0 %v13720_v60  ;;  %v13758_v60 = vld [vmem:[#allocation11 + $0xdb0] sm:$0xff]  }
 0x5eb   : > { %v12108_v19 = vpop.f32.mrb[44].mxu0  ;;  %12432 = vmatprep.subr.bf16.mxu1 %v13721_v6 }
 0x5ec   : > { %v12130_v22 = vpop.f32.mrb[80].mxu1  ;;  %v12109_v57 = vpop.f32.mrb[45].mxu0 }
 0x5ed   : > { %v12110_v50 = vadd.f32 %v12109_v57, %v12108_v19  ;;  %v12131_v47 = vpop.f32.mrb[81].mxu1  ;;  %v12111_v51 = vpop.f32.mrb[46].mxu0  ;;  %12411 = vmatpush3.bf16.msra.mxu0 %v13722_v12  ;;  %v13760_v19 = vld [vmem:[#allocation11 + $0xdf8] sm:$0xff]  }
 0x5ee   : > { %v12132_v61 = vadd.f32 %v12131_v47, %v12130_v22  ;;  %v12133_v56 = vpop.f32.mrb[82].mxu1  ;;  %12433 = vmatpush3.bf16.msra.mxu1 %v13723_v0  ;;  %v12112_v53 = vpop.f32.mrb[47].mxu0  ;;  %12412 = vmatprep.subr.bf16.mxu0 %v13724_v37  ;;  %v13759_v37 = vld [vmem:[#allocation11 + $0xe30] sm:$0xff]   ;;  %v13761_v57 = vld [vmem:[#allocation11 + $0xe78] sm:$0xff]  }
 0x5ef   : > { %v9192_v33 = vadd.f32 %v12110_v50, %v15481_v18  ;;  %v12134_v45 = vpop.f32.mrb[83].mxu1  ;;  %12434 = vmatprep.subr.bf16.mxu1 %v13725_v21  ;;  %v2132_v18 = vpack.c.bf16 %v2014_v63, %v2014_v63  ;;  %v13762_v47 = vld [vmem:[#allocation11 + $0xdb8] sm:$0xff]   ;;  %v13765_v56 = vld [vmem:[#allocation11 + $0xf40] sm:$0xff]   ;;  %v2019_v53 = vld [vmem:[#allocation3 + $0x192] sm:$0xff] }
 0x5f0   : > { %v13763_v51 = vld [vmem:[#allocation11 + $0xe38] sm:$0xff]   ;;  %v13767_v45 = vld [vmem:[#allocation11 + $0xf00] sm:$0xff]   ;;  %v13771_v63 = vld [vmem:[#allocation11 + $0xf08] sm:$0xff]  }
 0x5f1   : > { %v15484_v27 = vadd.f32 %v12132_v61, %v9192_v33  ;;  %12413 = vmatpush3.bf16.msra.mxu0 %v13726_v42  ;;  %v13764_v42 = vld [vmem:[#allocation11 + $0xec0] sm:$0xff]   ;;  %v2017_v61 = vld [vmem:[#allocation3 + $0x190] sm:$0xff] }
 0x5f2   : > { %12435 = vmatpush3.bf16.msra.mxu1 %v13727_v9  ;;  %12414 = vmatprep.subr.bf16.mxu0 %v13728_v39  ;;  %v13766_v9 = vld [vmem:[#allocation11 + $0xe80] sm:$0xff]   ;;  %v2023_v39 = vld [vmem:[#allocation3 + $0xf2] sm:$0xff]  ;;  %v2134_v33 = vpack.c.bf16 %v2017_v61, %v2017_v61 }
 0x5f3   : > { %12436 = vmatprep.subr.bf16.mxu1 %v13729_v36  ;;  %v2026_v36 = vld [vmem:[#allocation3 + $0x231] sm:$0xff] }
 0x5f4   : > { %v2141_v28 = vpack.c.bf16 %v2026_v36, %v2026_v36  ;;  %v13808_v36 = vld [vmem:[#allocation11 + $0xfd8] sm:$0xff]  }
 0x5f5   : > { %12415 = vmatpush3.bf16.msra.mxu0 %v13730_v25  ;;  %v13768_v25 = vld [vmem:[#allocation11 + $0xec8] sm:$0xff]  }
 0x5f6   : > { %12437 = vmatpush3.bf16.msra.mxu1 %v13731_v31  ;;  %12444 = vmatprep.subr.bf16.mxu0 %v13732_v43  ;;  %v2139_v31 = vpack.c.bf16 %v2023_v39, %v2023_v39  ;;  %v13769_v43 = vld [vmem:[#allocation11 + $0xf48] sm:$0xff]   ;;  %v13805_v39 = vld [vmem:[#allocation11 + $0x1050] sm:$0xff]  }
 0x5f7   : > { %12466 = vmatprep.subr.bf16.mxu1 %v13733_v38  ;;  %v13770_v38 = vld [vmem:[#allocation11 + $0xe88] sm:$0xff]  }
 0x5f8   : > { %9750 = vmatmul.mubr.bf16.vlgmr.msra.gmra.mrb[72].mxu0 %v2130_v4  ;;  %v13774_v4 = vld [vmem:[#allocation11 + $0xe90] sm:$0xff]  }
 0x5f9   : > { %9790 = vmatmul.mubr.bf16.vlgmr.msra.gmra.mrb[108].mxu1 %v2132_v18  ;;  %12445 = vmatpush3.bf16.msra.mxu0 %v13734_v1  ;;  %v13772_v1 = vld [vmem:[#allocation11 + $0xed0] sm:$0xff]   ;;  %v13777_v18 = vld [vmem:[#allocation11 + $0xf58] sm:$0xff]  }
 0x5fa   : > { %9829 = vmatprep.mubr.bf16.mxu0 %v2135_v48  ;;  %12467 = vmatpush3.bf16.msra.mxu1 %v13735_v62  ;;  %v13775_v62 = vld [vmem:[#allocation11 + $0xf10] sm:$0xff]   ;;  %v13779_v48 = vld [vmem:[#allocation11 + $0xf18] sm:$0xff]  }
 0x5fb   : > { %9869 = vmatprep.mubr.bf16.mxu1 %v2137_v24  ;;  %12446 = vmatprep.subr.bf16.mxu0 %v13736_v11  ;;  %v13778_v11 = vld [vmem:[#allocation11 + $0xe98] sm:$0xff]   ;;  %v13781_v24 = vld [vmem:[#allocation11 + $0xf60] sm:$0xff]  }
 0x5fc   : > { %12468 = vmatprep.subr.bf16.mxu1 %v13737_v34  ;;  %v13780_v34 = vld [vmem:[#allocation11 + $0xee0] sm:$0xff]  }
 0x5fd   : > { %12447 = vmatpush3.bf16.msra.mxu0 %v13738_v20  ;;  %v13782_v20 = vld [vmem:[#allocation11 + $0xea0] sm:$0xff]  }
 0x5fe   : > { %12469 = vmatpush3.bf16.msra.mxu1 %v13739_v30  ;;  %12448 = vmatprep.subr.bf16.mxu0 %v13740_v40  ;;  %v13783_v30 = vld [vmem:[#allocation11 + $0xf20] sm:$0xff]   ;;  %v13784_v40 = vld [vmem:[#allocation11 + $0xee8] sm:$0xff]  }
 0x5ff   : > { %12470 = vmatprep.subr.bf16.mxu1 %v13741_v32  ;;  %v13785_v32 = vld [vmem:[#allocation11 + $0xf68] sm:$0xff]  }
 0x601   : > { %12449 = vmatpush3.bf16.msra.mxu0 %v13742_v35  ;;  %v13786_v35 = vld [vmem:[#allocation11 + $0xea8] sm:$0xff]  }
 0x602   : > { %12471 = vmatpush3.bf16.msra.mxu1 %v13743_v46  ;;  %12450 = vmatprep.subr.bf16.mxu0 %v13744_v8  ;;  %v13787_v46 = vld [vmem:[#allocation11 + $0xf28] sm:$0xff]   ;;  %v13788_v8 = vld [vmem:[#allocation11 + $0xef0] sm:$0xff]  }
 0x603   : > { %12472 = vmatprep.subr.bf16.mxu1 %v13745_v16 }
 0x605   : > { %12451 = vmatpush3.bf16.msra.mxu0 %v13746_v29  ;;  %v13789_v29 = vld [vmem:[#allocation11 + $0xf70] sm:$0xff]  }
 0x606   : > { %12473 = vmatpush3.bf16.msra.mxu1 %v13747_v23  ;;  %12452 = vmatprep.subr.bf16.mxu0 %v13748_v59 }
 0x607   : > { %12474 = vmatprep.subr.bf16.mxu1 %v13749_v58 }
 0x609   : > { %12453 = vmatpush3.bf16.msra.mxu0 %v13750_v10 }
 0x60a   : > { %12475 = vmatpush3.bf16.msra.mxu1 %v13751_v41  ;;  %12454 = vmatprep.subr.bf16.mxu0 %v13752_v14  ;;  %v13790_v14 = vld [vmem:[#allocation11 + $0xeb0] sm:$0xff]  }
 0x60b   : > { %v12152_v3 = vpop.f32.mrb[48].mxu0  ;;  %12476 = vmatprep.subr.bf16.mxu1 %v13753_v49 }
 0x60c   : > { %v12174_v44 = vpop.f32.mrb[84].mxu1  ;;  %v12153_v5 = vpop.f32.mrb[49].mxu0 }
 0x60d   : > { %v12154_v13 = vadd.f32 %v12153_v5, %v12152_v3  ;;  %v12175_v54 = vpop.f32.mrb[85].mxu1  ;;  %v12155_v2 = vpop.f32.mrb[50].mxu0  ;;  %12455 = vmatpush3.bf16.msra.mxu0 %v13754_v52  ;;  %v13792_v3 = vld [vmem:[#allocation11 + $0xef8] sm:$0xff]  }
 0x60e   : > { %v12176_v6 = vadd.f32 %v12175_v54, %v12174_v44  ;;  %v12177_v12 = vpop.f32.mrb[86].mxu1  ;;  %12477 = vmatpush3.bf16.msra.mxu1 %v13755_v26  ;;  %v12156_v0 = vpop.f32.mrb[51].mxu0  ;;  %12456 = vmatprep.subr.bf16.mxu0 %v13756_v17  ;;  %v13791_v17 = vld [vmem:[#allocation11 + $0xf30] sm:$0xff]   ;;  %v13793_v5 = vld [vmem:[#allocation11 + $0xf78] sm:$0xff]  }
 0x60f   : > { %v9272_v21 = vadd.f32 %v12154_v13, %v15484_v27  ;;  %v12178_v22 = vpop.f32.mrb[87].mxu1  ;;  %12478 = vmatprep.subr.bf16.mxu1 %v13757_v55  ;;  %v2136_v27 = vpack.c.bf16 %v2019_v53, %v2019_v53  ;;  %v13794_v54 = vld [vmem:[#allocation11 + $0xeb8] sm:$0xff]   ;;  %v13797_v12 = vld [vmem:[#allocation11 + $0x1040] sm:$0xff]   ;;  %v2025_v0 = vld [vmem:[#allocation3 + $0x230] sm:$0xff] }
 0x610   : > { %v13795_v2 = vld [vmem:[#allocation11 + $0xf38] sm:$0xff]   ;;  %v13799_v22 = vld [vmem:[#allocation11 + $0x1000] sm:$0xff]   ;;  %v13803_v53 = vld [vmem:[#allocation11 + $0x1008] sm:$0xff]  }
 0x611   : > { %v15487_v50 = vadd.f32 %v12176_v6, %v9272_v21  ;;  %12457 = vmatpush3.bf16.msra.mxu0 %v13758_v60  ;;  %v13796_v60 = vld [vmem:[#allocation11 + $0xfc0] sm:$0xff]   ;;  %v2022_v6 = vld [vmem:[#allocation3 + $0xf1] sm:$0xff] }
 0x612   : > { %12479 = vmatpush3.bf16.msra.mxu1 %v13759_v37  ;;  %12458 = vmatprep.subr.bf16.mxu0 %v13760_v19  ;;  %v13798_v37 = vld [vmem:[#allocation11 + $0xf80] sm:$0xff]   ;;  %v2138_v21 = vpack.c.bf16 %v2022_v6, %v2022_v6 }
 0x613   : > { %12480 = vmatprep.subr.bf16.mxu1 %v13761_v57  ;;  %v2029_v19 = vld [vmem:[#allocation3 + $0x60] sm:$0xff] }
 0x614   : > { %v2031_v57 = vld [vmem:[#allocation3 + $0x62] sm:$0xff] }
 0x615   : > { %12459 = vmatpush3.bf16.msra.mxu0 %v13762_v47  ;;  %v13800_v47 = vld [vmem:[#allocation11 + $0xfc8] sm:$0xff]   ;;  %v2145_v61 = vpack.c.bf16 %v2031_v57, %v2031_v57  ;;  %v13840_v57 = vld [vmem:[#allocation11 + $0x10d8] sm:$0xff]  }
 0x616   : > { %12481 = vmatpush3.bf16.msra.mxu1 %v13763_v51  ;;  %12488 = vmatprep.subr.bf16.mxu0 %v13764_v42  ;;  %v2143_v51 = vpack.c.bf16 %v2029_v19, %v2029_v19  ;;  %v13801_v42 = vld [vmem:[#allocation11 + $0x1048] sm:$0xff]   ;;  %v13837_v19 = vld [vmem:[#allocation11 + $0x1150] sm:$0xff]  }
 0x617   : > { %12510 = vmatprep.subr.bf16.mxu1 %v13765_v56  ;;  %v13802_v56 = vld [vmem:[#allocation11 + $0xf88] sm:$0xff]  }
 0x618   : > { %9830 = vmatmul.mubr.bf16.vlgmr.msra.gmra.mrb[76].mxu0 %v2134_v33  ;;  %v13806_v33 = vld [vmem:[#allocation11 + $0xf90] sm:$0xff]  }
 0x619   : > { %9870 = vmatmul.mubr.bf16.vlgmr.msra.gmra.mrb[112].mxu1 %v2136_v27  ;;  %12489 = vmatpush3.bf16.msra.mxu0 %v13766_v9  ;;  %v13804_v9 = vld [vmem:[#allocation11 + $0xfd0] sm:$0xff]   ;;  %v13809_v27 = vld [vmem:[#allocation11 + $0x1058] sm:$0xff]  }
 0x61a   : > { %9909 = vmatprep.mubr.bf16.mxu0 %v2139_v31  ;;  %12511 = vmatpush3.bf16.msra.mxu1 %v13767_v45  ;;  %v13807_v45 = vld [vmem:[#allocation11 + $0x1010] sm:$0xff]   ;;  %v13811_v31 = vld [vmem:[#allocation11 + $0x1018] sm:$0xff]  }
 0x61b   : > { %9949 = vmatprep.mubr.bf16.mxu1 %v2141_v28  ;;  %12490 = vmatprep.subr.bf16.mxu0 %v13768_v25  ;;  %v13810_v25 = vld [vmem:[#allocation11 + $0xf98] sm:$0xff]   ;;  %v13813_v28 = vld [vmem:[#allocation11 + $0x1060] sm:$0xff]  }
 0x61c   : > { %12512 = vmatprep.subr.bf16.mxu1 %v13769_v43  ;;  %v13812_v43 = vld [vmem:[#allocation11 + $0xfe0] sm:$0xff]  }
 0x61d   : > { %12491 = vmatpush3.bf16.msra.mxu0 %v13770_v38  ;;  %v13814_v38 = vld [vmem:[#allocation11 + $0xfa0] sm:$0xff]  }
 0x61e   : > { %12513 = vmatpush3.bf16.msra.mxu1 %v13771_v63  ;;  %12492 = vmatprep.subr.bf16.mxu0 %v13772_v1  ;;  %v13815_v63 = vld [vmem:[#allocation11 + $0x1020] sm:$0xff]   ;;  %v13816_v1 = vld [vmem:[#allocation11 + $0xfe8] sm:$0xff]  }
 0x61f   : > { %12514 = vmatprep.subr.bf16.mxu1 %v13773_v15  ;;  %v13817_v15 = vld [vmem:[#allocation11 + $0x1068] sm:$0xff]  }
 0x621   : > { %12493 = vmatpush3.bf16.msra.mxu0 %v13774_v4  ;;  %v13818_v4 = vld [vmem:[#allocation11 + $0xfa8] sm:$0xff]  }
 0x622   : > { %12515 = vmatpush3.bf16.msra.mxu1 %v13775_v62  ;;  %12494 = vmatprep.subr.bf16.mxu0 %v13776_v7  ;;  %v13819_v62 = vld [vmem:[#allocation11 + $0x1028] sm:$0xff]   ;;  %v13820_v7 = vld [vmem:[#allocation11 + $0xff0] sm:$0xff]  }
 0x623   : > { %12516 = vmatprep.subr.bf16.mxu1 %v13777_v18 }
 0x625   : > { %12495 = vmatpush3.bf16.msra.mxu0 %v13778_v11  ;;  %v13821_v11 = vld [vmem:[#allocation11 + $0x1070] sm:$0xff]  }
 0x626   : > { %12517 = vmatpush3.bf16.msra.mxu1 %v13779_v48  ;;  %12496 = vmatprep.subr.bf16.mxu0 %v13780_v34 }
 0x627   : > { %12518 = vmatprep.subr.bf16.mxu1 %v13781_v24 }
 0x629   : > { %12497 = vmatpush3.bf16.msra.mxu0 %v13782_v20 }
 0x62a   : > { %12519 = vmatpush3.bf16.msra.mxu1 %v13783_v30  ;;  %12498 = vmatprep.subr.bf16.mxu0 %v13784_v40  ;;  %v13822_v40 = vld [vmem:[#allocation11 + $0xfb0] sm:$0xff]  }
 0x62b   : > { %v12196_v16 = vpop.f32.mrb[52].mxu0  ;;  %12520 = vmatprep.subr.bf16.mxu1 %v13785_v32 }
 0x62c   : > { %v12218_v23 = vpop.f32.mrb[88].mxu1  ;;  %v12197_v59 = vpop.f32.mrb[53].mxu0 }
 0x62d   : > { %v12198_v58 = vadd.f32 %v12197_v59, %v12196_v16  ;;  %v12219_v10 = vpop.f32.mrb[89].mxu1  ;;  %v12199_v41 = vpop.f32.mrb[54].mxu0  ;;  %12499 = vmatpush3.bf16.msra.mxu0 %v13786_v35  ;;  %v13824_v16 = vld [vmem:[#allocation11 + $0xff8] sm:$0xff]  }
 0x62e   : > { %v12220_v49 = vadd.f32 %v12219_v10, %v12218_v23  ;;  %v12221_v52 = vpop.f32.mrb[90].mxu1  ;;  %12521 = vmatpush3.bf16.msra.mxu1 %v13787_v46  ;;  %v12200_v26 = vpop.f32.mrb[55].mxu0  ;;  %12500 = vmatprep.subr.bf16.mxu0 %v13788_v8  ;;  %v13823_v8 = vld [vmem:[#allocation11 + $0x1030] sm:$0xff]   ;;  %v13825_v59 = vld [vmem:[#allocation11 + $0x1078] sm:$0xff]  }
 0x62f   : > { %v9352_v55 = vadd.f32 %v12198_v58, %v15487_v50  ;;  %v12222_v44 = vpop.f32.mrb[91].mxu1  ;;  %12522 = vmatprep.subr.bf16.mxu1 %v13789_v29  ;;  %v2140_v50 = vpack.c.bf16 %v2025_v0, %v2025_v0  ;;  %v13826_v10 = vld [vmem:[#allocation11 + $0xfb8] sm:$0xff]   ;;  %v13829_v52 = vld [vmem:[#allocation11 + $0x1140] sm:$0xff]   ;;  %v13835_v0 = vld [vmem:[#allocation11 + $0x1108] sm:$0xff]  }
 0x630   : > { %v13827_v41 = vld [vmem:[#allocation11 + $0x1038] sm:$0xff]   ;;  %v13831_v44 = vld [vmem:[#allocation11 + $0x1100] sm:$0xff]  }
 0x631   : > { %v15490_v13 = vadd.f32 %v12220_v49, %v9352_v55  ;;  %12501 = vmatpush3.bf16.msra.mxu0 %v13790_v14  ;;  %v13828_v14 = vld [vmem:[#allocation11 + $0x10c0] sm:$0xff]   ;;  %v2027_v49 = vld [vmem:[#allocation3 + $0x232] sm:$0xff] }
 0x632   : > { %12523 = vmatpush3.bf16.msra.mxu1 %v13791_v17  ;;  %12502 = vmatprep.subr.bf16.mxu0 %v13792_v3  ;;  %v2030_v26 = vld [vmem:[#allocation3 + $0x61] sm:$0xff]  ;;  %v2142_v55 = vpack.c.bf16 %v2027_v49, %v2027_v49 }
 0x633   : > { %12524 = vmatprep.subr.bf16.mxu1 %v13793_v5  ;;  %v13830_v17 = vld [vmem:[#allocation11 + $0x1080] sm:$0xff]  }
 0x634   : > { %v2034_v3 = vld [vmem:[#allocation3 + $0x1a1] sm:$0xff] }
 0x635   : > { %12503 = vmatpush3.bf16.msra.mxu0 %v13794_v54  ;;  %v2037_v5 = vld [vmem:[#allocation3 + $0x100] sm:$0xff]  ;;  %v13832_v54 = vld [vmem:[#allocation11 + $0x10c8] sm:$0xff]  }
 0x636   : > { %12525 = vmatpush3.bf16.msra.mxu1 %v13795_v2  ;;  %12532 = vmatprep.subr.bf16.mxu0 %v13796_v60  ;;  %v2147_v2 = vpack.c.bf16 %v2034_v3, %v2034_v3  ;;  %v13833_v60 = vld [vmem:[#allocation11 + $0x1148] sm:$0xff]   ;;  %v2149_v6 = vpack.c.bf16 %v2037_v5, %v2037_v5  ;;  %v13869_v3 = vld [vmem:[#allocation11 + $0x1250] sm:$0xff]   ;;  %v13872_v5 = vld [vmem:[#allocation11 + $0x11d8] sm:$0xff]  }
 0x637   : > { %12554 = vmatprep.subr.bf16.mxu1 %v13797_v12  ;;  %v13834_v12 = vld [vmem:[#allocation11 + $0x1088] sm:$0xff]  }
 0x638   : > { %9910 = vmatmul.mubr.bf16.vlgmr.msra.gmra.mrb[80].mxu0 %v2138_v21  ;;  %v13838_v21 = vld [vmem:[#allocation11 + $0x1090] sm:$0xff]  }
 0x639   : > { %9950 = vmatmul.mubr.bf16.vlgmr.msra.gmra.mrb[116].mxu1 %v2140_v50  ;;  %12533 = vmatpush3.bf16.msra.mxu0 %v13798_v37  ;;  %v13836_v37 = vld [vmem:[#allocation11 + $0x10d0] sm:$0xff]   ;;  %v13841_v50 = vld [vmem:[#allocation11 + $0x1158] sm:$0xff]  }
 0x63a   : > { %9989 = vmatprep.mubr.bf16.mxu0 %v2143_v51  ;;  %12555 = vmatpush3.bf16.msra.mxu1 %v13799_v22  ;;  %v13839_v22 = vld [vmem:[#allocation11 + $0x1110] sm:$0xff]   ;;  %v13843_v51 = vld [vmem:[#allocation11 + $0x1118] sm:$0xff]  }
 0x63b   : > { %10029 = vmatprep.mubr.bf16.mxu1 %v2145_v61  ;;  %12534 = vmatprep.subr.bf16.mxu0 %v13800_v47  ;;  %v13842_v47 = vld [vmem:[#allocation11 + $0x1098] sm:$0xff]   ;;  %v13845_v61 = vld [vmem:[#allocation11 + $0x1160] sm:$0xff]  }
 0x63c   : > { %12556 = vmatprep.subr.bf16.mxu1 %v13801_v42  ;;  %v13844_v42 = vld [vmem:[#allocation11 + $0x10e0] sm:$0xff]  }
 0x63d   : > { %12535 = vmatpush3.bf16.msra.mxu0 %v13802_v56  ;;  %v13846_v56 = vld [vmem:[#allocation11 + $0x10a0] sm:$0xff]  }
 0x63e   : > { %12557 = vmatpush3.bf16.msra.mxu1 %v13803_v53  ;;  %12536 = vmatprep.subr.bf16.mxu0 %v13804_v9  ;;  %v13847_v53 = vld [vmem:[#allocation11 + $0x1120] sm:$0xff]   ;;  %v13848_v9 = vld [vmem:[#allocation11 + $0x10e8] sm:$0xff]  }
 0x63f   : > { %12558 = vmatprep.subr.bf16.mxu1 %v13805_v39  ;;  %v13849_v39 = vld [vmem:[#allocation11 + $0x1168] sm:$0xff]  }
 0x641   : > { %12537 = vmatpush3.bf16.msra.mxu0 %v13806_v33  ;;  %v13850_v33 = vld [vmem:[#allocation11 + $0x10a8] sm:$0xff]  }
 0x642   : > { %12559 = vmatpush3.bf16.msra.mxu1 %v13807_v45  ;;  %12538 = vmatprep.subr.bf16.mxu0 %v13808_v36  ;;  %v13851_v45 = vld [vmem:[#allocation11 + $0x1128] sm:$0xff]   ;;  %v13852_v36 = vld [vmem:[#allocation11 + $0x10f0] sm:$0xff]  }
 0x643   : > { %12560 = vmatprep.subr.bf16.mxu1 %v13809_v27 }
 0x645   : > { %12539 = vmatpush3.bf16.msra.mxu0 %v13810_v25  ;;  %v13853_v25 = vld [vmem:[#allocation11 + $0x1170] sm:$0xff]  }
 0x646   : > { %12561 = vmatpush3.bf16.msra.mxu1 %v13811_v31  ;;  %12540 = vmatprep.subr.bf16.mxu0 %v13812_v43 }
 0x647   : > { %12562 = vmatprep.subr.bf16.mxu1 %v13813_v28 }
 0x649   : > { %12541 = vmatpush3.bf16.msra.mxu0 %v13814_v38 }
 0x64a   : > { %12563 = vmatpush3.bf16.msra.mxu1 %v13815_v63  ;;  %12542 = vmatprep.subr.bf16.mxu0 %v13816_v1  ;;  %v13854_v1 = vld [vmem:[#allocation11 + $0x10b0] sm:$0xff]  }
 0x64b   : > { %v12240_v18 = vpop.f32.mrb[56].mxu0  ;;  %12564 = vmatprep.subr.bf16.mxu1 %v13817_v15 }
 0x64c   : > { %v12262_v48 = vpop.f32.mrb[92].mxu1  ;;  %v12241_v34 = vpop.f32.mrb[57].mxu0 }
 0x64d   : > { %v12242_v24 = vadd.f32 %v12241_v34, %v12240_v18  ;;  %v12263_v20 = vpop.f32.mrb[93].mxu1  ;;  %v12243_v30 = vpop.f32.mrb[58].mxu0  ;;  %12543 = vmatpush3.bf16.msra.mxu0 %v13818_v4  ;;  %v13856_v18 = vld [vmem:[#allocation11 + $0x10f8] sm:$0xff]  }
 0x64e   : > { %v12264_v32 = vadd.f32 %v12263_v20, %v12262_v48  ;;  %v12265_v35 = vpop.f32.mrb[94].mxu1  ;;  %12565 = vmatpush3.bf16.msra.mxu1 %v13819_v62  ;;  %v12244_v46 = vpop.f32.mrb[59].mxu0  ;;  %12544 = vmatprep.subr.bf16.mxu0 %v13820_v7  ;;  %v13855_v7 = vld [vmem:[#allocation11 + $0x1130] sm:$0xff]   ;;  %v13857_v34 = vld [vmem:[#allocation11 + $0x1178] sm:$0xff]  }
 0x64f   : > { %v9432_v29 = vadd.f32 %v12242_v24, %v15490_v13  ;;  %v12266_v23 = vpop.f32.mrb[95].mxu1  ;;  %12566 = vmatprep.subr.bf16.mxu1 %v13821_v11  ;;  %v2144_v13 = vpack.c.bf16 %v2030_v26, %v2030_v26  ;;  %v13858_v20 = vld [vmem:[#allocation11 + $0x10b8] sm:$0xff]   ;;  %v13861_v35 = vld [vmem:[#allocation11 + $0x1240] sm:$0xff]   ;;  %v13867_v26 = vld [vmem:[#allocation11 + $0x1208] sm:$0xff]  }
 0x650   : > { %v13859_v30 = vld [vmem:[#allocation11 + $0x1138] sm:$0xff]   ;;  %v13863_v23 = vld [vmem:[#allocation11 + $0x1200] sm:$0xff]  }
 0x651   : > { %v15493_v58 = vadd.f32 %v12264_v32, %v9432_v29  ;;  %12545 = vmatpush3.bf16.msra.mxu0 %v13822_v40  ;;  %v13860_v40 = vld [vmem:[#allocation11 + $0x11c0] sm:$0xff]  }
 0x652   : > { %12567 = vmatpush3.bf16.msra.mxu1 %v13823_v8  ;;  %12546 = vmatprep.subr.bf16.mxu0 %v13824_v16  ;;  %v2033_v32 = vld [vmem:[#allocation3 + $0x1a0] sm:$0xff] }
 0x653   : > { %12568 = vmatprep.subr.bf16.mxu1 %v13825_v59  ;;  %v2035_v46 = vld [vmem:[#allocation3 + $0x1a2] sm:$0xff]  ;;  %v2146_v29 = vpack.c.bf16 %v2033_v32, %v2033_v32 }
 0x654   : > { %v13862_v8 = vld [vmem:[#allocation11 + $0x1180] sm:$0xff]  }
 0x655   : > { %12547 = vmatpush3.bf16.msra.mxu0 %v13826_v10  ;;  %v2039_v16 = vld [vmem:[#allocation3 + $0x102] sm:$0xff]  ;;  %v13864_v10 = vld [vmem:[#allocation11 + $0x11c8] sm:$0xff]  }
 0x656   : > { %12569 = vmatpush3.bf16.msra.mxu1 %v13827_v41  ;;  %12576 = vmatprep.subr.bf16.mxu0 %v13828_v14  ;;  %v2042_v59 = vld [vmem:[#allocation3 + $0x241] sm:$0xff]  ;;  %v2151_v41 = vpack.c.bf16 %v2039_v16, %v2039_v16  ;;  %v13865_v14 = vld [vmem:[#allocation11 + $0x1248] sm:$0xff]   ;;  %v13901_v16 = vld [vmem:[#allocation11 + $0x1350] sm:$0xff]  }
 0x657   : > { %12598 = vmatprep.subr.bf16.mxu1 %v13829_v52  ;;  %v2153_v49 = vpack.c.bf16 %v2042_v59, %v2042_v59  ;;  %v13866_v52 = vld [vmem:[#allocation11 + $0x1188] sm:$0xff]   ;;  %v13904_v59 = vld [vmem:[#allocation11 + $0x12d8] sm:$0xff]  }
 0x658   : > { %9990 = vmatmul.mubr.bf16.vlgmr.msra.gmra.mrb[84].mxu0 %v2142_v55  ;;  %v13870_v55 = vld [vmem:[#allocation11 + $0x1190] sm:$0xff]  }
 0x659   : > { %10030 = vmatmul.mubr.bf16.vlgmr.msra.gmra.mrb[120].mxu1 %v2144_v13  ;;  %12577 = vmatpush3.bf16.msra.mxu0 %v13830_v17  ;;  %v13868_v17 = vld [vmem:[#allocation11 + $0x11d0] sm:$0xff]   ;;  %v13873_v13 = vld [vmem:[#allocation11 + $0x1258] sm:$0xff]  }
 0x65a   : > { %10069 = vmatprep.mubr.bf16.mxu0 %v2147_v2  ;;  %12599 = vmatpush3.bf16.msra.mxu1 %v13831_v44  ;;  %v13871_v44 = vld [vmem:[#allocation11 + $0x1210] sm:$0xff]   ;;  %v13875_v2 = vld [vmem:[#allocation11 + $0x1218] sm:$0xff]  }
 0x65b   : > { %10109 = vmatprep.mubr.bf16.mxu1 %v2149_v6  ;;  %12578 = vmatprep.subr.bf16.mxu0 %v13832_v54  ;;  %v13874_v54 = vld [vmem:[#allocation11 + $0x1198] sm:$0xff]   ;;  %v13877_v6 = vld [vmem:[#allocation11 + $0x1260] sm:$0xff]  }
 0x65c   : > { %12600 = vmatprep.subr.bf16.mxu1 %v13833_v60  ;;  %v13876_v60 = vld [vmem:[#allocation11 + $0x11e0] sm:$0xff]  }
 0x65d   : > { %12579 = vmatpush3.bf16.msra.mxu0 %v13834_v12  ;;  %v13878_v12 = vld [vmem:[#allocation11 + $0x11a0] sm:$0xff]  }
 0x65e   : > { %12601 = vmatpush3.bf16.msra.mxu1 %v13835_v0  ;;  %12580 = vmatprep.subr.bf16.mxu0 %v13836_v37  ;;  %v13879_v0 = vld [vmem:[#allocation11 + $0x1220] sm:$0xff]   ;;  %v13880_v37 = vld [vmem:[#allocation11 + $0x11e8] sm:$0xff]  }
 0x65f   : > { %12602 = vmatprep.subr.bf16.mxu1 %v13837_v19  ;;  %v13881_v19 = vld [vmem:[#allocation11 + $0x1268] sm:$0xff]  }
 0x661   : > { %12581 = vmatpush3.bf16.msra.mxu0 %v13838_v21  ;;  %v13882_v21 = vld [vmem:[#allocation11 + $0x11a8] sm:$0xff]  }
 0x662   : > { %12603 = vmatpush3.bf16.msra.mxu1 %v13839_v22  ;;  %12582 = vmatprep.subr.bf16.mxu0 %v13840_v57  ;;  %v13883_v22 = vld [vmem:[#allocation11 + $0x1228] sm:$0xff]   ;;  %v13884_v57 = vld [vmem:[#allocation11 + $0x11f0] sm:$0xff]  }
 0x663   : > { %12604 = vmatprep.subr.bf16.mxu1 %v13841_v50 }
 0x665   : > { %12583 = vmatpush3.bf16.msra.mxu0 %v13842_v47  ;;  %v13885_v47 = vld [vmem:[#allocation11 + $0x1270] sm:$0xff]  }
 0x666   : > { %12605 = vmatpush3.bf16.msra.mxu1 %v13843_v51  ;;  %12584 = vmatprep.subr.bf16.mxu0 %v13844_v42 }
 0x667   : > { %12606 = vmatprep.subr.bf16.mxu1 %v13845_v61 }
 0x669   : > { %12585 = vmatpush3.bf16.msra.mxu0 %v13846_v56 }
 0x66a   : > { %12607 = vmatpush3.bf16.msra.mxu1 %v13847_v53  ;;  %12586 = vmatprep.subr.bf16.mxu0 %v13848_v9  ;;  %v13886_v9 = vld [vmem:[#allocation11 + $0x11b0] sm:$0xff]  }
 0x66b   : > { %v12284_v27 = vpop.f32.mrb[60].mxu0  ;;  %12608 = vmatprep.subr.bf16.mxu1 %v13849_v39 }
 0x66c   : > { %v12306_v31 = vpop.f32.mrb[96].mxu1  ;;  %v12285_v43 = vpop.f32.mrb[61].mxu0 }
 0x66d   : > { %v12286_v28 = vadd.f32 %v12285_v43, %v12284_v27  ;;  %v12307_v38 = vpop.f32.mrb[97].mxu1  ;;  %v12287_v63 = vpop.f32.mrb[62].mxu0  ;;  %12587 = vmatpush3.bf16.msra.mxu0 %v13850_v33  ;;  %v13888_v27 = vld [vmem:[#allocation11 + $0x11f8] sm:$0xff]  }
 0x66e   : > { %v12308_v15 = vadd.f32 %v12307_v38, %v12306_v31  ;;  %v12309_v4 = vpop.f32.mrb[98].mxu1  ;;  %12609 = vmatpush3.bf16.msra.mxu1 %v13851_v45  ;;  %v12288_v62 = vpop.f32.mrb[63].mxu0  ;;  %12588 = vmatprep.subr.bf16.mxu0 %v13852_v36  ;;  %v13887_v36 = vld [vmem:[#allocation11 + $0x1230] sm:$0xff]   ;;  %v13889_v43 = vld [vmem:[#allocation11 + $0x1278] sm:$0xff]  }
 0x66f   : > { %v9512_v11 = vadd.f32 %v12286_v28, %v15493_v58  ;;  %v12310_v48 = vpop.f32.mrb[99].mxu1  ;;  %12610 = vmatprep.subr.bf16.mxu1 %v13853_v25  ;;  %v2148_v58 = vpack.c.bf16 %v2035_v46, %v2035_v46  ;;  %v13890_v38 = vld [vmem:[#allocation11 + $0x11b8] sm:$0xff]   ;;  %v13893_v4 = vld [vmem:[#allocation11 + $0x1340] sm:$0xff]   ;;  %v13899_v46 = vld [vmem:[#allocation11 + $0x1308] sm:$0xff]  }
 0x670   : > { %v13891_v63 = vld [vmem:[#allocation11 + $0x1238] sm:$0xff]   ;;  %v13895_v48 = vld [vmem:[#allocation11 + $0x1300] sm:$0xff]  }
 0x671   : > { %v15496_v24 = vadd.f32 %v12308_v15, %v9512_v11  ;;  %12589 = vmatpush3.bf16.msra.mxu0 %v13854_v1  ;;  %v13892_v1 = vld [vmem:[#allocation11 + $0x12c0] sm:$0xff]  }
 0x672   : > { %12611 = vmatpush3.bf16.msra.mxu1 %v13855_v7  ;;  %12590 = vmatprep.subr.bf16.mxu0 %v13856_v18  ;;  %v2038_v15 = vld [vmem:[#allocation3 + $0x101] sm:$0xff]  ;;  %v2045_v18 = vld [vmem:[#allocation3 + $0x70] sm:$0xff] }
 0x673   : > { %12612 = vmatprep.subr.bf16.mxu1 %v13857_v34  ;;  %v2041_v62 = vld [vmem:[#allocation3 + $0x240] sm:$0xff]  ;;  %v2150_v11 = vpack.c.bf16 %v2038_v15, %v2038_v15  ;;  %v2047_v34 = vld [vmem:[#allocation3 + $0x72] sm:$0xff] }
 0x674   : > { %v13894_v7 = vld [vmem:[#allocation11 + $0x1280] sm:$0xff]   ;;  %v2157_v32 = vpack.c.bf16 %v2047_v34, %v2047_v34  ;;  %v13936_v34 = vld [vmem:[#allocation11 + $0x13d8] sm:$0xff]  }
 0x675   : > { %12591 = vmatpush3.bf16.msra.mxu0 %v13858_v20  ;;  %v13896_v20 = vld [vmem:[#allocation11 + $0x12c8] sm:$0xff]  }
 0x676   : > { %12613 = vmatpush3.bf16.msra.mxu1 %v13859_v30  ;;  %12620 = vmatprep.subr.bf16.mxu0 %v13860_v40  ;;  %v2155_v30 = vpack.c.bf16 %v2045_v18, %v2045_v18  ;;  %v13897_v40 = vld [vmem:[#allocation11 + $0x1348] sm:$0xff]   ;;  %v13933_v18 = vld [vmem:[#allocation11 + $0x1450] sm:$0xff]  }
 0x677   : > { %12642 = vmatprep.subr.bf16.mxu1 %v13861_v35  ;;  %v13898_v35 = vld [vmem:[#allocation11 + $0x1288] sm:$0xff]  }
 0x678   : > { %10070 = vmatmul.mubr.bf16.vlgmr.msra.gmra.mrb[88].mxu0 %v2146_v29  ;;  %v13902_v29 = vld [vmem:[#allocation11 + $0x1290] sm:$0xff]  }
 0x679   : > { %10110 = vmatmul.mubr.bf16.vlgmr.msra.gmra.mrb[124].mxu1 %v2148_v58  ;;  %12621 = vmatpush3.bf16.msra.mxu0 %v13862_v8  ;;  %v13900_v8 = vld [vmem:[#allocation11 + $0x12d0] sm:$0xff]   ;;  %v13905_v58 = vld [vmem:[#allocation11 + $0x1358] sm:$0xff]  }
 0x67a   : > { %10149 = vmatprep.mubr.bf16.mxu0 %v2151_v41  ;;  %12643 = vmatpush3.bf16.msra.mxu1 %v13863_v23  ;;  %v13903_v23 = vld [vmem:[#allocation11 + $0x1310] sm:$0xff]   ;;  %v13907_v41 = vld [vmem:[#allocation11 + $0x1318] sm:$0xff]  }
 0x67b   : > { %10189 = vmatprep.mubr.bf16.mxu1 %v2153_v49  ;;  %12622 = vmatprep.subr.bf16.mxu0 %v13864_v10  ;;  %v13906_v10 = vld [vmem:[#allocation11 + $0x1298] sm:$0xff]   ;;  %v13909_v49 = vld [vmem:[#allocation11 + $0x1360] sm:$0xff]  }
 0x67c   : > { %12644 = vmatprep.subr.bf16.mxu1 %v13865_v14  ;;  %v13908_v14 = vld [vmem:[#allocation11 + $0x12e0] sm:$0xff]  }
 0x67d   : > { %12623 = vmatpush3.bf16.msra.mxu0 %v13866_v52  ;;  %v13910_v52 = vld [vmem:[#allocation11 + $0x12a0] sm:$0xff]  }
 0x67e   : > { %12645 = vmatpush3.bf16.msra.mxu1 %v13867_v26  ;;  %12624 = vmatprep.subr.bf16.mxu0 %v13868_v17  ;;  %v13911_v26 = vld [vmem:[#allocation11 + $0x1320] sm:$0xff]   ;;  %v13912_v17 = vld [vmem:[#allocation11 + $0x12e8] sm:$0xff]  }
 0x67f   : > { %12646 = vmatprep.subr.bf16.mxu1 %v13869_v3  ;;  %v13913_v3 = vld [vmem:[#allocation11 + $0x1368] sm:$0xff]  }
 0x681   : > { %12625 = vmatpush3.bf16.msra.mxu0 %v13870_v55  ;;  %v13914_v55 = vld [vmem:[#allocation11 + $0x12a8] sm:$0xff]  }
 0x682   : > { %12647 = vmatpush3.bf16.msra.mxu1 %v13871_v44  ;;  %12626 = vmatprep.subr.bf16.mxu0 %v13872_v5  ;;  %v13915_v44 = vld [vmem:[#allocation11 + $0x1328] sm:$0xff]   ;;  %v13916_v5 = vld [vmem:[#allocation11 + $0x12f0] sm:$0xff]  }
 0x683   : > { %12648 = vmatprep.subr.bf16.mxu1 %v13873_v13 }
 0x685   : > { %12627 = vmatpush3.bf16.msra.mxu0 %v13874_v54  ;;  %v13917_v54 = vld [vmem:[#allocation11 + $0x1370] sm:$0xff]  }
 0x686   : > { %12649 = vmatpush3.bf16.msra.mxu1 %v13875_v2  ;;  %12628 = vmatprep.subr.bf16.mxu0 %v13876_v60 }
 0x687   : > { %12650 = vmatprep.subr.bf16.mxu1 %v13877_v6 }
 0x689   : > { %12629 = vmatpush3.bf16.msra.mxu0 %v13878_v12 }
 0x68a   : > { %12651 = vmatpush3.bf16.msra.mxu1 %v13879_v0  ;;  %12630 = vmatprep.subr.bf16.mxu0 %v13880_v37  ;;  %v13918_v37 = vld [vmem:[#allocation11 + $0x12b0] sm:$0xff]  }
 0x68b   : > { %v12328_v50 = vpop.f32.mrb[64].mxu0  ;;  %12652 = vmatprep.subr.bf16.mxu1 %v13881_v19 }
 0x68c   : > { %v12350_v51 = vpop.f32.mrb[100].mxu1  ;;  %v12329_v42 = vpop.f32.mrb[65].mxu0 }
 0x68d   : > { %v12330_v61 = vadd.f32 %v12329_v42, %v12328_v50  ;;  %v12351_v56 = vpop.f32.mrb[101].mxu1  ;;  %v12331_v53 = vpop.f32.mrb[66].mxu0  ;;  %12631 = vmatpush3.bf16.msra.mxu0 %v13882_v21  ;;  %v13920_v50 = vld [vmem:[#allocation11 + $0x12f8] sm:$0xff]  }
 0x68e   : > { %v12352_v39 = vadd.f32 %v12351_v56, %v12350_v51  ;;  %v12353_v33 = vpop.f32.mrb[102].mxu1  ;;  %12653 = vmatpush3.bf16.msra.mxu1 %v13883_v22  ;;  %v12332_v45 = vpop.f32.mrb[67].mxu0  ;;  %12632 = vmatprep.subr.bf16.mxu0 %v13884_v57  ;;  %v13919_v57 = vld [vmem:[#allocation11 + $0x1330] sm:$0xff]   ;;  %v13921_v42 = vld [vmem:[#allocation11 + $0x1378] sm:$0xff]  }
 0x68f   : > { %v9592_v25 = vadd.f32 %v12330_v61, %v15496_v24  ;;  %v12354_v31 = vpop.f32.mrb[103].mxu1  ;;  %12654 = vmatprep.subr.bf16.mxu1 %v13885_v47  ;;  %v2152_v24 = vpack.c.bf16 %v2041_v62, %v2041_v62  ;;  %v13922_v56 = vld [vmem:[#allocation11 + $0x12b8] sm:$0xff]   ;;  %v13925_v33 = vld [vmem:[#allocation11 + $0x1440] sm:$0xff]   ;;  %v2046_v45 = vld [vmem:[#allocation3 + $0x71] sm:$0xff] }
 0x690   : > { %v13923_v53 = vld [vmem:[#allocation11 + $0x1338] sm:$0xff]   ;;  %v13927_v31 = vld [vmem:[#allocation11 + $0x1400] sm:$0xff]   ;;  %v13931_v62 = vld [vmem:[#allocation11 + $0x1408] sm:$0xff]  }
 0x691   : > { %v15499_v28 = vadd.f32 %v12352_v39, %v9592_v25  ;;  %12633 = vmatpush3.bf16.msra.mxu0 %v13886_v9  ;;  %v13924_v9 = vld [vmem:[#allocation11 + $0x13c0] sm:$0xff]  }
 0x692   : > { %12655 = vmatpush3.bf16.msra.mxu1 %v13887_v36  ;;  %12634 = vmatprep.subr.bf16.mxu0 %v13888_v27  ;;  %v2043_v39 = vld [vmem:[#allocation3 + $0x242] sm:$0xff]  ;;  %v2050_v27 = vld [vmem:[#allocation3 + $0x1b1] sm:$0xff] }
 0x693   : > { %12656 = vmatprep.subr.bf16.mxu1 %v13889_v43  ;;  %v13926_v36 = vld [vmem:[#allocation11 + $0x1380] sm:$0xff]   ;;  %v2154_v25 = vpack.c.bf16 %v2043_v39, %v2043_v39  ;;  %v2053_v43 = vld [vmem:[#allocation3 + $0x110] sm:$0xff] }
 0x694   : > { %v2161_v15 = vpack.c.bf16 %v2053_v43, %v2053_v43  ;;  %v13968_v43 = vld [vmem:[#allocation11 + $0x14d8] sm:$0xff]  }
 0x695   : > { %12635 = vmatpush3.bf16.msra.mxu0 %v13890_v38  ;;  %v13928_v38 = vld [vmem:[#allocation11 + $0x13c8] sm:$0xff]  }
 0x696   : > { %12657 = vmatpush3.bf16.msra.mxu1 %v13891_v63  ;;  %12664 = vmatprep.subr.bf16.mxu0 %v13892_v1  ;;  %v2159_v63 = vpack.c.bf16 %v2050_v27, %v2050_v27  ;;  %v13929_v1 = vld [vmem:[#allocation11 + $0x1448] sm:$0xff]   ;;  %v13965_v27 = vld [vmem:[#allocation11 + $0x1550] sm:$0xff]  }
 0x697   : > { %12686 = vmatprep.subr.bf16.mxu1 %v13893_v4  ;;  %v13930_v4 = vld [vmem:[#allocation11 + $0x1388] sm:$0xff]  }
 0x698   : > { %10150 = vmatmul.mubr.bf16.vlgmr.msra.gmra.mrb[92].mxu0 %v2150_v11  ;;  %v13934_v11 = vld [vmem:[#allocation11 + $0x1390] sm:$0xff]  }
 0x699   : > { %10190 = vmatmul.mubr.bf16.vlgmr.msra.gmra.mrb[128].mxu1 %v2152_v24  ;;  %12665 = vmatpush3.bf16.msra.mxu0 %v13894_v7  ;;  %v13932_v7 = vld [vmem:[#allocation11 + $0x13d0] sm:$0xff]   ;;  %v13937_v24 = vld [vmem:[#allocation11 + $0x1458] sm:$0xff]  }
 0x69a   : > { %10229 = vmatprep.mubr.bf16.mxu0 %v2155_v30  ;;  %12687 = vmatpush3.bf16.msra.mxu1 %v13895_v48  ;;  %v13935_v48 = vld [vmem:[#allocation11 + $0x1410] sm:$0xff]   ;;  %v13939_v30 = vld [vmem:[#allocation11 + $0x1418] sm:$0xff]  }
 0x69b   : > { %10269 = vmatprep.mubr.bf16.mxu1 %v2157_v32  ;;  %12666 = vmatprep.subr.bf16.mxu0 %v13896_v20  ;;  %v13938_v20 = vld [vmem:[#allocation11 + $0x1398] sm:$0xff]   ;;  %v13941_v32 = vld [vmem:[#allocation11 + $0x1460] sm:$0xff]  }
 0x69c   : > { %12688 = vmatprep.subr.bf16.mxu1 %v13897_v40  ;;  %v13940_v40 = vld [vmem:[#allocation11 + $0x13e0] sm:$0xff]  }
 0x69d   : > { %12667 = vmatpush3.bf16.msra.mxu0 %v13898_v35  ;;  %v13942_v35 = vld [vmem:[#allocation11 + $0x13a0] sm:$0xff]  }
 0x69e   : > { %12689 = vmatpush3.bf16.msra.mxu1 %v13899_v46  ;;  %12668 = vmatprep.subr.bf16.mxu0 %v13900_v8  ;;  %v13943_v46 = vld [vmem:[#allocation11 + $0x1420] sm:$0xff]   ;;  %v13944_v8 = vld [vmem:[#allocation11 + $0x13e8] sm:$0xff]  }
 0x69f   : > { %12690 = vmatprep.subr.bf16.mxu1 %v13901_v16  ;;  %v13945_v16 = vld [vmem:[#allocation11 + $0x1468] sm:$0xff]  }
 0x6a1   : > { %12669 = vmatpush3.bf16.msra.mxu0 %v13902_v29  ;;  %v13946_v29 = vld [vmem:[#allocation11 + $0x13a8] sm:$0xff]  }
 0x6a2   : > { %12691 = vmatpush3.bf16.msra.mxu1 %v13903_v23  ;;  %12670 = vmatprep.subr.bf16.mxu0 %v13904_v59  ;;  %v13947_v23 = vld [vmem:[#allocation11 + $0x1428] sm:$0xff]   ;;  %v13948_v59 = vld [vmem:[#allocation11 + $0x13f0] sm:$0xff]  }
 0x6a3   : > { %12692 = vmatprep.subr.bf16.mxu1 %v13905_v58 }
 0x6a5   : > { %12671 = vmatpush3.bf16.msra.mxu0 %v13906_v10  ;;  %v13949_v10 = vld [vmem:[#allocation11 + $0x1470] sm:$0xff]  }
 0x6a6   : > { %12693 = vmatpush3.bf16.msra.mxu1 %v13907_v41  ;;  %12672 = vmatprep.subr.bf16.mxu0 %v13908_v14 }
 0x6a7   : > { %12694 = vmatprep.subr.bf16.mxu1 %v13909_v49 }
 0x6a9   : > { %12673 = vmatpush3.bf16.msra.mxu0 %v13910_v52 }
 0x6aa   : > { %12695 = vmatpush3.bf16.msra.mxu1 %v13911_v26  ;;  %12674 = vmatprep.subr.bf16.mxu0 %v13912_v17  ;;  %v13950_v17 = vld [vmem:[#allocation11 + $0x13b0] sm:$0xff]  }
 0x6ab   : > { %v12372_v13 = vpop.f32.mrb[68].mxu0  ;;  %12696 = vmatprep.subr.bf16.mxu1 %v13913_v3 }
 0x6ac   : > { %v12394_v2 = vpop.f32.mrb[104].mxu1  ;;  %v12373_v60 = vpop.f32.mrb[69].mxu0 }
 0x6ad   : > { %v12374_v6 = vadd.f32 %v12373_v60, %v12372_v13  ;;  %v12395_v12 = vpop.f32.mrb[105].mxu1  ;;  %v12375_v0 = vpop.f32.mrb[70].mxu0  ;;  %12675 = vmatpush3.bf16.msra.mxu0 %v13914_v55  ;;  %v13952_v13 = vld [vmem:[#allocation11 + $0x13f8] sm:$0xff]  }
 0x6ae   : > { %v12396_v19 = vadd.f32 %v12395_v12, %v12394_v2  ;;  %v12397_v21 = vpop.f32.mrb[106].mxu1  ;;  %12697 = vmatpush3.bf16.msra.mxu1 %v13915_v44  ;;  %v12376_v22 = vpop.f32.mrb[71].mxu0  ;;  %12676 = vmatprep.subr.bf16.mxu0 %v13916_v5  ;;  %v13951_v5 = vld [vmem:[#allocation11 + $0x1430] sm:$0xff]   ;;  %v13953_v60 = vld [vmem:[#allocation11 + $0x1478] sm:$0xff]  }
 0x6af   : > { %v9672_v47 = vadd.f32 %v12374_v6, %v15499_v28  ;;  %v12398_v51 = vpop.f32.mrb[107].mxu1  ;;  %12698 = vmatprep.subr.bf16.mxu1 %v13917_v54  ;;  %v2156_v28 = vpack.c.bf16 %v2046_v45, %v2046_v45  ;;  %v13954_v12 = vld [vmem:[#allocation11 + $0x13b8] sm:$0xff]   ;;  %v13957_v21 = vld [vmem:[#allocation11 + $0x1540] sm:$0xff]   ;;  %v2051_v22 = vld [vmem:[#allocation3 + $0x1b2] sm:$0xff] }
 0x6b0   : > { %v13955_v0 = vld [vmem:[#allocation11 + $0x1438] sm:$0xff]   ;;  %v13959_v51 = vld [vmem:[#allocation11 + $0x1500] sm:$0xff]   ;;  %v13963_v45 = vld [vmem:[#allocation11 + $0x1508] sm:$0xff]  }
 0x6b1   : > { %v15502_v61 = vadd.f32 %v12396_v19, %v9672_v47  ;;  %12677 = vmatpush3.bf16.msra.mxu0 %v13918_v37  ;;  %v13956_v37 = vld [vmem:[#allocation11 + $0x14c0] sm:$0xff]   ;;  %v2049_v19 = vld [vmem:[#allocation3 + $0x1b0] sm:$0xff] }
 0x6b2   : > { %12699 = vmatpush3.bf16.msra.mxu1 %v13919_v57  ;;  %12678 = vmatprep.subr.bf16.mxu0 %v13920_v50  ;;  %v13958_v57 = vld [vmem:[#allocation11 + $0x1480] sm:$0xff]   ;;  %v2055_v50 = vld [vmem:[#allocation3 + $0x112] sm:$0xff]  ;;  %v2158_v47 = vpack.c.bf16 %v2049_v19, %v2049_v19 }
 0x6b3   : > { %12700 = vmatprep.subr.bf16.mxu1 %v13921_v42  ;;  %v2058_v42 = vld [vmem:[#allocation3 + $0x251] sm:$0xff] }
 0x6b4   : > { %v2165_v39 = vpack.c.bf16 %v2058_v42, %v2058_v42  ;;  %v14000_v42 = vld [vmem:[#allocation11 + $0x15d8] sm:$0xff]  }
 0x6b5   : > { %12679 = vmatpush3.bf16.msra.mxu0 %v13922_v56  ;;  %v13960_v56 = vld [vmem:[#allocation11 + $0x14c8] sm:$0xff]  }
 0x6b6   : > { %12701 = vmatpush3.bf16.msra.mxu1 %v13923_v53  ;;  %12708 = vmatprep.subr.bf16.mxu0 %v13924_v9  ;;  %v2163_v53 = vpack.c.bf16 %v2055_v50, %v2055_v50  ;;  %v13961_v9 = vld [vmem:[#allocation11 + $0x1548] sm:$0xff]   ;;  %v13997_v50 = vld [vmem:[#allocation11 + $0x1650] sm:$0xff]  }
 0x6b7   : > { %12730 = vmatprep.subr.bf16.mxu1 %v13925_v33  ;;  %v13962_v33 = vld [vmem:[#allocation11 + $0x1488] sm:$0xff]  }
 0x6b8   : > { %10230 = vmatmul.mubr.bf16.vlgmr.msra.gmra.mrb[96].mxu0 %v2154_v25  ;;  %v13966_v25 = vld [vmem:[#allocation11 + $0x1490] sm:$0xff]  }
 0x6b9   : > { %10270 = vmatmul.mubr.bf16.vlgmr.msra.gmra.mrb[132].mxu1 %v2156_v28  ;;  %12709 = vmatpush3.bf16.msra.mxu0 %v13926_v36  ;;  %v13964_v36 = vld [vmem:[#allocation11 + $0x14d0] sm:$0xff]   ;;  %v13969_v28 = vld [vmem:[#allocation11 + $0x1558] sm:$0xff]  }
 0x6ba   : > { %10309 = vmatprep.mubr.bf16.mxu0 %v2159_v63  ;;  %12731 = vmatpush3.bf16.msra.mxu1 %v13927_v31  ;;  %v13967_v31 = vld [vmem:[#allocation11 + $0x1510] sm:$0xff]   ;;  %v13971_v63 = vld [vmem:[#allocation11 + $0x1518] sm:$0xff]  }
 0x6bb   : > { %10349 = vmatprep.mubr.bf16.mxu1 %v2161_v15  ;;  %12710 = vmatprep.subr.bf16.mxu0 %v13928_v38  ;;  %v13970_v38 = vld [vmem:[#allocation11 + $0x1498] sm:$0xff]   ;;  %v13973_v15 = vld [vmem:[#allocation11 + $0x1560] sm:$0xff]  }
 0x6bc   : > { %12732 = vmatprep.subr.bf16.mxu1 %v13929_v1  ;;  %v13972_v1 = vld [vmem:[#allocation11 + $0x14e0] sm:$0xff]  }
 0x6bd   : > { %12711 = vmatpush3.bf16.msra.mxu0 %v13930_v4  ;;  %v13974_v4 = vld [vmem:[#allocation11 + $0x14a0] sm:$0xff]  }
 0x6be   : > { %12733 = vmatpush3.bf16.msra.mxu1 %v13931_v62  ;;  %12712 = vmatprep.subr.bf16.mxu0 %v13932_v7  ;;  %v13975_v62 = vld [vmem:[#allocation11 + $0x1520] sm:$0xff]   ;;  %v13976_v7 = vld [vmem:[#allocation11 + $0x14e8] sm:$0xff]  }
 0x6bf   : > { %12734 = vmatprep.subr.bf16.mxu1 %v13933_v18  ;;  %v13977_v18 = vld [vmem:[#allocation11 + $0x1568] sm:$0xff]  }
 0x6c1   : > { %12713 = vmatpush3.bf16.msra.mxu0 %v13934_v11  ;;  %v13978_v11 = vld [vmem:[#allocation11 + $0x14a8] sm:$0xff]  }
 0x6c2   : > { %12735 = vmatpush3.bf16.msra.mxu1 %v13935_v48  ;;  %12714 = vmatprep.subr.bf16.mxu0 %v13936_v34  ;;  %v13979_v48 = vld [vmem:[#allocation11 + $0x1528] sm:$0xff]   ;;  %v13980_v34 = vld [vmem:[#allocation11 + $0x14f0] sm:$0xff]  }
 0x6c3   : > { %12736 = vmatprep.subr.bf16.mxu1 %v13937_v24 }
 0x6c5   : > { %12715 = vmatpush3.bf16.msra.mxu0 %v13938_v20  ;;  %v13981_v20 = vld [vmem:[#allocation11 + $0x1570] sm:$0xff]  }
 0x6c6   : > { %12737 = vmatpush3.bf16.msra.mxu1 %v13939_v30  ;;  %12716 = vmatprep.subr.bf16.mxu0 %v13940_v40 }
 0x6c7   : > { %12738 = vmatprep.subr.bf16.mxu1 %v13941_v32 }
 0x6c9   : > { %12717 = vmatpush3.bf16.msra.mxu0 %v13942_v35 }
 0x6ca   : > { %12739 = vmatpush3.bf16.msra.mxu1 %v13943_v46  ;;  %12718 = vmatprep.subr.bf16.mxu0 %v13944_v8  ;;  %v13982_v8 = vld [vmem:[#allocation11 + $0x14b0] sm:$0xff]  }
 0x6cb   : > { %v12416_v58 = vpop.f32.mrb[72].mxu0  ;;  %12740 = vmatprep.subr.bf16.mxu1 %v13945_v16 }
 0x6cc   : > { %v12438_v41 = vpop.f32.mrb[108].mxu1  ;;  %v12417_v14 = vpop.f32.mrb[73].mxu0 }
 0x6cd   : > { %v12418_v49 = vadd.f32 %v12417_v14, %v12416_v58  ;;  %v12439_v52 = vpop.f32.mrb[109].mxu1  ;;  %v12419_v26 = vpop.f32.mrb[74].mxu0  ;;  %12719 = vmatpush3.bf16.msra.mxu0 %v13946_v29  ;;  %v13984_v58 = vld [vmem:[#allocation11 + $0x14f8] sm:$0xff]  }
 0x6ce   : > { %v12440_v3 = vadd.f32 %v12439_v52, %v12438_v41  ;;  %v12441_v55 = vpop.f32.mrb[110].mxu1  ;;  %12741 = vmatpush3.bf16.msra.mxu1 %v13947_v23  ;;  %v12420_v44 = vpop.f32.mrb[75].mxu0  ;;  %12720 = vmatprep.subr.bf16.mxu0 %v13948_v59  ;;  %v13983_v59 = vld [vmem:[#allocation11 + $0x1530] sm:$0xff]   ;;  %v13985_v14 = vld [vmem:[#allocation11 + $0x1578] sm:$0xff]  }
 0x6cf   : > { %v9752_v54 = vadd.f32 %v12418_v49, %v15502_v61  ;;  %v12442_v2 = vpop.f32.mrb[111].mxu1  ;;  %12742 = vmatprep.subr.bf16.mxu1 %v13949_v10  ;;  %v2160_v61 = vpack.c.bf16 %v2051_v22, %v2051_v22  ;;  %v13986_v52 = vld [vmem:[#allocation11 + $0x14b8] sm:$0xff]   ;;  %v13989_v55 = vld [vmem:[#allocation11 + $0x1640] sm:$0xff]   ;;  %v2057_v44 = vld [vmem:[#allocation3 + $0x250] sm:$0xff] }
 0x6d0   : > { %v13987_v26 = vld [vmem:[#allocation11 + $0x1538] sm:$0xff]   ;;  %v13991_v2 = vld [vmem:[#allocation11 + $0x1600] sm:$0xff]   ;;  %v13995_v22 = vld [vmem:[#allocation11 + $0x1608] sm:$0xff]  }
 0x6d1   : > { %v15505_v6 = vadd.f32 %v12440_v3, %v9752_v54  ;;  %12721 = vmatpush3.bf16.msra.mxu0 %v13950_v17  ;;  %v13988_v17 = vld [vmem:[#allocation11 + $0x15c0] sm:$0xff]   ;;  %v2054_v3 = vld [vmem:[#allocation3 + $0x111] sm:$0xff] }
 0x6d2   : > { %12743 = vmatpush3.bf16.msra.mxu1 %v13951_v5  ;;  %12722 = vmatprep.subr.bf16.mxu0 %v13952_v13  ;;  %v13990_v5 = vld [vmem:[#allocation11 + $0x1580] sm:$0xff]   ;;  %v2162_v54 = vpack.c.bf16 %v2054_v3, %v2054_v3 }
 0x6d3   : > { %12744 = vmatprep.subr.bf16.mxu1 %v13953_v60  ;;  %v2061_v13 = vld [vmem:[#allocation3 + $0x80] sm:$0xff] }
 0x6d4   : > { %v2063_v60 = vld [vmem:[#allocation3 + $0x82] sm:$0xff] }
 0x6d5   : > { %12723 = vmatpush3.bf16.msra.mxu0 %v13954_v12  ;;  %v13992_v12 = vld [vmem:[#allocation11 + $0x15c8] sm:$0xff]   ;;  %v2169_v19 = vpack.c.bf16 %v2063_v60, %v2063_v60  ;;  %v14032_v60 = vld [vmem:[#allocation11 + $0x16d8] sm:$0xff]  }
 0x6d6   : > { %12745 = vmatpush3.bf16.msra.mxu1 %v13955_v0  ;;  %12752 = vmatprep.subr.bf16.mxu0 %v13956_v37  ;;  %v2167_v0 = vpack.c.bf16 %v2061_v13, %v2061_v13  ;;  %v13993_v37 = vld [vmem:[#allocation11 + $0x1648] sm:$0xff]   ;;  %v14029_v13 = vld [vmem:[#allocation11 + $0x1750] sm:$0xff]  }
 0x6d7   : > { %12774 = vmatprep.subr.bf16.mxu1 %v13957_v21  ;;  %v13994_v21 = vld [vmem:[#allocation11 + $0x1588] sm:$0xff]  }
 0x6d8   : > { %10310 = vmatmul.mubr.bf16.vlgmr.msra.gmra.mrb[100].mxu0 %v2158_v47  ;;  %v13998_v47 = vld [vmem:[#allocation11 + $0x1590] sm:$0xff]  }
 0x6d9   : > { %10350 = vmatmul.mubr.bf16.vlgmr.msra.gmra.mrb[136].mxu1 %v2160_v61  ;;  %12753 = vmatpush3.bf16.msra.mxu0 %v13958_v57  ;;  %v13996_v57 = vld [vmem:[#allocation11 + $0x15d0] sm:$0xff]   ;;  %v14001_v61 = vld [vmem:[#allocation11 + $0x1658] sm:$0xff]  }
 0x6da   : > { %10389 = vmatprep.mubr.bf16.mxu0 %v2163_v53  ;;  %12775 = vmatpush3.bf16.msra.mxu1 %v13959_v51  ;;  %v13999_v51 = vld [vmem:[#allocation11 + $0x1610] sm:$0xff]   ;;  %v14003_v53 = vld [vmem:[#allocation11 + $0x1618] sm:$0xff]  }
 0x6db   : > { %10429 = vmatprep.mubr.bf16.mxu1 %v2165_v39  ;;  %12754 = vmatprep.subr.bf16.mxu0 %v13960_v56  ;;  %v14002_v56 = vld [vmem:[#allocation11 + $0x1598] sm:$0xff]   ;;  %v14005_v39 = vld [vmem:[#allocation11 + $0x1660] sm:$0xff]  }
 0x6dc   : > { %12776 = vmatprep.subr.bf16.mxu1 %v13961_v9  ;;  %v14004_v9 = vld [vmem:[#allocation11 + $0x15e0] sm:$0xff]  }
 0x6dd   : > { %12755 = vmatpush3.bf16.msra.mxu0 %v13962_v33  ;;  %v14006_v33 = vld [vmem:[#allocation11 + $0x15a0] sm:$0xff]  }
 0x6de   : > { %12777 = vmatpush3.bf16.msra.mxu1 %v13963_v45  ;;  %12756 = vmatprep.subr.bf16.mxu0 %v13964_v36  ;;  %v14007_v45 = vld [vmem:[#allocation11 + $0x1620] sm:$0xff]   ;;  %v14008_v36 = vld [vmem:[#allocation11 + $0x15e8] sm:$0xff]  }
 0x6df   : > { %12778 = vmatprep.subr.bf16.mxu1 %v13965_v27  ;;  %v14009_v27 = vld [vmem:[#allocation11 + $0x1668] sm:$0xff]  }
 0x6e1   : > { %12757 = vmatpush3.bf16.msra.mxu0 %v13966_v25  ;;  %v14010_v25 = vld [vmem:[#allocation11 + $0x15a8] sm:$0xff]  }
 0x6e2   : > { %12779 = vmatpush3.bf16.msra.mxu1 %v13967_v31  ;;  %12758 = vmatprep.subr.bf16.mxu0 %v13968_v43  ;;  %v14011_v31 = vld [vmem:[#allocation11 + $0x1628] sm:$0xff]   ;;  %v14012_v43 = vld [vmem:[#allocation11 + $0x15f0] sm:$0xff]  }
 0x6e3   : > { %12780 = vmatprep.subr.bf16.mxu1 %v13969_v28 }
 0x6e5   : > { %12759 = vmatpush3.bf16.msra.mxu0 %v13970_v38  ;;  %v14013_v38 = vld [vmem:[#allocation11 + $0x1670] sm:$0xff]  }
 0x6e6   : > { %12781 = vmatpush3.bf16.msra.mxu1 %v13971_v63  ;;  %12760 = vmatprep.subr.bf16.mxu0 %v13972_v1 }
 0x6e7   : > { %12782 = vmatprep.subr.bf16.mxu1 %v13973_v15 }
 0x6e9   : > { %12761 = vmatpush3.bf16.msra.mxu0 %v13974_v4 }
 0x6ea   : > { %12783 = vmatpush3.bf16.msra.mxu1 %v13975_v62  ;;  %12762 = vmatprep.subr.bf16.mxu0 %v13976_v7  ;;  %v14014_v7 = vld [vmem:[#allocation11 + $0x15b0] sm:$0xff]  }
 0x6eb   : > { %v12460_v24 = vpop.f32.mrb[76].mxu0  ;;  %12784 = vmatprep.subr.bf16.mxu1 %v13977_v18 }
 0x6ec   : > { %v12482_v30 = vpop.f32.mrb[112].mxu1  ;;  %v12461_v40 = vpop.f32.mrb[77].mxu0 }
 0x6ed   : > { %v12462_v32 = vadd.f32 %v12461_v40, %v12460_v24  ;;  %v12483_v35 = vpop.f32.mrb[113].mxu1  ;;  %v12463_v46 = vpop.f32.mrb[78].mxu0  ;;  %12763 = vmatpush3.bf16.msra.mxu0 %v13978_v11  ;;  %v14016_v24 = vld [vmem:[#allocation11 + $0x15f8] sm:$0xff]  }
 0x6ee   : > { %v12484_v16 = vadd.f32 %v12483_v35, %v12482_v30  ;;  %v12485_v29 = vpop.f32.mrb[114].mxu1  ;;  %12785 = vmatpush3.bf16.msra.mxu1 %v13979_v48  ;;  %v12464_v23 = vpop.f32.mrb[79].mxu0  ;;  %12764 = vmatprep.subr.bf16.mxu0 %v13980_v34  ;;  %v14015_v34 = vld [vmem:[#allocation11 + $0x1630] sm:$0xff]   ;;  %v14017_v40 = vld [vmem:[#allocation11 + $0x1678] sm:$0xff]  }
 0x6ef   : > { %v9832_v10 = vadd.f32 %v12462_v32, %v15505_v6  ;;  %v12486_v41 = vpop.f32.mrb[115].mxu1  ;;  %12786 = vmatprep.subr.bf16.mxu1 %v13981_v20  ;;  %v2164_v6 = vpack.c.bf16 %v2057_v44, %v2057_v44  ;;  %v14018_v35 = vld [vmem:[#allocation11 + $0x15b8] sm:$0xff]   ;;  %v14021_v29 = vld [vmem:[#allocation11 + $0x1740] sm:$0xff]   ;;  %v14027_v44 = vld [vmem:[#allocation11 + $0x1708] sm:$0xff]  }
 0x6f0   : > { %v14019_v46 = vld [vmem:[#allocation11 + $0x1638] sm:$0xff]   ;;  %v14023_v41 = vld [vmem:[#allocation11 + $0x1700] sm:$0xff]  }
 0x6f1   : > { %v15508_v49 = vadd.f32 %v12484_v16, %v9832_v10  ;;  %12765 = vmatpush3.bf16.msra.mxu0 %v13982_v8  ;;  %v14020_v8 = vld [vmem:[#allocation11 + $0x16c0] sm:$0xff]   ;;  %v2059_v16 = vld [vmem:[#allocation3 + $0x252] sm:$0xff] }
 0x6f2   : > { %12787 = vmatpush3.bf16.msra.mxu1 %v13983_v59  ;;  %12766 = vmatprep.subr.bf16.mxu0 %v13984_v58  ;;  %v2062_v23 = vld [vmem:[#allocation3 + $0x81] sm:$0xff]  ;;  %v2166_v10 = vpack.c.bf16 %v2059_v16, %v2059_v16 }
 0x6f3   : > { %12788 = vmatprep.subr.bf16.mxu1 %v13985_v14  ;;  %v14022_v59 = vld [vmem:[#allocation11 + $0x1680] sm:$0xff]  }
 0x6f4   : > { %v2066_v58 = vld [vmem:[#allocation3 + $0x1c1] sm:$0xff] }
 0x6f5   : > { %12767 = vmatpush3.bf16.msra.mxu0 %v13986_v52  ;;  %v2069_v14 = vld [vmem:[#allocation3 + $0x120] sm:$0xff]  ;;  %v14024_v52 = vld [vmem:[#allocation11 + $0x16c8] sm:$0xff]  }
 0x6f6   : > { %12789 = vmatpush3.bf16.msra.mxu1 %v13987_v26  ;;  %12796 = vmatprep.subr.bf16.mxu0 %v13988_v17  ;;  %v2171_v26 = vpack.c.bf16 %v2066_v58, %v2066_v58  ;;  %v14025_v17 = vld [vmem:[#allocation11 + $0x1748] sm:$0xff]   ;;  %v2173_v3 = vpack.c.bf16 %v2069_v14, %v2069_v14  ;;  %v14061_v58 = vld [vmem:[#allocation11 + $0x1850] sm:$0xff]   ;;  %v14064_v14 = vld [vmem:[#allocation11 + $0x17d8] sm:$0xff]  }
 0x6f7   : > { %12818 = vmatprep.subr.bf16.mxu1 %v13989_v55  ;;  %v14026_v55 = vld [vmem:[#allocation11 + $0x1688] sm:$0xff]  }
 0x6f8   : > { %10390 = vmatmul.mubr.bf16.vlgmr.msra.gmra.mrb[104].mxu0 %v2162_v54  ;;  %v14030_v54 = vld [vmem:[#allocation11 + $0x1690] sm:$0xff]  }
 0x6f9   : > { %10430 = vmatmul.mubr.bf16.vlgmr.msra.gmra.mrb[140].mxu1 %v2164_v6  ;;  %12797 = vmatpush3.bf16.msra.mxu0 %v13990_v5  ;;  %v14028_v5 = vld [vmem:[#allocation11 + $0x16d0] sm:$0xff]   ;;  %v14033_v6 = vld [vmem:[#allocation11 + $0x1758] sm:$0xff]  }
 0x6fa   : > { %10469 = vmatprep.mubr.bf16.mxu0 %v2167_v0  ;;  %12819 = vmatpush3.bf16.msra.mxu1 %v13991_v2  ;;  %v14031_v2 = vld [vmem:[#allocation11 + $0x1710] sm:$0xff]   ;;  %v14035_v0 = vld [vmem:[#allocation11 + $0x1718] sm:$0xff]  }
 0x6fb   : > { %10509 = vmatprep.mubr.bf16.mxu1 %v2169_v19  ;;  %12798 = vmatprep.subr.bf16.mxu0 %v13992_v12  ;;  %v14034_v12 = vld [vmem:[#allocation11 + $0x1698] sm:$0xff]   ;;  %v14037_v19 = vld [vmem:[#allocation11 + $0x1760] sm:$0xff]  }
 0x6fc   : > { %12820 = vmatprep.subr.bf16.mxu1 %v13993_v37  ;;  %v14036_v37 = vld [vmem:[#allocation11 + $0x16e0] sm:$0xff]  }
 0x6fd   : > { %12799 = vmatpush3.bf16.msra.mxu0 %v13994_v21  ;;  %v14038_v21 = vld [vmem:[#allocation11 + $0x16a0] sm:$0xff]  }
 0x6fe   : > { %12821 = vmatpush3.bf16.msra.mxu1 %v13995_v22  ;;  %12800 = vmatprep.subr.bf16.mxu0 %v13996_v57  ;;  %v14039_v22 = vld [vmem:[#allocation11 + $0x1720] sm:$0xff]   ;;  %v14040_v57 = vld [vmem:[#allocation11 + $0x16e8] sm:$0xff]  }
 0x6ff   : > { %12822 = vmatprep.subr.bf16.mxu1 %v13997_v50  ;;  %v14041_v50 = vld [vmem:[#allocation11 + $0x1768] sm:$0xff]  }
 0x701   : > { %12801 = vmatpush3.bf16.msra.mxu0 %v13998_v47  ;;  %v14042_v47 = vld [vmem:[#allocation11 + $0x16a8] sm:$0xff]  }
 0x702   : > { %12823 = vmatpush3.bf16.msra.mxu1 %v13999_v51  ;;  %12802 = vmatprep.subr.bf16.mxu0 %v14000_v42  ;;  %v14043_v51 = vld [vmem:[#allocation11 + $0x1728] sm:$0xff]   ;;  %v14044_v42 = vld [vmem:[#allocation11 + $0x16f0] sm:$0xff]  }
 0x703   : > { %12824 = vmatprep.subr.bf16.mxu1 %v14001_v61 }
 0x705   : > { %12803 = vmatpush3.bf16.msra.mxu0 %v14002_v56  ;;  %v14045_v56 = vld [vmem:[#allocation11 + $0x1770] sm:$0xff]  }
 0x706   : > { %12825 = vmatpush3.bf16.msra.mxu1 %v14003_v53  ;;  %12804 = vmatprep.subr.bf16.mxu0 %v14004_v9 }
 0x707   : > { %12826 = vmatprep.subr.bf16.mxu1 %v14005_v39 }
 0x709   : > { %12805 = vmatpush3.bf16.msra.mxu0 %v14006_v33 }
 0x70a   : > { %12827 = vmatpush3.bf16.msra.mxu1 %v14007_v45  ;;  %12806 = vmatprep.subr.bf16.mxu0 %v14008_v36  ;;  %v14046_v36 = vld [vmem:[#allocation11 + $0x16b0] sm:$0xff]  }
 0x70b   : > { %v12504_v28 = vpop.f32.mrb[80].mxu0  ;;  %12828 = vmatprep.subr.bf16.mxu1 %v14009_v27 }
 0x70c   : > { %v12526_v63 = vpop.f32.mrb[116].mxu1  ;;  %v12505_v1 = vpop.f32.mrb[81].mxu0 }
 0x70d   : > { %v12506_v15 = vadd.f32 %v12505_v1, %v12504_v28  ;;  %v12527_v4 = vpop.f32.mrb[117].mxu1  ;;  %v12507_v62 = vpop.f32.mrb[82].mxu0  ;;  %12807 = vmatpush3.bf16.msra.mxu0 %v14010_v25  ;;  %v14048_v28 = vld [vmem:[#allocation11 + $0x16f8] sm:$0xff]  }
 0x70e   : > { %v12528_v18 = vadd.f32 %v12527_v4, %v12526_v63  ;;  %v12529_v11 = vpop.f32.mrb[118].mxu1  ;;  %12829 = vmatpush3.bf16.msra.mxu1 %v14011_v31  ;;  %v12508_v48 = vpop.f32.mrb[83].mxu0  ;;  %12808 = vmatprep.subr.bf16.mxu0 %v14012_v43  ;;  %v14047_v43 = vld [vmem:[#allocation11 + $0x1730] sm:$0xff]   ;;  %v14049_v1 = vld [vmem:[#allocation11 + $0x1778] sm:$0xff]  }
 0x70f   : > { %v9912_v20 = vadd.f32 %v12506_v15, %v15508_v49  ;;  %v12530_v30 = vpop.f32.mrb[119].mxu1  ;;  %12830 = vmatprep.subr.bf16.mxu1 %v14013_v38  ;;  %v2168_v49 = vpack.c.bf16 %v2062_v23, %v2062_v23  ;;  %v14050_v4 = vld [vmem:[#allocation11 + $0x16b8] sm:$0xff]   ;;  %v14053_v11 = vld [vmem:[#allocation11 + $0x1840] sm:$0xff]   ;;  %v14059_v23 = vld [vmem:[#allocation11 + $0x1808] sm:$0xff]  }
 0x710   : > { %v14051_v62 = vld [vmem:[#allocation11 + $0x1738] sm:$0xff]   ;;  %v14055_v30 = vld [vmem:[#allocation11 + $0x1800] sm:$0xff]  }
 0x711   : > { %v15511_v32 = vadd.f32 %v12528_v18, %v9912_v20  ;;  %12809 = vmatpush3.bf16.msra.mxu0 %v14014_v7  ;;  %v14052_v7 = vld [vmem:[#allocation11 + $0x17c0] sm:$0xff]  }
 0x712   : > { %12831 = vmatpush3.bf16.msra.mxu1 %v14015_v34  ;;  %12810 = vmatprep.subr.bf16.mxu0 %v14016_v24  ;;  %v2065_v18 = vld [vmem:[#allocation3 + $0x1c0] sm:$0xff] }
 0x713   : > { %12832 = vmatprep.subr.bf16.mxu1 %v14017_v40  ;;  %v2067_v48 = vld [vmem:[#allocation3 + $0x1c2] sm:$0xff]  ;;  %v2170_v20 = vpack.c.bf16 %v2065_v18, %v2065_v18 }
 0x714   : > { %v14054_v34 = vld [vmem:[#allocation11 + $0x1780] sm:$0xff]  }
 0x715   : > { %12811 = vmatpush3.bf16.msra.mxu0 %v14018_v35  ;;  %v2071_v24 = vld [vmem:[#allocation3 + $0x122] sm:$0xff]  ;;  %v14056_v35 = vld [vmem:[#allocation11 + $0x17c8] sm:$0xff]  }
 0x716   : > { %12833 = vmatpush3.bf16.msra.mxu1 %v14019_v46  ;;  %12840 = vmatprep.subr.bf16.mxu0 %v14020_v8  ;;  %v2074_v40 = vld [vmem:[#allocation3 + $0x261] sm:$0xff]  ;;  %v2175_v46 = vpack.c.bf16 %v2071_v24, %v2071_v24  ;;  %v14057_v8 = vld [vmem:[#allocation11 + $0x1848] sm:$0xff]   ;;  %v14093_v24 = vld [vmem:[#allocation11 + $0x1950] sm:$0xff]  }
 0x717   : > { %12862 = vmatprep.subr.bf16.mxu1 %v14021_v29  ;;  %v2177_v16 = vpack.c.bf16 %v2074_v40, %v2074_v40  ;;  %v14058_v29 = vld [vmem:[#allocation11 + $0x1788] sm:$0xff]   ;;  %v14096_v40 = vld [vmem:[#allocation11 + $0x18d8] sm:$0xff]  }
 0x718   : > { %10470 = vmatmul.mubr.bf16.vlgmr.msra.gmra.mrb[108].mxu0 %v2166_v10  ;;  %v14062_v10 = vld [vmem:[#allocation11 + $0x1790] sm:$0xff]  }
 0x719   : > { %10510 = vmatmul.mubr.bf16.vlgmr.msra.gmra.mrb[144].mxu1 %v2168_v49  ;;  %12841 = vmatpush3.bf16.msra.mxu0 %v14022_v59  ;;  %v14060_v59 = vld [vmem:[#allocation11 + $0x17d0] sm:$0xff]   ;;  %v14065_v49 = vld [vmem:[#allocation11 + $0x1858] sm:$0xff]  }
 0x71a   : > { %10549 = vmatprep.mubr.bf16.mxu0 %v2171_v26  ;;  %12863 = vmatpush3.bf16.msra.mxu1 %v14023_v41  ;;  %v14063_v41 = vld [vmem:[#allocation11 + $0x1810] sm:$0xff]   ;;  %v14067_v26 = vld [vmem:[#allocation11 + $0x1818] sm:$0xff]  }
 0x71b   : > { %10589 = vmatprep.mubr.bf16.mxu1 %v2173_v3  ;;  %12842 = vmatprep.subr.bf16.mxu0 %v14024_v52  ;;  %v14066_v52 = vld [vmem:[#allocation11 + $0x1798] sm:$0xff]   ;;  %v14069_v3 = vld [vmem:[#allocation11 + $0x1860] sm:$0xff]  }
 0x71c   : > { %12864 = vmatprep.subr.bf16.mxu1 %v14025_v17  ;;  %v14068_v17 = vld [vmem:[#allocation11 + $0x17e0] sm:$0xff]  }
 0x71d   : > { %12843 = vmatpush3.bf16.msra.mxu0 %v14026_v55  ;;  %v14070_v55 = vld [vmem:[#allocation11 + $0x17a0] sm:$0xff]  }
 0x71e   : > { %12865 = vmatpush3.bf16.msra.mxu1 %v14027_v44  ;;  %12844 = vmatprep.subr.bf16.mxu0 %v14028_v5  ;;  %v14071_v44 = vld [vmem:[#allocation11 + $0x1820] sm:$0xff]   ;;  %v14072_v5 = vld [vmem:[#allocation11 + $0x17e8] sm:$0xff]  }
 0x71f   : > { %12866 = vmatprep.subr.bf16.mxu1 %v14029_v13  ;;  %v14073_v13 = vld [vmem:[#allocation11 + $0x1868] sm:$0xff]  }
 0x721   : > { %12845 = vmatpush3.bf16.msra.mxu0 %v14030_v54  ;;  %v14074_v54 = vld [vmem:[#allocation11 + $0x17a8] sm:$0xff]  }
 0x722   : > { %12867 = vmatpush3.bf16.msra.mxu1 %v14031_v2  ;;  %12846 = vmatprep.subr.bf16.mxu0 %v14032_v60  ;;  %v14075_v2 = vld [vmem:[#allocation11 + $0x1828] sm:$0xff]   ;;  %v14076_v60 = vld [vmem:[#allocation11 + $0x17f0] sm:$0xff]  }
 0x723   : > { %12868 = vmatprep.subr.bf16.mxu1 %v14033_v6 }
 0x725   : > { %12847 = vmatpush3.bf16.msra.mxu0 %v14034_v12  ;;  %v14077_v12 = vld [vmem:[#allocation11 + $0x1870] sm:$0xff]  }
 0x726   : > { %12869 = vmatpush3.bf16.msra.mxu1 %v14035_v0  ;;  %12848 = vmatprep.subr.bf16.mxu0 %v14036_v37 }
 0x727   : > { %12870 = vmatprep.subr.bf16.mxu1 %v14037_v19 }
 0x729   : > { %12849 = vmatpush3.bf16.msra.mxu0 %v14038_v21 }
 0x72a   : > { %12871 = vmatpush3.bf16.msra.mxu1 %v14039_v22  ;;  %12850 = vmatprep.subr.bf16.mxu0 %v14040_v57  ;;  %v14078_v57 = vld [vmem:[#allocation11 + $0x17b0] sm:$0xff]  }
 0x72b   : > { %v12548_v61 = vpop.f32.mrb[84].mxu0  ;;  %12872 = vmatprep.subr.bf16.mxu1 %v14041_v50 }
 0x72c   : > { %v12570_v53 = vpop.f32.mrb[120].mxu1  ;;  %v12549_v9 = vpop.f32.mrb[85].mxu0 }
 0x72d   : > { %v12550_v39 = vadd.f32 %v12549_v9, %v12548_v61  ;;  %v12571_v33 = vpop.f32.mrb[121].mxu1  ;;  %v12551_v45 = vpop.f32.mrb[86].mxu0  ;;  %12851 = vmatpush3.bf16.msra.mxu0 %v14042_v47  ;;  %v14080_v61 = vld [vmem:[#allocation11 + $0x17f8] sm:$0xff]  }
 0x72e   : > { %v12572_v27 = vadd.f32 %v12571_v33, %v12570_v53  ;;  %v12573_v25 = vpop.f32.mrb[122].mxu1  ;;  %12873 = vmatpush3.bf16.msra.mxu1 %v14043_v51  ;;  %v12552_v31 = vpop.f32.mrb[87].mxu0  ;;  %12852 = vmatprep.subr.bf16.mxu0 %v14044_v42  ;;  %v14079_v42 = vld [vmem:[#allocation11 + $0x1830] sm:$0xff]   ;;  %v14081_v9 = vld [vmem:[#allocation11 + $0x1878] sm:$0xff]  }
 0x72f   : > { %v9992_v38 = vadd.f32 %v12550_v39, %v15511_v32  ;;  %v12574_v63 = vpop.f32.mrb[123].mxu1  ;;  %12874 = vmatprep.subr.bf16.mxu1 %v14045_v56  ;;  %v2172_v32 = vpack.c.bf16 %v2067_v48, %v2067_v48  ;;  %v14082_v33 = vld [vmem:[#allocation11 + $0x17b8] sm:$0xff]   ;;  %v14085_v25 = vld [vmem:[#allocation11 + $0x1940] sm:$0xff]   ;;  %v14091_v48 = vld [vmem:[#allocation11 + $0x1908] sm:$0xff]  }
 0x730   : > { %v14083_v45 = vld [vmem:[#allocation11 + $0x1838] sm:$0xff]   ;;  %v14087_v63 = vld [vmem:[#allocation11 + $0x1900] sm:$0xff]  }
 0x731   : > { %v15514_v15 = vadd.f32 %v12572_v27, %v9992_v38  ;;  %12853 = vmatpush3.bf16.msra.mxu0 %v14046_v36  ;;  %v14084_v36 = vld [vmem:[#allocation11 + $0x18c0] sm:$0xff]  }
 0x732   : > { %12875 = vmatpush3.bf16.msra.mxu1 %v14047_v43  ;;  %12854 = vmatprep.subr.bf16.mxu0 %v14048_v28  ;;  %v2070_v27 = vld [vmem:[#allocation3 + $0x121] sm:$0xff]  ;;  %v2079_v28 = vld [vmem:[#allocation3 + $0x92] sm:$0xff] }
 0x733   : > { %12876 = vmatprep.subr.bf16.mxu1 %v14049_v1  ;;  %v2073_v31 = vld [vmem:[#allocation3 + $0x260] sm:$0xff]  ;;  %v2174_v38 = vpack.c.bf16 %v2070_v27, %v2070_v27  ;;  %v14088_v1 = vld [vmem:[#allocation11 + $0x18c8] sm:$0xff]   ;;  %v2181_v18 = vpack.c.bf16 %v2079_v28, %v2079_v28 }
 0x734   : > { %v14086_v43 = vld [vmem:[#allocation11 + $0x1880] sm:$0xff]  }
 0x735   : > { %12855 = vmatpush3.bf16.msra.mxu0 %v14050_v4  ;;  %v14089_v4 = vld [vmem:[#allocation11 + $0x1948] sm:$0xff]  }
 0x736   : > { %12877 = vmatpush3.bf16.msra.mxu1 %v14051_v62  ;;  %12884 = vmatprep.subr.bf16.mxu0 %v14052_v7  ;;  %v14128_v62 = vld [vmem:[#allocation3] sm:$0xff] }
 0x737   : > { %12906 = vmatprep.subr.bf16.mxu1 %v14053_v11  ;;  %v2179_v7 = vpack.c.bf16 %v14128_v62, %v14128_v62  ;;  %v14090_v11 = vld [vmem:[#allocation11 + $0x1888] sm:$0xff]  }
 0x738   : > { %10550 = vmatmul.mubr.bf16.vlgmr.msra.gmra.mrb[112].mxu0 %v2170_v20  ;;  %v14094_v20 = vld [vmem:[#allocation11 + $0x1890] sm:$0xff]  }
 0x739   : > { %10590 = vmatmul.mubr.bf16.vlgmr.msra.gmra.mrb[148].mxu1 %v2172_v32  ;;  %12885 = vmatpush3.bf16.msra.mxu0 %v14054_v34  ;;  %v14092_v34 = vld [vmem:[#allocation11 + $0x18d0] sm:$0xff]   ;;  %v14097_v32 = vld [vmem:[#allocation11 + $0x1958] sm:$0xff]  }
 0x73a   : > { %10629 = vmatprep.mubr.bf16.mxu0 %v2175_v46  ;;  %12907 = vmatpush3.bf16.msra.mxu1 %v14055_v30  ;;  %v14095_v30 = vld [vmem:[#allocation11 + $0x1910] sm:$0xff]   ;;  %v14099_v46 = vld [vmem:[#allocation11 + $0x1918] sm:$0xff]  }
 0x73b   : > { %10669 = vmatprep.mubr.bf16.mxu1 %v2177_v16  ;;  %12886 = vmatprep.subr.bf16.mxu0 %v14056_v35  ;;  %v14098_v35 = vld [vmem:[#allocation11 + $0x1898] sm:$0xff]   ;;  %v14101_v16 = vld [vmem:[#allocation11 + $0x1960] sm:$0xff]  }
 0x73c   : > { %12908 = vmatprep.subr.bf16.mxu1 %v14057_v8  ;;  %v14100_v8 = vld [vmem:[#allocation11 + $0x18e0] sm:$0xff]  }
 0x73d   : > { %12887 = vmatpush3.bf16.msra.mxu0 %v14058_v29  ;;  %v14102_v29 = vld [vmem:[#allocation11 + $0x18a0] sm:$0xff]  }
 0x73e   : > { %12909 = vmatpush3.bf16.msra.mxu1 %v14059_v23  ;;  %12888 = vmatprep.subr.bf16.mxu0 %v14060_v59  ;;  %v14103_v23 = vld [vmem:[#allocation11 + $0x1920] sm:$0xff]   ;;  %v14104_v59 = vld [vmem:[#allocation11 + $0x18e8] sm:$0xff]  }
 0x73f   : > { %12910 = vmatprep.subr.bf16.mxu1 %v14061_v58  ;;  %v14105_v58 = vld [vmem:[#allocation11 + $0x1968] sm:$0xff]  }
 0x741   : > { %12889 = vmatpush3.bf16.msra.mxu0 %v14062_v10  ;;  %v14106_v10 = vld [vmem:[#allocation11 + $0x18a8] sm:$0xff]  }
 0x742   : > { %12911 = vmatpush3.bf16.msra.mxu1 %v14063_v41  ;;  %12890 = vmatprep.subr.bf16.mxu0 %v14064_v14  ;;  %v14107_v41 = vld [vmem:[#allocation11 + $0x1928] sm:$0xff]   ;;  %v14108_v14 = vld [vmem:[#allocation11 + $0x18f0] sm:$0xff]  }
 0x743   : > { %12912 = vmatprep.subr.bf16.mxu1 %v14065_v49 }
 0x745   : > { %12891 = vmatpush3.bf16.msra.mxu0 %v14066_v52  ;;  %v14109_v52 = vld [vmem:[#allocation11 + $0x1970] sm:$0xff]  }
 0x746   : > { %12913 = vmatpush3.bf16.msra.mxu1 %v14067_v26  ;;  %12892 = vmatprep.subr.bf16.mxu0 %v14068_v17 }
 0x747   : > { %12914 = vmatprep.subr.bf16.mxu1 %v14069_v3 }
 0x749   : > { %12893 = vmatpush3.bf16.msra.mxu0 %v14070_v55 }
 0x74a   : > { %12915 = vmatpush3.bf16.msra.mxu1 %v14071_v44  ;;  %12894 = vmatprep.subr.bf16.mxu0 %v14072_v5  ;;  %v14110_v5 = vld [vmem:[#allocation11 + $0x18b0] sm:$0xff]  }
 0x74b   : > { %v12592_v6 = vpop.f32.mrb[88].mxu0  ;;  %12916 = vmatprep.subr.bf16.mxu1 %v14073_v13 }
 0x74c   : > { %v12614_v0 = vpop.f32.mrb[124].mxu1  ;;  %v12593_v37 = vpop.f32.mrb[89].mxu0 }
 0x74d   : > { %v12594_v19 = vadd.f32 %v12593_v37, %v12592_v6  ;;  %v12615_v21 = vpop.f32.mrb[125].mxu1  ;;  %v12595_v22 = vpop.f32.mrb[90].mxu0  ;;  %12895 = vmatpush3.bf16.msra.mxu0 %v14074_v54  ;;  %v14112_v6 = vld [vmem:[#allocation11 + $0x18f8] sm:$0xff]  }
 0x74e   : > { %v12616_v50 = vadd.f32 %v12615_v21, %v12614_v0  ;;  %v12617_v47 = vpop.f32.mrb[126].mxu1  ;;  %12917 = vmatpush3.bf16.msra.mxu1 %v14075_v2  ;;  %v12596_v51 = vpop.f32.mrb[91].mxu0  ;;  %12896 = vmatprep.subr.bf16.mxu0 %v14076_v60  ;;  %v14111_v60 = vld [vmem:[#allocation11 + $0x1930] sm:$0xff]   ;;  %v14113_v37 = vld [vmem:[#allocation11 + $0x1978] sm:$0xff]  }
 0x74f   : > { %v10072_v56 = vadd.f32 %v12594_v19, %v15514_v15  ;;  %v12618_v53 = vpop.f32.mrb[127].mxu1  ;;  %12918 = vmatprep.subr.bf16.mxu1 %v14077_v12  ;;  %v2176_v15 = vpack.c.bf16 %v2073_v31, %v2073_v31  ;;  %v14114_v21 = vld [vmem:[#allocation11 + $0x18b8] sm:$0xff]  }
 0x750   : > { %v14115_v22 = vld [vmem:[#allocation11 + $0x1938] sm:$0xff]  }
 0x751   : > { %v15517_v39 = vadd.f32 %v12616_v50, %v10072_v56  ;;  %12897 = vmatpush3.bf16.msra.mxu0 %v14078_v57  ;;  %v2078_v57 = vld [vmem:[#allocation3 + $0x91] sm:$0xff]  ;;  %v2075_v50 = vld [vmem:[#allocation3 + $0x262] sm:$0xff] }
 0x752   : > { %12919 = vmatpush3.bf16.msra.mxu1 %v14079_v42  ;;  %12898 = vmatprep.subr.bf16.mxu0 %v14080_v61  ;;  %v2180_v47 = vpack.c.bf16 %v2078_v57, %v2078_v57  ;;  %v2178_v51 = vpack.c.bf16 %v2075_v50, %v2075_v50 }
 0x753   : > { %12920 = vmatprep.subr.bf16.mxu1 %v14081_v9 }
 0x755   : > { %12899 = vmatpush3.bf16.msra.mxu0 %v14082_v33 }
 0x756   : > { %12921 = vmatpush3.bf16.msra.mxu1 %v14083_v45  ;;  %12928 = vmatprep.subr.bf16.mxu0 %v14084_v36 }
 0x757   : > { %12950 = vmatprep.subr.bf16.mxu1 %v14085_v25 }
 0x758   : > { %10630 = vmatmul.mubr.bf16.vlgmr.msra.gmra.mrb[116].mxu0 %v2174_v38 }
 0x759   : > { %10670 = vmatmul.mubr.bf16.vlgmr.msra.gmra.mrb[152].mxu1 %v2176_v15  ;;  %12929 = vmatpush3.bf16.msra.mxu0 %v14086_v43 }
 0x75a   : > { %12951 = vmatpush3.bf16.msra.mxu1 %v14087_v63  ;;  %12930 = vmatprep.subr.bf16.mxu0 %v14088_v1 }
 0x75b   : > { %12952 = vmatprep.subr.bf16.mxu1 %v14089_v4  ;;  %10709 = vmatprep.mubr.bf16.mxu0 %v2179_v7 }
 0x75c   : > { %10749 = vmatprep.mubr.bf16.mxu1 %v2181_v18 }
 0x75d   : > { %12931 = vmatpush3.bf16.msra.mxu0 %v14090_v11 }
 0x75e   : > { %12953 = vmatpush3.bf16.msra.mxu1 %v14091_v48  ;;  %12932 = vmatprep.subr.bf16.mxu0 %v14092_v34 }
 0x75f   : > { %12954 = vmatprep.subr.bf16.mxu1 %v14093_v24 }
 0x761   : > { %12933 = vmatpush3.bf16.msra.mxu0 %v14094_v20 }
 0x762   : > { %12955 = vmatpush3.bf16.msra.mxu1 %v14095_v30  ;;  %12934 = vmatprep.subr.bf16.mxu0 %v14096_v40 }
 0x763   : > { %12956 = vmatprep.subr.bf16.mxu1 %v14097_v32 }
 0x765   : > { %12935 = vmatpush3.bf16.msra.mxu0 %v14098_v35 }
 0x766   : > { %12957 = vmatpush3.bf16.msra.mxu1 %v14099_v46  ;;  %12936 = vmatprep.subr.bf16.mxu0 %v14100_v8 }
 0x767   : > { %12958 = vmatprep.subr.bf16.mxu1 %v14101_v16 }
 0x769   : > { %12937 = vmatpush3.bf16.msra.mxu0 %v14102_v29 }
 0x76a   : > { %12959 = vmatpush3.bf16.msra.mxu1 %v14103_v23  ;;  %12938 = vmatprep.subr.bf16.mxu0 %v14104_v59 }
 0x76b   : > { %v12636_v49 = vpop.f32.mrb[92].mxu0  ;;  %12960 = vmatprep.subr.bf16.mxu1 %v14105_v58 }
 0x76c   : > { %v12658_v26 = vpop.f32.mrb[128].mxu1  ;;  %v12637_v17 = vpop.f32.mrb[93].mxu0 }
 0x76d   : > { %v12638_v3 = vadd.f32 %v12637_v17, %v12636_v49  ;;  %v12659_v55 = vpop.f32.mrb[129].mxu1  ;;  %v12639_v44 = vpop.f32.mrb[94].mxu0  ;;  %12939 = vmatpush3.bf16.msra.mxu0 %v14106_v10 }
 0x76e   : > { %v12660_v13 = vadd.f32 %v12659_v55, %v12658_v26  ;;  %v12661_v54 = vpop.f32.mrb[130].mxu1  ;;  %12961 = vmatpush3.bf16.msra.mxu1 %v14107_v41  ;;  %v12640_v2 = vpop.f32.mrb[95].mxu0  ;;  %12940 = vmatprep.subr.bf16.mxu0 %v14108_v14 }
 0x76f   : > { %v10152_v12 = vadd.f32 %v12638_v3, %v15517_v39  ;;  %v12662_v0 = vpop.f32.mrb[131].mxu1  ;;  %12962 = vmatprep.subr.bf16.mxu1 %v14109_v52 }
 0x771   : > { %v10192_v19 = vadd.f32 %v12660_v13, %v10152_v12  ;;  %12941 = vmatpush3.bf16.msra.mxu0 %v14110_v5 }
 0x772   : > { %12963 = vmatpush3.bf16.msra.mxu1 %v14111_v60  ;;  %12942 = vmatprep.subr.bf16.mxu0 %v14112_v6 }
 0x773   : > { %12964 = vmatprep.subr.bf16.mxu1 %v14113_v37 }
 0x775   : > { %12943 = vmatpush3.bf16.msra.mxu0 %v14114_v21 }
 0x776   : > { %12965 = vmatpush3.bf16.msra.mxu1 %v14115_v22 }
 0x778   : > { %10710 = vmatmul.mubr.bf16.vlgmr.msra.gmra.mrb[120].mxu0 %v2178_v51 }
 0x779   : > { %10750 = vmatmul.mubr.bf16.vlgmr.msra.gmra.mrb[156].mxu1 %v2180_v47 }
 0x78b   : > { %v12680_v42 = vpop.f32.mrb[96].mxu0 }
 0x78c   : > { %v12702_v61 = vpop.f32.mrb[132].mxu1  ;;  %v12681_v56 = vpop.f32.mrb[97].mxu0 }
 0x78d   : > { %v12682_v53 = vadd.f32 %v12681_v56, %v12680_v42  ;;  %v12703_v9 = vpop.f32.mrb[133].mxu1  ;;  %v12683_v39 = vpop.f32.mrb[98].mxu0 }
 0x78e   : > { %v12704_v33 = vadd.f32 %v12703_v9, %v12702_v61  ;;  %v12705_v45 = vpop.f32.mrb[134].mxu1  ;;  %v12684_v36 = vpop.f32.mrb[99].mxu0 }
 0x78f   : > { %v10232_v27 = vadd.f32 %v12682_v53, %v10192_v19  ;;  %v12706_v25 = vpop.f32.mrb[135].mxu1 }
 0x791   : > { %v10272_v31 = vadd.f32 %v12704_v33, %v10232_v27 }
 0x7ab   : > { %v12724_v43 = vpop.f32.mrb[100].mxu0 }
 0x7ac   : > { %v12746_v28 = vpop.f32.mrb[136].mxu1  ;;  %v12725_v38 = vpop.f32.mrb[101].mxu0 }
 0x7ad   : > { %v12726_v63 = vadd.f32 %v12725_v38, %v12724_v43  ;;  %v12747_v1 = vpop.f32.mrb[137].mxu1  ;;  %v12727_v15 = vpop.f32.mrb[102].mxu0 }
 0x7ae   : > { %v12748_v4 = vadd.f32 %v12747_v1, %v12746_v28  ;;  %v12749_v62 = vpop.f32.mrb[138].mxu1  ;;  %v12728_v7 = vpop.f32.mrb[103].mxu0 }
 0x7af   : > { %v10312_v18 = vadd.f32 %v12726_v63, %v10272_v31  ;;  %v12750_v11 = vpop.f32.mrb[139].mxu1 }
 0x7b1   : > { %v10352_v48 = vadd.f32 %v12748_v4, %v10312_v18 }
 0x7cb   : > { %v12768_v34 = vpop.f32.mrb[104].mxu0 }
 0x7cc   : > { %v12790_v24 = vpop.f32.mrb[140].mxu1  ;;  %v12769_v20 = vpop.f32.mrb[105].mxu0 }
 0x7cd   : > { %v12770_v30 = vadd.f32 %v12769_v20, %v12768_v34  ;;  %v12791_v40 = vpop.f32.mrb[141].mxu1  ;;  %v12771_v32 = vpop.f32.mrb[106].mxu0 }
 0x7ce   : > { %v12792_v35 = vadd.f32 %v12791_v40, %v12790_v24  ;;  %v12793_v46 = vpop.f32.mrb[142].mxu1  ;;  %v12772_v8 = vpop.f32.mrb[107].mxu0 }
 0x7cf   : > { %v10392_v16 = vadd.f32 %v12770_v30, %v10352_v48  ;;  %v12794_v29 = vpop.f32.mrb[143].mxu1 }
 0x7d1   : > { %v10432_v23 = vadd.f32 %v12792_v35, %v10392_v16 }
 0x7eb   : > { %v12812_v59 = vpop.f32.mrb[108].mxu0 }
 0x7ec   : > { %v12834_v58 = vpop.f32.mrb[144].mxu1  ;;  %v12813_v10 = vpop.f32.mrb[109].mxu0 }
 0x7ed   : > { %v12814_v41 = vadd.f32 %v12813_v10, %v12812_v59  ;;  %v12835_v14 = vpop.f32.mrb[145].mxu1  ;;  %v12815_v49 = vpop.f32.mrb[110].mxu0 }
 0x7ee   : > { %v12836_v52 = vadd.f32 %v12835_v14, %v12834_v58  ;;  %v12837_v26 = vpop.f32.mrb[146].mxu1  ;;  %v12816_v17 = vpop.f32.mrb[111].mxu0 }
 0x7ef   : > { %v10472_v3 = vadd.f32 %v12814_v41, %v10432_v23  ;;  %v12838_v55 = vpop.f32.mrb[147].mxu1 }
 0x7f1   : > { %v10512_v44 = vadd.f32 %v12836_v52, %v10472_v3 }
 0x80b   : > { %v12856_v5 = vpop.f32.mrb[112].mxu0 }
 0x80c   : > { %v12878_v13 = vpop.f32.mrb[148].mxu1  ;;  %v12857_v54 = vpop.f32.mrb[113].mxu0 }
 0x80d   : > { %v12858_v2 = vadd.f32 %v12857_v54, %v12856_v5  ;;  %v12879_v60 = vpop.f32.mrb[149].mxu1  ;;  %v12859_v6 = vpop.f32.mrb[114].mxu0 }
 0x80e   : > { %v12880_v12 = vadd.f32 %v12879_v60, %v12878_v13  ;;  %v12881_v0 = vpop.f32.mrb[150].mxu1  ;;  %v12860_v37 = vpop.f32.mrb[115].mxu0 }
 0x80f   : > { %v10552_v19 = vadd.f32 %v12858_v2, %v10512_v44  ;;  %v12882_v21 = vpop.f32.mrb[151].mxu1 }
 0x811   : > { %v10592_v22 = vadd.f32 %v12880_v12, %v10552_v19 }
 0x82b   : > { %v12900_v57 = vpop.f32.mrb[116].mxu0 }
 0x82c   : > { %v12922_v50 = vpop.f32.mrb[152].mxu1  ;;  %v12901_v47 = vpop.f32.mrb[117].mxu0 }
 0x82d   : > { %v12902_v51 = vadd.f32 %v12901_v47, %v12900_v57  ;;  %v12923_v42 = vpop.f32.mrb[153].mxu1  ;;  %v12903_v61 = vpop.f32.mrb[118].mxu0 }
 0x82e   : > { %v12924_v56 = vadd.f32 %v12923_v42, %v12922_v50  ;;  %v12925_v53 = vpop.f32.mrb[154].mxu1  ;;  %v12904_v9 = vpop.f32.mrb[119].mxu0 }
 0x82f   : > { %v10632_v39 = vadd.f32 %v12902_v51, %v10592_v22  ;;  %v12926_v33 = vpop.f32.mrb[155].mxu1 }
 0x831   : > { %v10672_v45 = vadd.f32 %v12924_v56, %v10632_v39 }
 0x84b   : > { %v12944_v36 = vpop.f32.mrb[120].mxu0 }
 0x84c   : > { %v12966_v27 = vpop.f32.mrb[156].mxu1  ;;  %v12945_v25 = vpop.f32.mrb[121].mxu0 }
 0x84d   : > { %v12946_v31 = vadd.f32 %v12945_v25, %v12944_v36  ;;  %v12967_v43 = vpop.f32.mrb[157].mxu1  ;;  %v12947_v28 = vpop.f32.mrb[122].mxu0 }
 0x84e   : > { %v12968_v38 = vadd.f32 %v12967_v43, %v12966_v27  ;;  %v12969_v63 = vpop.f32.mrb[158].mxu1  ;;  %v12948_v1 = vpop.f32.mrb[123].mxu0 }
 0x84f   : > { %v10712_v15 = vadd.f32 %v12946_v31, %v10672_v45  ;;  %v12970_v4 = vpop.f32.mrb[159].mxu1 }
 0x851   : > { %v10752_v62 = vadd.f32 %v12968_v38, %v10712_v15 }
 0x853   : > { %10757 = vst [vmem:[%s358_s8] sm:$0xff] %v10752_v62 }
 0x854 PF: > { %s21_s24 = sadd.s32 1, %s14319_s24  }
 0x855   : > { %p18_p9 = scmp.ge.s32.totalorder %s21_s24, 4  }
 0x857   :  { %20 = sbr.rel (!%p18_p9) target bundleno = 4 (0x4), region = 142 }
 0x85e   :  { %10777 = vsyncpa [#allocation5], 1 }
 0x85f   :  { %10779 = vsyncpa [#allocation5 + $0x1], 1 }
 0x860   :  { %10780 = vsyncpa [#allocation7], 1 }
 0x861   :  { %10781 = vsyncpa [#allocation10], 1 }
 0x862   :  { %10782 = vsyncpa [#allocation13], 1 }

</bundles_post_ra>
